<compile_context>
chip_gen: v7x
topology: tpu7x:2x2x1
jax: 0.10.0
libtpu: 0.0.40
codegen_flags: <defaults>
</compile_context>

<pallas_src>
import functools

import numpy as np
import jax
import jax.numpy as jnp
from jax.experimental import pallas as pl
from jax.experimental.pallas import tpu as pltpu

# Only affects the pure-JAX reference / wrapper glue; in-kernel dots pass
# precision explicitly.
jax.config.update("jax_default_matmul_precision", "highest")

# ----------------------------- configuration --------------------------------
DIM = 32          # = out_dim (downsample is None so dim == out_dim)
H_RES, W_RES = 8, 8
DEPTH = 2
NUM_HEADS = 4
WS = 4            # window_size
MLP_RATIO = 4.0
BATCH = 2

HIDDEN = int(DIM * MLP_RATIO)     # 128
L_TOK = H_RES * W_RES             # 64 tokens per image
NVEC = 10                         # packed 1-D parameter rows per block

_SQRT_HALF = 0.7071067811865476
_MASK_NEG = -100.0                # same fill value PyTorch uses for the shift mask

_DOT_KW = dict(preferred_element_type=jnp.float32,
               precision=jax.lax.Precision.DEFAULT)


# ------------------------------ math helpers --------------------------------
def _erf_approx(x):
    # Abramowitz & Stegun 7.1.26, |err| < 1.5e-7 (float32-accurate).
    p = 0.3275911
    a1, a2, a3, a4, a5 = 0.254829592, -0.284496736, 1.421413741, -1.453152027, 1.061405429
    ax = jnp.abs(x)
    t = 1.0 / (1.0 + p * ax)
    poly = ((((a5 * t + a4) * t + a3) * t + a2) * t + a1) * t
    y = 1.0 - poly * jnp.exp(-ax * ax)
    return jnp.where(x < 0.0, -y, y)


def _gelu_exact(x):
    # matches torch.nn.GELU() (erf form) to float32 precision
    return 0.5 * x * (1.0 + _erf_approx(x * _SQRT_HALF))


def _layer_norm(x, g, b, eps=1e-5):
    mu = jnp.mean(x, axis=-1, keepdims=True)
    var = jnp.mean(jnp.square(x - mu), axis=-1, keepdims=True)
    return (x - mu) * jax.lax.rsqrt(var + eps) * g + b


# ------------------------- window partition helpers --------------------------
def window_partition(x, ws):
    B, H, W, C = x.shape
    x = x.reshape(B, H // ws, ws, W // ws, ws, C)
    x = x.transpose(0, 1, 3, 2, 4, 5)
    return x.reshape(-1, ws, ws, C)


def window_reverse(windows, ws, H, W):
    B = windows.shape[0] // ((H // ws) * (W // ws))
    x = windows.reshape(B, H // ws, W // ws, ws, ws, -1)
    x = x.transpose(0, 1, 3, 2, 4, 5)
    return x.reshape(B, H, W, -1)


def to_windows(x, H, W, ws, shift):
    # (B, L, C) original token order -> (B, L, C) window-permuted order
    B, L, C = x.shape
    xs = x.reshape(B, H, W, C)
    if shift > 0:
        xs = jnp.roll(xs, shift=(-shift, -shift), axis=(1, 2))
    return window_partition(xs, ws).reshape(B, L, C)


def from_windows(xw, H, W, ws, shift):
    # inverse of to_windows
    B, L, C = xw.shape
    nW = (H // ws) * (W // ws)
    xs = window_reverse(xw.reshape(B * nW, ws, ws, C), ws, H, W)
    if shift > 0:
        xs = jnp.roll(xs, shift=(shift, shift), axis=(1, 2))
    return xs.reshape(B, L, C)


def _window_order_indices(H, W, ws, shift):
    # a[i] = original token index sitting at window-order position i
    idx = np.arange(H * W).reshape(H, W)
    if shift > 0:
        idx = np.roll(idx, shift=(-shift, -shift), axis=(0, 1))
    return idx.reshape(H // ws, ws, W // ws, ws).transpose(0, 2, 1, 3).reshape(-1)


def relative_position_index_np(ws):
    coords = np.stack(np.meshgrid(np.arange(ws), np.arange(ws), indexing="ij"))
    coords_flat = coords.reshape(2, -1)
    rel = coords_flat[:, :, None] - coords_flat[:, None, :]
    rel = rel.transpose(1, 2, 0).astype(np.int64)
    rel[:, :, 0] += ws - 1
    rel[:, :, 1] += ws - 1
    rel[:, :, 0] *= 2 * ws - 1
    return rel.sum(-1)  # (N, N)


def compute_attn_mask(H, W, ws, shift):
    img_mask = np.zeros((1, H, W, 1), np.float32)
    cnt = 0
    for hs in (slice(0, H - ws), slice(H - ws, H - shift), slice(H - shift, H)):
        for wsl in (slice(0, W - ws), slice(W - ws, W - shift), slice(W - shift, W)):
            img_mask[:, hs, wsl, :] = cnt
            cnt += 1
    mw = window_partition(img_mask, ws).reshape(-1, ws * ws)
    am = mw[:, None, :] - mw[:, :, None]
    am = np.where(am != 0, _MASK_NEG, 0.0).astype(np.float32)
    return jnp.asarray(am)  # (nW, N, N)


def build_attn_bias(rpb, mask):
    # Fold rel-pos bias + shift mask + cross-window exclusion into one additive
    # bias over the stacked (nW*N) token axis: (heads, 64, 64), -100 off the
    # per-window diagonal blocks.
    heads, N, _ = rpb.shape
    nW = mask.shape[0]
    L = nW * N
    blocks = rpb[:, None, :, :] + mask[None, :, :, :]          # (heads, nW, N, N)
    bias = jnp.full((heads, L, L), _MASK_NEG, jnp.float32)
    for w in range(nW):
        bias = bias.at[:, w * N:(w + 1) * N, w * N:(w + 1) * N].set(blocks[:, w])
    return bias


# ------------------------------ fused layer kernel ---------------------------
def _layer_kernel(x_ref, vec_ref, wmat_ref, w1_ref, w2_ref, bias_ref, perm_ref,
                  o_ref, *, num_heads, nvec):
    # One grid step processes S tokens (S = 64 per batch element on the
    # batch-parallel path, S = 128 with batch folded into rows) through BOTH
    # SwinTransformerBlocks of the BasicLayer.
    f32, bf16 = jnp.float32, jnp.bfloat16

    x = x_ref[...].astype(f32)                     # (S, C) window-ordered tokens
    S, C = x.shape
    hd = C // num_heads
    hidden = w1_ref.shape[2]

    # Per-head column masks, computed ONCE (no 8-lane head slices, no per-iter
    # recomputation of the compares).
    col = jax.lax.broadcasted_iota(jnp.int32, (1, C), 1)
    head_masks = [((col >= h * hd) & (col < (h + 1) * hd)).astype(f32)
                  for h in range(num_heads)]

    for blk in range(2):                           # both SwinTransformerBlocks
        base = blk * nvec
        g1  = vec_ref[base + 0:base + 1, 0:C]
        b1  = vec_ref[base + 1:base + 2, 0:C]
        bq  = vec_ref[base + 2:base + 3, 0:C]      # pre-scaled by head_dim**-0.5
        bk  = vec_ref[base + 3:base + 4, 0:C]
        bv  = vec_ref[base + 4:base + 5, 0:C]
        bp  = vec_ref[base + 5:base + 6, 0:C]
        g2  = vec_ref[base + 6:base + 7, 0:C]
        b2  = vec_ref[base + 7:base + 8, 0:C]
        bb1 = vec_ref[base + 8:base + 9, 0:hidden]
        bb2 = vec_ref[base + 9:base + 10, 0:C]

        # ---- LN1 + separate Q/K/V projections (no lane-sliced fused QKV) ----
        xn1 = _layer_norm(x, g1, b1).astype(bf16)
        q = (jnp.dot(xn1, wmat_ref[blk, 0], **_DOT_KW) + bq).astype(bf16)
        k =  jnp.dot(xn1, wmat_ref[blk, 1], **_DOT_KW) + bk
        v =  jnp.dot(xn1, wmat_ref[blk, 2], **_DOT_KW) + bv

        # ---- windowed multi-head attention over the stacked token axis ----
        attn_cat = jnp.zeros((S, C), f32)          # == concat_h(out_h) along channels
        for h in range(num_heads):
            kh = (k * head_masks[h]).astype(bf16)  # head-h columns only
            vh = (v * head_masks[h]).astype(bf16)
            s = jax.lax.dot_general(q, kh, (((1,), (1,)), ((), ())), **_DOT_KW)
            s = s + bias_ref[blk, h]               # rpb + shift mask + window/batch blocking
            s = s - jnp.max(s, axis=-1, keepdims=True)
            e = jnp.exp(s)
            prob = e * pl.reciprocal(jnp.sum(e, axis=-1, keepdims=True), approx=True)
            attn_cat = attn_cat + jnp.dot(prob.astype(bf16), vh, **_DOT_KW)

        # output projection for all heads + attention residual (drop_path = 0)
        x = x + jnp.dot(attn_cat.astype(bf16), wmat_ref[blk, 3], **_DOT_KW) + bp

        # ---- LN2 + MLP (GELU) + residual ----
        xn2 = _layer_norm(x, g2, b2).astype(bf16)
        hmid = jnp.dot(xn2, w1_ref[blk], **_DOT_KW) + bb1
        hmid = _gelu_exact(hmid).astype(bf16)
        x = x + jnp.dot(hmid, w2_ref[blk], **_DOT_KW) + bb2

        if blk == 0:
            # Inter-block permutation (shift-0 window order -> shift-2 window
            # order), applied in-kernel as a permutation-matrix matmul.  f32
            # operands with HIGHEST precision keep the residual path exact.
            x = jnp.dot(perm_ref[...], x, preferred_element_type=jnp.float32,
                        precision=jax.lax.Precision.HIGHEST)

    # Lane-dense packed store: (S, 32) -> (S//4, 128) so the store path uses
    # full-width vst instead of 32-lane masked partial stores.
    g = S // 4
    packed = jnp.concatenate([x[i * g:(i + 1) * g, :] for i in range(4)], axis=1)
    o_ref[...] = packed.astype(o_ref.dtype)


def fused_layer_pallas(xflat, prep, *, n_seg):
    rtot, C = xflat.shape
    S = rtot // n_seg
    kernel = functools.partial(_layer_kernel, num_heads=NUM_HEADS, nvec=NVEC)
    return pl.pallas_call(
        kernel,
        out_shape=jax.ShapeDtypeStruct((rtot // 4, 128), xflat.dtype),
        grid_spec=pltpu.PrefetchScalarGridSpec(
            num_scalar_prefetch=0,
            grid=(n_seg,),
            in_specs=[
                pl.BlockSpec((S, C), lambda b: (b, 0)),                       # x (window order)
                pl.BlockSpec(prep["vecs"].shape, lambda b: (0, 0)),           # packed 1-D params
                pl.BlockSpec(prep["wmat"].shape, lambda b: (0, 0, 0, 0)),     # Wq/Wk/Wv/Wproj (bf16)
                pl.BlockSpec(prep["w1s"].shape, lambda b: (0, 0, 0)),         # fc1 W (bf16)
                pl.BlockSpec(prep["w2s"].shape, lambda b: (0, 0, 0)),         # fc2 W (bf16)
                pl.BlockSpec(prep["bias"].shape, lambda b: (0, 0, 0, 0)),     # fused attn bias
                pl.BlockSpec(prep["perm"].shape, lambda b: (0, 0)),           # inter-block perm
            ],
            out_specs=pl.BlockSpec((S // 4, 128), lambda b: (b, 0)),
        ),
        compiler_params=pltpu.CompilerParams(
            dimension_semantics=("parallel",)),
    )(xflat, prep["vecs"], prep["wmat"], prep["w1s"], prep["w2s"],
      prep["bias"], prep["perm"])


# ----------------------------- layer forward ---------------------------------
def basic_layer_forward(x, prep, *, batch_parallel):
    # downsample is None in this configuration -> skipped (matches PyTorch).
    # Boundary permutations (to shift-0 window order / back from shift-2
    # window order) are cheap one-time XLA transposes around the single kernel;
    # everything in between runs inside one pallas_call.
    B, L, C = x.shape
    n_seg = B if batch_parallel else 1
    S = (B * L) // n_seg
    xw0 = to_windows(x, H_RES, W_RES, WS, 0).reshape(B * L, C)
    packed = fused_layer_pallas(xw0, prep, n_seg=n_seg)
    yw2 = (packed.reshape(n_seg, S // 4, 4, C)
                 .transpose(0, 2, 1, 3)
                 .reshape(B, L, C))                # shift-2 window order
    return from_windows(yw2, H_RES, W_RES, WS, WS // 2)


# ------------------------------ one-time prep --------------------------------
def _pad_row(v, width=128):
    v = jnp.asarray(v, jnp.float32)
    return jnp.pad(v, (0, width - v.shape[0]))[None, :]


def prepare_layer(params_list, masks, batch_parallel):
    # Hoisted out of the jitted forward: bias build, weight packing, bf16 casts.
    C, heads = DIM, NUM_HEADS
    scale = (C // heads) ** -0.5
    S = L_TOK if batch_parallel else BATCH * L_TOK
    assert HIDDEN <= 128

    vec_rows, wmats, w1s, w2s, biases = [], [], [], [], []
    for p, mask in zip(params_list, masks):
        vec_rows.append(jnp.concatenate([
            _pad_row(p["g1"]), _pad_row(p["b1"]),
            _pad_row(p["bqkv"][0:C] * scale),
            _pad_row(p["bqkv"][C:2 * C]),
            _pad_row(p["bqkv"][2 * C:3 * C]),
            _pad_row(p["bproj"]), _pad_row(p["g2"]), _pad_row(p["b2"]),
            _pad_row(p["bb1"]), _pad_row(p["bb2"]),
        ], axis=0))                                          # (NVEC, 128)
        wmats.append(jnp.stack([
            p["wqkv"][:, 0:C] * scale,                       # scale folded into W_q / b_q
            p["wqkv"][:, C:2 * C],
            p["wqkv"][:, 2 * C:3 * C],
            p["wproj"],
        ], axis=0))                                          # (4, C, C)
        w1s.append(p["w1"])
        w2s.append(p["w2"])

        b64 = build_attn_bias(p["rpb"], mask)                # (heads, 64, 64)
        if S == L_TOK:
            biases.append(b64)
        else:                                                # batch-block-diagonal
            big = jnp.full((heads, S, S), _MASK_NEG, jnp.float32)
            for s0 in range(0, S, L_TOK):
                big = big.at[:, s0:s0 + L_TOK, s0:s0 + L_TOK].set(b64)
            biases.append(big)

    # Inter-block permutation (shift-0 window order -> shift-2 window order).
    a0 = _window_order_indices(H_RES, W_RES, WS, 0)
    a2 = _window_order_indices(H_RES, W_RES, WS, WS // 2)
    inv_a0 = np.argsort(a0)
    p_idx = inv_a0[a2]
    p64 = np.zeros((L_TOK, L_TOK), np.float32)
    p64[np.arange(L_TOK), p_idx] = 1.0
    perm = np.zeros((S, S), np.float32)
    for s0 in range(0, S, L_TOK):
        perm[s0:s0 + L_TOK, s0:s0 + L_TOK] = p64

    return dict(
        vecs=jnp.concatenate(vec_rows, axis=0),              # (2*NVEC, 128) f32
        wmat=jnp.stack(wmats, 0).astype(jnp.bfloat16),       # (2, 4, C, C)
        w1s=jnp.stack(w1s, 0).astype(jnp.bfloat16),          # (2, C, hidden)
        w2s=jnp.stack(w2s, 0).astype(jnp.bfloat16),          # (2, hidden, C)
        bias=jnp.stack(biases, 0),                           # (2, heads, S, S) f32
        perm=jnp.asarray(perm),                              # (S, S) f32
    )


def _prefer_batch_parallel():
    # v7x has 2 TensorCores/chip -> keep the batch-parallel grid there (one
    # batch element per core).  Single-TC v5e/v6e: fold batch into rows.
    if BATCH < 2:
        return False
    try:
        kind = jax.devices()[0].device_kind.lower()
    except Exception:
        return False
    return ("v7" in kind) or ("7x" in kind)


# ----------------------------- pure-JAX reference ----------------------------
def reference_block(x, p, H, W, ws, shift, num_heads, attn_mask):
    B, L, C = x.shape
    hd = C // num_heads
    scale = hd ** -0.5
    shortcut = x
    xn = _layer_norm(x, p["g1"], p["b1"])
    xs = xn.reshape(B, H, W, C)
    if shift > 0:
        xs = jnp.roll(xs, shift=(-shift, -shift), axis=(1, 2))
    xw = window_partition(xs, ws).reshape(-1, ws * ws, C)
    nWB, N, _ = xw.shape
    qkv = xw @ p["wqkv"] + p["bqkv"]
    qkv = qkv.reshape(nWB, N, 3, num_heads, hd).transpose(2, 0, 3, 1, 4)
    q, k, v = qkv[0] * scale, qkv[1], qkv[2]
    attn = jnp.einsum("whnd,whmd->whnm", q, k) + p["rpb"][None]
    nW_img = attn_mask.shape[0]
    attn = attn.reshape(nWB // nW_img, nW_img, num_heads, N, N) + attn_mask[None, :, None]
    attn = attn.reshape(nWB, num_heads, N, N)
    attn = jax.nn.softmax(attn, axis=-1)
    out = jnp.einsum("whnm,whmd->whnd", attn, v).transpose(0, 2, 1, 3).reshape(nWB, N, C)
    out = out @ p["wproj"] + p["bproj"]
    xs = window_reverse(out.reshape(-1, ws, ws, C), ws, H, W)
    if shift > 0:
        xs = jnp.roll(xs, shift=(shift, shift), axis=(1, 2))
    x = shortcut + xs.reshape(B, H * W, C)
    xn = _layer_norm(x, p["g2"], p["b2"])
    h = jax.nn.gelu(xn @ p["w1"] + p["bb1"], approximate=False)
    return x + (h @ p["w2"] + p["bb2"])


def reference_forward(x, params_list, masks):
    for i in range(DEPTH):
        shift = 0 if i % 2 == 0 else WS // 2
        x = reference_block(x, params_list[i], H_RES, W_RES, WS, shift,
                            NUM_HEADS, masks[i])
    return x


# ------------------------------ parameter init -------------------------------
def init_block_params(key, dim, num_heads, ws, mlp_ratio):
    hidden = int(dim * mlp_ratio)
    nb = (2 * ws - 1) ** 2
    ks = jax.random.split(key, 9)
    params = dict(
        g1=1.0 + 0.01 * jax.random.normal(ks[0], (dim,), jnp.float32),
        b1=0.01 * jax.random.normal(ks[1], (dim,), jnp.float32),
        wqkv=0.02 * jax.random.normal(ks[2], (dim, 3 * dim), jnp.float32),
        bqkv=0.01 * jax.random.normal(ks[3], (3 * dim,), jnp.float32),
        wproj=0.02 * jax.random.normal(ks[4], (dim, dim), jnp.float32),
        bproj=0.01 * jax.random.normal(ks[5], (dim,), jnp.float32),
        g2=1.0 + 0.01 * jax.random.normal(ks[6], (dim,), jnp.float32),
        b2=0.01 * jax.random.normal(ks[7], (dim,), jnp.float32),
    )
    kt, k1, k2 = jax.random.split(ks[8], 3)
    params["w1"] = 0.02 * jax.random.normal(k1, (dim, hidden), jnp.float32)
    params["bb1"] = jnp.zeros((hidden,), jnp.float32)
    params["w2"] = 0.02 * jax.random.normal(k2, (hidden, dim), jnp.float32)
    params["bb2"] = jnp.zeros((dim,), jnp.float32)
    rpb_table = 0.02 * jax.random.normal(kt, (nb, num_heads), jnp.float32)
    idx = relative_position_index_np(ws)
    N = ws * ws
    rpb = rpb_table[idx.reshape(-1)].reshape(N, N, num_heads)
    params["rpb"] = jnp.transpose(rpb, (2, 0, 1))           # (num_heads, N, N)
    return params


# ----------------------------------- main ------------------------------------
if __name__ == "__main__":
    key = jax.random.PRNGKey(0)
    kx, kp = jax.random.split(key)
    x = jax.random.normal(kx, (BATCH, L_TOK, DIM), jnp.float32)

    params_list = [init_block_params(k, DIM, NUM_HEADS, WS, MLP_RATIO)
                   for k in jax.random.split(kp, DEPTH)]

    N = WS * WS
    nW_img = (H_RES // WS) * (W_RES // WS)
    masks = [jnp.zeros((nW_img, N, N), jnp.float32),                 # W-MSA (shift 0)
             compute_attn_mask(H_RES, W_RES, WS, WS // 2)]           # SW-MSA (shift 2)

    batch_parallel = _prefer_batch_parallel()
    prep = prepare_layer(params_list, masks, batch_parallel)

    fwd = jax.jit(functools.partial(basic_layer_forward, batch_parallel=batch_parallel))
    out = jax.block_until_ready(fwd(x, prep))

    assert out.shape == (BATCH, L_TOK, DIM)
    ref = reference_forward(x, params_list, masks)
    max_err = float(jnp.max(jnp.abs(out - ref)))
    # kernel uses bf16 MXU operands (f32 accumulation) + approx softmax recip,
    # compared against a pure f32 reference
    assert np.isfinite(max_err) and max_err < 1e-2, f"max_err={max_err}"

    print("KERNEL_OK")
</pallas_src>

<mosaic_0001>
module attributes {stable_mosaic.version = 11 : i64} {
  func.func @_layer_kernel(%arg0: i32, %arg1: memref<128x32xf32, #tpu.memory_space<vmem>>, %arg2: memref<20x128xf32, #tpu.memory_space<vmem>>, %arg3: memref<2x4x32x32xbf16, #tpu.memory_space<vmem>>, %arg4: memref<2x32x128xbf16, #tpu.memory_space<vmem>>, %arg5: memref<2x128x32xbf16, #tpu.memory_space<vmem>>, %arg6: memref<2x4x128x128xf32, #tpu.memory_space<vmem>>, %arg7: memref<128x128xf32, #tpu.memory_space<vmem>>, %arg8: memref<32x128xf32, #tpu.memory_space<vmem>>) attributes {dimension_semantics = [#tpu.dimension_semantics<parallel>], iteration_bounds = array<i64: 1>, scalar_prefetch = 0 : i64, scratch_operands = 0 : i64, tpu.core_type = #tpu.core_type<tc>, window_params = [{transform_indices = @transform_0, window_bounds = array<i64: 128, 32>}, {pipeline_mode = #tpu.pipeline_mode<synchronous>, transform_indices = @transform_1, window_bounds = array<i64: 20, 128>}, {pipeline_mode = #tpu.pipeline_mode<synchronous>, transform_indices = @transform_2, window_bounds = array<i64: 2, 4, 32, 32>}, {pipeline_mode = #tpu.pipeline_mode<synchronous>, transform_indices = @transform_3, window_bounds = array<i64: 2, 32, 128>}, {pipeline_mode = #tpu.pipeline_mode<synchronous>, transform_indices = @transform_4, window_bounds = array<i64: 2, 128, 32>}, {pipeline_mode = #tpu.pipeline_mode<synchronous>, transform_indices = @transform_5, window_bounds = array<i64: 2, 4, 128, 128>}, {pipeline_mode = #tpu.pipeline_mode<synchronous>, transform_indices = @transform_6, window_bounds = array<i64: 128, 128>}, {transform_indices = @transform_7, window_bounds = array<i64: 32, 128>}]} {
    %c0 = arith.constant 0 : index
    %c0_0 = arith.constant 0 : index
    %0 = vector.load %arg1[%c0, %c0_0] : memref<128x32xf32, #tpu.memory_space<vmem>>, vector<128x32xf32>
    %1 = tpu.iota {dimensions = array<i32: 1>} : vector<1x32xi32>
    %c0_i32 = arith.constant 0 : i32
    %2 = vector.broadcast %c0_i32 : i32 to vector<1x32xi32>
    %3 = arith.cmpi sge, %1, %2 : vector<1x32xi32>
    %c8_i32 = arith.constant 8 : i32
    %4 = vector.broadcast %c8_i32 : i32 to vector<1x32xi32>
    %5 = arith.cmpi slt, %1, %4 : vector<1x32xi32>
    %6 = arith.andi %3, %5 : vector<1x32xi1>
    %7 = arith.extui %6 : vector<1x32xi1> to vector<1x32xi32>
    %8 = arith.sitofp %7 : vector<1x32xi32> to vector<1x32xf32>
    %c8_i32_1 = arith.constant 8 : i32
    %9 = vector.broadcast %c8_i32_1 : i32 to vector<1x32xi32>
    %10 = arith.cmpi sge, %1, %9 : vector<1x32xi32>
    %c16_i32 = arith.constant 16 : i32
    %11 = vector.broadcast %c16_i32 : i32 to vector<1x32xi32>
    %12 = arith.cmpi slt, %1, %11 : vector<1x32xi32>
    %13 = arith.andi %10, %12 : vector<1x32xi1>
    %14 = arith.extui %13 : vector<1x32xi1> to vector<1x32xi32>
    %15 = arith.sitofp %14 : vector<1x32xi32> to vector<1x32xf32>
    %c16_i32_2 = arith.constant 16 : i32
    %16 = vector.broadcast %c16_i32_2 : i32 to vector<1x32xi32>
    %17 = arith.cmpi sge, %1, %16 : vector<1x32xi32>
    %c24_i32 = arith.constant 24 : i32
    %18 = vector.broadcast %c24_i32 : i32 to vector<1x32xi32>
    %19 = arith.cmpi slt, %1, %18 : vector<1x32xi32>
    %20 = arith.andi %17, %19 : vector<1x32xi1>
    %21 = arith.extui %20 : vector<1x32xi1> to vector<1x32xi32>
    %22 = arith.sitofp %21 : vector<1x32xi32> to vector<1x32xf32>
    %c24_i32_3 = arith.constant 24 : i32
    %23 = vector.broadcast %c24_i32_3 : i32 to vector<1x32xi32>
    %24 = arith.cmpi sge, %1, %23 : vector<1x32xi32>
    %c32_i32 = arith.constant 32 : i32
    %25 = vector.broadcast %c32_i32 : i32 to vector<1x32xi32>
    %26 = arith.cmpi slt, %1, %25 : vector<1x32xi32>
    %27 = arith.andi %24, %26 : vector<1x32xi1>
    %28 = arith.extui %27 : vector<1x32xi1> to vector<1x32xi32>
    %29 = arith.sitofp %28 : vector<1x32xi32> to vector<1x32xf32>
    %c0_4 = arith.constant 0 : index
    %c0_5 = arith.constant 0 : index
    %30 = vector.load %arg2[%c0_4, %c0_5] : memref<20x128xf32, #tpu.memory_space<vmem>>, vector<1x32xf32>
    %c1 = arith.constant 1 : index
    %c0_6 = arith.constant 0 : index
    %31 = vector.load %arg2[%c1, %c0_6] : memref<20x128xf32, #tpu.memory_space<vmem>>, vector<1x32xf32>
    %c2 = arith.constant 2 : index
    %c0_7 = arith.constant 0 : index
    %32 = vector.load %arg2[%c2, %c0_7] : memref<20x128xf32, #tpu.memory_space<vmem>>, vector<1x32xf32>
    %c3 = arith.constant 3 : index
    %c0_8 = arith.constant 0 : index
    %33 = vector.load %arg2[%c3, %c0_8] : memref<20x128xf32, #tpu.memory_space<vmem>>, vector<1x32xf32>
    %c4 = arith.constant 4 : index
    %c0_9 = arith.constant 0 : index
    %34 = vector.load %arg2[%c4, %c0_9] : memref<20x128xf32, #tpu.memory_space<vmem>>, vector<1x32xf32>
    %c5 = arith.constant 5 : index
    %c0_10 = arith.constant 0 : index
    %35 = vector.load %arg2[%c5, %c0_10] : memref<20x128xf32, #tpu.memory_space<vmem>>, vector<1x32xf32>
    %c6 = arith.constant 6 : index
    %c0_11 = arith.constant 0 : index
    %36 = vector.load %arg2[%c6, %c0_11] : memref<20x128xf32, #tpu.memory_space<vmem>>, vector<1x32xf32>
    %c7 = arith.constant 7 : index
    %c0_12 = arith.constant 0 : index
    %37 = vector.load %arg2[%c7, %c0_12] : memref<20x128xf32, #tpu.memory_space<vmem>>, vector<1x32xf32>
    %c8 = arith.constant 8 : index
    %c0_13 = arith.constant 0 : index
    %38 = vector.load %arg2[%c8, %c0_13] : memref<20x128xf32, #tpu.memory_space<vmem>>, vector<1x128xf32>
    %c9 = arith.constant 9 : index
    %c0_14 = arith.constant 0 : index
    %39 = vector.load %arg2[%c9, %c0_14] : memref<20x128xf32, #tpu.memory_space<vmem>>, vector<1x32xf32>
    %cst = arith.constant dense<0.000000e+00> : vector<128xf32>
    %40 = vector.multi_reduction <add>, %0, %cst [1] : vector<128x32xf32> to vector<128xf32>
    %41 = vector.shape_cast %40 : vector<128xf32> to vector<128x1xf32>
    %cst_15 = arith.constant 3.200000e+01 : f32
    %42 = vector.broadcast %cst_15 : f32 to vector<128x1xf32>
    %43 = arith.divf %41, %42 : vector<128x1xf32>
    %44 = vector.broadcast %43 : vector<128x1xf32> to vector<128x32xf32>
    %45 = arith.subf %0, %44 : vector<128x32xf32>
    %46 = arith.mulf %45, %45 : vector<128x32xf32>
    %cst_16 = arith.constant dense<0.000000e+00> : vector<128xf32>
    %47 = vector.multi_reduction <add>, %46, %cst_16 [1] : vector<128x32xf32> to vector<128xf32>
    %48 = vector.shape_cast %47 : vector<128xf32> to vector<128x1xf32>
    %cst_17 = arith.constant 3.200000e+01 : f32
    %49 = vector.broadcast %cst_17 : f32 to vector<128x1xf32>
    %50 = arith.divf %48, %49 : vector<128x1xf32>
    %51 = vector.broadcast %43 : vector<128x1xf32> to vector<128x32xf32>
    %52 = arith.subf %0, %51 : vector<128x32xf32>
    %cst_18 = arith.constant 9.99999974E-6 : f32
    %53 = vector.broadcast %cst_18 : f32 to vector<128x1xf32>
    %54 = arith.addf %50, %53 : vector<128x1xf32>
    %55 = math.rsqrt %54 : vector<128x1xf32>
    %56 = vector.broadcast %55 : vector<128x1xf32> to vector<128x32xf32>
    %57 = arith.mulf %52, %56 : vector<128x32xf32>
    %58 = vector.broadcast %30 : vector<1x32xf32> to vector<128x32xf32>
    %59 = arith.mulf %57, %58 : vector<128x32xf32>
    %60 = vector.broadcast %31 : vector<1x32xf32> to vector<128x32xf32>
    %61 = arith.addf %59, %60 : vector<128x32xf32>
    %62 = arith.truncf %61 : vector<128x32xf32> to vector<128x32xbf16>
    %c0_19 = arith.constant 0 : index
    %c0_20 = arith.constant 0 : index
    %c0_21 = arith.constant 0 : index
    %c0_22 = arith.constant 0 : index
    %63 = vector.load %arg3[%c0_19, %c0_20, %c0_21, %c0_22] : memref<2x4x32x32xbf16, #tpu.memory_space<vmem>>, vector<1x1x32x32xbf16>
    %64 = vector.shape_cast %63 : vector<1x1x32x32xbf16> to vector<32x32xbf16>
    %cst_23 = arith.constant dense<0.000000e+00> : vector<128x32xf32>
    %65 = tpu.matmul %62, %64, %cst_23 {dimension_numbers = #tpu.dot_dimension_numbers<[1], [0], [0], [1], [0, 0, 1, 1], [], []>} : vector<128x32xbf16>, vector<32x32xbf16>, vector<128x32xf32> -> vector<128x32xf32>
    %66 = vector.broadcast %32 : vector<1x32xf32> to vector<128x32xf32>
    %67 = arith.addf %65, %66 : vector<128x32xf32>
    %68 = arith.truncf %67 : vector<128x32xf32> to vector<128x32xbf16>
    %c0_24 = arith.constant 0 : index
    %c1_25 = arith.constant 1 : index
    %c0_26 = arith.constant 0 : index
    %c0_27 = arith.constant 0 : index
    %69 = vector.load %arg3[%c0_24, %c1_25, %c0_26, %c0_27] : memref<2x4x32x32xbf16, #tpu.memory_space<vmem>>, vector<1x1x32x32xbf16>
    %70 = vector.shape_cast %69 : vector<1x1x32x32xbf16> to vector<32x32xbf16>
    %cst_28 = arith.constant dense<0.000000e+00> : vector<128x32xf32>
    %71 = tpu.matmul %62, %70, %cst_28 {dimension_numbers = #tpu.dot_dimension_numbers<[1], [0], [0], [1], [0, 0, 1, 1], [], []>} : vector<128x32xbf16>, vector<32x32xbf16>, vector<128x32xf32> -> vector<128x32xf32>
    %72 = vector.broadcast %33 : vector<1x32xf32> to vector<128x32xf32>
    %73 = arith.addf %71, %72 : vector<128x32xf32>
    %c0_29 = arith.constant 0 : index
    %c2_30 = arith.constant 2 : index
    %c0_31 = arith.constant 0 : index
    %c0_32 = arith.constant 0 : index
    %74 = vector.load %arg3[%c0_29, %c2_30, %c0_31, %c0_32] : memref<2x4x32x32xbf16, #tpu.memory_space<vmem>>, vector<1x1x32x32xbf16>
    %75 = vector.shape_cast %74 : vector<1x1x32x32xbf16> to vector<32x32xbf16>
    %cst_33 = arith.constant dense<0.000000e+00> : vector<128x32xf32>
    %76 = tpu.matmul %62, %75, %cst_33 {dimension_numbers = #tpu.dot_dimension_numbers<[1], [0], [0], [1], [0, 0, 1, 1], [], []>} : vector<128x32xbf16>, vector<32x32xbf16>, vector<128x32xf32> -> vector<128x32xf32>
    %77 = vector.broadcast %34 : vector<1x32xf32> to vector<128x32xf32>
    %78 = arith.addf %76, %77 : vector<128x32xf32>
    %cst_34 = arith.constant 0.000000e+00 : f32
    %79 = vector.broadcast %cst_34 : f32 to vector<128x32xf32>
    %80 = vector.broadcast %8 : vector<1x32xf32> to vector<128x32xf32>
    %81 = arith.mulf %73, %80 : vector<128x32xf32>
    %82 = arith.truncf %81 : vector<128x32xf32> to vector<128x32xbf16>
    %83 = vector.broadcast %8 : vector<1x32xf32> to vector<128x32xf32>
    %84 = arith.mulf %78, %83 : vector<128x32xf32>
    %85 = arith.truncf %84 : vector<128x32xf32> to vector<128x32xbf16>
    %cst_35 = arith.constant dense<0.000000e+00> : vector<128x128xf32>
    %86 = tpu.matmul %68, %82, %cst_35 {dimension_numbers = #tpu.dot_dimension_numbers<[1], [1], [0], [0], [0, 0, 1, 0], [], []>} : vector<128x32xbf16>, vector<128x32xbf16>, vector<128x128xf32> -> vector<128x128xf32>
    %c0_36 = arith.constant 0 : index
    %c0_37 = arith.constant 0 : index
    %c0_38 = arith.constant 0 : index
    %c0_39 = arith.constant 0 : index
    %87 = vector.load %arg6[%c0_36, %c0_37, %c0_38, %c0_39] : memref<2x4x128x128xf32, #tpu.memory_space<vmem>>, vector<1x1x128x128xf32>
    %88 = vector.shape_cast %87 : vector<1x1x128x128xf32> to vector<128x128xf32>
    %89 = arith.addf %86, %88 : vector<128x128xf32>
    %cst_40 = arith.constant dense<0xFF800000> : vector<128xf32>
    %90 = vector.multi_reduction <maximumf>, %89, %cst_40 [1] : vector<128x128xf32> to vector<128xf32>
    %91 = vector.shape_cast %90 : vector<128xf32> to vector<128x1xf32>
    %92 = vector.broadcast %91 : vector<128x1xf32> to vector<128x128xf32>
    %93 = arith.subf %89, %92 : vector<128x128xf32>
    %94 = math.exp %93 : vector<128x128xf32>
    %cst_41 = arith.constant dense<0.000000e+00> : vector<128xf32>
    %95 = vector.multi_reduction <add>, %94, %cst_41 [1] : vector<128x128xf32> to vector<128xf32>
    %96 = vector.shape_cast %95 : vector<128xf32> to vector<128x1xf32>
    %97 = tpu.reciprocal %96 {approx = true} : vector<128x1xf32> -> vector<128x1xf32>
    %98 = vector.broadcast %97 : vector<128x1xf32> to vector<128x128xf32>
    %99 = arith.mulf %94, %98 : vector<128x128xf32>
    %100 = arith.truncf %99 : vector<128x128xf32> to vector<128x128xbf16>
    %cst_42 = arith.constant dense<0.000000e+00> : vector<128x32xf32>
    %101 = tpu.matmul %100, %85, %cst_42 {dimension_numbers = #tpu.dot_dimension_numbers<[1], [0], [0], [1], [0, 0, 1, 1], [], []>} : vector<128x128xbf16>, vector<128x32xbf16>, vector<128x32xf32> -> vector<128x32xf32>
    %102 = arith.addf %79, %101 : vector<128x32xf32>
    %103 = vector.broadcast %15 : vector<1x32xf32> to vector<128x32xf32>
    %104 = arith.mulf %73, %103 : vector<128x32xf32>
    %105 = arith.truncf %104 : vector<128x32xf32> to vector<128x32xbf16>
    %106 = vector.broadcast %15 : vector<1x32xf32> to vector<128x32xf32>
    %107 = arith.mulf %78, %106 : vector<128x32xf32>
    %108 = arith.truncf %107 : vector<128x32xf32> to vector<128x32xbf16>
    %cst_43 = arith.constant dense<0.000000e+00> : vector<128x128xf32>
    %109 = tpu.matmul %68, %105, %cst_43 {dimension_numbers = #tpu.dot_dimension_numbers<[1], [1], [0], [0], [0, 0, 1, 0], [], []>} : vector<128x32xbf16>, vector<128x32xbf16>, vector<128x128xf32> -> vector<128x128xf32>
    %c0_44 = arith.constant 0 : index
    %c1_45 = arith.constant 1 : index
    %c0_46 = arith.constant 0 : index
    %c0_47 = arith.constant 0 : index
    %110 = vector.load %arg6[%c0_44, %c1_45, %c0_46, %c0_47] : memref<2x4x128x128xf32, #tpu.memory_space<vmem>>, vector<1x1x128x128xf32>
    %111 = vector.shape_cast %110 : vector<1x1x128x128xf32> to vector<128x128xf32>
    %112 = arith.addf %109, %111 : vector<128x128xf32>
    %cst_48 = arith.constant dense<0xFF800000> : vector<128xf32>
    %113 = vector.multi_reduction <maximumf>, %112, %cst_48 [1] : vector<128x128xf32> to vector<128xf32>
    %114 = vector.shape_cast %113 : vector<128xf32> to vector<128x1xf32>
    %115 = vector.broadcast %114 : vector<128x1xf32> to vector<128x128xf32>
    %116 = arith.subf %112, %115 : vector<128x128xf32>
    %117 = math.exp %116 : vector<128x128xf32>
    %cst_49 = arith.constant dense<0.000000e+00> : vector<128xf32>
    %118 = vector.multi_reduction <add>, %117, %cst_49 [1] : vector<128x128xf32> to vector<128xf32>
    %119 = vector.shape_cast %118 : vector<128xf32> to vector<128x1xf32>
    %120 = tpu.reciprocal %119 {approx = true} : vector<128x1xf32> -> vector<128x1xf32>
    %121 = vector.broadcast %120 : vector<128x1xf32> to vector<128x128xf32>
    %122 = arith.mulf %117, %121 : vector<128x128xf32>
    %123 = arith.truncf %122 : vector<128x128xf32> to vector<128x128xbf16>
    %cst_50 = arith.constant dense<0.000000e+00> : vector<128x32xf32>
    %124 = tpu.matmul %123, %108, %cst_50 {dimension_numbers = #tpu.dot_dimension_numbers<[1], [0], [0], [1], [0, 0, 1, 1], [], []>} : vector<128x128xbf16>, vector<128x32xbf16>, vector<128x32xf32> -> vector<128x32xf32>
    %125 = arith.addf %102, %124 : vector<128x32xf32>
    %126 = vector.broadcast %22 : vector<1x32xf32> to vector<128x32xf32>
    %127 = arith.mulf %73, %126 : vector<128x32xf32>
    %128 = arith.truncf %127 : vector<128x32xf32> to vector<128x32xbf16>
    %129 = vector.broadcast %22 : vector<1x32xf32> to vector<128x32xf32>
    %130 = arith.mulf %78, %129 : vector<128x32xf32>
    %131 = arith.truncf %130 : vector<128x32xf32> to vector<128x32xbf16>
    %cst_51 = arith.constant dense<0.000000e+00> : vector<128x128xf32>
    %132 = tpu.matmul %68, %128, %cst_51 {dimension_numbers = #tpu.dot_dimension_numbers<[1], [1], [0], [0], [0, 0, 1, 0], [], []>} : vector<128x32xbf16>, vector<128x32xbf16>, vector<128x128xf32> -> vector<128x128xf32>
    %c0_52 = arith.constant 0 : index
    %c2_53 = arith.constant 2 : index
    %c0_54 = arith.constant 0 : index
    %c0_55 = arith.constant 0 : index
    %133 = vector.load %arg6[%c0_52, %c2_53, %c0_54, %c0_55] : memref<2x4x128x128xf32, #tpu.memory_space<vmem>>, vector<1x1x128x128xf32>
    %134 = vector.shape_cast %133 : vector<1x1x128x128xf32> to vector<128x128xf32>
    %135 = arith.addf %132, %134 : vector<128x128xf32>
    %cst_56 = arith.constant dense<0xFF800000> : vector<128xf32>
    %136 = vector.multi_reduction <maximumf>, %135, %cst_56 [1] : vector<128x128xf32> to vector<128xf32>
    %137 = vector.shape_cast %136 : vector<128xf32> to vector<128x1xf32>
    %138 = vector.broadcast %137 : vector<128x1xf32> to vector<128x128xf32>
    %139 = arith.subf %135, %138 : vector<128x128xf32>
    %140 = math.exp %139 : vector<128x128xf32>
    %cst_57 = arith.constant dense<0.000000e+00> : vector<128xf32>
    %141 = vector.multi_reduction <add>, %140, %cst_57 [1] : vector<128x128xf32> to vector<128xf32>
    %142 = vector.shape_cast %141 : vector<128xf32> to vector<128x1xf32>
    %143 = tpu.reciprocal %142 {approx = true} : vector<128x1xf32> -> vector<128x1xf32>
    %144 = vector.broadcast %143 : vector<128x1xf32> to vector<128x128xf32>
    %145 = arith.mulf %140, %144 : vector<128x128xf32>
    %146 = arith.truncf %145 : vector<128x128xf32> to vector<128x128xbf16>
    %cst_58 = arith.constant dense<0.000000e+00> : vector<128x32xf32>
    %147 = tpu.matmul %146, %131, %cst_58 {dimension_numbers = #tpu.dot_dimension_numbers<[1], [0], [0], [1], [0, 0, 1, 1], [], []>} : vector<128x128xbf16>, vector<128x32xbf16>, vector<128x32xf32> -> vector<128x32xf32>
    %148 = arith.addf %125, %147 : vector<128x32xf32>
    %149 = vector.broadcast %29 : vector<1x32xf32> to vector<128x32xf32>
    %150 = arith.mulf %73, %149 : vector<128x32xf32>
    %151 = arith.truncf %150 : vector<128x32xf32> to vector<128x32xbf16>
    %152 = vector.broadcast %29 : vector<1x32xf32> to vector<128x32xf32>
    %153 = arith.mulf %78, %152 : vector<128x32xf32>
    %154 = arith.truncf %153 : vector<128x32xf32> to vector<128x32xbf16>
    %cst_59 = arith.constant dense<0.000000e+00> : vector<128x128xf32>
    %155 = tpu.matmul %68, %151, %cst_59 {dimension_numbers = #tpu.dot_dimension_numbers<[1], [1], [0], [0], [0, 0, 1, 0], [], []>} : vector<128x32xbf16>, vector<128x32xbf16>, vector<128x128xf32> -> vector<128x128xf32>
    %c0_60 = arith.constant 0 : index
    %c3_61 = arith.constant 3 : index
    %c0_62 = arith.constant 0 : index
    %c0_63 = arith.constant 0 : index
    %156 = vector.load %arg6[%c0_60, %c3_61, %c0_62, %c0_63] : memref<2x4x128x128xf32, #tpu.memory_space<vmem>>, vector<1x1x128x128xf32>
    %157 = vector.shape_cast %156 : vector<1x1x128x128xf32> to vector<128x128xf32>
    %158 = arith.addf %155, %157 : vector<128x128xf32>
    %cst_64 = arith.constant dense<0xFF800000> : vector<128xf32>
    %159 = vector.multi_reduction <maximumf>, %158, %cst_64 [1] : vector<128x128xf32> to vector<128xf32>
    %160 = vector.shape_cast %159 : vector<128xf32> to vector<128x1xf32>
    %161 = vector.broadcast %160 : vector<128x1xf32> to vector<128x128xf32>
    %162 = arith.subf %158, %161 : vector<128x128xf32>
    %163 = math.exp %162 : vector<128x128xf32>
    %cst_65 = arith.constant dense<0.000000e+00> : vector<128xf32>
    %164 = vector.multi_reduction <add>, %163, %cst_65 [1] : vector<128x128xf32> to vector<128xf32>
    %165 = vector.shape_cast %164 : vector<128xf32> to vector<128x1xf32>
    %166 = tpu.reciprocal %165 {approx = true} : vector<128x1xf32> -> vector<128x1xf32>
    %167 = vector.broadcast %166 : vector<128x1xf32> to vector<128x128xf32>
    %168 = arith.mulf %163, %167 : vector<128x128xf32>
    %169 = arith.truncf %168 : vector<128x128xf32> to vector<128x128xbf16>
    %cst_66 = arith.constant dense<0.000000e+00> : vector<128x32xf32>
    %170 = tpu.matmul %169, %154, %cst_66 {dimension_numbers = #tpu.dot_dimension_numbers<[1], [0], [0], [1], [0, 0, 1, 1], [], []>} : vector<128x128xbf16>, vector<128x32xbf16>, vector<128x32xf32> -> vector<128x32xf32>
    %171 = arith.addf %148, %170 : vector<128x32xf32>
    %172 = arith.truncf %171 : vector<128x32xf32> to vector<128x32xbf16>
    %c0_67 = arith.constant 0 : index
    %c3_68 = arith.constant 3 : index
    %c0_69 = arith.constant 0 : index
    %c0_70 = arith.constant 0 : index
    %173 = vector.load %arg3[%c0_67, %c3_68, %c0_69, %c0_70] : memref<2x4x32x32xbf16, #tpu.memory_space<vmem>>, vector<1x1x32x32xbf16>
    %174 = vector.shape_cast %173 : vector<1x1x32x32xbf16> to vector<32x32xbf16>
    %cst_71 = arith.constant dense<0.000000e+00> : vector<128x32xf32>
    %175 = tpu.matmul %172, %174, %cst_71 {dimension_numbers = #tpu.dot_dimension_numbers<[1], [0], [0], [1], [0, 0, 1, 1], [], []>} : vector<128x32xbf16>, vector<32x32xbf16>, vector<128x32xf32> -> vector<128x32xf32>
    %176 = arith.addf %0, %175 : vector<128x32xf32>
    %177 = vector.broadcast %35 : vector<1x32xf32> to vector<128x32xf32>
    %178 = arith.addf %176, %177 : vector<128x32xf32>
    %cst_72 = arith.constant dense<0.000000e+00> : vector<128xf32>
    %179 = vector.multi_reduction <add>, %178, %cst_72 [1] : vector<128x32xf32> to vector<128xf32>
    %180 = vector.shape_cast %179 : vector<128xf32> to vector<128x1xf32>
    %cst_73 = arith.constant 3.200000e+01 : f32
    %181 = vector.broadcast %cst_73 : f32 to vector<128x1xf32>
    %182 = arith.divf %180, %181 : vector<128x1xf32>
    %183 = vector.broadcast %182 : vector<128x1xf32> to vector<128x32xf32>
    %184 = arith.subf %178, %183 : vector<128x32xf32>
    %185 = arith.mulf %184, %184 : vector<128x32xf32>
    %cst_74 = arith.constant dense<0.000000e+00> : vector<128xf32>
    %186 = vector.multi_reduction <add>, %185, %cst_74 [1] : vector<128x32xf32> to vector<128xf32>
    %187 = vector.shape_cast %186 : vector<128xf32> to vector<128x1xf32>
    %cst_75 = arith.constant 3.200000e+01 : f32
    %188 = vector.broadcast %cst_75 : f32 to vector<128x1xf32>
    %189 = arith.divf %187, %188 : vector<128x1xf32>
    %190 = vector.broadcast %182 : vector<128x1xf32> to vector<128x32xf32>
    %191 = arith.subf %178, %190 : vector<128x32xf32>
    %cst_76 = arith.constant 9.99999974E-6 : f32
    %192 = vector.broadcast %cst_76 : f32 to vector<128x1xf32>
    %193 = arith.addf %189, %192 : vector<128x1xf32>
    %194 = math.rsqrt %193 : vector<128x1xf32>
    %195 = vector.broadcast %194 : vector<128x1xf32> to vector<128x32xf32>
    %196 = arith.mulf %191, %195 : vector<128x32xf32>
    %197 = vector.broadcast %36 : vector<1x32xf32> to vector<128x32xf32>
    %198 = arith.mulf %196, %197 : vector<128x32xf32>
    %199 = vector.broadcast %37 : vector<1x32xf32> to vector<128x32xf32>
    %200 = arith.addf %198, %199 : vector<128x32xf32>
    %201 = arith.truncf %200 : vector<128x32xf32> to vector<128x32xbf16>
    %c0_77 = arith.constant 0 : index
    %c0_78 = arith.constant 0 : index
    %c0_79 = arith.constant 0 : index
    %202 = vector.load %arg4[%c0_77, %c0_78, %c0_79] : memref<2x32x128xbf16, #tpu.memory_space<vmem>>, vector<1x32x128xbf16>
    %203 = vector.shape_cast %202 : vector<1x32x128xbf16> to vector<32x128xbf16>
    %cst_80 = arith.constant dense<0.000000e+00> : vector<128x128xf32>
    %204 = tpu.matmul %201, %203, %cst_80 {dimension_numbers = #tpu.dot_dimension_numbers<[1], [0], [0], [1], [0, 0, 1, 1], [], []>} : vector<128x32xbf16>, vector<32x128xbf16>, vector<128x128xf32> -> vector<128x128xf32>
    %205 = vector.broadcast %38 : vector<1x128xf32> to vector<128x128xf32>
    %206 = arith.addf %204, %205 : vector<128x128xf32>
    %cst_81 = arith.constant 5.000000e-01 : f32
    %207 = vector.broadcast %cst_81 : f32 to vector<128x128xf32>
    %208 = arith.mulf %207, %206 : vector<128x128xf32>
    %cst_82 = arith.constant 0.707106769 : f32
    %209 = vector.broadcast %cst_82 : f32 to vector<128x128xf32>
    %210 = arith.mulf %206, %209 : vector<128x128xf32>
    %211 = math.absf %210 : vector<128x128xf32>
    %cst_83 = arith.constant 0.327591091 : f32
    %212 = vector.broadcast %cst_83 : f32 to vector<128x128xf32>
    %213 = arith.mulf %212, %211 : vector<128x128xf32>
    %cst_84 = arith.constant 1.000000e+00 : f32
    %214 = vector.broadcast %cst_84 : f32 to vector<128x128xf32>
    %215 = arith.addf %214, %213 : vector<128x128xf32>
    %cst_85 = arith.constant 1.000000e+00 : f32
    %216 = vector.broadcast %cst_85 : f32 to vector<128x128xf32>
    %217 = arith.divf %216, %215 : vector<128x128xf32>
    %cst_86 = arith.constant 1.06140542 : f32
    %218 = vector.broadcast %cst_86 : f32 to vector<128x128xf32>
    %219 = arith.mulf %218, %217 : vector<128x128xf32>
    %cst_87 = arith.constant -1.45315206 : f32
    %220 = vector.broadcast %cst_87 : f32 to vector<128x128xf32>
    %221 = arith.addf %219, %220 : vector<128x128xf32>
    %222 = arith.mulf %221, %217 : vector<128x128xf32>
    %cst_88 = arith.constant 1.42141378 : f32
    %223 = vector.broadcast %cst_88 : f32 to vector<128x128xf32>
    %224 = arith.addf %222, %223 : vector<128x128xf32>
    %225 = arith.mulf %224, %217 : vector<128x128xf32>
    %cst_89 = arith.constant -0.284496725 : f32
    %226 = vector.broadcast %cst_89 : f32 to vector<128x128xf32>
    %227 = arith.addf %225, %226 : vector<128x128xf32>
    %228 = arith.mulf %227, %217 : vector<128x128xf32>
    %cst_90 = arith.constant 0.254829586 : f32
    %229 = vector.broadcast %cst_90 : f32 to vector<128x128xf32>
    %230 = arith.addf %228, %229 : vector<128x128xf32>
    %231 = arith.mulf %230, %217 : vector<128x128xf32>
    %cst_91 = arith.constant 0.000000e+00 : f32
    %232 = vector.broadcast %cst_91 : f32 to vector<128x128xf32>
    %233 = arith.subf %232, %211 : vector<128x128xf32>
    %234 = arith.mulf %233, %211 : vector<128x128xf32>
    %235 = math.exp %234 : vector<128x128xf32>
    %236 = arith.mulf %231, %235 : vector<128x128xf32>
    %cst_92 = arith.constant 1.000000e+00 : f32
    %237 = vector.broadcast %cst_92 : f32 to vector<128x128xf32>
    %238 = arith.subf %237, %236 : vector<128x128xf32>
    %cst_93 = arith.constant 0.000000e+00 : f32
    %239 = vector.broadcast %cst_93 : f32 to vector<128x128xf32>
    %240 = arith.cmpf olt, %210, %239 : vector<128x128xf32>
    %cst_94 = arith.constant 0.000000e+00 : f32
    %241 = vector.broadcast %cst_94 : f32 to vector<128x128xf32>
    %242 = arith.subf %241, %238 : vector<128x128xf32>
    %243 = arith.select %240, %242, %238 : vector<128x128xi1>, vector<128x128xf32>
    %cst_95 = arith.constant 1.000000e+00 : f32
    %244 = vector.broadcast %cst_95 : f32 to vector<128x128xf32>
    %245 = arith.addf %244, %243 : vector<128x128xf32>
    %246 = arith.mulf %208, %245 : vector<128x128xf32>
    %247 = arith.truncf %246 : vector<128x128xf32> to vector<128x128xbf16>
    %c0_96 = arith.constant 0 : index
    %c0_97 = arith.constant 0 : index
    %c0_98 = arith.constant 0 : index
    %248 = vector.load %arg5[%c0_96, %c0_97, %c0_98] : memref<2x128x32xbf16, #tpu.memory_space<vmem>>, vector<1x128x32xbf16>
    %249 = vector.shape_cast %248 : vector<1x128x32xbf16> to vector<128x32xbf16>
    %cst_99 = arith.constant dense<0.000000e+00> : vector<128x32xf32>
    %250 = tpu.matmul %247, %249, %cst_99 {dimension_numbers = #tpu.dot_dimension_numbers<[1], [0], [0], [1], [0, 0, 1, 1], [], []>} : vector<128x128xbf16>, vector<128x32xbf16>, vector<128x32xf32> -> vector<128x32xf32>
    %251 = arith.addf %178, %250 : vector<128x32xf32>
    %252 = vector.broadcast %39 : vector<1x32xf32> to vector<128x32xf32>
    %253 = arith.addf %251, %252 : vector<128x32xf32>
    %c0_100 = arith.constant 0 : index
    %c0_101 = arith.constant 0 : index
    %254 = vector.load %arg7[%c0_100, %c0_101] : memref<128x128xf32, #tpu.memory_space<vmem>>, vector<128x128xf32>
    %cst_102 = arith.constant dense<0.000000e+00> : vector<128x32xf32>
    %255 = tpu.matmul %254, %253, %cst_102 {dimension_numbers = #tpu.dot_dimension_numbers<[1], [0], [0], [1], [0, 0, 1, 1], [], []>, precision = #tpu.contract_precision<fp32>} : vector<128x128xf32>, vector<128x32xf32>, vector<128x32xf32> -> vector<128x32xf32>
    %c10 = arith.constant 10 : index
    %c0_103 = arith.constant 0 : index
    %256 = vector.load %arg2[%c10, %c0_103] : memref<20x128xf32, #tpu.memory_space<vmem>>, vector<1x32xf32>
    %c11 = arith.constant 11 : index
    %c0_104 = arith.constant 0 : index
    %257 = vector.load %arg2[%c11, %c0_104] : memref<20x128xf32, #tpu.memory_space<vmem>>, vector<1x32xf32>
    %c12 = arith.constant 12 : index
    %c0_105 = arith.constant 0 : index
    %258 = vector.load %arg2[%c12, %c0_105] : memref<20x128xf32, #tpu.memory_space<vmem>>, vector<1x32xf32>
    %c13 = arith.constant 13 : index
    %c0_106 = arith.constant 0 : index
    %259 = vector.load %arg2[%c13, %c0_106] : memref<20x128xf32, #tpu.memory_space<vmem>>, vector<1x32xf32>
    %c14 = arith.constant 14 : index
    %c0_107 = arith.constant 0 : index
    %260 = vector.load %arg2[%c14, %c0_107] : memref<20x128xf32, #tpu.memory_space<vmem>>, vector<1x32xf32>
    %c15 = arith.constant 15 : index
    %c0_108 = arith.constant 0 : index
    %261 = vector.load %arg2[%c15, %c0_108] : memref<20x128xf32, #tpu.memory_space<vmem>>, vector<1x32xf32>
    %c16 = arith.constant 16 : index
    %c0_109 = arith.constant 0 : index
    %262 = vector.load %arg2[%c16, %c0_109] : memref<20x128xf32, #tpu.memory_space<vmem>>, vector<1x32xf32>
    %c17 = arith.constant 17 : index
    %c0_110 = arith.constant 0 : index
    %263 = vector.load %arg2[%c17, %c0_110] : memref<20x128xf32, #tpu.memory_space<vmem>>, vector<1x32xf32>
    %c18 = arith.constant 18 : index
    %c0_111 = arith.constant 0 : index
    %264 = vector.load %arg2[%c18, %c0_111] : memref<20x128xf32, #tpu.memory_space<vmem>>, vector<1x128xf32>
    %c19 = arith.constant 19 : index
    %c0_112 = arith.constant 0 : index
    %265 = vector.load %arg2[%c19, %c0_112] : memref<20x128xf32, #tpu.memory_space<vmem>>, vector<1x32xf32>
    %cst_113 = arith.constant dense<0.000000e+00> : vector<128xf32>
    %266 = vector.multi_reduction <add>, %255, %cst_113 [1] : vector<128x32xf32> to vector<128xf32>
    %267 = vector.shape_cast %266 : vector<128xf32> to vector<128x1xf32>
    %cst_114 = arith.constant 3.200000e+01 : f32
    %268 = vector.broadcast %cst_114 : f32 to vector<128x1xf32>
    %269 = arith.divf %267, %268 : vector<128x1xf32>
    %270 = vector.broadcast %269 : vector<128x1xf32> to vector<128x32xf32>
    %271 = arith.subf %255, %270 : vector<128x32xf32>
    %272 = arith.mulf %271, %271 : vector<128x32xf32>
    %cst_115 = arith.constant dense<0.000000e+00> : vector<128xf32>
    %273 = vector.multi_reduction <add>, %272, %cst_115 [1] : vector<128x32xf32> to vector<128xf32>
    %274 = vector.shape_cast %273 : vector<128xf32> to vector<128x1xf32>
    %cst_116 = arith.constant 3.200000e+01 : f32
    %275 = vector.broadcast %cst_116 : f32 to vector<128x1xf32>
    %276 = arith.divf %274, %275 : vector<128x1xf32>
    %277 = vector.broadcast %269 : vector<128x1xf32> to vector<128x32xf32>
    %278 = arith.subf %255, %277 : vector<128x32xf32>
    %cst_117 = arith.constant 9.99999974E-6 : f32
    %279 = vector.broadcast %cst_117 : f32 to vector<128x1xf32>
    %280 = arith.addf %276, %279 : vector<128x1xf32>
    %281 = math.rsqrt %280 : vector<128x1xf32>
    %282 = vector.broadcast %281 : vector<128x1xf32> to vector<128x32xf32>
    %283 = arith.mulf %278, %282 : vector<128x32xf32>
    %284 = vector.broadcast %256 : vector<1x32xf32> to vector<128x32xf32>
    %285 = arith.mulf %283, %284 : vector<128x32xf32>
    %286 = vector.broadcast %257 : vector<1x32xf32> to vector<128x32xf32>
    %287 = arith.addf %285, %286 : vector<128x32xf32>
    %288 = arith.truncf %287 : vector<128x32xf32> to vector<128x32xbf16>
    %c1_118 = arith.constant 1 : index
    %c0_119 = arith.constant 0 : index
    %c0_120 = arith.constant 0 : index
    %c0_121 = arith.constant 0 : index
    %289 = vector.load %arg3[%c1_118, %c0_119, %c0_120, %c0_121] : memref<2x4x32x32xbf16, #tpu.memory_space<vmem>>, vector<1x1x32x32xbf16>
    %290 = vector.shape_cast %289 : vector<1x1x32x32xbf16> to vector<32x32xbf16>
    %cst_122 = arith.constant dense<0.000000e+00> : vector<128x32xf32>
    %291 = tpu.matmul %288, %290, %cst_122 {dimension_numbers = #tpu.dot_dimension_numbers<[1], [0], [0], [1], [0, 0, 1, 1], [], []>} : vector<128x32xbf16>, vector<32x32xbf16>, vector<128x32xf32> -> vector<128x32xf32>
    %292 = vector.broadcast %258 : vector<1x32xf32> to vector<128x32xf32>
    %293 = arith.addf %291, %292 : vector<128x32xf32>
    %294 = arith.truncf %293 : vector<128x32xf32> to vector<128x32xbf16>
    %c1_123 = arith.constant 1 : index
    %c1_124 = arith.constant 1 : index
    %c0_125 = arith.constant 0 : index
    %c0_126 = arith.constant 0 : index
    %295 = vector.load %arg3[%c1_123, %c1_124, %c0_125, %c0_126] : memref<2x4x32x32xbf16, #tpu.memory_space<vmem>>, vector<1x1x32x32xbf16>
    %296 = vector.shape_cast %295 : vector<1x1x32x32xbf16> to vector<32x32xbf16>
    %cst_127 = arith.constant dense<0.000000e+00> : vector<128x32xf32>
    %297 = tpu.matmul %288, %296, %cst_127 {dimension_numbers = #tpu.dot_dimension_numbers<[1], [0], [0], [1], [0, 0, 1, 1], [], []>} : vector<128x32xbf16>, vector<32x32xbf16>, vector<128x32xf32> -> vector<128x32xf32>
    %298 = vector.broadcast %259 : vector<1x32xf32> to vector<128x32xf32>
    %299 = arith.addf %297, %298 : vector<128x32xf32>
    %c1_128 = arith.constant 1 : index
    %c2_129 = arith.constant 2 : index
    %c0_130 = arith.constant 0 : index
    %c0_131 = arith.constant 0 : index
    %300 = vector.load %arg3[%c1_128, %c2_129, %c0_130, %c0_131] : memref<2x4x32x32xbf16, #tpu.memory_space<vmem>>, vector<1x1x32x32xbf16>
    %301 = vector.shape_cast %300 : vector<1x1x32x32xbf16> to vector<32x32xbf16>
    %cst_132 = arith.constant dense<0.000000e+00> : vector<128x32xf32>
    %302 = tpu.matmul %288, %301, %cst_132 {dimension_numbers = #tpu.dot_dimension_numbers<[1], [0], [0], [1], [0, 0, 1, 1], [], []>} : vector<128x32xbf16>, vector<32x32xbf16>, vector<128x32xf32> -> vector<128x32xf32>
    %303 = vector.broadcast %260 : vector<1x32xf32> to vector<128x32xf32>
    %304 = arith.addf %302, %303 : vector<128x32xf32>
    %cst_133 = arith.constant 0.000000e+00 : f32
    %305 = vector.broadcast %cst_133 : f32 to vector<128x32xf32>
    %306 = vector.broadcast %8 : vector<1x32xf32> to vector<128x32xf32>
    %307 = arith.mulf %299, %306 : vector<128x32xf32>
    %308 = arith.truncf %307 : vector<128x32xf32> to vector<128x32xbf16>
    %309 = vector.broadcast %8 : vector<1x32xf32> to vector<128x32xf32>
    %310 = arith.mulf %304, %309 : vector<128x32xf32>
    %311 = arith.truncf %310 : vector<128x32xf32> to vector<128x32xbf16>
    %cst_134 = arith.constant dense<0.000000e+00> : vector<128x128xf32>
    %312 = tpu.matmul %294, %308, %cst_134 {dimension_numbers = #tpu.dot_dimension_numbers<[1], [1], [0], [0], [0, 0, 1, 0], [], []>} : vector<128x32xbf16>, vector<128x32xbf16>, vector<128x128xf32> -> vector<128x128xf32>
    %c1_135 = arith.constant 1 : index
    %c0_136 = arith.constant 0 : index
    %c0_137 = arith.constant 0 : index
    %c0_138 = arith.constant 0 : index
    %313 = vector.load %arg6[%c1_135, %c0_136, %c0_137, %c0_138] : memref<2x4x128x128xf32, #tpu.memory_space<vmem>>, vector<1x1x128x128xf32>
    %314 = vector.shape_cast %313 : vector<1x1x128x128xf32> to vector<128x128xf32>
    %315 = arith.addf %312, %314 : vector<128x128xf32>
    %cst_139 = arith.constant dense<0xFF800000> : vector<128xf32>
    %316 = vector.multi_reduction <maximumf>, %315, %cst_139 [1] : vector<128x128xf32> to vector<128xf32>
    %317 = vector.shape_cast %316 : vector<128xf32> to vector<128x1xf32>
    %318 = vector.broadcast %317 : vector<128x1xf32> to vector<128x128xf32>
    %319 = arith.subf %315, %318 : vector<128x128xf32>
    %320 = math.exp %319 : vector<128x128xf32>
    %cst_140 = arith.constant dense<0.000000e+00> : vector<128xf32>
    %321 = vector.multi_reduction <add>, %320, %cst_140 [1] : vector<128x128xf32> to vector<128xf32>
    %322 = vector.shape_cast %321 : vector<128xf32> to vector<128x1xf32>
    %323 = tpu.reciprocal %322 {approx = true} : vector<128x1xf32> -> vector<128x1xf32>
    %324 = vector.broadcast %323 : vector<128x1xf32> to vector<128x128xf32>
    %325 = arith.mulf %320, %324 : vector<128x128xf32>
    %326 = arith.truncf %325 : vector<128x128xf32> to vector<128x128xbf16>
    %cst_141 = arith.constant dense<0.000000e+00> : vector<128x32xf32>
    %327 = tpu.matmul %326, %311, %cst_141 {dimension_numbers = #tpu.dot_dimension_numbers<[1], [0], [0], [1], [0, 0, 1, 1], [], []>} : vector<128x128xbf16>, vector<128x32xbf16>, vector<128x32xf32> -> vector<128x32xf32>
    %328 = arith.addf %305, %327 : vector<128x32xf32>
    %329 = vector.broadcast %15 : vector<1x32xf32> to vector<128x32xf32>
    %330 = arith.mulf %299, %329 : vector<128x32xf32>
    %331 = arith.truncf %330 : vector<128x32xf32> to vector<128x32xbf16>
    %332 = vector.broadcast %15 : vector<1x32xf32> to vector<128x32xf32>
    %333 = arith.mulf %304, %332 : vector<128x32xf32>
    %334 = arith.truncf %333 : vector<128x32xf32> to vector<128x32xbf16>
    %cst_142 = arith.constant dense<0.000000e+00> : vector<128x128xf32>
    %335 = tpu.matmul %294, %331, %cst_142 {dimension_numbers = #tpu.dot_dimension_numbers<[1], [1], [0], [0], [0, 0, 1, 0], [], []>} : vector<128x32xbf16>, vector<128x32xbf16>, vector<128x128xf32> -> vector<128x128xf32>
    %c1_143 = arith.constant 1 : index
    %c1_144 = arith.constant 1 : index
    %c0_145 = arith.constant 0 : index
    %c0_146 = arith.constant 0 : index
    %336 = vector.load %arg6[%c1_143, %c1_144, %c0_145, %c0_146] : memref<2x4x128x128xf32, #tpu.memory_space<vmem>>, vector<1x1x128x128xf32>
    %337 = vector.shape_cast %336 : vector<1x1x128x128xf32> to vector<128x128xf32>
    %338 = arith.addf %335, %337 : vector<128x128xf32>
    %cst_147 = arith.constant dense<0xFF800000> : vector<128xf32>
    %339 = vector.multi_reduction <maximumf>, %338, %cst_147 [1] : vector<128x128xf32> to vector<128xf32>
    %340 = vector.shape_cast %339 : vector<128xf32> to vector<128x1xf32>
    %341 = vector.broadcast %340 : vector<128x1xf32> to vector<128x128xf32>
    %342 = arith.subf %338, %341 : vector<128x128xf32>
    %343 = math.exp %342 : vector<128x128xf32>
    %cst_148 = arith.constant dense<0.000000e+00> : vector<128xf32>
    %344 = vector.multi_reduction <add>, %343, %cst_148 [1] : vector<128x128xf32> to vector<128xf32>
    %345 = vector.shape_cast %344 : vector<128xf32> to vector<128x1xf32>
    %346 = tpu.reciprocal %345 {approx = true} : vector<128x1xf32> -> vector<128x1xf32>
    %347 = vector.broadcast %346 : vector<128x1xf32> to vector<128x128xf32>
    %348 = arith.mulf %343, %347 : vector<128x128xf32>
    %349 = arith.truncf %348 : vector<128x128xf32> to vector<128x128xbf16>
    %cst_149 = arith.constant dense<0.000000e+00> : vector<128x32xf32>
    %350 = tpu.matmul %349, %334, %cst_149 {dimension_numbers = #tpu.dot_dimension_numbers<[1], [0], [0], [1], [0, 0, 1, 1], [], []>} : vector<128x128xbf16>, vector<128x32xbf16>, vector<128x32xf32> -> vector<128x32xf32>
    %351 = arith.addf %328, %350 : vector<128x32xf32>
    %352 = vector.broadcast %22 : vector<1x32xf32> to vector<128x32xf32>
    %353 = arith.mulf %299, %352 : vector<128x32xf32>
    %354 = arith.truncf %353 : vector<128x32xf32> to vector<128x32xbf16>
    %355 = vector.broadcast %22 : vector<1x32xf32> to vector<128x32xf32>
    %356 = arith.mulf %304, %355 : vector<128x32xf32>
    %357 = arith.truncf %356 : vector<128x32xf32> to vector<128x32xbf16>
    %cst_150 = arith.constant dense<0.000000e+00> : vector<128x128xf32>
    %358 = tpu.matmul %294, %354, %cst_150 {dimension_numbers = #tpu.dot_dimension_numbers<[1], [1], [0], [0], [0, 0, 1, 0], [], []>} : vector<128x32xbf16>, vector<128x32xbf16>, vector<128x128xf32> -> vector<128x128xf32>
    %c1_151 = arith.constant 1 : index
    %c2_152 = arith.constant 2 : index
    %c0_153 = arith.constant 0 : index
    %c0_154 = arith.constant 0 : index
    %359 = vector.load %arg6[%c1_151, %c2_152, %c0_153, %c0_154] : memref<2x4x128x128xf32, #tpu.memory_space<vmem>>, vector<1x1x128x128xf32>
    %360 = vector.shape_cast %359 : vector<1x1x128x128xf32> to vector<128x128xf32>
    %361 = arith.addf %358, %360 : vector<128x128xf32>
    %cst_155 = arith.constant dense<0xFF800000> : vector<128xf32>
    %362 = vector.multi_reduction <maximumf>, %361, %cst_155 [1] : vector<128x128xf32> to vector<128xf32>
    %363 = vector.shape_cast %362 : vector<128xf32> to vector<128x1xf32>
    %364 = vector.broadcast %363 : vector<128x1xf32> to vector<128x128xf32>
    %365 = arith.subf %361, %364 : vector<128x128xf32>
    %366 = math.exp %365 : vector<128x128xf32>
    %cst_156 = arith.constant dense<0.000000e+00> : vector<128xf32>
    %367 = vector.multi_reduction <add>, %366, %cst_156 [1] : vector<128x128xf32> to vector<128xf32>
    %368 = vector.shape_cast %367 : vector<128xf32> to vector<128x1xf32>
    %369 = tpu.reciprocal %368 {approx = true} : vector<128x1xf32> -> vector<128x1xf32>
    %370 = vector.broadcast %369 : vector<128x1xf32> to vector<128x128xf32>
    %371 = arith.mulf %366, %370 : vector<128x128xf32>
    %372 = arith.truncf %371 : vector<128x128xf32> to vector<128x128xbf16>
    %cst_157 = arith.constant dense<0.000000e+00> : vector<128x32xf32>
    %373 = tpu.matmul %372, %357, %cst_157 {dimension_numbers = #tpu.dot_dimension_numbers<[1], [0], [0], [1], [0, 0, 1, 1], [], []>} : vector<128x128xbf16>, vector<128x32xbf16>, vector<128x32xf32> -> vector<128x32xf32>
    %374 = arith.addf %351, %373 : vector<128x32xf32>
    %375 = vector.broadcast %29 : vector<1x32xf32> to vector<128x32xf32>
    %376 = arith.mulf %299, %375 : vector<128x32xf32>
    %377 = arith.truncf %376 : vector<128x32xf32> to vector<128x32xbf16>
    %378 = vector.broadcast %29 : vector<1x32xf32> to vector<128x32xf32>
    %379 = arith.mulf %304, %378 : vector<128x32xf32>
    %380 = arith.truncf %379 : vector<128x32xf32> to vector<128x32xbf16>
    %cst_158 = arith.constant dense<0.000000e+00> : vector<128x128xf32>
    %381 = tpu.matmul %294, %377, %cst_158 {dimension_numbers = #tpu.dot_dimension_numbers<[1], [1], [0], [0], [0, 0, 1, 0], [], []>} : vector<128x32xbf16>, vector<128x32xbf16>, vector<128x128xf32> -> vector<128x128xf32>
    %c1_159 = arith.constant 1 : index
    %c3_160 = arith.constant 3 : index
    %c0_161 = arith.constant 0 : index
    %c0_162 = arith.constant 0 : index
    %382 = vector.load %arg6[%c1_159, %c3_160, %c0_161, %c0_162] : memref<2x4x128x128xf32, #tpu.memory_space<vmem>>, vector<1x1x128x128xf32>
    %383 = vector.shape_cast %382 : vector<1x1x128x128xf32> to vector<128x128xf32>
    %384 = arith.addf %381, %383 : vector<128x128xf32>
    %cst_163 = arith.constant dense<0xFF800000> : vector<128xf32>
    %385 = vector.multi_reduction <maximumf>, %384, %cst_163 [1] : vector<128x128xf32> to vector<128xf32>
    %386 = vector.shape_cast %385 : vector<128xf32> to vector<128x1xf32>
    %387 = vector.broadcast %386 : vector<128x1xf32> to vector<128x128xf32>
    %388 = arith.subf %384, %387 : vector<128x128xf32>
    %389 = math.exp %388 : vector<128x128xf32>
    %cst_164 = arith.constant dense<0.000000e+00> : vector<128xf32>
    %390 = vector.multi_reduction <add>, %389, %cst_164 [1] : vector<128x128xf32> to vector<128xf32>
    %391 = vector.shape_cast %390 : vector<128xf32> to vector<128x1xf32>
    %392 = tpu.reciprocal %391 {approx = true} : vector<128x1xf32> -> vector<128x1xf32>
    %393 = vector.broadcast %392 : vector<128x1xf32> to vector<128x128xf32>
    %394 = arith.mulf %389, %393 : vector<128x128xf32>
    %395 = arith.truncf %394 : vector<128x128xf32> to vector<128x128xbf16>
    %cst_165 = arith.constant dense<0.000000e+00> : vector<128x32xf32>
    %396 = tpu.matmul %395, %380, %cst_165 {dimension_numbers = #tpu.dot_dimension_numbers<[1], [0], [0], [1], [0, 0, 1, 1], [], []>} : vector<128x128xbf16>, vector<128x32xbf16>, vector<128x32xf32> -> vector<128x32xf32>
    %397 = arith.addf %374, %396 : vector<128x32xf32>
    %398 = arith.truncf %397 : vector<128x32xf32> to vector<128x32xbf16>
    %c1_166 = arith.constant 1 : index
    %c3_167 = arith.constant 3 : index
    %c0_168 = arith.constant 0 : index
    %c0_169 = arith.constant 0 : index
    %399 = vector.load %arg3[%c1_166, %c3_167, %c0_168, %c0_169] : memref<2x4x32x32xbf16, #tpu.memory_space<vmem>>, vector<1x1x32x32xbf16>
    %400 = vector.shape_cast %399 : vector<1x1x32x32xbf16> to vector<32x32xbf16>
    %cst_170 = arith.constant dense<0.000000e+00> : vector<128x32xf32>
    %401 = tpu.matmul %398, %400, %cst_170 {dimension_numbers = #tpu.dot_dimension_numbers<[1], [0], [0], [1], [0, 0, 1, 1], [], []>} : vector<128x32xbf16>, vector<32x32xbf16>, vector<128x32xf32> -> vector<128x32xf32>
    %402 = arith.addf %255, %401 : vector<128x32xf32>
    %403 = vector.broadcast %261 : vector<1x32xf32> to vector<128x32xf32>
    %404 = arith.addf %402, %403 : vector<128x32xf32>
    %cst_171 = arith.constant dense<0.000000e+00> : vector<128xf32>
    %405 = vector.multi_reduction <add>, %404, %cst_171 [1] : vector<128x32xf32> to vector<128xf32>
    %406 = vector.shape_cast %405 : vector<128xf32> to vector<128x1xf32>
    %cst_172 = arith.constant 3.200000e+01 : f32
    %407 = vector.broadcast %cst_172 : f32 to vector<128x1xf32>
    %408 = arith.divf %406, %407 : vector<128x1xf32>
    %409 = vector.broadcast %408 : vector<128x1xf32> to vector<128x32xf32>
    %410 = arith.subf %404, %409 : vector<128x32xf32>
    %411 = arith.mulf %410, %410 : vector<128x32xf32>
    %cst_173 = arith.constant dense<0.000000e+00> : vector<128xf32>
    %412 = vector.multi_reduction <add>, %411, %cst_173 [1] : vector<128x32xf32> to vector<128xf32>
    %413 = vector.shape_cast %412 : vector<128xf32> to vector<128x1xf32>
    %cst_174 = arith.constant 3.200000e+01 : f32
    %414 = vector.broadcast %cst_174 : f32 to vector<128x1xf32>
    %415 = arith.divf %413, %414 : vector<128x1xf32>
    %416 = vector.broadcast %408 : vector<128x1xf32> to vector<128x32xf32>
    %417 = arith.subf %404, %416 : vector<128x32xf32>
    %cst_175 = arith.constant 9.99999974E-6 : f32
    %418 = vector.broadcast %cst_175 : f32 to vector<128x1xf32>
    %419 = arith.addf %415, %418 : vector<128x1xf32>
    %420 = math.rsqrt %419 : vector<128x1xf32>
    %421 = vector.broadcast %420 : vector<128x1xf32> to vector<128x32xf32>
    %422 = arith.mulf %417, %421 : vector<128x32xf32>
    %423 = vector.broadcast %262 : vector<1x32xf32> to vector<128x32xf32>
    %424 = arith.mulf %422, %423 : vector<128x32xf32>
    %425 = vector.broadcast %263 : vector<1x32xf32> to vector<128x32xf32>
    %426 = arith.addf %424, %425 : vector<128x32xf32>
    %427 = arith.truncf %426 : vector<128x32xf32> to vector<128x32xbf16>
    %c1_176 = arith.constant 1 : index
    %c0_177 = arith.constant 0 : index
    %c0_178 = arith.constant 0 : index
    %428 = vector.load %arg4[%c1_176, %c0_177, %c0_178] : memref<2x32x128xbf16, #tpu.memory_space<vmem>>, vector<1x32x128xbf16>
    %429 = vector.shape_cast %428 : vector<1x32x128xbf16> to vector<32x128xbf16>
    %cst_179 = arith.constant dense<0.000000e+00> : vector<128x128xf32>
    %430 = tpu.matmul %427, %429, %cst_179 {dimension_numbers = #tpu.dot_dimension_numbers<[1], [0], [0], [1], [0, 0, 1, 1], [], []>} : vector<128x32xbf16>, vector<32x128xbf16>, vector<128x128xf32> -> vector<128x128xf32>
    %431 = vector.broadcast %264 : vector<1x128xf32> to vector<128x128xf32>
    %432 = arith.addf %430, %431 : vector<128x128xf32>
    %cst_180 = arith.constant 5.000000e-01 : f32
    %433 = vector.broadcast %cst_180 : f32 to vector<128x128xf32>
    %434 = arith.mulf %433, %432 : vector<128x128xf32>
    %cst_181 = arith.constant 0.707106769 : f32
    %435 = vector.broadcast %cst_181 : f32 to vector<128x128xf32>
    %436 = arith.mulf %432, %435 : vector<128x128xf32>
    %437 = math.absf %436 : vector<128x128xf32>
    %cst_182 = arith.constant 0.327591091 : f32
    %438 = vector.broadcast %cst_182 : f32 to vector<128x128xf32>
    %439 = arith.mulf %438, %437 : vector<128x128xf32>
    %cst_183 = arith.constant 1.000000e+00 : f32
    %440 = vector.broadcast %cst_183 : f32 to vector<128x128xf32>
    %441 = arith.addf %440, %439 : vector<128x128xf32>
    %cst_184 = arith.constant 1.000000e+00 : f32
    %442 = vector.broadcast %cst_184 : f32 to vector<128x128xf32>
    %443 = arith.divf %442, %441 : vector<128x128xf32>
    %cst_185 = arith.constant 1.06140542 : f32
    %444 = vector.broadcast %cst_185 : f32 to vector<128x128xf32>
    %445 = arith.mulf %444, %443 : vector<128x128xf32>
    %cst_186 = arith.constant -1.45315206 : f32
    %446 = vector.broadcast %cst_186 : f32 to vector<128x128xf32>
    %447 = arith.addf %445, %446 : vector<128x128xf32>
    %448 = arith.mulf %447, %443 : vector<128x128xf32>
    %cst_187 = arith.constant 1.42141378 : f32
    %449 = vector.broadcast %cst_187 : f32 to vector<128x128xf32>
    %450 = arith.addf %448, %449 : vector<128x128xf32>
    %451 = arith.mulf %450, %443 : vector<128x128xf32>
    %cst_188 = arith.constant -0.284496725 : f32
    %452 = vector.broadcast %cst_188 : f32 to vector<128x128xf32>
    %453 = arith.addf %451, %452 : vector<128x128xf32>
    %454 = arith.mulf %453, %443 : vector<128x128xf32>
    %cst_189 = arith.constant 0.254829586 : f32
    %455 = vector.broadcast %cst_189 : f32 to vector<128x128xf32>
    %456 = arith.addf %454, %455 : vector<128x128xf32>
    %457 = arith.mulf %456, %443 : vector<128x128xf32>
    %cst_190 = arith.constant 0.000000e+00 : f32
    %458 = vector.broadcast %cst_190 : f32 to vector<128x128xf32>
    %459 = arith.subf %458, %437 : vector<128x128xf32>
    %460 = arith.mulf %459, %437 : vector<128x128xf32>
    %461 = math.exp %460 : vector<128x128xf32>
    %462 = arith.mulf %457, %461 : vector<128x128xf32>
    %cst_191 = arith.constant 1.000000e+00 : f32
    %463 = vector.broadcast %cst_191 : f32 to vector<128x128xf32>
    %464 = arith.subf %463, %462 : vector<128x128xf32>
    %cst_192 = arith.constant 0.000000e+00 : f32
    %465 = vector.broadcast %cst_192 : f32 to vector<128x128xf32>
    %466 = arith.cmpf olt, %436, %465 : vector<128x128xf32>
    %cst_193 = arith.constant 0.000000e+00 : f32
    %467 = vector.broadcast %cst_193 : f32 to vector<128x128xf32>
    %468 = arith.subf %467, %464 : vector<128x128xf32>
    %469 = arith.select %466, %468, %464 : vector<128x128xi1>, vector<128x128xf32>
    %cst_194 = arith.constant 1.000000e+00 : f32
    %470 = vector.broadcast %cst_194 : f32 to vector<128x128xf32>
    %471 = arith.addf %470, %469 : vector<128x128xf32>
    %472 = arith.mulf %434, %471 : vector<128x128xf32>
    %473 = arith.truncf %472 : vector<128x128xf32> to vector<128x128xbf16>
    %c1_195 = arith.constant 1 : index
    %c0_196 = arith.constant 0 : index
    %c0_197 = arith.constant 0 : index
    %474 = vector.load %arg5[%c1_195, %c0_196, %c0_197] : memref<2x128x32xbf16, #tpu.memory_space<vmem>>, vector<1x128x32xbf16>
    %475 = vector.shape_cast %474 : vector<1x128x32xbf16> to vector<128x32xbf16>
    %cst_198 = arith.constant dense<0.000000e+00> : vector<128x32xf32>
    %476 = tpu.matmul %473, %475, %cst_198 {dimension_numbers = #tpu.dot_dimension_numbers<[1], [0], [0], [1], [0, 0, 1, 1], [], []>} : vector<128x128xbf16>, vector<128x32xbf16>, vector<128x32xf32> -> vector<128x32xf32>
    %477 = arith.addf %404, %476 : vector<128x32xf32>
    %478 = vector.broadcast %265 : vector<1x32xf32> to vector<128x32xf32>
    %479 = arith.addf %477, %478 : vector<128x32xf32>
    %480 = vector.extract_strided_slice %479 {offsets = [0, 0], sizes = [32, 32], strides = [1, 1]} : vector<128x32xf32> to vector<32x32xf32>
    %481 = vector.extract_strided_slice %479 {offsets = [32, 0], sizes = [32, 32], strides = [1, 1]} : vector<128x32xf32> to vector<32x32xf32>
    %482 = vector.extract_strided_slice %479 {offsets = [64, 0], sizes = [32, 32], strides = [1, 1]} : vector<128x32xf32> to vector<32x32xf32>
    %483 = vector.extract_strided_slice %479 {offsets = [96, 0], sizes = [32, 32], strides = [1, 1]} : vector<128x32xf32> to vector<32x32xf32>
    %484 = tpu.concatenate %480, %481, %482, %483 in 1 : vector<32x32xf32>, vector<32x32xf32>, vector<32x32xf32>, vector<32x32xf32> -> vector<32x128xf32>
    %c0_199 = arith.constant 0 : index
    %c0_200 = arith.constant 0 : index
    %485 = vector.load %arg8[%c0_199, %c0_200] : memref<32x128xf32, #tpu.memory_space<vmem>>, vector<32x128xf32>
    tpu.vector_store %arg8[%c0_199, %c0_200], %484 {strides = array<i32>} : memref<32x128xf32, #tpu.memory_space<vmem>>, vector<32x128xf32>,
    return
  }
  func.func @transform_0(%arg0: i32) -> (i32, i32) {
    %c0_i32 = arith.constant 0 : i32
    %c0_i32_0 = arith.constant 0 : i32
    return %arg0, %c0_i32 : i32, i32
  }
  func.func @transform_1(%arg0: i32) -> (i32, i32) {
    %c0_i32 = arith.constant 0 : i32
    %c0_i32_0 = arith.constant 0 : i32
    %c0_i32_1 = arith.constant 0 : i32
    return %c0_i32, %c0_i32_0 : i32, i32
  }
  func.func @transform_2(%arg0: i32) -> (i32, i32, i32, i32) {
    %c0_i32 = arith.constant 0 : i32
    %c0_i32_0 = arith.constant 0 : i32
    %c0_i32_1 = arith.constant 0 : i32
    %c0_i32_2 = arith.constant 0 : i32
    %c0_i32_3 = arith.constant 0 : i32
    return %c0_i32, %c0_i32_0, %c0_i32_1, %c0_i32_2 : i32, i32, i32, i32
  }
  func.func @transform_3(%arg0: i32) -> (i32, i32, i32) {
    %c0_i32 = arith.constant 0 : i32
    %c0_i32_0 = arith.constant 0 : i32
    %c0_i32_1 = arith.constant 0 : i32
    %c0_i32_2 = arith.constant 0 : i32
    return %c0_i32, %c0_i32_0, %c0_i32_1 : i32, i32, i32
  }
  func.func @transform_4(%arg0: i32) -> (i32, i32, i32) {
    %c0_i32 = arith.constant 0 : i32
    %c0_i32_0 = arith.constant 0 : i32
    %c0_i32_1 = arith.constant 0 : i32
    %c0_i32_2 = arith.constant 0 : i32
    return %c0_i32, %c0_i32_0, %c0_i32_1 : i32, i32, i32
  }
  func.func @transform_5(%arg0: i32) -> (i32, i32, i32, i32) {
    %c0_i32 = arith.constant 0 : i32
    %c0_i32_0 = arith.constant 0 : i32
    %c0_i32_1 = arith.constant 0 : i32
    %c0_i32_2 = arith.constant 0 : i32
    %c0_i32_3 = arith.constant 0 : i32
    return %c0_i32, %c0_i32_0, %c0_i32_1, %c0_i32_2 : i32, i32, i32, i32
  }
  func.func @transform_6(%arg0: i32) -> (i32, i32) {
    %c0_i32 = arith.constant 0 : i32
    %c0_i32_0 = arith.constant 0 : i32
    %c0_i32_1 = arith.constant 0 : i32
    return %c0_i32, %c0_i32_0 : i32, i32
  }
  func.func @transform_7(%arg0: i32) -> (i32, i32) {
    %c0_i32 = arith.constant 0 : i32
    %c0_i32_0 = arith.constant 0 : i32
    return %arg0, %c0_i32 : i32, i32
  }
}

</mosaic_0001>

<bundles_post_ra>
// kernel: basic_layer_forward.1
= control target key start
LH: loop header
LB: loop body
LE: loop exit
PB: predicated region body
PF: predicated region fallthrough
CT: control target
= control target key end

     0   :  { %12 = vsyncpa [#allocation3], 0  ;;  %s12009_s24 = smov [#allocation2]   ;;  %s17094_s0 = inlined_call_operand.vmem [shape: f32[128,32], index: 0, kind: input, shape index: {}]   ;;  %s17095_s1 = inlined_call_operand.vmem [shape: f32[20,128], index: 1, kind: input, shape index: {}]   ;;  %s17096_s2 = inlined_call_operand.vmem [shape: bf16[2,4,32,32], index: 2, kind: input, shape index: {}]   ;;  %s17097_s3 = inlined_call_operand.vmem [shape: bf16[2,32,128], index: 3, kind: input, shape index: {}]   ;;  %s17098_s4 = inlined_call_operand.vmem [shape: bf16[2,128,32], index: 4, kind: input, shape index: {}]   ;;  %s17099_s5 = inlined_call_operand.hbm [shape: f32[2,4,128,128], index: 5, kind: input, shape index: {}]   ;;  %s17100_s6 = inlined_call_operand.vmem [shape: f32[128,128], index: 6, kind: input, shape index: {}]   ;;  %s17101_s7 = inlined_call_operand.vmem [shape: f32[32,128], index: 7, kind: output, shape index: {}]  }
   0x1   :  { %s28_s25 = sshll.u32 %s12009_s24, 4  ;;  %s11985_s28 = scalar_lea.hbm %s17099_s5, 16384  ;;  %s29_s25 = int_to_ptr.vmem [resolvable:$true] %s28_s25 }
   0x2   :  { %p11986_p0 = scmp.ne.s32.totalorder %s17099_s5, %s11985_s28  ;;  %p11989_p1 = scmp.lt.u32.totalorder %s11985_s28, %s17099_s5 }
   0x4   :  { %p11991_p2 = pnand %p11989_p1, %p11986_p0 }
   0x6   :  { %11994 = shalt.err (!%p11991_p2)
}
   0x7   :  { %s11995_s10 = scalar_lea.vmem %s29_s25, 16384  ;;  %p12000_p4 = scmp.lt.s32.totalorder %s29_s25, %s29_s25 }
   0x8   :  { %p11996_p3 = scmp.ne.s32.totalorder %s29_s25, %s11995_s10  ;;  %p12001_p5 = scmp.lt.s32.totalorder %s11995_s10, %s11995_s10 }
   0xa   :  { %p12002_p6 = por %p12001_p5, %p12000_p4 }
   0xc   :  { %p12003_p7 = pnand %p12002_p6, %p11996_p3 }
   0xe   :  { %12006 = shalt.err (!%p12003_p7)
}
   0xf   :  { %s12010_s11 = smov 128   ;;  %s12011_s12 = smov 8  }
  0x10   :  { %34 = dma.hbm_to_vmem [thread:$0]  %s17099_s5, 16384, %s29_s25, [#allocation3], %s12010_s11, %s12010_s11, %s12011_s12  }
  0x11   :  { %12007 = dma.done.wait [#allocation3], 16384  }
  0x12   :  { %12008 = vsyncadd [#allocation3], 4294950912  ;;  %vm89_vm0 = vcmask 261120   ;;  %v41_v0 = vld [vmem:[%s17094_s0] sm:$0xff]  ;;  %v43_v1 = vld [vmem:[%s17094_s0 + $0x10] sm:$0xff]  ;;  %s12015_s20 = smov 96  }
  0x13   :  { %v42_v2 = vld [vmem:[%s17094_s0 + $0x8] sm:$0xff]  ;;  %v90_v3 = vsel %vm89_vm0, %v41_v0, 0.0  ;;  %v96_v4 = vsel %vm89_vm0, %v43_v1, 0.0  ;;  %v44_v5 = vld [vmem:[%s17094_s0 + $0x18] sm:$0xff]  ;;  %v12085_v6 = vld [vmem:[%s17094_s0 + $0x20] sm:$0xff] }
  0x14   :  { %v12090_v7 = vld [vmem:[%s17094_s0 + $0x28] sm:$0xff]  ;;  %91 = vadd.xlane.f32.xlu0 %v90_v3  ;;  %97 = vadd.xlane.f32.xlu1 %v96_v4  ;;  %v93_v8 = vsel %vm89_vm0, %v42_v2, 0.0  ;;  %v99_v9 = vsel %vm89_vm0, %v44_v5, 0.0  ;;  %v102_v10 = vsel %vm89_vm0, %v12085_v6, 0.0  ;;  %v12099_v11 = vld [vmem:[%s17094_s0 + $0x30] sm:$0xff]  ;;  %v12104_v12 = vld [vmem:[%s17094_s0 + $0x38] sm:$0xff] }
  0x15   :  { %v12109_v13 = vld [vmem:[%s17094_s0 + $0x40] sm:$0xff]  ;;  %v105_v14 = vsel %vm89_vm0, %v12090_v7, 0.0  ;;  %v108_v15 = vsel %vm89_vm0, %v12099_v11, 0.0  ;;  %v111_v16 = vsel %vm89_vm0, %v12104_v12, 0.0  ;;  %v12120_v17 = vld [vmem:[%s17094_s0 + $0x48] sm:$0xff]  ;;  %v12125_v18 = vld [vmem:[%s17094_s0 + $0x50] sm:$0xff] }
  0x16   :  { %v12130_v19 = vld [vmem:[%s17094_s0 + $0x58] sm:$0xff]  ;;  %v114_v20 = vsel %vm89_vm0, %v12109_v13, 0.0  ;;  %v117_v21 = vsel %vm89_vm0, %v12120_v17, 0.0  ;;  %v120_v22 = vsel %vm89_vm0, %v12125_v18, 0.0  ;;  %v12141_v23 = vld [vmem:[%s17094_s0 + $0x60] sm:$0xff]  ;;  %v12146_v24 = vld [vmem:[%s17094_s0 + $0x68] sm:$0xff] }
  0x17   :  { %v12151_v25 = vld [vmem:[%s17094_s0 + $0x70] sm:$0xff]  ;;  %v123_v26 = vsel %vm89_vm0, %v12130_v19, 0.0  ;;  %v126_v27 = vsel %vm89_vm0, %v12141_v23, 0.0  ;;  %v129_v28 = vsel %vm89_vm0, %v12146_v24, 0.0  ;;  %v12162_v29 = vld [vmem:[%s17094_s0 + $0x78] sm:$0xff] }
  0x18   :  { %94 = vadd.xlane.f32.xlu0 %v93_v8  ;;  %100 = vadd.xlane.f32.xlu1 %v99_v9  ;;  %v132_v30 = vsel %vm89_vm0, %v12151_v25, 0.0  ;;  %v135_v31 = vsel %vm89_vm0, %v12162_v29, 0.0 }
  0x1c   :  { %103 = vadd.xlane.f32.xlu0 %v102_v10  ;;  %106 = vadd.xlane.f32.xlu1 %v105_v14 }
  0x20   :  { %109 = vadd.xlane.f32.xlu0 %v108_v15  ;;  %112 = vadd.xlane.f32.xlu1 %v111_v16 }
  0x24   :  { %115 = vadd.xlane.f32.xlu0 %v114_v20  ;;  %118 = vadd.xlane.f32.xlu1 %v117_v21 }
  0x28   :  { %121 = vadd.xlane.f32.xlu0 %v120_v22  ;;  %124 = vadd.xlane.f32.xlu1 %v123_v26 }
  0x2c   :  { %127 = vadd.xlane.f32.xlu0 %v126_v27  ;;  %130 = vadd.xlane.f32.xlu1 %v129_v28 }
  0x30   :  { %133 = vadd.xlane.f32.xlu0 %v132_v30  ;;  %136 = vadd.xlane.f32.xlu1 %v135_v31 }
  0xa1   :  { %v92_v32 = vpop.xlane.xlu0 %91  ;;  %v98_v33 = vpop.xlane.xlu1 %97 }
  0xa2   :  { %v139_v34 = vmul.f32 0.03125, %v92_v32  ;;  %v141_v35 = vmul.f32 0.03125, %v98_v33 }
  0xa4   :  { %v12168_v36 = vsub.f32 %v41_v0, %v139_v34  ;;  %v12170_v37 = vsub.f32 %v43_v1, %v141_v35 }
  0xa5   :  { %v95_v38 = vpop.xlane.xlu0 %94  ;;  %v101_v39 = vpop.xlane.xlu1 %100 }
  0xa6   :  { %v140_v40 = vmul.f32 0.03125, %v95_v38  ;;  %v142_v41 = vmul.f32 0.03125, %v101_v39  ;;  %v171_v42 = vmul.f32 %v12168_v36, %v12168_v36  ;;  %v173_v43 = vmul.f32 %v12170_v37, %v12170_v37 }
  0xa8   :  { %v12176_v44 = vsub.f32 %v42_v2, %v140_v40  ;;  %v12178_v45 = vsub.f32 %v44_v5, %v142_v41  ;;  %v187_v46 = vsel %vm89_vm0, %v171_v42, 0.0  ;;  %v193_v49 = vsel %vm89_vm0, %v173_v43, 0.0 }
  0xa9   :  { %188 = vadd.xlane.f32.xlu0 %v187_v46  ;;  %v104_v47 = vpop.xlane.xlu0 %103  ;;  %v107_v48 = vpop.xlane.xlu1 %106 }
  0xaa   :  { %v143_v50 = vmul.f32 0.03125, %v104_v47  ;;  %v144_v51 = vmul.f32 0.03125, %v107_v48  ;;  %v172_v52 = vmul.f32 %v12176_v44, %v12176_v44  ;;  %v174_v53 = vmul.f32 %v12178_v45, %v12178_v45 }
  0xac   :  { %v12187_v54 = vsub.f32 %v12085_v6, %v143_v50  ;;  %v12190_v55 = vsub.f32 %v12090_v7, %v144_v51  ;;  %v190_v56 = vsel %vm89_vm0, %v172_v52, 0.0  ;;  %v196_v59 = vsel %vm89_vm0, %v174_v53, 0.0  ;;  %v11166_v53 = vld [vmem:[%s17096_s2 + $0x10] sm:$0xff]  }
  0xad   :  { %194 = vadd.xlane.f32.xlu0 %v193_v49  ;;  %191 = vadd.xlane.f32.xlu1 %v190_v56  ;;  %v110_v57 = vpop.xlane.xlu0 %109  ;;  %v113_v58 = vpop.xlane.xlu1 %112  ;;  %v11167_v56 = vld [vmem:[%s17096_s2 + $0x8] sm:$0xff]  }
  0xae   :  { %v145_v60 = vmul.f32 0.03125, %v110_v57  ;;  %v146_v61 = vmul.f32 0.03125, %v113_v58  ;;  %v175_v62 = vmul.f32 %v12187_v54, %v12187_v54  ;;  %v176_v63 = vmul.f32 %v12190_v55, %v12190_v55  ;;  %9634 = vmatprep.subr.bf16.mxu1 %v11166_v53  ;;  %v11168_v57 = vld [vmem:[%s17096_s2 + $0x18] sm:$0xff]   ;;  %v12275_v58 = vld [vmem:[%s17096_s2 + $0x20] sm:$0xff]  }
  0xaf   :  { %9635 = vmatpush3.bf16.msra.mxu1 %v11166_v53 }
  0xb0   :  { %v12199_v0 = vsub.f32 %v12099_v11, %v145_v60  ;;  %v12202_v1 = vsub.f32 %v12104_v12, %v146_v61  ;;  %v199_v2 = vsel %vm89_vm0, %v175_v62, 0.0  ;;  %v202_v5 = vsel %vm89_vm0, %v176_v63, 0.0  ;;  %9636 = vmatprep.subr.bf16.mxu1 %v11168_v57 }
  0xb1   :  { %197 = vadd.xlane.f32.xlu1 %v196_v59  ;;  %200 = vadd.xlane.f32.xlu0 %v199_v2  ;;  %v116_v3 = vpop.xlane.xlu0 %115  ;;  %v119_v4 = vpop.xlane.xlu1 %118 }
  0xb2   :  { %v147_v6 = vmul.f32 0.03125, %v116_v3  ;;  %v148_v7 = vmul.f32 0.03125, %v119_v4  ;;  %v177_v8 = vmul.f32 %v12199_v0, %v12199_v0  ;;  %v178_v9 = vmul.f32 %v12202_v1, %v12202_v1 }
  0xb3   :  { %9637 = vmatpush3.bf16.msra.mxu1 %v11168_v57 }
  0xb4   :  { %v12211_v10 = vsub.f32 %v12109_v13, %v147_v6  ;;  %v12214_v11 = vsub.f32 %v12120_v17, %v148_v7  ;;  %v205_v12 = vsel %vm89_vm0, %v177_v8, 0.0  ;;  %v208_v16 = vsel %vm89_vm0, %v178_v9, 0.0 }
  0xb5   :  { %203 = vadd.xlane.f32.xlu1 %v202_v5  ;;  %206 = vadd.xlane.f32.xlu0 %v205_v12  ;;  %v122_v14 = vpop.xlane.xlu0 %121  ;;  %v125_v15 = vpop.xlane.xlu1 %124 }
  0xb6   :  { %v149_v20 = vmul.f32 0.03125, %v122_v14  ;;  %v150_v21 = vmul.f32 0.03125, %v125_v15  ;;  %v179_v22 = vmul.f32 %v12211_v10, %v12211_v10  ;;  %v180_v13 = vmul.f32 %v12214_v11, %v12214_v11 }
  0xb8   :  { %v12223_v26 = vsub.f32 %v12125_v18, %v149_v20  ;;  %v12226_v17 = vsub.f32 %v12130_v19, %v150_v21  ;;  %v211_v27 = vsel %vm89_vm0, %v179_v22, 0.0  ;;  %v214_v31 = vsel %vm89_vm0, %v180_v13, 0.0 }
  0xb9   :  { %209 = vadd.xlane.f32.xlu1 %v208_v16  ;;  %212 = vadd.xlane.f32.xlu0 %v211_v27  ;;  %v128_v28 = vpop.xlane.xlu0 %127  ;;  %v131_v30 = vpop.xlane.xlu1 %130 }
  0xba   :  { %v151_v32 = vmul.f32 0.03125, %v128_v28  ;;  %v152_v33 = vmul.f32 0.03125, %v131_v30  ;;  %v181_v34 = vmul.f32 %v12223_v26, %v12223_v26  ;;  %v182_v18 = vmul.f32 %v12226_v17, %v12226_v17 }
  0xbc   :  { %v12235_v35 = vsub.f32 %v12141_v23, %v151_v32  ;;  %v12238_v19 = vsub.f32 %v12146_v24, %v152_v33  ;;  %v217_v38 = vsel %vm89_vm0, %v181_v34, 0.0  ;;  %v220_v41 = vsel %vm89_vm0, %v182_v18, 0.0  ;;  %v12282_v34 = vld [vmem:[%s17095_s1] ss:$0 sm:$0xff] }
  0xbd   :  { %215 = vadd.xlane.f32.xlu1 %v214_v31  ;;  %218 = vadd.xlane.f32.xlu0 %v217_v38  ;;  %v134_v39 = vpop.xlane.xlu0 %133  ;;  %v137_v40 = vpop.xlane.xlu1 %136 }
  0xbe   :  { %v153_v42 = vmul.f32 0.03125, %v134_v39  ;;  %v154_v43 = vmul.f32 0.03125, %v137_v40  ;;  %v183_v46 = vmul.f32 %v12235_v35, %v12235_v35  ;;  %v184_v23 = vmul.f32 %v12238_v19, %v12238_v19 }
  0xc0   :  { %v12247_v47 = vsub.f32 %v12151_v25, %v153_v42  ;;  %v12250_v24 = vsub.f32 %v12162_v29, %v154_v43  ;;  %v223_v48 = vsel %vm89_vm0, %v183_v46, 0.0  ;;  %v226_v49 = vsel %vm89_vm0, %v184_v23, 0.0  ;;  %v11165_v29 = vld [vmem:[%s17096_s2] sm:$0xff]  }
  0xc1   :  { %221 = vadd.xlane.f32.xlu1 %v220_v41  ;;  %224 = vadd.xlane.f32.xlu0 %v223_v48  ;;  %v12289_v48 = vld [vmem:[%s17095_s1 + $0x1] ss:$0 sm:$0xff] }
  0xc2   :  { %v185_v50 = vmul.f32 %v12247_v47, %v12247_v47  ;;  %v186_v51 = vmul.f32 %v12250_v24, %v12250_v24  ;;  %9614 = vmatprep.subr.bf16.mxu0 %v11165_v29 }
  0xc3   :  { %9615 = vmatpush3.bf16.msra.mxu0 %v11165_v29 }
  0xc4   :  { %v229_v52 = vsel %vm89_vm0, %v185_v50, 0.0  ;;  %v232_v25 = vsel %vm89_vm0, %v186_v51, 0.0  ;;  %9616 = vmatprep.subr.bf16.mxu0 %v11167_v56 }
  0xc5   :  { %227 = vadd.xlane.f32.xlu1 %v226_v49  ;;  %230 = vadd.xlane.f32.xlu0 %v229_v52 }
  0xc7   :  { %9617 = vmatpush3.bf16.msra.mxu0 %v11167_v56 }
  0xc8   :  { %9654 = vmatprep.subr.bf16.mxu0 %v12275_v58 }
  0xc9   :  { %233 = vadd.xlane.f32.xlu1 %v232_v25 }
 0x136   :  { %v189_v59 = vpop.xlane.xlu0 %188 }
 0x137   :  { %v235_v60 = vmul.f32 0.03125, %v189_v59 }
 0x139   :  { %v251_v61 = vadd.f32 1e-05, %v235_v60 }
 0x13a   :  { %v192_v62 = vpop.xlane.xlu1 %191  ;;  %v195_v63 = vpop.xlane.xlu0 %194 }
 0x13b   :  { %11201 = vrsqrt.f32 %v251_v61  ;;  %v236_v2 = vmul.f32 0.03125, %v192_v62  ;;  %v237_v3 = vmul.f32 0.03125, %v195_v63 }
 0x13d   :  { %v252_v4 = vadd.f32 1e-05, %v236_v2  ;;  %v253_v5 = vadd.f32 1e-05, %v237_v3 }
 0x13e   :  { %v198_v6 = vpop.xlane.xlu1 %197  ;;  %v201_v7 = vpop.xlane.xlu0 %200 }
 0x13f   :  { %11203 = vrsqrt.f32 %v252_v4  ;;  %v238_v8 = vmul.f32 0.03125, %v198_v6  ;;  %v239_v9 = vmul.f32 0.03125, %v201_v7 }
 0x140   :  { %11205 = vrsqrt.f32 %v253_v5 }
 0x141   :  { %v254_v12 = vadd.f32 1e-05, %v238_v8  ;;  %v255_v14 = vadd.f32 1e-05, %v239_v9 }
 0x142   :  { %v204_v15 = vpop.xlane.xlu1 %203  ;;  %v207_v16 = vpop.xlane.xlu0 %206 }
 0x143   :  { %11207 = vrsqrt.f32 %v254_v12  ;;  %v240_v20 = vmul.f32 0.03125, %v204_v15  ;;  %v241_v21 = vmul.f32 0.03125, %v207_v16 }
 0x144   :  { %11209 = vrsqrt.f32 %v255_v14 }
 0x145   :  { %v11202_v22 = vpop.eup %11201  ;;  %v256_v13 = vadd.f32 1e-05, %v240_v20  ;;  %v257_v27 = vadd.f32 1e-05, %v241_v21 }
 0x146   :  { %v210_v28 = vpop.xlane.xlu1 %209  ;;  %v213_v30 = vpop.xlane.xlu0 %212  ;;  %v283_v31 = vmul.f32 %v11202_v22, %v12168_v36  ;;  %v11170_v22 = vld [vmem:[%s17096_s2 + $0x28] sm:$0xff]  }
 0x147   :  { %11211 = vrsqrt.f32 %v256_v13  ;;  %v242_v32 = vmul.f32 0.03125, %v210_v28  ;;  %v243_v33 = vmul.f32 0.03125, %v213_v30 }
 0x148   :  { %11213 = vrsqrt.f32 %v257_v27  ;;  %v303_v46 = vmul.f32 %v12282_v34, %v283_v31 }
 0x149   :  { %v11204_v18 = vpop.eup %11203  ;;  %v258_v38 = vadd.f32 1e-05, %v242_v32  ;;  %v259_v39 = vadd.f32 1e-05, %v243_v33 }
 0x14a   :  { %v11206_v40 = vpop.eup %11205  ;;  %v216_v41 = vpop.xlane.xlu1 %215  ;;  %v284_v43 = vmul.f32 %v11204_v18, %v12176_v44  ;;  %v323_v57 = vadd.f32 %v12289_v48, %v303_v46 }
 0x14b   :  { %v219_v42 = vpop.xlane.xlu0 %218  ;;  %11215 = vrsqrt.f32 %v258_v38  ;;  %v244_v36 = vmul.f32 0.03125, %v216_v41  ;;  %v285_v49 = vmul.f32 %v11206_v40, %v12170_v37 }
 0x14c   :  { %v245_v23 = vmul.f32 0.03125, %v219_v42  ;;  %11217 = vrsqrt.f32 %v259_v39  ;;  %v304_v50 = vmul.f32 %v12282_v34, %v284_v43 }
 0x14d   :  { %v11208_v51 = vpop.eup %11207  ;;  %v260_v52 = vadd.f32 1e-05, %v244_v36  ;;  %v305_v44 = vmul.f32 %v12282_v34, %v285_v49 }
 0x14e   :  { %v261_v25 = vadd.f32 1e-05, %v245_v23  ;;  %v11210_v29 = vpop.eup %11209  ;;  %v222_v53 = vpop.xlane.xlu1 %221  ;;  %v324_v59 = vadd.f32 %v12289_v48, %v304_v50  ;;  %v286_v60 = vmul.f32 %v11208_v51, %v12178_v45 }
 0x14f   :  { %v225_v56 = vpop.xlane.xlu0 %224  ;;  %11219 = vrsqrt.f32 %v260_v52  ;;  %v246_v61 = vmul.f32 0.03125, %v222_v53  ;;  %v287_v2 = vmul.f32 %v11210_v29, %v12187_v54  ;;  %v325_v6 = vadd.f32 %v12289_v48, %v305_v44 }
 0x150   :  { %v247_v37 = vmul.f32 0.03125, %v225_v56  ;;  %11221 = vrsqrt.f32 %v261_v25  ;;  %v12297_v62 = vpack.c.bf16 %v324_v59, %v323_v57  ;;  %v306_v63 = vmul.f32 %v12282_v34, %v286_v60 }
 0x151   :  { %v11212_v3 = vpop.eup %11211  ;;  %v262_v4 = vadd.f32 1e-05, %v246_v61  ;;  %v307_v54 = vmul.f32 %v12282_v34, %v287_v2 }
 0x152   :  { %v263_v5 = vadd.f32 1e-05, %v247_v37  ;;  %v11214_v7 = vpop.eup %11213  ;;  %v228_v8 = vpop.xlane.xlu1 %227  ;;  %9618 = vmatprep.mubr.msk.bf16.mxu0 %vm89_vm0, %v12297_v62  ;;  %9638 = vmatprep.mubr.msk.bf16.mxu1 %vm89_vm0, %v12297_v62  ;;  %v326_v9 = vadd.f32 %v12289_v48, %v306_v63  ;;  %v288_v12 = vmul.f32 %v11212_v3, %v12190_v55 }
 0x153   :  { %v231_v45 = vpop.xlane.xlu0 %230  ;;  %11223 = vrsqrt.f32 %v262_v4  ;;  %v248_v14 = vmul.f32 0.03125, %v228_v8  ;;  %v289_v16 = vmul.f32 %v11214_v7, %v12199_v0  ;;  %v327_v55 = vadd.f32 %v12289_v48, %v307_v54 }
 0x154   :  { %v249_v15 = vmul.f32 0.03125, %v231_v45  ;;  %11225 = vrsqrt.f32 %v263_v5  ;;  %v12310_v20 = vpack.c.bf16 %v326_v9, %v325_v6  ;;  %v308_v21 = vmul.f32 %v12282_v34, %v288_v12  ;;  %v12379_v9 = vld [vmem:[%s17095_s1 + $0x2] ss:$0 sm:$0xff] }
 0x155   :  { %v11216_v13 = vpop.eup %11215  ;;  %v264_v27 = vadd.f32 1e-05, %v248_v14  ;;  %v309_v33 = vmul.f32 %v12282_v34, %v289_v16  ;;  %v12384_v14 = vld [vmem:[%s17095_s1 + $0x3] ss:$0 sm:$0xff] }
 0x156   :  { %v265_v28 = vadd.f32 1e-05, %v249_v15  ;;  %v11218_v30 = vpop.eup %11217  ;;  %v234_v31 = vpop.xlane.xlu1 %233  ;;  %9619 = vmatmul.mubr.msk.bf16.vlgmr.msra.gmra.mrb[0].mxu0 %vm89_vm0, %v12310_v20  ;;  %9639 = vmatmul.mubr.msk.bf16.vlgmr.msra.gmra.mrb[0].mxu1 %vm89_vm0, %v12310_v20  ;;  %v328_v0 = vadd.f32 %v12289_v48, %v308_v21  ;;  %v290_v32 = vmul.f32 %v11216_v13, %v12202_v1 }
 0x157   :  { %11227 = vrsqrt.f32 %v264_v27  ;;  %v250_v18 = vmul.f32 0.03125, %v234_v31  ;;  %v291_v38 = vmul.f32 %v11218_v30, %v12211_v10  ;;  %9655 = vmatpush3.bf16.msra.mxu0 %v12275_v58  ;;  %v329_v1 = vadd.f32 %v12289_v48, %v309_v33 }
 0x158   :  { %11229 = vrsqrt.f32 %v265_v28  ;;  %v341_v39 = vpack.c.bf16 %v328_v0, %v327_v55  ;;  %v310_v40 = vmul.f32 %v12282_v34, %v290_v32  ;;  %9656 = vmatprep.subr.bf16.mxu0 %v11170_v22 }
 0x159   :  { %v11220_v41 = vpop.eup %11219  ;;  %v266_v42 = vadd.f32 1e-05, %v250_v18  ;;  %v311_v43 = vmul.f32 %v12282_v34, %v291_v38 }
 0x15a   :  { %v11222_v46 = vpop.eup %11221  ;;  %9622 = vmatprep.mubr.msk.bf16.mxu0 %vm89_vm0, %v341_v39  ;;  %9642 = vmatprep.mubr.msk.bf16.mxu1 %vm89_vm0, %v341_v39  ;;  %v330_v10 = vadd.f32 %v12289_v48, %v310_v40  ;;  %v292_v58 = vmul.f32 %v11220_v41, %v12214_v11 }
 0x15b   :  { %11231 = vrsqrt.f32 %v266_v42  ;;  %v293_v36 = vmul.f32 %v11222_v46, %v12223_v26  ;;  %9657 = vmatpush3.bf16.msra.mxu0 %v11170_v22  ;;  %v331_v51 = vadd.f32 %v12289_v48, %v311_v43 }
 0x15c   :  { %v342_v23 = vpack.c.bf16 %v330_v10, %v329_v1  ;;  %v312_v49 = vmul.f32 %v12282_v34, %v292_v58 }
 0x15d   :  { %v11224_v50 = vpop.eup %11223  ;;  %v313_v11 = vmul.f32 %v12282_v34, %v293_v36 }
 0x15e   :  { %v11226_v52 = vpop.eup %11225  ;;  %9623 = vmatmul.mubr.msk.bf16.gmra.mrb[4].mxu0 %vm89_vm0, %v342_v23  ;;  %9643 = vmatmul.mubr.msk.bf16.gmra.mrb[4].mxu1 %vm89_vm0, %v342_v23  ;;  %v332_v25 = vadd.f32 %v12289_v48, %v312_v49  ;;  %v294_v44 = vmul.f32 %v11224_v50, %v12226_v17 }
 0x15f   :  { %v295_v26 = vmul.f32 %v11226_v52, %v12235_v35  ;;  %v333_v60 = vadd.f32 %v12289_v48, %v313_v11 }
 0x160   :  { %v343_v29 = vpack.c.bf16 %v332_v25, %v331_v51  ;;  %v314_v53 = vmul.f32 %v12282_v34, %v294_v44 }
 0x161   :  { %v11228_v56 = vpop.eup %11227  ;;  %v315_v57 = vmul.f32 %v12282_v34, %v295_v26 }
 0x162   :  { %v11230_v59 = vpop.eup %11229  ;;  %9626 = vmatprep.mubr.msk.bf16.mxu0 %vm89_vm0, %v343_v29  ;;  %9646 = vmatprep.mubr.msk.bf16.mxu1 %vm89_vm0, %v343_v29  ;;  %v334_v61 = vadd.f32 %v12289_v48, %v314_v53  ;;  %v296_v17 = vmul.f32 %v11228_v56, %v12238_v19 }
 0x163   :  { %v297_v37 = vmul.f32 %v11230_v59, %v12247_v47  ;;  %v335_v3 = vadd.f32 %v12289_v48, %v315_v57 }
 0x164   :  { %v344_v35 = vpack.c.bf16 %v334_v61, %v333_v60  ;;  %v316_v63 = vmul.f32 %v12282_v34, %v296_v17 }
 0x165   :  { %v11232_v2 = vpop.eup %11231  ;;  %v317_v6 = vmul.f32 %v12282_v34, %v297_v37 }
 0x166   :  { %9627 = vmatmul.mubr.msk.bf16.gmra.mrb[8].mxu0 %vm89_vm0, %v344_v35  ;;  %9647 = vmatmul.mubr.msk.bf16.gmra.mrb[8].mxu1 %vm89_vm0, %v344_v35  ;;  %v336_v4 = vadd.f32 %v12289_v48, %v316_v63  ;;  %v298_v5 = vmul.f32 %v11232_v2, %v12250_v24  ;;  %v57_v24 = vlaneseq }
 0x167   :  { %v337_v47 = vadd.f32 %v12289_v48, %v317_v6 }
 0x168   :  { %v345_v7 = vpack.c.bf16 %v336_v4, %v335_v3  ;;  %v318_v19 = vmul.f32 %v12282_v34, %v298_v5  ;;  %v58_v34 = vand.u32 127, %v57_v24 }
 0x16a   :  { %9630 = vmatprep.mubr.msk.bf16.mxu0 %vm89_vm0, %v345_v7  ;;  %9650 = vmatprep.mubr.msk.bf16.mxu1 %vm89_vm0, %v345_v7  ;;  %v338_v8 = vadd.f32 %v12289_v48, %v318_v19  ;;  %vm74_vm1 = vcmp.ge.s32.totalorder %v58_v34, 24  ;;  %vm75_vm2 = vcmp.lt.s32.totalorder %v58_v34, 32  ;;  %v12012_v48 = vmov 0.0  }
 0x16b   :  { %vm76_vm3 = vmand %vm74_vm1, %vm75_vm2  ;;  %vm60_vm4 = vcmp.lt.s32.totalorder %v58_v34, 8  ;;  %vm64_vm5 = vcmp.ge.s32.totalorder %v58_v34, 8  ;;  %vm65_vm6 = vcmp.lt.s32.totalorder %v58_v34, 16  ;;  %vm69_vm7 = vcmp.ge.s32.totalorder %v58_v34, 16 }
 0x16c   :  { %v346_v45 = vpack.c.bf16 %v338_v8, %v337_v47  ;;  %vm70_vm8 = vcmp.lt.s32.totalorder %v58_v34, 24  ;;  %v12387_v28 = vsel %vm60_vm4, 1.0, %v12012_v48  ;;  %vm66_vm9 = vmand %vm64_vm5, %vm65_vm6 }
 0x16d   :  { %17282 = vst [vmem:[#allocation6_spill] sm:$0xff] %v12387_v28  ;;  %vm71_vm10 = vmand %vm69_vm7, %vm70_vm8  ;;  %v12397_v18 = vsel %vm66_vm9, 1.0, %v12012_v48 }
 0x16e   :  { %9631 = vmatmul.mubr.msk.bf16.gmra.mrb[12].mxu0 %vm89_vm0, %v346_v45  ;;  %9651 = vmatmul.mubr.msk.bf16.gmra.mrb[12].mxu1 %vm89_vm0, %v346_v45  ;;  %17283 = vst [vmem:[#allocation7_spill] sm:$0xff] %v12397_v18  ;;  %v12407_v1 = vsel %vm71_vm10, 1.0, %v12012_v48 }
 0x16f   :  { %9658 = vmatprep.mubr.msk.bf16.mxu0 %vm89_vm0, %v12297_v62  ;;  %v12374_v62 = vsel %vm76_vm3, 1.0, %v12012_v48  ;;  %17285 = vst [vmem:[#allocation9_spill] sm:$0xff] %v12407_v1 }
 0x170   :  { %17281 = vst [vmem:[#allocation5_spill] sm:$0xff] %v12374_v62 }
 0x176   :  { %9659 = vmatmul.mubr.msk.bf16.vlgmr.msra.gmra.mrb[16].mxu0 %vm89_vm0, %v12310_v20 }
 0x177   :  { %9662 = vmatprep.mubr.msk.bf16.mxu0 %vm89_vm0, %v341_v39 }
 0x17e   :  { %9663 = vmatmul.mubr.msk.bf16.gmra.mrb[20].mxu0 %vm89_vm0, %v342_v23 }
 0x17f   :  { %9666 = vmatprep.mubr.msk.bf16.mxu0 %vm89_vm0, %v343_v29 }
 0x186   :  { %9667 = vmatmul.mubr.msk.bf16.gmra.mrb[24].mxu0 %vm89_vm0, %v344_v35 }
 0x187   :  { %9670 = vmatprep.mubr.msk.bf16.mxu0 %vm89_vm0, %v345_v7 }
 0x18e   :  { %9671 = vmatmul.mubr.msk.bf16.gmra.mrb[28].mxu0 %vm89_vm0, %v346_v45 }
 0x229   :  { %v9620_v12 = vpop.f32.mrb[0].mxu0  ;;  %v9640_v54 = vpop.f32.mrb[0].mxu1 }
 0x22a   :  { %v434_v15 = vadd.f32 %v9620_v12, %v12379_v9  ;;  %v425_v16 = vpop.f32.mrb[1].mxu0  ;;  %v551_v20 = vpop.f32.mrb[1].mxu1  ;;  %v560_v39 = vadd.f32 %v9640_v54, %v12384_v14 }
 0x22b   :  { %v9621_v21 = vpop.f32.mrb[2].mxu0  ;;  %v9641_v22 = vpop.f32.mrb[2].mxu1  ;;  %v552_v55 = vadd.f32 %v12384_v14, %v551_v20  ;;  %v426_v33 = vadd.f32 %v12379_v9, %v425_v16 }
 0x22c   :  { %v428_v13 = vpop.f32.mrb[3].mxu0  ;;  %v554_v27 = vpop.f32.mrb[3].mxu1  ;;  %v437_v30 = vadd.f32 %v9621_v21, %v12379_v9  ;;  %v563_v31 = vadd.f32 %v9641_v22, %v12384_v14  ;;  %v734_v53 = vmul.f32 %v12387_v28, %v560_v39  ;;  %v1095_v56 = vmul.f32 %v12397_v18, %v560_v39 }
 0x22d   :  { %v429_v0 = vadd.f32 %v12379_v9, %v428_v13  ;;  %v12394_v32 = vadd.f32 %v12384_v14, %v554_v27  ;;  %v732_v40 = vmul.f32 %v12387_v28, %v552_v55  ;;  %v1093_v11 = vmul.f32 %v12397_v18, %v552_v55 }
 0x22e   :  { %v12399_v38 = vpack.c.bf16 %v437_v30, %v434_v15  ;;  %v735_v10 = vmul.f32 %v12387_v28, %v563_v31  ;;  %v1096_v50 = vmul.f32 %v12397_v18, %v563_v31  ;;  %v12423_v57 = vmul.f32 %v12407_v1, %v560_v39 }
 0x22f   :  { %v12403_v41 = vpack.c.bf16 %v429_v0, %v426_v33  ;;  %v733_v42 = vmul.f32 %v12387_v28, %v12394_v32  ;;  %v1094_v58 = vmul.f32 %v12397_v18, %v12394_v32  ;;  %v12434_v3 = vmul.f32 %v12374_v62, %v560_v39 }
 0x230   :  { %v749_v63 = vpack.c.bf16 %v735_v10, %v734_v53  ;;  %v1110_v2 = vpack.c.bf16 %v1096_v50, %v1095_v56  ;;  %v12437_v4 = vmul.f32 %v12407_v1, %v552_v55  ;;  %v12440_v5 = vmul.f32 %v12374_v62, %v552_v55 }
 0x231   :  { %17284 = vst [vmem:[#allocation8_spill] sm:$0xff] %v12403_v41  ;;  %v9624_v43 = vpop.f32.mrb[4].mxu0  ;;  %v9644_v46 = vpop.f32.mrb[4].mxu1  ;;  %9690 = vmatprep.mubr.msk.bf16.mxu1 %vm89_vm0, %v12403_v41  ;;  %9722 = vmatprep.mubr.msk.bf16.mxu0 %vm89_vm0, %v12403_v41  ;;  %v748_v44 = vpack.c.bf16 %v733_v42, %v732_v40  ;;  %v1109_v61 = vpack.c.bf16 %v1094_v58, %v1093_v11 }
 0x232   :  { %v450_v36 = vadd.f32 %v9624_v43, %v12379_v9  ;;  %v441_v23 = vpop.f32.mrb[5].mxu0  ;;  %v567_v49 = vpop.f32.mrb[5].mxu1  ;;  %v576_v7 = vadd.f32 %v9644_v46, %v12384_v14  ;;  %v12452_v34 = vmul.f32 %v12407_v1, %v563_v31  ;;  %v12459_v20 = vmul.f32 %v12374_v62, %v563_v31 }
 0x233   :  { %v442_v51 = vadd.f32 %v12379_v9, %v441_v23  ;;  %v9625_v52 = vpop.f32.mrb[6].mxu0  ;;  %v9645_v25 = vpop.f32.mrb[6].mxu1  ;;  %11094 = vmatprep.subr.msk.bf16.mxu1 %vm89_vm0, %v748_v44  ;;  %v568_v59 = vadd.f32 %v12384_v14, %v567_v49  ;;  %v821_v35 = vsel %vm89_vm0, %v748_v44, 0  ;;  %11102 = vmatprep.subr.msk.bf16.mxu0 %vm89_vm0, %v1109_v61  ;;  %v1159_v12 = vsel %vm89_vm0, %v1109_v61, 0 }
 0x234   :  { %v444_v26 = vpop.f32.mrb[7].mxu0  ;;  %v570_v29 = vpop.f32.mrb[7].mxu1  ;;  %v453_v60 = vadd.f32 %v9625_v52, %v12379_v9  ;;  %v579_v19 = vadd.f32 %v9645_v25, %v12384_v14  ;;  %9675 = vmatpush3.bf16.xpose.msra.mxu1 %v821_v35  ;;  %v12463_v21 = vmul.f32 %v12407_v1, %v12394_v32  ;;  %9707 = vmatpush3.bf16.xpose.msra.mxu0 %v1159_v12  ;;  %v824_v11 = vsel %vm89_vm0, %v749_v63, 0 }
 0x235   :  { %v445_v17 = vadd.f32 %v12379_v9, %v444_v26  ;;  %v12430_v37 = vadd.f32 %v12384_v14, %v570_v29  ;;  %v736_v48 = vmul.f32 %v12387_v28, %v568_v59  ;;  %11095 = vmatprep.subr.msk.bf16.mxu1 %vm89_vm0, %v749_v63  ;;  %11103 = vmatprep.subr.msk.bf16.mxu0 %vm89_vm0, %v1110_v2  ;;  %v1162_v63 = vsel %vm89_vm0, %v1110_v2, 0 }
 0x236   :  { %v12442_v6 = vpack.c.bf16 %v453_v60, %v450_v36  ;;  %v12476_v42 = vmul.f32 %v12374_v62, %v12394_v32  ;;  %v738_v43 = vmul.f32 %v12387_v28, %v576_v7  ;;  %v739_v46 = vmul.f32 %v12387_v28, %v579_v19 }
 0x237   :  { %v12447_v47 = vpack.c.bf16 %v445_v17, %v442_v51  ;;  %v737_v8 = vmul.f32 %v12387_v28, %v12430_v37  ;;  %v1098_v30 = vmul.f32 %v12397_v18, %v12430_v37  ;;  %v1100_v10 = vmul.f32 %v12397_v18, %v579_v19 }
 0x238   :  { %v1099_v58 = vmul.f32 %v12397_v18, %v576_v7  ;;  %v12483_v36 = vmul.f32 %v12407_v1, %v576_v7  ;;  %v12486_v23 = vmul.f32 %v12374_v62, %v576_v7  ;;  %v1097_v49 = vmul.f32 %v12397_v18, %v568_v59 }
 0x239   :  { %v9628_v45 = vpop.f32.mrb[8].mxu0  ;;  %v9648_v24 = vpop.f32.mrb[8].mxu1  ;;  %v750_v40 = vpack.c.bf16 %v737_v8, %v736_v48  ;;  %v12490_v50 = vmul.f32 %v12407_v1, %v568_v59  ;;  %v12498_v25 = vmul.f32 %v12374_v62, %v568_v59  ;;  %v12505_v60 = vpack.c.bf16 %v739_v46, %v738_v43 }
 0x23a   :  { %v466_v54 = vadd.f32 %v9628_v45, %v12379_v9  ;;  %v457_v15 = vpop.f32.mrb[9].mxu0  ;;  %v583_v16 = vpop.f32.mrb[9].mxu1  ;;  %v592_v22 = vadd.f32 %v9648_v24, %v12384_v14  ;;  %v1111_v26 = vpack.c.bf16 %v1098_v30, %v1097_v49  ;;  %v12507_v61 = vpack.c.bf16 %v1100_v10, %v1099_v58 }
 0x23b   :  { %v458_v13 = vadd.f32 %v12379_v9, %v457_v15  ;;  %v9629_v27 = vpop.f32.mrb[10].mxu0  ;;  %v9649_v55 = vpop.f32.mrb[10].mxu1  ;;  %v12512_v59 = vmul.f32 %v12407_v1, %v579_v19  ;;  %v584_v35 = vadd.f32 %v12384_v14, %v583_v16  ;;  %v12520_v24 = vmul.f32 %v12374_v62, %v579_v19 }
 0x23c   :  { %v469_v0 = vadd.f32 %v9629_v27, %v12379_v9  ;;  %v12472_v31 = vadd.f32 %v9649_v55, %v12384_v14  ;;  %v460_v33 = vpop.f32.mrb[11].mxu0  ;;  %v586_v39 = vpop.f32.mrb[11].mxu1  ;;  %v742_v32 = vmul.f32 %v12387_v28, %v592_v22  ;;  %9677 = vmatpush3.bf16.xpose.msra.mxu1 %v824_v11  ;;  %v12524_v48 = vmul.f32 %v12407_v1, %v12430_v37 }
 0x23d   :  { %v461_v44 = vadd.f32 %v12379_v9, %v460_v33  ;;  %v12503_v29 = vadd.f32 %v12384_v14, %v586_v39  ;;  %11096 = vmatprep.subr.msk.bf16.mxu1 %vm89_vm0, %v750_v40  ;;  %9709 = vmatpush3.bf16.xpose.msra.mxu0 %v1162_v63  ;;  %v12530_v2 = vmul.f32 %v12374_v62, %v12430_v37  ;;  %v1165_v63 = vsel %vm89_vm0, %v1111_v26, 0 }
 0x23e   :  { %v12493_v51 = vpack.c.bf16 %v469_v0, %v466_v54  ;;  %v743_v52 = vmul.f32 %v12387_v28, %v12472_v31  ;;  %v12534_v19 = vmul.f32 %v12407_v1, %v592_v22  ;;  %11104 = vmatprep.subr.msk.bf16.mxu0 %vm89_vm0, %v1111_v26  ;;  %v1104_v0 = vmul.f32 %v12397_v18, %v12472_v31 }
 0x23f   :  { %v12515_v7 = vpack.c.bf16 %v461_v44, %v458_v13  ;;  %v1103_v13 = vmul.f32 %v12397_v18, %v592_v22  ;;  %v741_v33 = vmul.f32 %v12387_v28, %v12503_v29  ;;  %v1102_v37 = vmul.f32 %v12397_v18, %v12503_v29 }
 0x240   :  { %v12509_v17 = vpack.c.bf16 %v743_v52, %v742_v32  ;;  %v12548_v43 = vmul.f32 %v12374_v62, %v592_v22  ;;  %v740_v46 = vmul.f32 %v12387_v28, %v584_v35  ;;  %v1101_v10 = vmul.f32 %v12397_v18, %v584_v35 }
 0x241   :  { %v9632_v53 = vpop.f32.mrb[12].mxu0  ;;  %v9652_v56 = vpop.f32.mrb[12].mxu1  ;;  %v1633_v58 = vmul.f32 %v12407_v1, %v584_v35  ;;  %v12554_v49 = vmul.f32 %v12374_v62, %v584_v35  ;;  %v12573_v35 = vld [vmem:[%s17095_s1 + $0x4] ss:$0 sm:$0xff]  ;;  %v1636_v41 = vmul.f32 %v12407_v1, %v12472_v31 }
 0x242   :  { %v473_v8 = vpop.f32.mrb[13].mxu0  ;;  %v599_v45 = vpop.f32.mrb[13].mxu1  ;;  %v482_v12 = vadd.f32 %v9632_v53, %v12379_v9  ;;  %v12557_v32 = vadd.f32 %v9652_v56, %v12384_v14  ;;  %v827_v53 = vsel %vm89_vm0, %v750_v40, 0 }
 0x243   :  { %v474_v54 = vadd.f32 %v12379_v9, %v473_v8  ;;  %v9633_v15 = vpop.f32.mrb[14].mxu0  ;;  %v9653_v16 = vpop.f32.mrb[14].mxu1  ;;  %v12560_v52 = vadd.f32 %v12384_v14, %v599_v45  ;;  %v12577_v45 = vpack.c.bf16 %v741_v33, %v740_v46 }
 0x244   :  { %v485_v27 = vadd.f32 %v9633_v15, %v12379_v9  ;;  %v476_v55 = vpop.f32.mrb[15].mxu0  ;;  %v602_v30 = vpop.f32.mrb[15].mxu1  ;;  %v12545_v39 = vadd.f32 %v9653_v16, %v12384_v14  ;;  %9679 = vmatpush3.bf16.xpose.msra.mxu1 %v827_v53  ;;  %v1107_v33 = vmul.f32 %v12397_v18, %v12557_v32 }
 0x245   :  { %v477_v22 = vadd.f32 %v12379_v9, %v476_v55  ;;  %v12566_v11 = vadd.f32 %v12384_v14, %v602_v30  ;;  %v12579_v9 = vpack.c.bf16 %v1102_v37, %v1101_v10  ;;  %v12581_v14 = vpack.c.bf16 %v1104_v0, %v1103_v13  ;;  %11097 = vmatprep.subr.msk.bf16.mxu1 %vm89_vm0, %v12505_v60 }
 0x246   :  { %v12562_v44 = vpack.c.bf16 %v485_v27, %v482_v12  ;;  %v747_v56 = vmul.f32 %v12387_v28, %v12545_v39  ;;  %v1108_v40 = vmul.f32 %v12397_v18, %v12545_v39  ;;  %v746_v27 = vmul.f32 %v12387_v28, %v12557_v32  ;;  %9711 = vmatpush3.bf16.xpose.msra.mxu0 %v1165_v63 }
 0x247   :  { %v12585_v26 = vpack.c.bf16 %v477_v22, %v474_v54  ;;  %v745_v12 = vmul.f32 %v12387_v28, %v12566_v11  ;;  %v1106_v15 = vmul.f32 %v12397_v18, %v12566_v11  ;;  %v744_v13 = vmul.f32 %v12387_v28, %v12560_v52  ;;  %11105 = vmatprep.subr.msk.bf16.mxu0 %vm89_vm0, %v12507_v61 }
 0x248   :  { %17286 = vst [vmem:[#allocation10_spill] sm:$0xff] %v12562_v44  ;;  %v1105_v54 = vmul.f32 %v12397_v18, %v12560_v52  ;;  %v1634_v0 = vmul.f32 %v12407_v1, %v12503_v29  ;;  %v12627_v44 = vpack.c.bf16 %v1108_v40, %v1107_v33 }
 0x249   :  { %v9660_v8 = vpop.f32.mrb[16].mxu0  ;;  %v12617_v53 = vpack.c.bf16 %v745_v12, %v744_v13  ;;  %v2085_v12 = vmul.f32 %v12374_v62, %v12503_v29  ;;  %v12655_v13 = vpack.c.bf16 %v12524_v48, %v12490_v50 }
 0x24a   :  { %v669_v16 = vpop.f32.mrb[17].mxu0  ;;  %v12609_v37 = vadd.f32 %v9660_v8, %v12573_v35  ;;  %v12619_v63 = vpack.c.bf16 %v1106_v15, %v1105_v54  ;;  %v2087_v8 = vmul.f32 %v12374_v62, %v12472_v31  ;;  %v830_v15 = vsel %vm89_vm0, %v12505_v60, 0 }
 0x24b   :  { %v12600_v55 = vadd.f32 %v12573_v35, %v669_v16  ;;  %v9661_v30 = vpop.f32.mrb[18].mxu0  ;;  %v12621_v16 = vpack.c.bf16 %v747_v56, %v746_v27  ;;  %v1638_v31 = vmul.f32 %v12407_v1, %v12566_v11  ;;  %v12659_v54 = vpack.c.bf16 %v12512_v59, %v12483_v36 }
 0x24c   :  { %v12612_v46 = vadd.f32 %v9661_v30, %v12573_v35  ;;  %v672_v10 = vpop.f32.mrb[19].mxu0  ;;  %v12631_v30 = vpack.c.bf16 %v12463_v21, %v12437_v4  ;;  %v1119_v40 = vmul.f32 %v12397_v18, %v12609_v37  ;;  %v12649_v21 = vpack.c.bf16 %v12452_v34, %v12423_v57  ;;  %9681 = vmatpush3.bf16.xpose.msra.mxu1 %v830_v15 }
 0x24d   :  { %v12615_v22 = vadd.f32 %v12573_v35, %v672_v10  ;;  %v1117_v56 = vmul.f32 %v12397_v18, %v12600_v55  ;;  %17287 = vst [vmem:[#allocation11_spill] sm:$0xff] %v12659_v54  ;;  %v12661_v33 = vpack.c.bf16 %v1634_v0, %v1633_v58  ;;  %v1640_v10 = vmul.f32 %v12407_v1, %v12545_v39 }
 0x24e   :  { %v1120_v4 = vmul.f32 %v12397_v18, %v12612_v46  ;;  %v1168_v57 = vsel %vm89_vm0, %v12507_v61, 0  ;;  %11098 = vmatprep.subr.msk.bf16.mxu1 %vm89_vm0, %v12577_v45  ;;  %v1637_v36 = vmul.f32 %v12407_v1, %v12560_v52  ;;  %v756_v61 = vmul.f32 %v12387_v28, %v12600_v55 }
 0x24f   :  { %v1118_v27 = vmul.f32 %v12397_v18, %v12615_v22  ;;  %17288 = vst [vmem:[#allocation12_spill] sm:$0xff] %v12661_v33  ;;  %9713 = vmatpush3.bf16.xpose.msra.mxu0 %v1168_v57  ;;  %v757_v0 = vmul.f32 %v12387_v28, %v12615_v22  ;;  %v1639_v15 = vmul.f32 %v12407_v1, %v12557_v32 }
 0x250   :  { %v12672_v48 = vpack.c.bf16 %v1120_v4, %v1119_v40  ;;  %11106 = vmatprep.subr.msk.bf16.mxu0 %vm89_vm0, %v12579_v9  ;;  %v12693_v4 = vpack.c.bf16 %v1636_v41, %v12534_v19  ;;  %v12702_v33 = vpack.c.bf16 %v1638_v31, %v1637_v36  ;;  %v12712_v41 = vpack.c.bf16 %v12476_v42, %v12440_v5 }
 0x251   :  { %v9664_v29 = vpop.f32.mrb[20].mxu0  ;;  %v12651_v60 = vpack.c.bf16 %v1118_v27, %v1117_v56  ;;  %v2091_v56 = vmul.f32 %v12374_v62, %v12545_v39  ;;  %v12708_v54 = vpack.c.bf16 %v1640_v10, %v1639_v15  ;;  %v12720_v31 = vpack.c.bf16 %v12459_v20, %v12434_v3 }
 0x252   :  { %v12670_v34 = vadd.f32 %v9664_v29, %v12573_v35  ;;  %v685_v50 = vpop.f32.mrb[21].mxu0  ;;  %v2089_v29 = vmul.f32 %v12374_v62, %v12566_v11  ;;  %v12724_v36 = vpack.c.bf16 %v12530_v2, %v12498_v25  ;;  %v2088_v10 = vmul.f32 %v12374_v62, %v12560_v52 }
 0x253   :  { %v12677_v59 = vadd.f32 %v12573_v35, %v685_v50  ;;  %v9665_v58 = vpop.f32.mrb[22].mxu0  ;;  %v12700_v50 = vpack.c.bf16 %v757_v0, %v756_v61  ;;  %v833_v5 = vsel %vm89_vm0, %v12577_v45, 0  ;;  %v12734_v61 = vpack.c.bf16 %v12520_v24, %v12486_v23 }
 0x254   :  { %v12690_v27 = vadd.f32 %v9665_v58, %v12573_v35  ;;  %v688_v40 = vpop.f32.mrb[23].mxu0  ;;  %v1123_v39 = vmul.f32 %v12397_v18, %v12670_v34  ;;  %17290 = vst [vmem:[#allocation14_spill] sm:$0xff] %v12724_v36  ;;  %v2090_v3 = vmul.f32 %v12374_v62, %v12557_v32  ;;  %9683 = vmatpush3.bf16.xpose.msra.mxu1 %v833_v5  ;;  %v1171_v2 = vsel %vm89_vm0, %v12579_v9, 0 }
 0x255   :  { %v12698_v57 = vadd.f32 %v12573_v35, %v688_v40  ;;  %17289 = vst [vmem:[#allocation13_spill] sm:$0xff] %v12700_v50  ;;  %v1121_v19 = vmul.f32 %v12397_v18, %v12677_v59  ;;  %17291 = vst [vmem:[#allocation15_spill] sm:$0xff] %v12734_v61  ;;  %v12741_v25 = vpack.c.bf16 %v2085_v12, %v12554_v49  ;;  %11099 = vmatprep.subr.msk.bf16.mxu1 %vm89_vm0, %v12509_v17 }
 0x256   :  { %v1124_v58 = vmul.f32 %v12397_v18, %v12690_v27  ;;  %v12751_v24 = vpack.c.bf16 %v2087_v8, %v12548_v43  ;;  %v12753_v32 = vpack.c.bf16 %v2089_v29, %v2088_v10  ;;  %v836_v9 = vsel %vm89_vm0, %v12509_v17, 0 }
 0x257   :  { %v1122_v11 = vmul.f32 %v12397_v18, %v12698_v57  ;;  %17292 = vst [vmem:[#allocation16_spill] sm:$0xff] %v12741_v25  ;;  %9715 = vmatpush3.bf16.xpose.msra.mxu0 %v1171_v2  ;;  %v1174_v12 = vsel %vm89_vm0, %v12581_v14, 0  ;;  %v12762_v15 = vpack.c.bf16 %v2091_v56, %v2090_v3  ;;  %v839_v40 = vsel %vm89_vm0, %v12617_v53, 0 }
 0x258   :  { %v12730_v42 = vpack.c.bf16 %v1124_v58, %v1123_v39  ;;  %17293 = vst [vmem:[#allocation17_spill] sm:$0xff] %v12751_v24  ;;  %17294 = vst [vmem:[#allocation18_spill] sm:$0xff] %v12753_v32  ;;  %11107 = vmatprep.subr.msk.bf16.mxu0 %vm89_vm0, %v12581_v14  ;;  %v12773_v29 = vsel %vm89_vm0, %v12619_v63, 0  ;;  %v758_v17 = vmul.f32 %v12387_v28, %v12609_v37 }
 0x259   :  { %v9668_v20 = vpop.f32.mrb[24].mxu0  ;;  %v12738_v0 = vpack.c.bf16 %v1122_v11, %v1121_v19  ;;  %17295 = vst [vmem:[#allocation19_spill] sm:$0xff] %v12762_v15  ;;  %v759_v58 = vmul.f32 %v12387_v28, %v12612_v46  ;;  %v760_v11 = vmul.f32 %v12387_v28, %v12677_v59  ;;  %v761_v10 = vmul.f32 %v12387_v28, %v12698_v57 }
 0x25a   :  { %v12748_v52 = vadd.f32 %v9668_v20, %v12573_v35  ;;  %v701_v23 = vpop.f32.mrb[25].mxu0  ;;  %v762_v5 = vmul.f32 %v12387_v28, %v12670_v34  ;;  %v763_v2 = vmul.f32 %v12387_v28, %v12690_v27  ;;  %v1655_v25 = vmul.f32 %v12407_v1, %v12670_v34 }
 0x25b   :  { %v12756_v45 = vadd.f32 %v12573_v35, %v701_v23  ;;  %v9669_v49 = vpop.f32.mrb[26].mxu0  ;;  %v12796_v20 = vpack.c.bf16 %v759_v58, %v758_v17 }
 0x25c   :  { %v12767_v43 = vadd.f32 %v9669_v49, %v12573_v35  ;;  %v704_v8 = vpop.f32.mrb[27].mxu0  ;;  %v1127_v39 = vmul.f32 %v12397_v18, %v12748_v52  ;;  %v766_v32 = vmul.f32 %v12387_v28, %v12748_v52  ;;  %9685 = vmatpush3.bf16.xpose.msra.mxu1 %v836_v9  ;;  %v12812_v58 = vpack.c.bf16 %v763_v2, %v762_v5 }
 0x25d   :  { %v12778_v56 = vadd.f32 %v12573_v35, %v704_v8  ;;  %v1125_v14 = vmul.f32 %v12397_v18, %v12756_v45  ;;  %17296 = vst [vmem:[#allocation20_spill] sm:$0xff] %v12796_v20  ;;  %v764_v23 = vmul.f32 %v12387_v28, %v12756_v45  ;;  %v12804_v8 = vpack.c.bf16 %v761_v10, %v760_v11 }
 0x25e   :  { %v1128_v19 = vmul.f32 %v12397_v18, %v12767_v43  ;;  %17298 = vst [vmem:[#allocation22_spill] sm:$0xff] %v12812_v58  ;;  %v767_v20 = vmul.f32 %v12387_v28, %v12767_v43  ;;  %11100 = vmatprep.subr.msk.bf16.mxu1 %vm89_vm0, %v12617_v53  ;;  %v1650_v9 = vmul.f32 %v12407_v1, %v12615_v22 }
 0x25f   :  { %v1126_v3 = vmul.f32 %v12397_v18, %v12778_v56  ;;  %17297 = vst [vmem:[#allocation21_spill] sm:$0xff] %v12804_v8  ;;  %v765_v15 = vmul.f32 %v12387_v28, %v12778_v56  ;;  %9717 = vmatpush3.bf16.xpose.msra.mxu0 %v1174_v12  ;;  %v1652_v53 = vmul.f32 %v12407_v1, %v12612_v46 }
 0x260   :  { %v12802_v49 = vpack.c.bf16 %v1128_v19, %v1127_v39  ;;  %v1649_v39 = vmul.f32 %v12407_v1, %v12600_v55  ;;  %v12830_v2 = vpack.c.bf16 %v767_v20, %v766_v32  ;;  %11108 = vmatprep.subr.msk.bf16.mxu0 %vm89_vm0, %v12619_v63  ;;  %v1654_v8 = vmul.f32 %v12407_v1, %v12698_v57 }
 0x261   :  { %v9672_v24 = vpop.f32.mrb[28].mxu0  ;;  %v12810_v17 = vpack.c.bf16 %v1126_v3, %v1125_v14  ;;  %v12823_v10 = vpack.c.bf16 %v765_v15, %v764_v23  ;;  %v1651_v14 = vmul.f32 %v12407_v1, %v12609_v37  ;;  %v1659_v36 = vmul.f32 %v12407_v1, %v12748_v52 }
 0x262   :  { %v12821_v19 = vadd.f32 %v9672_v24, %v12573_v35  ;;  %v717_v11 = vpop.f32.mrb[29].mxu0  ;;  %17300 = vst [vmem:[#allocation24_spill] sm:$0xff] %v12830_v2  ;;  %v1653_v24 = vmul.f32 %v12407_v1, %v12677_v59  ;;  %v12843_v32 = vpack.c.bf16 %v1650_v9, %v1649_v39  ;;  %v1656_v9 = vmul.f32 %v12407_v1, %v12690_v27 }
 0x263   :  { %17299 = vst [vmem:[#allocation23_spill] sm:$0xff] %v12823_v10  ;;  %v718_v5 = vadd.f32 %v12573_v35, %v717_v11  ;;  %v9673_v3 = vpop.f32.mrb[30].mxu0  ;;  %v12848_v58 = vpack.c.bf16 %v1652_v53, %v1651_v14  ;;  %v1657_v14 = vmul.f32 %v12407_v1, %v12756_v45 }
 0x264   :  { %v729_v15 = vadd.f32 %v9673_v3, %v12573_v35  ;;  %v720_v23 = vpop.f32.mrb[31].mxu0  ;;  %v1131_v12 = vmul.f32 %v12397_v18, %v12821_v19  ;;  %v770_v11 = vmul.f32 %v12387_v28, %v12821_v19  ;;  %17301 = vst [vmem:[#allocation25_spill] sm:$0xff] %v12843_v32  ;;  %v1658_v32 = vmul.f32 %v12407_v1, %v12778_v56 }
 0x265   :  { %v721_v20 = vadd.f32 %v12573_v35, %v720_v23  ;;  %v1129_v2 = vmul.f32 %v12397_v18, %v718_v5  ;;  %v768_v10 = vmul.f32 %v12387_v28, %v718_v5  ;;  %17302 = vst [vmem:[#allocation26_spill] sm:$0xff] %v12848_v58  ;;  %v12866_v58 = vpack.c.bf16 %v1654_v8, %v1653_v24 }
 0x266   :  { %v1132_v63 = vmul.f32 %v12397_v18, %v729_v15  ;;  %v771_v3 = vmul.f32 %v12387_v28, %v729_v15  ;;  %9687 = vmatpush3.bf16.xpose.msra.mxu1 %v839_v40  ;;  %v1660_v8 = vmul.f32 %v12407_v1, %v12767_v43  ;;  %v1661_v24 = vmul.f32 %v12407_v1, %v718_v5 }
 0x267   :  { %v1130_v39 = vmul.f32 %v12397_v18, %v721_v20  ;;  %v769_v35 = vmul.f32 %v12387_v28, %v721_v20  ;;  %17304 = vst [vmem:[#allocation28_spill] sm:$0xff] %v12866_v58  ;;  %v12874_v28 = vpack.c.bf16 %v1656_v9, %v1655_v25  ;;  %11101 = vmatprep.subr.msk.bf16.mxu1 %vm89_vm0, %v12621_v16 }
 0x268   :  { %v12862_v53 = vpack.c.bf16 %v1132_v63, %v1131_v12  ;;  %v12864_v23 = vpack.c.bf16 %v771_v3, %v770_v11  ;;  %v12880_v12 = vpack.c.bf16 %v1658_v32, %v1657_v14  ;;  %v1662_v40 = vmul.f32 %v12407_v1, %v721_v20  ;;  %9719 = vmatpush3.bf16.xpose.msra.mxu0 %v12773_v29 }
 0x269   :  { %v12870_v61 = vpack.c.bf16 %v1130_v39, %v1129_v2  ;;  %v12872_v18 = vpack.c.bf16 %v769_v35, %v768_v10  ;;  %17306 = vst [vmem:[#allocation30_spill] sm:$0xff] %v12874_v28  ;;  %v1663_v25 = vmul.f32 %v12407_v1, %v12821_v19  ;;  %v1664_v10 = vmul.f32 %v12407_v1, %v729_v15 }
 0x26a   :  { %17303 = vst [vmem:[#allocation27_spill] sm:$0xff] %v12864_v23  ;;  %17307 = vst [vmem:[#allocation31_spill] sm:$0xff] %v12880_v12  ;;  %v2100_v2 = vmul.f32 %v12374_v62, %v12600_v55  ;;  %v2101_v11 = vmul.f32 %v12374_v62, %v12615_v22  ;;  %11109 = vmatprep.subr.msk.bf16.mxu0 %vm89_vm0, %v12627_v44  ;;  %v12896_v32 = vpack.c.bf16 %v1660_v8, %v1659_v36 }
 0x26b   :  { %17305 = vst [vmem:[#allocation29_spill] sm:$0xff] %v12872_v18  ;;  %v12898_v63 = vpack.c.bf16 %v1662_v40, %v1661_v24  ;;  %v2102_v29 = vmul.f32 %v12374_v62, %v12609_v37  ;;  %v2103_v3 = vmul.f32 %v12374_v62, %v12612_v46  ;;  %v12904_v39 = vpack.c.bf16 %v1664_v10, %v1663_v25  ;;  %v17326_v10 = vld [vmem:[#allocation17_spill] sm:$0xff] }
 0x26c   :  { %17308 = vst [vmem:[#allocation32_spill] sm:$0xff] %v12896_v32  ;;  %v12906_v35 = vpack.c.bf16 %v2101_v11, %v2100_v2  ;;  %v2104_v55 = vmul.f32 %v12374_v62, %v12677_v59  ;;  %v2105_v22 = vmul.f32 %v12374_v62, %v12698_v57  ;;  %v2106_v9 = vmul.f32 %v12374_v62, %v12670_v34  ;;  %v17327_v11 = vld [vmem:[#allocation18_spill] sm:$0xff] }
 0x26d   :  { %17309 = vst [vmem:[#allocation33_spill] sm:$0xff] %v12898_v63  ;;  %17310 = vst [vmem:[#allocation34_spill] sm:$0xff] %v12904_v39  ;;  %v12912_v36 = vpack.c.bf16 %v2103_v3, %v2102_v29  ;;  %v2107_v37 = vmul.f32 %v12374_v62, %v12690_v27  ;;  %v2108_v46 = vmul.f32 %v12374_v62, %v12756_v45  ;;  %v842_v34 = vsel %vm89_vm0, %v12621_v16, 0  ;;  %v17328_v3 = vld [vmem:[#allocation19_spill] sm:$0xff] }
 0x26e   :  { %17311 = vst [vmem:[#allocation35_spill] sm:$0xff] %v12906_v35  ;;  %v12920_v14 = vpack.c.bf16 %v2105_v22, %v2104_v55  ;;  %v2109_v8 = vmul.f32 %v12374_v62, %v12778_v56  ;;  %v2110_v59 = vmul.f32 %v12374_v62, %v12748_v52  ;;  %v2111_v57 = vmul.f32 %v12374_v62, %v12767_v43 }
 0x26f   :  { %17312 = vst [vmem:[#allocation36_spill] sm:$0xff] %v12912_v36  ;;  %v12930_v24 = vpack.c.bf16 %v2107_v37, %v2106_v9  ;;  %v2112_v27 = vmul.f32 %v12374_v62, %v718_v5  ;;  %v2113_v45 = vmul.f32 %v12374_v62, %v721_v20  ;;  %9689 = vmatpush3.bf16.xpose.msra.mxu1 %v842_v34  ;;  %v1180_v43 = vsel %vm89_vm0, %v12627_v44, 0  ;;  %v17325_v20 = vld [vmem:[#allocation16_spill] sm:$0xff] }
 0x270   :  { %17313 = vst [vmem:[#allocation37_spill] sm:$0xff] %v12920_v14  ;;  %v12934_v40 = vpack.c.bf16 %v2109_v8, %v2108_v46  ;;  %v12936_v25 = vpack.c.bf16 %v2111_v57, %v2110_v59  ;;  %v2114_v52 = vmul.f32 %v12374_v62, %v12821_v19  ;;  %v2115_v56 = vmul.f32 %v12374_v62, %v729_v15  ;;  %v17324_v15 = vld [vmem:[#allocation15_spill] sm:$0xff]  ;;  %v1145_v46 = vld [vmem:[#allocation2 + $0x98] sm:$0xff] }
 0x271   :  { %17314 = vst [vmem:[#allocation38_spill] sm:$0xff] %v12930_v24  ;;  %9738 = vmatprep.subr.bf16.mxu1 %v12651_v60  ;;  %v12944_v16 = vpack.c.bf16 %v2113_v45, %v2112_v27  ;;  %9721 = vmatpush3.bf16.xpose.msra.mxu0 %v1180_v43  ;;  %v1691_v44 = vsel %vm89_vm0, %v12631_v30, 0  ;;  %v1712_v19 = vsel %vm89_vm0, %v12708_v54, 0  ;;  %v2157_v2 = vsel %vm89_vm0, %v17326_v10, 0  ;;  %v1142_v45 = vld [vmem:[#allocation2 + $0x80] sm:$0xff] }
 0x272   :  { %17315 = vst [vmem:[#allocation39_spill] sm:$0xff] %v12934_v40  ;;  %17316 = vst [vmem:[#allocation40_spill] sm:$0xff] %v12936_v25  ;;  %v12946_v5 = vpack.c.bf16 %v2115_v56, %v2114_v52  ;;  %11110 = vmatprep.subr.msk.bf16.mxu0 %vm89_vm0, %v12631_v30  ;;  %v1694_v30 = vsel %vm89_vm0, %v12649_v21, 0  ;;  %v2160_v29 = vsel %vm89_vm0, %v17327_v11, 0  ;;  %v2163_v55 = vsel %vm89_vm0, %v17328_v3, 0 }
 0x273   :  { %17317 = vst [vmem:[#allocation41_spill] sm:$0xff] %v12944_v16 }
 0x274   :  { %17318 = vst [vmem:[#allocation42_spill] sm:$0xff] %v12946_v5 }
 0x276   :  { %9691 = vmatmul.mubr.msk.bf16.vlgmr.msra.gmra.mrb[16].mxu1 %vm89_vm0, %v12399_v38 }
 0x277   :  { %9694 = vmatprep.mubr.msk.bf16.mxu1 %vm89_vm0, %v12447_v47  ;;  %9739 = vmatpush3.bf16.msra.mxu1 %v12651_v60  ;;  %v17319_v60 = vld [vmem:[#allocation11_spill] sm:$0xff] }
 0x278   :  { %9723 = vmatmul.mubr.msk.bf16.vlgmr.msra.gmra.mrb[32].mxu0 %vm89_vm0, %v12399_v38  ;;  %9740 = vmatprep.subr.bf16.mxu1 %v12672_v48 }
 0x279   :  { %9726 = vmatprep.mubr.msk.bf16.mxu0 %vm89_vm0, %v12447_v47  ;;  %9803 = vmatpush3.bf16.xpose.msra.mxu0 %v1691_v44  ;;  %v1143_v44 = vld [vmem:[#allocation2 + $0x88] sm:$0xff] }
 0x27a   :  { %11111 = vmatprep.subr.msk.bf16.mxu0 %vm89_vm0, %v12649_v21  ;;  %v1697_v21 = vsel %vm89_vm0, %v12655_v13, 0 }
 0x27b   :  { %9741 = vmatpush3.bf16.msra.mxu1 %v12672_v48  ;;  %v17320_v48 = vld [vmem:[#allocation10_spill] sm:$0xff] }
 0x27c   :  { %9742 = vmatprep.subr.bf16.mxu1 %v12738_v0 }
 0x27e   :  { %9695 = vmatmul.mubr.msk.bf16.gmra.mrb[20].mxu1 %vm89_vm0, %v12442_v6 }
 0x27f   :  { %9698 = vmatprep.mubr.msk.bf16.mxu1 %vm89_vm0, %v12515_v7  ;;  %9743 = vmatpush3.bf16.msra.mxu1 %v12738_v0  ;;  %v17322_v0 = vld [vmem:[#allocation12_spill] sm:$0xff] }
 0x280   :  { %9727 = vmatmul.mubr.msk.bf16.gmra.mrb[36].mxu0 %vm89_vm0, %v12442_v6  ;;  %9744 = vmatprep.subr.bf16.mxu1 %v12730_v42 }
 0x281   :  { %9730 = vmatprep.mubr.msk.bf16.mxu0 %vm89_vm0, %v12515_v7  ;;  %9805 = vmatpush3.bf16.xpose.msra.mxu0 %v1694_v30 }
 0x282   :  { %11112 = vmatprep.subr.msk.bf16.mxu0 %vm89_vm0, %v12655_v13  ;;  %v1700_v13 = vsel %vm89_vm0, %v17319_v60, 0 }
 0x283   :  { %9745 = vmatpush3.bf16.msra.mxu1 %v12730_v42  ;;  %v17321_v42 = vld [vmem:[#allocation8_spill] sm:$0xff] }
 0x284   :  { %9746 = vmatprep.subr.bf16.mxu1 %v12810_v17 }
 0x286   :  { %9699 = vmatmul.mubr.msk.bf16.gmra.mrb[24].mxu1 %vm89_vm0, %v12493_v51 }
 0x287   :  { %9702 = vmatprep.mubr.msk.bf16.mxu1 %vm89_vm0, %v12585_v26  ;;  %9747 = vmatpush3.bf16.msra.mxu1 %v12810_v17  ;;  %v1709_v17 = vsel %vm89_vm0, %v12702_v33, 0 }
 0x288   :  { %9731 = vmatmul.mubr.msk.bf16.gmra.mrb[40].mxu0 %vm89_vm0, %v12493_v51  ;;  %9748 = vmatprep.subr.bf16.mxu1 %v12802_v49 }
 0x289   :  { %9734 = vmatprep.mubr.msk.bf16.mxu0 %vm89_vm0, %v12585_v26  ;;  %9807 = vmatpush3.bf16.xpose.msra.mxu0 %v1697_v21 }
 0x28a   :  { %11113 = vmatprep.subr.msk.bf16.mxu0 %vm89_vm0, %v17319_v60 }
 0x28b   :  { %9749 = vmatpush3.bf16.msra.mxu1 %v12802_v49  ;;  %v1706_v49 = vsel %vm89_vm0, %v12693_v4, 0 }
 0x28c   :  { %9750 = vmatprep.subr.bf16.mxu1 %v12870_v61 }
 0x28e   :  { %9703 = vmatmul.mubr.msk.bf16.gmra.mrb[28].mxu1 %vm89_vm0, %v17320_v48 }
 0x28f   :  { %9751 = vmatpush3.bf16.msra.mxu1 %v12870_v61  ;;  %v1703_v61 = vsel %vm89_vm0, %v17322_v0, 0 }
 0x290   :  { %9735 = vmatmul.mubr.msk.bf16.gmra.mrb[44].mxu0 %vm89_vm0, %v17320_v48  ;;  %9752 = vmatprep.subr.bf16.mxu1 %v12862_v53 }
 0x291   :  { %9809 = vmatpush3.bf16.xpose.msra.mxu0 %v1700_v13  ;;  %9818 = vmatprep.mubr.msk.bf16.mxu0 %vm89_vm0, %v17321_v42 }
 0x292   :  { %11114 = vmatprep.subr.msk.bf16.mxu0 %vm89_vm0, %v17322_v0 }
 0x293   :  { %9753 = vmatpush3.bf16.msra.mxu1 %v12862_v53  ;;  %v2154_v53 = vsel %vm89_vm0, %v17325_v20, 0 }
 0x294   :  { %9770 = vmatprep.subr.bf16.mxu1 %v12700_v50 }
 0x299   :  { %9811 = vmatpush3.bf16.xpose.msra.mxu0 %v1703_v61 }
 0x29a   :  { %11115 = vmatprep.subr.msk.bf16.mxu0 %vm89_vm0, %v12693_v4  ;;  %v2142_v4 = vsel %vm89_vm0, %v12712_v41, 0 }
 0x2a1   :  { %9813 = vmatpush3.bf16.xpose.msra.mxu0 %v1706_v49 }
 0x2a2   :  { %11116 = vmatprep.subr.msk.bf16.mxu0 %vm89_vm0, %v12702_v33  ;;  %v17323_v33 = vld [vmem:[#allocation14_spill] sm:$0xff] }
 0x2a9   :  { %9815 = vmatpush3.bf16.xpose.msra.mxu0 %v1709_v17  ;;  %v781_v17 = vld [vmem:[#allocation2 + $0x8] sm:$0xff] }
 0x2aa   :  { %11117 = vmatprep.subr.msk.bf16.mxu0 %vm89_vm0, %v12708_v54  ;;  %v2145_v54 = vsel %vm89_vm0, %v12720_v31, 0 }
 0x2b1   :  { %9817 = vmatpush3.bf16.xpose.msra.mxu0 %v1712_v19 }
 0x2b2   :  { %11118 = vmatprep.subr.msk.bf16.mxu0 %vm89_vm0, %v12712_v41  ;;  %v2148_v41 = vsel %vm89_vm0, %v17323_v33, 0 }
 0x2b8   :  { %9819 = vmatmul.mubr.msk.bf16.vlgmr.msra.gmra.mrb[48].mxu0 %vm89_vm0, %v12399_v38 }
 0x2b9   :  { %9822 = vmatprep.mubr.msk.bf16.mxu0 %vm89_vm0, %v12447_v47  ;;  %9867 = vmatpush3.bf16.xpose.msra.mxu0 %v2142_v4  ;;  %v1148_v4 = vld [vmem:[#allocation2 + $0xb0] sm:$0xff] }
 0x2ba   :  { %11119 = vmatprep.subr.msk.bf16.mxu0 %vm89_vm0, %v12720_v31  ;;  %v2151_v31 = vsel %vm89_vm0, %v17324_v15, 0 }
 0x2c0   :  { %9823 = vmatmul.mubr.msk.bf16.gmra.mrb[52].mxu0 %vm89_vm0, %v12442_v6 }
 0x2c1   :  { %9826 = vmatprep.mubr.msk.bf16.mxu0 %vm89_vm0, %v12515_v7  ;;  %9869 = vmatpush3.bf16.xpose.msra.mxu0 %v2145_v54 }
 0x2c2   :  { %11120 = vmatprep.subr.msk.bf16.mxu0 %vm89_vm0, %v17323_v33 }
 0x2c8   :  { %9827 = vmatmul.mubr.msk.bf16.gmra.mrb[56].mxu0 %vm89_vm0, %v12493_v51 }
 0x2c9   :  { %9830 = vmatprep.mubr.msk.bf16.mxu0 %vm89_vm0, %v12585_v26  ;;  %9871 = vmatpush3.bf16.xpose.msra.mxu0 %v2148_v41 }
 0x2ca   :  { %11121 = vmatprep.subr.msk.bf16.mxu0 %vm89_vm0, %v17324_v15  ;;  %v1149_v15 = vld [vmem:[#allocation2 + $0xb8] sm:$0xff] }
 0x2d0   :  { %9831 = vmatmul.mubr.msk.bf16.gmra.mrb[60].mxu0 %vm89_vm0, %v17320_v48 }
 0x2d1   :  { %9873 = vmatpush3.bf16.xpose.msra.mxu0 %v2151_v31  ;;  %9882 = vmatprep.mubr.msk.bf16.mxu0 %vm89_vm0, %v17321_v42  ;;  %v780_v42 = vld [vmem:[#allocation2] sm:$0xff] }
 0x2d2   :  { %11122 = vmatprep.subr.msk.bf16.mxu0 %vm89_vm0, %v17325_v20 }
 0x2d9   :  { %9875 = vmatpush3.bf16.xpose.msra.mxu0 %v2154_v53 }
 0x2da   :  { %11123 = vmatprep.subr.msk.bf16.mxu0 %vm89_vm0, %v17326_v10 }
 0x2e1   :  { %9877 = vmatpush3.bf16.xpose.msra.mxu0 %v2157_v2 }
 0x2e2   :  { %11124 = vmatprep.subr.msk.bf16.mxu0 %vm89_vm0, %v17327_v11  ;;  %v786_v11 = vld [vmem:[#allocation2 + $0x30] sm:$0xff] }
 0x2e9   :  { %9879 = vmatpush3.bf16.xpose.msra.mxu0 %v2160_v29 }
 0x2ea   :  { %11125 = vmatprep.subr.msk.bf16.mxu0 %vm89_vm0, %v17328_v3 }
 0x2f1   :  { %9881 = vmatpush3.bf16.xpose.msra.mxu0 %v2163_v55 }
 0x2f8   :  { %9883 = vmatmul.mubr.msk.bf16.vlgmr.msra.gmra.mrb[64].mxu0 %vm89_vm0, %v12399_v38  ;;  %v1144_v38 = vld [vmem:[#allocation2 + $0x90] sm:$0xff] }
 0x2f9   :  { %9886 = vmatprep.mubr.msk.bf16.mxu0 %vm89_vm0, %v12447_v47 }
 0x300   :  { %9887 = vmatmul.mubr.msk.bf16.gmra.mrb[68].mxu0 %vm89_vm0, %v12442_v6 }
 0x301   :  { %9890 = vmatprep.mubr.msk.bf16.mxu0 %vm89_vm0, %v12515_v7  ;;  %v782_v7 = vld [vmem:[#allocation2 + $0x10] sm:$0xff] }
 0x308   :  { %9891 = vmatmul.mubr.msk.bf16.gmra.mrb[72].mxu0 %vm89_vm0, %v12493_v51 }
 0x309   :  { %9894 = vmatprep.mubr.msk.bf16.mxu0 %vm89_vm0, %v12585_v26  ;;  %v783_v26 = vld [vmem:[#allocation2 + $0x18] sm:$0xff] }
 0x310   :  { %9895 = vmatmul.mubr.msk.bf16.gmra.mrb[76].mxu0 %vm89_vm0, %v17320_v48 }
 0x349   :  { %v9692_v22 = vpop.f32.mrb[16].mxu1 }
 0x34a   :  { %v878_v9 = vpop.f32.mrb[17].mxu1  ;;  %v13093_v27 = vadd.f32 %v9692_v22, %v782_v7  ;;  %v787_v22 = vld [vmem:[#allocation2 + $0x38] sm:$0xff] }
 0x34b   :  { %v9724_v37 = vpop.f32.mrb[32].mxu0  ;;  %v9693_v47 = vpop.f32.mrb[18].mxu1  ;;  %v13105_v19 = vadd.f32 %v878_v9, %v780_v42  ;;  %v1146_v9 = vld [vmem:[#allocation2 + $0xa0] sm:$0xff] }
 0x34c   :  { %v13088_v8 = vadd.f32 %v9724_v37, %v1144_v38  ;;  %v1216_v6 = vpop.f32.mrb[33].mxu0  ;;  %v881_v59 = vpop.f32.mrb[19].mxu1  ;;  %v13096_v56 = vadd.f32 %v9693_v47, %v783_v26 }
 0x34d   :  { %v9725_v57 = vpop.f32.mrb[34].mxu0  ;;  %v13099_v60 = vadd.f32 %v1216_v6, %v1142_v45  ;;  %v13108_v33 = vadd.f32 %v881_v59, %v781_v17  ;;  %v1147_v6 = vld [vmem:[#allocation2 + $0xa8] sm:$0xff]  ;;  %v784_v45 = vld [vmem:[#allocation2 + $0x20] sm:$0xff] }
 0x34e   :  { %v13090_v34 = vadd.f32 %v9725_v57, %v1145_v46  ;;  %1283 = vmax.xlane.f32.xlu0 %v13088_v8  ;;  %v1219_v51 = vpop.f32.mrb[35].mxu0 }
 0x34f   :  { %v13102_v61 = vadd.f32 %v1219_v51, %v1143_v44 }
 0x350   :  { %1285 = vmax.xlane.f32.xlu1 %v13090_v34 }
 0x351   :  { %v9696_v52 = vpop.f32.mrb[20].mxu1 }
 0x352   :  { %945 = vmax.xlane.f32.xlu0 %v13093_v27  ;;  %v894_v43 = vpop.f32.mrb[21].mxu1  ;;  %v13117_v38 = vadd.f32 %v9696_v52, %v786_v11  ;;  %v791_v11 = vld [vmem:[#allocation2 + $0x58] sm:$0xff] }
 0x353   :  { %v9728_v30 = vpop.f32.mrb[36].mxu0  ;;  %v9697_v21 = vpop.f32.mrb[22].mxu1  ;;  %v13129_v42 = vadd.f32 %v894_v43, %v784_v45  ;;  %v789_v45 = vld [vmem:[#allocation2 + $0x48] sm:$0xff] }
 0x354   :  { %947 = vmax.xlane.f32.xlu1 %v13096_v56  ;;  %v1232_v48 = vpop.f32.mrb[37].mxu0  ;;  %v897_v13 = vpop.f32.mrb[23].mxu1  ;;  %v13111_v53 = vadd.f32 %v9728_v30, %v1148_v4  ;;  %v13120_v47 = vadd.f32 %v9697_v21, %v787_v22  ;;  %v785_v21 = vld [vmem:[#allocation2 + $0x28] sm:$0xff]  ;;  %v1150_v22 = vld [vmem:[#allocation2 + $0xc0] sm:$0xff] }
 0x355   :  { %v9729_v0 = vpop.f32.mrb[38].mxu0  ;;  %v13123_v57 = vadd.f32 %v1232_v48, %v1146_v9  ;;  %v13132_v17 = vadd.f32 %v897_v13, %v785_v21  ;;  %v1153_v48 = vld [vmem:[#allocation2 + $0xd8] sm:$0xff]  ;;  %v1151_v9 = vld [vmem:[#allocation2 + $0xc8] sm:$0xff]  ;;  %v1156_v21 = vld [vmem:[#allocation2 + $0xf0] sm:$0xff] }
 0x356   :  { %v1235_v49 = vpop.f32.mrb[39].mxu0  ;;  %1279 = vmax.xlane.f32.xlu0 %v13099_v60  ;;  %v13114_v3 = vadd.f32 %v9729_v0, %v1149_v15  ;;  %v1152_v0 = vld [vmem:[#allocation2 + $0xd0] sm:$0xff] }
 0x357   :  { %v13126_v44 = vadd.f32 %v1235_v49, %v1147_v6  ;;  %v790_v49 = vld [vmem:[#allocation2 + $0x50] sm:$0xff]  ;;  %v788_v6 = vld [vmem:[#allocation2 + $0x40] sm:$0xff] }
 0x358   :  { %1281 = vmax.xlane.f32.xlu1 %v13102_v61 }
 0x359   :  { %v9700_v54 = vpop.f32.mrb[24].mxu1 }
 0x35a   :  { %941 = vmax.xlane.f32.xlu0 %v13105_v19  ;;  %v910_v41 = vpop.f32.mrb[25].mxu1  ;;  %v13141_v43 = vadd.f32 %v9700_v54, %v790_v49  ;;  %v795_v49 = vld [vmem:[#allocation2 + $0x78] sm:$0xff] }
 0x35b   :  { %v9732_v31 = vpop.f32.mrb[40].mxu0  ;;  %v9701_v20 = vpop.f32.mrb[26].mxu1  ;;  %v13153_v54 = vadd.f32 %v910_v41, %v788_v6  ;;  %v793_v6 = vld [vmem:[#allocation2 + $0x68] sm:$0xff] }
 0x35c   :  { %v1248_v10 = vpop.f32.mrb[41].mxu0  ;;  %943 = vmax.xlane.f32.xlu1 %v13108_v33  ;;  %v913_v2 = vpop.f32.mrb[27].mxu1  ;;  %v13135_v4 = vadd.f32 %v9732_v31, %v1152_v0  ;;  %v13144_v13 = vadd.f32 %v9701_v20, %v791_v11  ;;  %v1157_v0 = vld [vmem:[#allocation2 + $0xf8] sm:$0xff]  ;;  %v1154_v11 = vld [vmem:[#allocation2 + $0xe0] sm:$0xff] }
 0x35d   :  { %v9733_v29 = vpop.f32.mrb[42].mxu0  ;;  %v13147_v31 = vadd.f32 %v1248_v10, %v1150_v22  ;;  %v13156_v20 = vadd.f32 %v913_v2, %v789_v45  ;;  %v1155_v22 = vld [vmem:[#allocation2 + $0xe8] sm:$0xff]  ;;  %v1676_v45 = vld [vmem:[#allocation2 + $0x110] sm:$0xff] }
 0x35e   :  { %v1251_v55 = vpop.f32.mrb[43].mxu0  ;;  %1291 = vmax.xlane.f32.xlu0 %v13111_v53  ;;  %v13138_v15 = vadd.f32 %v9733_v29, %v1153_v48  ;;  %v794_v48 = vld [vmem:[#allocation2 + $0x70] sm:$0xff] }
 0x35f   :  { %v13150_v29 = vadd.f32 %v1251_v55, %v1151_v9  ;;  %v792_v9 = vld [vmem:[#allocation2 + $0x60] sm:$0xff] }
 0x360   :  { %1293 = vmax.xlane.f32.xlu1 %v13114_v3 }
 0x361   :  { %v9704_v37 = vpop.f32.mrb[28].mxu1 }
 0x362   :  { %953 = vmax.xlane.f32.xlu0 %v13117_v38  ;;  %v926_v46 = vpop.f32.mrb[29].mxu1  ;;  %v13165_v41 = vadd.f32 %v9704_v37, %v794_v48 }
 0x363   :  { %v9736_v59 = vpop.f32.mrb[44].mxu0  ;;  %v9705_v7 = vpop.f32.mrb[30].mxu1  ;;  %v13177_v37 = vadd.f32 %v926_v46, %v792_v9 }
 0x364   :  { %955 = vmax.xlane.f32.xlu1 %v13120_v47  ;;  %v1264_v51 = vpop.f32.mrb[45].mxu0  ;;  %v929_v26 = vpop.f32.mrb[31].mxu1  ;;  %v13159_v10 = vadd.f32 %v9736_v59, %v1156_v21  ;;  %v13168_v2 = vadd.f32 %v9705_v7, %v795_v49 }
 0x365   :  { %v9737_v52 = vpop.f32.mrb[46].mxu0  ;;  %v13171_v59 = vadd.f32 %v1264_v51, %v1154_v11  ;;  %v13180_v7 = vadd.f32 %v929_v26, %v793_v6  ;;  %v1677_v51 = vld [vmem:[#allocation2 + $0x118] sm:$0xff]  ;;  %v1680_v26 = vld [vmem:[#allocation2 + $0x130] sm:$0xff] }
 0x366   :  { %1287 = vmax.xlane.f32.xlu0 %v13123_v57  ;;  %v1267_v30 = vpop.f32.mrb[47].mxu0  ;;  %v13162_v55 = vadd.f32 %v9737_v52, %v1157_v0 }
 0x367   :  { %v13174_v52 = vadd.f32 %v1267_v30, %v1155_v22  ;;  %v1674_v30 = vld [vmem:[#allocation2 + $0x100] sm:$0xff]  ;;  %v1675_v22 = vld [vmem:[#allocation2 + $0x108] sm:$0xff] }
 0x368   :  { %1289 = vmax.xlane.f32.xlu1 %v13126_v44 }
 0x36a   :  { %949 = vmax.xlane.f32.xlu0 %v13129_v42 }
 0x36c   :  { %951 = vmax.xlane.f32.xlu1 %v13132_v17 }
 0x36e   :  { %1299 = vmax.xlane.f32.xlu0 %v13135_v4 }
 0x370   :  { %1301 = vmax.xlane.f32.xlu1 %v13138_v15 }
 0x372   :  { %961 = vmax.xlane.f32.xlu0 %v13141_v43 }
 0x374   :  { %963 = vmax.xlane.f32.xlu1 %v13144_v13 }
 0x376   :  { %1295 = vmax.xlane.f32.xlu0 %v13147_v31 }
 0x378   :  { %1297 = vmax.xlane.f32.xlu1 %v13150_v29 }
 0x37a   :  { %957 = vmax.xlane.f32.xlu0 %v13153_v54 }
 0x37c   :  { %959 = vmax.xlane.f32.xlu1 %v13156_v20 }
 0x37e   :  { %1307 = vmax.xlane.f32.xlu0 %v13159_v10 }
 0x380   :  { %1309 = vmax.xlane.f32.xlu1 %v13162_v55 }
 0x382   :  { %969 = vmax.xlane.f32.xlu0 %v13165_v41 }
 0x384   :  { %971 = vmax.xlane.f32.xlu1 %v13168_v2 }
 0x386   :  { %1303 = vmax.xlane.f32.xlu0 %v13171_v59 }
 0x388   :  { %1305 = vmax.xlane.f32.xlu1 %v13174_v52 }
 0x38a   :  { %965 = vmax.xlane.f32.xlu0 %v13177_v37 }
 0x38b   :  { %v9820_v21 = vpop.f32.mrb[48].mxu0 }
 0x38c   :  { %v13183_v0 = vadd.f32 %v9820_v21, %v1676_v45  ;;  %v1748_v48 = vpop.f32.mrb[49].mxu0  ;;  %967 = vmax.xlane.f32.xlu1 %v13180_v7  ;;  %v1681_v21 = vld [vmem:[#allocation2 + $0x138] sm:$0xff] }
 0x38d   :  { %v9821_v49 = vpop.f32.mrb[50].mxu0  ;;  %v13189_v9 = vadd.f32 %v1748_v48, %v1674_v30  ;;  %v1679_v30 = vld [vmem:[#allocation2 + $0x128] sm:$0xff] }
 0x38e   :  { %v13186_v11 = vadd.f32 %v9821_v49, %v1677_v51  ;;  %v1751_v46 = vpop.f32.mrb[51].mxu0  ;;  %1815 = vmax.xlane.f32.xlu0 %v13183_v0  ;;  %v1678_v51 = vld [vmem:[#allocation2 + $0x120] sm:$0xff] }
 0x38f   :  { %v13192_v6 = vadd.f32 %v1751_v46, %v1675_v22  ;;  %v1684_v46 = vld [vmem:[#allocation2 + $0x150] sm:$0xff] }
 0x390   :  { %1817 = vmax.xlane.f32.xlu1 %v13186_v11 }
 0x392   :  { %1811 = vmax.xlane.f32.xlu0 %v13189_v9 }
 0x393   :  { %v9824_v45 = vpop.f32.mrb[52].mxu0 }
 0x394   :  { %v13195_v62 = vadd.f32 %v9824_v45, %v1680_v26  ;;  %v1764_v1 = vpop.f32.mrb[53].mxu0  ;;  %1813 = vmax.xlane.f32.xlu1 %v13192_v6  ;;  %v1685_v45 = vld [vmem:[#allocation2 + $0x158] sm:$0xff] }
 0x395   :  { %v9825_v49 = vpop.f32.mrb[54].mxu0  ;;  %v13201_v16 = vadd.f32 %v1764_v1, %v1678_v51  ;;  %v1683_v51 = vld [vmem:[#allocation2 + $0x148] sm:$0xff] }
 0x396   :  { %v13198_v5 = vadd.f32 %v9825_v49, %v1681_v21  ;;  %v1767_v48 = vpop.f32.mrb[55].mxu0  ;;  %1823 = vmax.xlane.f32.xlu0 %v13195_v62  ;;  %v1682_v21 = vld [vmem:[#allocation2 + $0x140] sm:$0xff] }
 0x397   :  { %v13204_v22 = vadd.f32 %v1767_v48, %v1679_v30  ;;  %v1688_v48 = vld [vmem:[#allocation2 + $0x170] sm:$0xff] }
 0x398   :  { %1825 = vmax.xlane.f32.xlu1 %v13198_v5 }
 0x39a   :  { %1819 = vmax.xlane.f32.xlu0 %v13201_v16 }
 0x39b   :  { %v9828_v26 = vpop.f32.mrb[56].mxu0 }
 0x39c   :  { %v13207_v25 = vadd.f32 %v9828_v26, %v1684_v46  ;;  %v1780_v40 = vpop.f32.mrb[57].mxu0  ;;  %1821 = vmax.xlane.f32.xlu1 %v13204_v22  ;;  %v1689_v26 = vld [vmem:[#allocation2 + $0x178] sm:$0xff] }
 0x39d   :  { %v9829_v49 = vpop.f32.mrb[58].mxu0  ;;  %v13213_v14 = vadd.f32 %v1780_v40, %v1682_v21  ;;  %v1687_v21 = vld [vmem:[#allocation2 + $0x168] sm:$0xff] }
 0x39e   :  { %v13210_v24 = vadd.f32 %v9829_v49, %v1685_v45  ;;  %v1783_v1 = vpop.f32.mrb[59].mxu0  ;;  %1831 = vmax.xlane.f32.xlu0 %v13207_v25  ;;  %v1686_v45 = vld [vmem:[#allocation2 + $0x160] sm:$0xff] }
 0x39f   :  { %v13216_v30 = vadd.f32 %v1783_v1, %v1683_v51  ;;  %v2127_v51 = vld [vmem:[#allocation2 + $0x190] sm:$0xff] }
 0x3a0   :  { %1833 = vmax.xlane.f32.xlu1 %v13210_v24 }
 0x3a2   :  { %1827 = vmax.xlane.f32.xlu0 %v13213_v14 }
 0x3a3   :  { %v9832_v46 = vpop.f32.mrb[60].mxu0 }
 0x3a4   :  { %v13219_v36 = vadd.f32 %v9832_v46, %v1688_v48  ;;  %v1796_v35 = vpop.f32.mrb[61].mxu0  ;;  %1829 = vmax.xlane.f32.xlu1 %v13216_v30  ;;  %v2128_v46 = vld [vmem:[#allocation2 + $0x198] sm:$0xff] }
 0x3a5   :  { %v9833_v49 = vpop.f32.mrb[62].mxu0  ;;  %v13225_v63 = vadd.f32 %v1796_v35, %v1686_v45  ;;  %v2126_v45 = vld [vmem:[#allocation2 + $0x188] sm:$0xff] }
 0x3a6   :  { %v13222_v39 = vadd.f32 %v9833_v49, %v1689_v26  ;;  %v1799_v40 = vpop.f32.mrb[63].mxu0  ;;  %1839 = vmax.xlane.f32.xlu0 %v13219_v36  ;;  %v2125_v49 = vld [vmem:[#allocation2 + $0x180] sm:$0xff] }
 0x3a7   :  { %v13228_v1 = vadd.f32 %v1799_v40, %v1687_v21  ;;  %v2131_v21 = vld [vmem:[#allocation2 + $0x1b0] sm:$0xff] }
 0x3a8   :  { %17329 = vst [vmem:[#allocation11_spill] sm:$0xff] %v13222_v39  ;;  %1841 = vmax.xlane.f32.xlu1 %v13222_v39 }
 0x3aa   :  { %1835 = vmax.xlane.f32.xlu0 %v13225_v63 }
 0x3ac   :  { %1837 = vmax.xlane.f32.xlu1 %v13228_v1 }
 0x3cb   :  { %v9884_v48 = vpop.f32.mrb[64].mxu0 }
 0x3cc   :  { %v13232_v32 = vadd.f32 %v9884_v48, %v2127_v51  ;;  %v2199_v26 = vpop.f32.mrb[65].mxu0  ;;  %v2132_v48 = vld [vmem:[#allocation2 + $0x1b8] sm:$0xff] }
 0x3cd   :  { %v9885_v12 = vpop.f32.mrb[66].mxu0  ;;  %v13237_v40 = vadd.f32 %v2199_v26, %v2125_v49  ;;  %v2130_v49 = vld [vmem:[#allocation2 + $0x1a8] sm:$0xff] }
 0x3ce   :  { %17330 = vst [vmem:[#allocation10_spill] sm:$0xff] %v13232_v32  ;;  %v13234_v28 = vadd.f32 %v9885_v12, %v2128_v46  ;;  %v2202_v35 = vpop.f32.mrb[67].mxu0  ;;  %2266 = vmax.xlane.f32.xlu0 %v13232_v32  ;;  %v2129_v12 = vld [vmem:[#allocation2 + $0x1a0] sm:$0xff] }
 0x3cf   :  { %17332 = vst [vmem:[#allocation12_spill] sm:$0xff] %v13237_v40  ;;  %v13240_v58 = vadd.f32 %v2202_v35, %v2126_v45  ;;  %v2135_v35 = vld [vmem:[#allocation2 + $0x1d0] sm:$0xff] }
 0x3d0   :  { %17331 = vst [vmem:[#allocation8_spill] sm:$0xff] %v13234_v28  ;;  %2268 = vmax.xlane.f32.xlu1 %v13234_v28 }
 0x3d1   :  { %17333 = vst [vmem:[#allocation14_spill] sm:$0xff] %v13240_v58 }
 0x3d2   :  { %2262 = vmax.xlane.f32.xlu0 %v13237_v40 }
 0x3d3   :  { %v9888_v51 = vpop.f32.mrb[68].mxu0 }
 0x3d4   :  { %v13243_v23 = vadd.f32 %v9888_v51, %v2131_v21  ;;  %v2215_v18 = vpop.f32.mrb[69].mxu0  ;;  %2264 = vmax.xlane.f32.xlu1 %v13240_v58  ;;  %v2136_v58 = vld [vmem:[#allocation2 + $0x1d8] sm:$0xff] }
 0x3d5   :  { %v9889_v46 = vpop.f32.mrb[70].mxu0  ;;  %v13249_v28 = vadd.f32 %v2215_v18, %v2129_v12 }
 0x3d6   :  { %17334 = vst [vmem:[#allocation15_spill] sm:$0xff] %v13243_v23  ;;  %v13246_v50 = vadd.f32 %v9889_v46, %v2132_v48  ;;  %v2218_v26 = vpop.f32.mrb[71].mxu0  ;;  %2274 = vmax.xlane.f32.xlu0 %v13243_v23  ;;  %v2133_v23 = vld [vmem:[#allocation2 + $0x1c0] sm:$0xff] }
 0x3d7   :  { %17336 = vst [vmem:[#allocation17_spill] sm:$0xff] %v13249_v28  ;;  %v13252_v45 = vadd.f32 %v2218_v26, %v2130_v49 }
 0x3d8   :  { %17335 = vst [vmem:[#allocation16_spill] sm:$0xff] %v13246_v50  ;;  %2276 = vmax.xlane.f32.xlu1 %v13246_v50 }
 0x3da   :  { %2270 = vmax.xlane.f32.xlu0 %v13249_v28  ;;  %v2134_v28 = vld [vmem:[#allocation2 + $0x1c8] sm:$0xff] }
 0x3db   :  { %v1284_v21 = vpop.xlane.xlu0 %1283  ;;  %v9892_v51 = vpop.f32.mrb[72].mxu0 }
 0x3dc   :  { %v1313_v40 = vsub.f32 %v13088_v8, %v1284_v21  ;;  %v13256_v48 = vadd.f32 %v9892_v51, %v2135_v35  ;;  %v2231_v46 = vpop.f32.mrb[73].mxu0  ;;  %2272 = vmax.xlane.f32.xlu1 %v13252_v45 }
 0x3dd   :  { %v1286_v18 = vpop.xlane.xlu1 %1285  ;;  %v9893_v12 = vpop.f32.mrb[74].mxu0  ;;  %v13265_v8 = vadd.f32 %v2231_v46, %v2133_v23 }
 0x3de   :  { %v1331_v32 = vmul.f32 1.442695, %v1313_v40  ;;  %v1314_v50 = vsub.f32 %v13090_v34, %v1286_v18  ;;  %v13260_v26 = vadd.f32 %v9893_v12, %v2136_v58  ;;  %v2234_v49 = vpop.f32.mrb[75].mxu0  ;;  %2282 = vmax.xlane.f32.xlu0 %v13256_v48 }
 0x3df   :  { %v13263_v39 = vpop.xlane.xlu0 %945  ;;  %17338 = vst [vmem:[#allocation19_spill] sm:$0xff] %v13265_v8  ;;  %v13270_v40 = vadd.f32 %v2234_v49, %v2134_v28 }
 0x3e0   :  { %17337 = vst [vmem:[#allocation18_spill] sm:$0xff] %v13260_v26  ;;  %11233 = vpow2.f32 %v1331_v32  ;;  %v1333_v35 = vmul.f32 1.442695, %v1314_v50  ;;  %2284 = vmax.xlane.f32.xlu1 %v13260_v26 }
 0x3e1   :  { %v13268_v21 = vpop.xlane.xlu1 %947  ;;  %17339 = vst [vmem:[#allocation43_spill] sm:$0xff] %v13270_v40 }
 0x3e2   :  { %11235 = vpow2.f32 %v1333_v35  ;;  %2278 = vmax.xlane.f32.xlu0 %v13265_v8 }
 0x3e3   :  { %v1280_v58 = vpop.xlane.xlu0 %1279  ;;  %v13273_v34 = vpop.f32.mrb[76].mxu0 }
 0x3e4   :  { %v1311_v51 = vsub.f32 %v13099_v60, %v1280_v58  ;;  %v13276_v18 = vpop.f32.mrb[77].mxu0  ;;  %2280 = vmax.xlane.f32.xlu1 %v13270_v40 }
 0x3e5   :  { %v1282_v23 = vpop.xlane.xlu1 %1281  ;;  %v13279_v50 = vpop.f32.mrb[78].mxu0 }
 0x3e6   :  { %v1327_v32 = vmul.f32 1.442695, %v1311_v51  ;;  %v1312_v46 = vsub.f32 %v13102_v61, %v1282_v23  ;;  %v13282_v12 = vpop.f32.mrb[79].mxu0 }
 0x3e7   :  { %v942_v28 = vpop.xlane.xlu0 %941 }
 0x3e8   :  { %11237 = vpow2.f32 %v1327_v32  ;;  %v1329_v49 = vmul.f32 1.442695, %v1312_v46  ;;  %v973_v35 = vsub.f32 %v13105_v19, %v942_v28 }
 0x3e9   :  { %v944_v26 = vpop.xlane.xlu1 %943 }
 0x3ea   :  { %v13285_v8 = vpop.eup %11233  ;;  %11239 = vpow2.f32 %v1329_v49  ;;  %v989_v60 = vmul.f32 1.442695, %v973_v35  ;;  %v974_v58 = vsub.f32 %v13108_v33, %v944_v26 }
 0x3eb   :  { %17340 = vst [vmem:[#allocation44_spill] sm:$0xff] %v13285_v8  ;;  %v1292_v40 = vpop.xlane.xlu0 %1291  ;;  %1363 = vadd.xlane.f32.xlu0 %v13285_v8 }
 0x3ec   :  { %v13289_v51 = vpop.eup %11235  ;;  %11241 = vpow2.f32 %v989_v60  ;;  %v991_v61 = vmul.f32 1.442695, %v974_v58  ;;  %v1317_v23 = vsub.f32 %v13111_v53, %v1292_v40 }
 0x3ed   :  { %v1294_v32 = vpop.xlane.xlu1 %1293  ;;  %1365 = vadd.xlane.f32.xlu1 %v13289_v51 }
 0x3ee   :  { %11243 = vpow2.f32 %v991_v61  ;;  %v1339_v19 = vmul.f32 1.442695, %v1317_v23  ;;  %v1318_v46 = vsub.f32 %v13114_v3, %v1294_v32 }
 0x3ef   :  { %v13294_v28 = vpop.xlane.xlu0 %953 }
 0x3f0   :  { %11245 = vpow2.f32 %v1339_v19  ;;  %v1341_v33 = vmul.f32 1.442695, %v1318_v46 }
 0x3f1   :  { %v13296_v26 = vpop.xlane.xlu1 %955 }
 0x3f2   :  { %v13298_v49 = vpop.eup %11237  ;;  %11247 = vpow2.f32 %v1341_v33 }
 0x3f3   :  { %v1288_v35 = vpop.xlane.xlu0 %1287  ;;  %1359 = vadd.xlane.f32.xlu0 %v13298_v49 }
 0x3f4   :  { %v13301_v53 = vpop.eup %11239  ;;  %v1315_v40 = vsub.f32 %v13123_v57, %v1288_v35 }
 0x3f5   :  { %v1290_v60 = vpop.xlane.xlu1 %1289  ;;  %1361 = vadd.xlane.f32.xlu1 %v13301_v53 }
 0x3f6   :  { %v13305_v3 = vpop.eup %11241  ;;  %v1335_v58 = vmul.f32 1.442695, %v1315_v40  ;;  %v1316_v61 = vsub.f32 %v13126_v44, %v1290_v60 }
 0x3f7   :  { %17341 = vst [vmem:[#allocation45_spill] sm:$0xff] %v13305_v3  ;;  %v13308_v23 = vpop.xlane.xlu0 %949  ;;  %1021 = vadd.xlane.f32.xlu0 %v13305_v3 }
 0x3f8   :  { %v13311_v32 = vpop.eup %11243  ;;  %11249 = vpow2.f32 %v1335_v58  ;;  %v1337_v19 = vmul.f32 1.442695, %v1316_v61 }
 0x3f9   :  { %17342 = vst [vmem:[#allocation46_spill] sm:$0xff] %v13311_v32  ;;  %v13313_v46 = vpop.xlane.xlu1 %951  ;;  %1023 = vadd.xlane.f32.xlu1 %v13311_v32 }
 0x3fa   :  { %v13316_v57 = vpop.eup %11245  ;;  %11251 = vpow2.f32 %v1337_v19 }
 0x3fb   :  { %17343 = vst [vmem:[#allocation47_spill] sm:$0xff] %v13316_v57  ;;  %v1300_v33 = vpop.xlane.xlu0 %1299  ;;  %1371 = vadd.xlane.f32.xlu0 %v13316_v57 }
 0x3fc   :  { %v13319_v35 = vpop.eup %11247  ;;  %v1321_v44 = vsub.f32 %v13135_v4, %v1300_v33 }
 0x3fd   :  { %17344 = vst [vmem:[#allocation48_spill] sm:$0xff] %v13319_v35  ;;  %v1302_v40 = vpop.xlane.xlu1 %1301  ;;  %1373 = vadd.xlane.f32.xlu1 %v13319_v35 }
 0x3fe   :  { %v1347_v60 = vmul.f32 1.442695, %v1321_v44  ;;  %v1322_v58 = vsub.f32 %v13138_v15, %v1302_v40 }
 0x3ff   :  { %v13324_v61 = vpop.xlane.xlu0 %961 }
 0x400   :  { %11253 = vpow2.f32 %v1347_v60  ;;  %v1349_v3 = vmul.f32 1.442695, %v1322_v58 }
 0x401   :  { %v13326_v32 = vpop.xlane.xlu1 %963 }
 0x402   :  { %v13328_v19 = vpop.eup %11249  ;;  %11255 = vpow2.f32 %v1349_v3 }
 0x403   :  { %17345 = vst [vmem:[#allocation49_spill] sm:$0xff] %v13328_v19  ;;  %v1296_v57 = vpop.xlane.xlu0 %1295  ;;  %1367 = vadd.xlane.f32.xlu0 %v13328_v19 }
 0x404   :  { %v13331_v8 = vpop.eup %11251  ;;  %v1319_v4 = vsub.f32 %v13147_v31, %v1296_v57 }
 0x405   :  { %17346 = vst [vmem:[#allocation50_spill] sm:$0xff] %v13331_v8  ;;  %v1298_v33 = vpop.xlane.xlu1 %1297  ;;  %1369 = vadd.xlane.f32.xlu1 %v13331_v8 }
 0x406   :  { %v1343_v15 = vmul.f32 1.442695, %v1319_v4  ;;  %v1320_v44 = vsub.f32 %v13150_v29, %v1298_v33 }
 0x407   :  { %v13336_v40 = vpop.xlane.xlu0 %957 }
 0x408   :  { %11257 = vpow2.f32 %v1343_v15  ;;  %v1345_v60 = vmul.f32 1.442695, %v1320_v44 }
 0x409   :  { %v13338_v58 = vpop.xlane.xlu1 %959 }
 0x40a   :  { %v13340_v3 = vpop.eup %11253  ;;  %11259 = vpow2.f32 %v1345_v60 }
 0x40b   :  { %17347 = vst [vmem:[#allocation51_spill] sm:$0xff] %v13340_v3  ;;  %v1308_v19 = vpop.xlane.xlu0 %1307  ;;  %1379 = vadd.xlane.f32.xlu0 %v13340_v3 }
 0x40c   :  { %v13343_v35 = vpop.eup %11255  ;;  %v1325_v31 = vsub.f32 %v13159_v10, %v1308_v19  ;;  %v975_v10 = vsub.f32 %v13093_v27, %v13263_v39 }
 0x40d   :  { %17348 = vst [vmem:[#allocation52_spill] sm:$0xff] %v13343_v35  ;;  %v1310_v57 = vpop.xlane.xlu1 %1309  ;;  %1381 = vadd.xlane.f32.xlu1 %v13343_v35 }
 0x40e   :  { %v1355_v29 = vmul.f32 1.442695, %v1325_v31  ;;  %v1326_v4 = vsub.f32 %v13162_v55, %v1310_v57  ;;  %v976_v31 = vsub.f32 %v13096_v56, %v13268_v21  ;;  %v978_v21 = vsub.f32 %v13132_v17, %v13313_v46 }
 0x40f   :  { %v13348_v33 = vpop.xlane.xlu0 %969  ;;  %v980_v17 = vsub.f32 %v13120_v47, %v13296_v26  ;;  %v982_v47 = vsub.f32 %v13156_v20, %v13338_v58  ;;  %v984_v20 = vsub.f32 %v13144_v13, %v13326_v32 }
 0x410   :  { %11261 = vpow2.f32 %v1355_v29  ;;  %v1357_v15 = vmul.f32 1.442695, %v1326_v4  ;;  %v993_v4 = vmul.f32 1.442695, %v975_v10  ;;  %v995_v35 = vmul.f32 1.442695, %v976_v31 }
 0x411   :  { %v13350_v44 = vpop.xlane.xlu1 %971  ;;  %v999_v46 = vmul.f32 1.442695, %v978_v21  ;;  %v987_v32 = vsub.f32 %v13165_v41, %v13348_v33 }
 0x412   :  { %v13352_v60 = vpop.eup %11257  ;;  %11263 = vpow2.f32 %v1357_v15 }
 0x413   :  { %17349 = vst [vmem:[#allocation53_spill] sm:$0xff] %v13352_v60  ;;  %v1304_v3 = vpop.xlane.xlu0 %1303  ;;  %1375 = vadd.xlane.f32.xlu0 %v13352_v60 }
 0x414   :  { %v13355_v8 = vpop.eup %11259  ;;  %v1323_v19 = vsub.f32 %v13171_v59, %v1304_v3  ;;  %v977_v59 = vsub.f32 %v13129_v42, %v13308_v23  ;;  %v2137_v23 = vld [vmem:[#allocation2 + $0x1e0] sm:$0xff] }
 0x415   :  { %v1306_v55 = vpop.xlane.xlu1 %1305  ;;  %1377 = vadd.xlane.f32.xlu1 %v13355_v8 }
 0x416   :  { %v1351_v57 = vmul.f32 1.442695, %v1323_v19  ;;  %v1324_v29 = vsub.f32 %v13174_v52, %v1306_v55  ;;  %v979_v19 = vsub.f32 %v13117_v38, %v13294_v28  ;;  %v997_v55 = vmul.f32 1.442695, %v977_v59 }
 0x417   :  { %v966_v27 = vpop.xlane.xlu0 %965  ;;  %v981_v38 = vsub.f32 %v13153_v54, %v13336_v40  ;;  %v13396_v28 = vadd.f32 %v13276_v18, %v2137_v23  ;;  %v1003_v59 = vmul.f32 1.442695, %v980_v17  ;;  %v983_v54 = vsub.f32 %v13141_v43, %v13324_v61 }
 0x418   :  { %11265 = vpow2.f32 %v1351_v57  ;;  %v1353_v15 = vmul.f32 1.442695, %v1324_v29  ;;  %v2138_v57 = vld [vmem:[#allocation2 + $0x1e8] sm:$0xff]  ;;  %v1001_v29 = vmul.f32 1.442695, %v979_v19  ;;  %v2140_v19 = vld [vmem:[#allocation2 + $0x1f8] sm:$0xff]  ;;  %v985_v43 = vsub.f32 %v13177_v37, %v966_v27 }
 0x419   :  { %v968_v56 = vpop.xlane.xlu1 %967  ;;  %v13402_v26 = vadd.f32 %v13282_v12, %v2138_v57  ;;  %v1005_v18 = vmul.f32 1.442695, %v981_v38  ;;  %v1007_v12 = vmul.f32 1.442695, %v982_v47  ;;  %v13414_v58 = vadd.f32 %v13279_v50, %v2140_v19 }
 0x41a   :  { %v13364_v60 = vpop.eup %11261  ;;  %11267 = vpow2.f32 %v1353_v15  ;;  %v2139_v15 = vld [vmem:[#allocation2 + $0x1f0] sm:$0xff]  ;;  %v1009_v23 = vmul.f32 1.442695, %v983_v54  ;;  %v1011_v17 = vmul.f32 1.442695, %v984_v20  ;;  %v986_v13 = vsub.f32 %v13180_v7, %v968_v56 }
 0x41b   :  { %1387 = vadd.xlane.f32.xlu0 %v13364_v60  ;;  %11269 = vpow2.f32 %v993_v4  ;;  %v13376_v3 = vpop.xlane.xlu0 %1815  ;;  %v13408_v40 = vadd.f32 %v13273_v34, %v2139_v15  ;;  %v988_v57 = vsub.f32 %v13168_v2, %v13350_v44  ;;  %v1017_v38 = vmul.f32 1.442695, %v987_v32 }
 0x41c   :  { %v13367_v39 = vpop.eup %11263  ;;  %11271 = vpow2.f32 %v995_v35  ;;  %v1845_v44 = vsub.f32 %v13183_v0, %v13376_v3 }
 0x41d   :  { %1389 = vadd.xlane.f32.xlu1 %v13367_v39  ;;  %v13383_v35 = vpop.xlane.xlu1 %1817  ;;  %11273 = vpow2.f32 %v997_v55  ;;  %v1019_v15 = vmul.f32 1.442695, %v988_v57 }
 0x41e   :  { %11275 = vpow2.f32 %v999_v46  ;;  %v1013_v46 = vmul.f32 1.442695, %v985_v43 }
 0x41f   :  { %v1812_v4 = vpop.xlane.xlu0 %1811  ;;  %11277 = vpow2.f32 %v1001_v29  ;;  %v1015_v29 = vmul.f32 1.442695, %v986_v13 }
 0x420   :  { %11279 = vpow2.f32 %v1003_v59  ;;  %v1843_v41 = vsub.f32 %v13189_v9, %v1812_v4  ;;  %v1846_v4 = vsub.f32 %v13186_v11, %v13383_v35 }
 0x421   :  { %v1814_v21 = vpop.xlane.xlu1 %1813  ;;  %11281 = vpow2.f32 %v1005_v18  ;;  %v1863_v18 = vmul.f32 1.442695, %v1845_v44 }
 0x422   :  { %v13372_v52 = vpop.eup %11265  ;;  %11283 = vpow2.f32 %v1007_v12  ;;  %v1844_v59 = vsub.f32 %v13192_v6, %v1814_v21  ;;  %v1859_v19 = vmul.f32 1.442695, %v1843_v41  ;;  %v1865_v12 = vmul.f32 1.442695, %v1846_v4 }
 0x423   :  { %1383 = vadd.xlane.f32.xlu0 %v13372_v52  ;;  %v13416_v55 = vpop.xlane.xlu0 %1823  ;;  %11285 = vpow2.f32 %v1009_v23 }
 0x424   :  { %v13379_v10 = vpop.eup %11267  ;;  %11287 = vpow2.f32 %v1011_v17  ;;  %v1861_v6 = vmul.f32 1.442695, %v1844_v59  ;;  %v1849_v35 = vsub.f32 %v13195_v62, %v13416_v55 }
 0x425   :  { %1385 = vadd.xlane.f32.xlu1 %v13379_v10  ;;  %v13386_v42 = vpop.eup %11269  ;;  %v13420_v34 = vpop.xlane.xlu1 %1825  ;;  %11289 = vpow2.f32 %v1013_v46 }
 0x426   :  { %v13391_v31 = vpop.eup %11271  ;;  %11291 = vpow2.f32 %v1015_v29  ;;  %v1850_v13 = vsub.f32 %v13198_v5, %v13420_v34 }
 0x427   :  { %1025 = vadd.xlane.f32.xlu0 %v13386_v42  ;;  %v13423_v61 = vpop.eup %11273  ;;  %v1820_v37 = vpop.xlane.xlu0 %1819  ;;  %11293 = vpow2.f32 %v1017_v38 }
 0x428   :  { %v13427_v50 = vpop.eup %11275  ;;  %11295 = vpow2.f32 %v1019_v15  ;;  %v1847_v20 = vsub.f32 %v13201_v16, %v1820_v37  ;;  %v1871_v37 = vmul.f32 1.442695, %v1849_v35  ;;  %v1873_v29 = vmul.f32 1.442695, %v1850_v13 }
 0x429   :  { %1027 = vadd.xlane.f32.xlu1 %v13391_v31  ;;  %v13432_v27 = vpop.eup %11277  ;;  %v1822_v7 = vpop.xlane.xlu1 %1821  ;;  %11297 = vpow2.f32 %v1859_v19 }
 0x42a   :  { %v13437_v56 = vpop.eup %11279  ;;  %11299 = vpow2.f32 %v1861_v6  ;;  %v1848_v23 = vsub.f32 %v13204_v22, %v1822_v7  ;;  %v1867_v17 = vmul.f32 1.442695, %v1847_v20 }
 0x42b   :  { %2286 = vmax.xlane.f32.xlu0 %v13396_v28  ;;  %v13441_v33 = vpop.eup %11281  ;;  %v1832_v47 = vpop.xlane.xlu0 %1831  ;;  %11301 = vpow2.f32 %v1863_v18 }
 0x42c   :  { %v13445_v2 = vpop.eup %11283  ;;  %11303 = vpow2.f32 %v1865_v12  ;;  %v1869_v32 = vmul.f32 1.442695, %v1848_v23  ;;  %v1853_v34 = vsub.f32 %v13207_v25, %v1832_v47 }
 0x42d   :  { %2288 = vmax.xlane.f32.xlu1 %v13402_v26  ;;  %v1834_v54 = vpop.xlane.xlu1 %1833  ;;  %v13450_v9 = vpop.eup %11285  ;;  %11305 = vpow2.f32 %v1867_v17 }
 0x42e   :  { %v13455_v21 = vpop.eup %11287  ;;  %11307 = vpow2.f32 %v1869_v32  ;;  %v1854_v15 = vsub.f32 %v13210_v24, %v1834_v54  ;;  %v1879_v19 = vmul.f32 1.442695, %v1853_v34 }
 0x42f   :  { %2290 = vmax.xlane.f32.xlu0 %v13408_v40  ;;  %v1828_v0 = vpop.xlane.xlu0 %1827  ;;  %v13459_v3 = vpop.eup %11289  ;;  %11309 = vpow2.f32 %v1871_v37 }
 0x430   :  { %v13463_v11 = vpop.eup %11291  ;;  %v1851_v57 = vsub.f32 %v13213_v14, %v1828_v0  ;;  %11311 = vpow2.f32 %v1873_v29  ;;  %v1881_v47 = vmul.f32 1.442695, %v1854_v15  ;;  %v17352_v29 = vld [vmem:[#allocation12_spill] sm:$0xff] }
 0x431   :  { %2292 = vmax.xlane.f32.xlu1 %v13414_v58  ;;  %v1830_v43 = vpop.xlane.xlu1 %1829  ;;  %v13468_v16 = vpop.eup %11293 }
 0x432   :  { %v13473_v46 = vpop.eup %11295  ;;  %v1852_v7 = vsub.f32 %v13216_v30, %v1830_v43  ;;  %v1875_v38 = vmul.f32 1.442695, %v1851_v57  ;;  %v17351_v57 = vld [vmem:[#allocation10_spill] sm:$0xff] }
 0x433   :  { %1029 = vadd.xlane.f32.xlu0 %v13423_v61  ;;  %v1840_v22 = vpop.xlane.xlu0 %1839  ;;  %v13477_v55 = vpop.eup %11297 }
 0x434   :  { %v13481_v5 = vpop.eup %11299  ;;  %v1877_v59 = vmul.f32 1.442695, %v1852_v7  ;;  %11313 = vpow2.f32 %v1875_v38  ;;  %v1857_v54 = vsub.f32 %v13219_v36, %v1840_v22 }
 0x435   :  { %1031 = vadd.xlane.f32.xlu1 %v13427_v50  ;;  %v1842_v62 = vpop.xlane.xlu1 %1841  ;;  %v13485_v14 = vpop.eup %11301 }
 0x436   :  { %v13489_v30 = vpop.eup %11303  ;;  %11315 = vpow2.f32 %v1877_v59 }
 0x437   :  { %1033 = vadd.xlane.f32.xlu0 %v13432_v27  ;;  %v1836_v41 = vpop.xlane.xlu0 %1835  ;;  %v13493_v25 = vpop.eup %11305  ;;  %11317 = vpow2.f32 %v1879_v19 }
 0x438   :  { %v1855_v4 = vsub.f32 %v13225_v63, %v1836_v41  ;;  %v13497_v24 = vpop.eup %11307  ;;  %11319 = vpow2.f32 %v1881_v47  ;;  %v17350_v63 = vld [vmem:[#allocation11_spill] sm:$0xff]  ;;  %v17353_v41 = vld [vmem:[#allocation8_spill] sm:$0xff] }
 0x439   :  { %1035 = vadd.xlane.f32.xlu1 %v13437_v56  ;;  %v1838_v44 = vpop.xlane.xlu1 %1837  ;;  %v13501_v20 = vpop.eup %11309  ;;  %v1858_v0 = vsub.f32 %v17350_v63, %v1842_v62 }
 0x43a   :  { %v1856_v6 = vsub.f32 %v13228_v1, %v1838_v44  ;;  %v1883_v18 = vmul.f32 1.442695, %v1855_v4  ;;  %v13505_v23 = vpop.eup %11311  ;;  %v1887_v1 = vmul.f32 1.442695, %v1857_v54  ;;  %v17354_v44 = vld [vmem:[#allocation14_spill] sm:$0xff] }
 0x43b   :  { %1037 = vadd.xlane.f32.xlu0 %v13441_v33  ;;  %v1889_v36 = vmul.f32 1.442695, %v1858_v0 }
 0x43c   :  { %v1885_v12 = vmul.f32 1.442695, %v1856_v6  ;;  %11321 = vpow2.f32 %v1883_v18 }
 0x43d   :  { %1039 = vadd.xlane.f32.xlu1 %v13445_v2 }
 0x43e   :  { %v13508_v43 = vpop.eup %11313  ;;  %11323 = vpow2.f32 %v1885_v12 }
 0x43f   :  { %1041 = vadd.xlane.f32.xlu0 %v13450_v9  ;;  %11325 = vpow2.f32 %v1887_v1 }
 0x440   :  { %v13511_v17 = vpop.eup %11315  ;;  %11327 = vpow2.f32 %v1889_v36  ;;  %v17355_v36 = vld [vmem:[#allocation15_spill] sm:$0xff] }
 0x441   :  { %1043 = vadd.xlane.f32.xlu1 %v13455_v21  ;;  %v13514_v32 = vpop.eup %11317 }
 0x442   :  { %v13517_v37 = vpop.eup %11319 }
 0x443   :  { %1045 = vadd.xlane.f32.xlu0 %v13459_v3 }
 0x445   :  { %1047 = vadd.xlane.f32.xlu1 %v13463_v11 }
 0x446   :  { %v13522_v38 = vpop.eup %11321 }
 0x447   :  { %1049 = vadd.xlane.f32.xlu0 %v13468_v16 }
 0x448   :  { %v13527_v47 = vpop.eup %11323 }
 0x449   :  { %1051 = vadd.xlane.f32.xlu1 %v13473_v46  ;;  %v13530_v63 = vpop.eup %11325 }
 0x44a   :  { %v13533_v1 = vpop.eup %11327 }
 0x44b   :  { %1891 = vadd.xlane.f32.xlu0 %v13477_v55 }
 0x44d   :  { %1893 = vadd.xlane.f32.xlu1 %v13481_v5 }
 0x44f   :  { %1895 = vadd.xlane.f32.xlu0 %v13485_v14 }
 0x451   :  { %1897 = vadd.xlane.f32.xlu1 %v13489_v30 }
 0x453   :  { %1899 = vadd.xlane.f32.xlu0 %v13493_v25 }
 0x455   :  { %1901 = vadd.xlane.f32.xlu1 %v13497_v24 }
 0x457   :  { %1903 = vadd.xlane.f32.xlu0 %v13501_v20 }
 0x459   :  { %1905 = vadd.xlane.f32.xlu1 %v13505_v23 }
 0x45b   :  { %1907 = vadd.xlane.f32.xlu0 %v13508_v43  ;;  %v2267_v35 = vpop.xlane.xlu0 %2266 }
 0x45c   :  { %v2296_v62 = vsub.f32 %v17351_v57, %v2267_v35 }
 0x45d   :  { %1909 = vadd.xlane.f32.xlu1 %v13511_v17  ;;  %v2269_v13 = vpop.xlane.xlu1 %2268 }
 0x45e   :  { %v2297_v15 = vsub.f32 %v17353_v41, %v2269_v13  ;;  %v2314_v6 = vmul.f32 1.442695, %v2296_v62  ;;  %v17356_v13 = vld [vmem:[#allocation17_spill] sm:$0xff]  ;;  %v17357_v62 = vld [vmem:[#allocation16_spill] sm:$0xff] }
 0x45f   :  { %1911 = vadd.xlane.f32.xlu0 %v13514_v32  ;;  %v2263_v22 = vpop.xlane.xlu0 %2262 }
 0x460   :  { %v2294_v7 = vsub.f32 %v17352_v29, %v2263_v22  ;;  %v2316_v0 = vmul.f32 1.442695, %v2297_v15 }
 0x461   :  { %1913 = vadd.xlane.f32.xlu1 %v13517_v37  ;;  %v2265_v34 = vpop.xlane.xlu1 %2264 }
 0x462   :  { %v2310_v59 = vmul.f32 1.442695, %v2294_v7  ;;  %v2295_v19 = vsub.f32 %v17354_v44, %v2265_v34 }
 0x463   :  { %1915 = vadd.xlane.f32.xlu0 %v13522_v38  ;;  %v2275_v4 = vpop.xlane.xlu0 %2274 }
 0x464   :  { %11329 = vpow2.f32 %v2310_v59  ;;  %v2312_v54 = vmul.f32 1.442695, %v2295_v19  ;;  %v2300_v35 = vsub.f32 %v17355_v36, %v2275_v4 }
 0x465   :  { %1917 = vadd.xlane.f32.xlu1 %v13527_v47  ;;  %v2277_v18 = vpop.xlane.xlu1 %2276 }
 0x466   :  { %11331 = vpow2.f32 %v2312_v54  ;;  %v2301_v29 = vsub.f32 %v17357_v62, %v2277_v18  ;;  %v2322_v15 = vmul.f32 1.442695, %v2300_v35  ;;  %v17359_v35 = vld [vmem:[#allocation18_spill] sm:$0xff] }
 0x467   :  { %1919 = vadd.xlane.f32.xlu0 %v13530_v63  ;;  %v2271_v12 = vpop.xlane.xlu0 %2270  ;;  %11333 = vpow2.f32 %v2314_v6 }
 0x468   :  { %v2298_v22 = vsub.f32 %v17356_v13, %v2271_v12  ;;  %11335 = vpow2.f32 %v2316_v0  ;;  %v2324_v6 = vmul.f32 1.442695, %v2301_v29  ;;  %v17358_v0 = vld [vmem:[#allocation19_spill] sm:$0xff] }
 0x469   :  { %1921 = vadd.xlane.f32.xlu1 %v13533_v1  ;;  %v2273_v57 = vpop.xlane.xlu1 %2272 }
 0x46a   :  { %v2318_v7 = vmul.f32 1.442695, %v2298_v22  ;;  %v2299_v34 = vsub.f32 %v13252_v45, %v2273_v57  ;;  %v17360_v57 = vld [vmem:[#allocation43_spill] sm:$0xff] }
 0x46b   :  { %v2283_v41 = vpop.xlane.xlu0 %2282 }
 0x46c   :  { %11337 = vpow2.f32 %v2318_v7  ;;  %v2320_v59 = vmul.f32 1.442695, %v2299_v34  ;;  %v2304_v18 = vsub.f32 %v13256_v48, %v2283_v41 }
 0x46d   :  { %v2285_v44 = vpop.xlane.xlu1 %2284 }
 0x46e   :  { %v13540_v19 = vpop.eup %11329  ;;  %11339 = vpow2.f32 %v2320_v59  ;;  %v2305_v13 = vsub.f32 %v17359_v35, %v2285_v44  ;;  %v2330_v7 = vmul.f32 1.442695, %v2304_v18 }
 0x46f   :  { %2342 = vadd.xlane.f32.xlu0 %v13540_v19  ;;  %v2279_v4 = vpop.xlane.xlu0 %2278  ;;  %11341 = vpow2.f32 %v2322_v15 }
 0x470   :  { %v13543_v54 = vpop.eup %11331  ;;  %v2302_v12 = vsub.f32 %v17358_v0, %v2279_v4  ;;  %11343 = vpow2.f32 %v2324_v6  ;;  %v2332_v41 = vmul.f32 1.442695, %v2305_v13 }
 0x471   :  { %2344 = vadd.xlane.f32.xlu1 %v13543_v54  ;;  %v2281_v45 = vpop.xlane.xlu1 %2280  ;;  %v13548_v36 = vpop.eup %11333 }
 0x472   :  { %v2326_v22 = vmul.f32 1.442695, %v2302_v12  ;;  %v2303_v62 = vsub.f32 %v17360_v57, %v2281_v45  ;;  %v13553_v29 = vpop.eup %11335 }
 0x473   :  { %2346 = vadd.xlane.f32.xlu0 %v13548_v36  ;;  %17361 = vst [vmem:[#allocation11_spill] sm:$0xff] %v13553_v29 }
 0x474   :  { %11345 = vpow2.f32 %v2326_v22  ;;  %v2328_v48 = vmul.f32 1.442695, %v2303_v62 }
 0x475   :  { %2348 = vadd.xlane.f32.xlu1 %v13553_v29 }
 0x476   :  { %v13556_v34 = vpop.eup %11337  ;;  %11347 = vpow2.f32 %v2328_v48 }
 0x477   :  { %17362 = vst [vmem:[#allocation10_spill] sm:$0xff] %v13556_v34  ;;  %2350 = vadd.xlane.f32.xlu0 %v13556_v34  ;;  %11349 = vpow2.f32 %v2330_v7  ;;  %v17371_v34 = vld [vmem:[#allocation13_spill] sm:$0xff] }
 0x478   :  { %v13559_v15 = vpop.eup %11339  ;;  %11351 = vpow2.f32 %v2332_v41  ;;  %v1364_v6 = vpop.xlane.xlu0 %1363 }
 0x479   :  { %17363 = vst [vmem:[#allocation12_spill] sm:$0xff] %v13559_v15  ;;  %2352 = vadd.xlane.f32.xlu1 %v13559_v15  ;;  %v13562_v59 = vpop.eup %11341 }
 0x47a   :  { %17364 = vst [vmem:[#allocation8_spill] sm:$0xff] %v13562_v59  ;;  %v13565_v44 = vpop.eup %11343  ;;  %v1366_v4 = vpop.xlane.xlu1 %1365 }
 0x47b   :  { %2354 = vadd.xlane.f32.xlu0 %v13562_v59  ;;  %17365 = vst [vmem:[#allocation14_spill] sm:$0xff] %v13565_v44  ;;  %11353 = vrcp.f32 %v1366_v4 }
 0x47d   :  { %2356 = vadd.xlane.f32.xlu1 %v13565_v44 }
 0x47e   :  { %v13568_v18 = vpop.eup %11345 }
 0x47f   :  { %17366 = vst [vmem:[#allocation15_spill] sm:$0xff] %v13568_v18  ;;  %2358 = vadd.xlane.f32.xlu0 %v13568_v18 }
 0x480   :  { %v13571_v0 = vpop.eup %11347  ;;  %v1360_v12 = vpop.xlane.xlu0 %1359 }
 0x481   :  { %17367 = vst [vmem:[#allocation17_spill] sm:$0xff] %v13571_v0  ;;  %11355 = vrcp.f32 %v1360_v12  ;;  %2360 = vadd.xlane.f32.xlu1 %v13571_v0  ;;  %v13574_v45 = vpop.eup %11349  ;;  %v17370_v0 = vld [vmem:[#allocation44_spill] sm:$0xff] }
 0x482   :  { %17368 = vst [vmem:[#allocation16_spill] sm:$0xff] %v13574_v45  ;;  %11357 = vrcp.f32 %v1364_v6  ;;  %v1362_v35 = vpop.xlane.xlu1 %1361  ;;  %v13577_v13 = vpop.eup %11351 }
 0x483   :  { %11359 = vrcp.f32 %v1362_v35  ;;  %2362 = vadd.xlane.f32.xlu0 %v13574_v45  ;;  %17369 = vst [vmem:[#allocation19_spill] sm:$0xff] %v13577_v13 }
 0x484   :  { %v13580_v22 = vpop.xlane.xlu0 %1021 }
 0x485   :  { %2364 = vadd.xlane.f32.xlu1 %v13577_v13  ;;  %v11354_v62 = vpop.eup %11353 }
 0x486   :  { %v13582_v57 = vpop.xlane.xlu1 %1023  ;;  %v1410_v12 = vmul.f32 %v11354_v62, %v13289_v51  ;;  %v17372_v51 = vld [vmem:[#allocation20_spill] sm:$0xff] }
 0x488   :  { %v1372_v41 = vpop.xlane.xlu0 %1371 }
 0x48a   :  { %v1374_v6 = vpop.xlane.xlu1 %1373 }
 0x48b   :  { %v11356_v7 = vpop.eup %11355  ;;  %11361 = vrcp.f32 %v1374_v6 }
 0x48c   :  { %v11358_v48 = vpop.eup %11357  ;;  %v1407_v35 = vmul.f32 %v11356_v7, %v13298_v49  ;;  %v17373_v49 = vld [vmem:[#allocation21_spill] sm:$0xff] }
 0x48d   :  { %v11360_v4 = vpop.eup %11359  ;;  %v1409_v18 = vmul.f32 %v11358_v48, %v17370_v0  ;;  %v17377_v48 = vld [vmem:[#allocation50_spill] sm:$0xff] }
 0x48e   :  { %v1408_v45 = vmul.f32 %v11360_v4, %v13301_v53  ;;  %v17378_v4 = vld [vmem:[#allocation47_spill] sm:$0xff] }
 0x48f   :  { %v1424_v59 = vpack.c.bf16 %v1410_v12, %v1409_v18 }
 0x490   :  { %v1368_v13 = vpop.xlane.xlu0 %1367  ;;  %v1423_v44 = vpack.c.bf16 %v1408_v45, %v1407_v35 }
 0x491   :  { %11363 = vrcp.f32 %v1368_v13  ;;  %v17374_v13 = vld [vmem:[#allocation22_spill] sm:$0xff] }
 0x492   :  { %11365 = vrcp.f32 %v1372_v41  ;;  %v1370_v15 = vpop.xlane.xlu1 %1369  ;;  %9754 = vmatprep.mubr.bf16.mxu1 %v1423_v44  ;;  %v17376_v44 = vld [vmem:[#allocation49_spill] sm:$0xff] }
 0x493   :  { %11367 = vrcp.f32 %v1370_v15  ;;  %9755 = vmatmul.mubr.bf16.vlgmr.msra.gmra.mrb[32].mxu1 %v1424_v59  ;;  %v17375_v15 = vld [vmem:[#allocation48_spill] sm:$0xff] }
 0x494   :  { %9771 = vmatpush3.bf16.msra.mxu1 %v17371_v34 }
 0x495   :  { %9772 = vmatprep.subr.bf16.mxu1 %v17372_v51  ;;  %v11362_v53 = vpop.eup %11361 }
 0x496   :  { %v1414_v59 = vmul.f32 %v11362_v53, %v17375_v15  ;;  %v17380_v53 = vld [vmem:[#allocation24_spill] sm:$0xff] }
 0x498   :  { %9773 = vmatpush3.bf16.msra.mxu1 %v17372_v51  ;;  %v1380_v7 = vpop.xlane.xlu0 %1379  ;;  %v17379_v51 = vld [vmem:[#allocation23_spill] sm:$0xff] }
 0x499   :  { %9774 = vmatprep.subr.bf16.mxu1 %v17373_v49 }
 0x49a   :  { %v1382_v45 = vpop.xlane.xlu1 %1381 }
 0x49b   :  { %v11364_v0 = vpop.eup %11363  ;;  %11369 = vrcp.f32 %v1382_v45 }
 0x49c   :  { %v11366_v62 = vpop.eup %11365  ;;  %9775 = vmatpush3.bf16.msra.mxu1 %v17373_v49  ;;  %v1411_v34 = vmul.f32 %v11364_v0, %v17376_v44  ;;  %v17381_v0 = vld [vmem:[#allocation29_spill] sm:$0xff] }
 0x49d   :  { %v11368_v18 = vpop.eup %11367  ;;  %9776 = vmatprep.subr.bf16.mxu1 %v17374_v13  ;;  %v1413_v12 = vmul.f32 %v11366_v62, %v17378_v4  ;;  %v17385_v4 = vld [vmem:[#allocation51_spill] sm:$0xff] }
 0x49e   :  { %v1412_v41 = vmul.f32 %v11368_v18, %v17377_v48 }
 0x49f   :  { %v1426_v49 = vpack.c.bf16 %v1414_v59, %v1413_v12  ;;  %v17382_v59 = vld [vmem:[#allocation27_spill] sm:$0xff] }
 0x4a0   :  { %9777 = vmatpush3.bf16.msra.mxu1 %v17374_v13  ;;  %v1376_v6 = vpop.xlane.xlu0 %1375  ;;  %v1425_v35 = vpack.c.bf16 %v1412_v41, %v1411_v34  ;;  %v17384_v34 = vld [vmem:[#allocation53_spill] sm:$0xff] }
 0x4a1   :  { %9778 = vmatprep.subr.bf16.mxu1 %v17379_v51  ;;  %11371 = vrcp.f32 %v1376_v6 }
 0x4a2   :  { %11373 = vrcp.f32 %v1380_v7  ;;  %v1378_v29 = vpop.xlane.xlu1 %1377  ;;  %9758 = vmatprep.mubr.bf16.mxu1 %v1425_v35 }
 0x4a3   :  { %11375 = vrcp.f32 %v1378_v29  ;;  %9759 = vmatmul.mubr.bf16.gmra.mrb[36].mxu1 %v1426_v49  ;;  %v17383_v29 = vld [vmem:[#allocation52_spill] sm:$0xff] }
 0x4a4   :  { %9779 = vmatpush3.bf16.msra.mxu1 %v17379_v51  ;;  %11377 = vrcp.f32 %v13580_v22  ;;  %v17386_v51 = vld [vmem:[#allocation25_spill] sm:$0xff] }
 0x4a5   :  { %9780 = vmatprep.subr.bf16.mxu1 %v17380_v53  ;;  %v11370_v62 = vpop.eup %11369  ;;  %11379 = vrcp.f32 %v13582_v57 }
 0x4a6   :  { %v1418_v44 = vmul.f32 %v11370_v62, %v17383_v29 }
 0x4a8   :  { %9781 = vmatpush3.bf16.msra.mxu1 %v17380_v53  ;;  %v1388_v13 = vpop.xlane.xlu0 %1387 }
 0x4a9   :  { %9782 = vmatprep.subr.bf16.mxu1 %v17381_v0 }
 0x4aa   :  { %v1390_v7 = vpop.xlane.xlu1 %1389 }
 0x4ab   :  { %v11372_v18 = vpop.eup %11371  ;;  %11381 = vrcp.f32 %v1390_v7 }
 0x4ac   :  { %v11374_v45 = vpop.eup %11373  ;;  %9783 = vmatpush3.bf16.msra.mxu1 %v17381_v0  ;;  %v1415_v48 = vmul.f32 %v11372_v18, %v17384_v34 }
 0x4ad   :  { %v11376_v15 = vpop.eup %11375  ;;  %9784 = vmatprep.subr.bf16.mxu1 %v17382_v59  ;;  %v1417_v12 = vmul.f32 %v11374_v45, %v17385_v4 }
 0x4ae   :  { %v1416_v41 = vmul.f32 %v11376_v15, %v13355_v8  ;;  %v11378_v0 = vpop.eup %11377 }
 0x4af   :  { %v1428_v49 = vpack.c.bf16 %v1418_v44, %v1417_v12  ;;  %v11380_v62 = vpop.eup %11379 }
 0x4b0   :  { %9785 = vmatpush3.bf16.msra.mxu1 %v17382_v59  ;;  %v1384_v6 = vpop.xlane.xlu0 %1383  ;;  %v1427_v35 = vpack.c.bf16 %v1416_v41, %v1415_v48 }
 0x4b1   :  { %9834 = vmatprep.subr.bf16.mxu1 %v17386_v51  ;;  %11383 = vrcp.f32 %v1384_v6 }
 0x4b2   :  { %11385 = vrcp.f32 %v1388_v13  ;;  %v1386_v53 = vpop.xlane.xlu1 %1385  ;;  %9762 = vmatprep.mubr.bf16.mxu1 %v1427_v35  ;;  %v17387_v35 = vld [vmem:[#allocation46_spill] sm:$0xff] }
 0x4b3   :  { %11387 = vrcp.f32 %v1386_v53  ;;  %9763 = vmatmul.mubr.bf16.gmra.mrb[40].mxu1 %v1428_v49  ;;  %v1070_v49 = vmul.f32 %v11380_v62, %v17387_v35 }
 0x4b4   :  { %v1026_v22 = vpop.xlane.xlu0 %1025 }
 0x4b5   :  { %v11382_v45 = vpop.eup %11381 }
 0x4b6   :  { %v1028_v8 = vpop.xlane.xlu1 %1027  ;;  %v1422_v4 = vmul.f32 %v11382_v45, %v13367_v39 }
 0x4b7   :  { %11389 = vrcp.f32 %v1028_v8 }
 0x4b8   :  { %v2287_v57 = vpop.xlane.xlu0 %2286  ;;  %11391 = vrcp.f32 %v1026_v22 }
 0x4b9   :  { %v2306_v18 = vsub.f32 %v13396_v28, %v2287_v57 }
 0x4ba   :  { %v2289_v15 = vpop.xlane.xlu1 %2288 }
 0x4bb   :  { %v11384_v7 = vpop.eup %11383  ;;  %v2334_v59 = vmul.f32 1.442695, %v2306_v18  ;;  %v2307_v29 = vsub.f32 %v13402_v26, %v2289_v15  ;;  %v17388_v18 = vld [vmem:[#allocation45_spill] sm:$0xff] }
 0x4bc   :  { %v11386_v13 = vpop.eup %11385  ;;  %v2291_v44 = vpop.xlane.xlu0 %2290  ;;  %v1419_v6 = vmul.f32 %v11384_v7, %v13372_v52  ;;  %v1069_v15 = vmul.f32 %v11378_v0, %v17388_v18 }
 0x4bd   :  { %v11388_v34 = vpop.eup %11387  ;;  %11393 = vpow2.f32 %v2334_v59  ;;  %v2336_v48 = vmul.f32 1.442695, %v2307_v29  ;;  %v2308_v41 = vsub.f32 %v13408_v40, %v2291_v44  ;;  %v1421_v22 = vmul.f32 %v11386_v13, %v13364_v60 }
 0x4be   :  { %v2293_v12 = vpop.xlane.xlu1 %2292  ;;  %v1420_v28 = vmul.f32 %v11388_v34, %v13379_v10  ;;  %v1085_v10 = vpack.c.bf16 %v1070_v49, %v1069_v15 }
 0x4bf   :  { %11395 = vpow2.f32 %v2336_v48  ;;  %v2338_v53 = vmul.f32 1.442695, %v2308_v41  ;;  %v2309_v26 = vsub.f32 %v13414_v58, %v2293_v12  ;;  %v1430_v39 = vpack.c.bf16 %v1422_v4, %v1421_v22  ;;  %v17389_v4 = vld [vmem:[#allocation26_spill] sm:$0xff] }
 0x4c0   :  { %v1030_v8 = vpop.xlane.xlu0 %1029  ;;  %v1429_v57 = vpack.c.bf16 %v1420_v28, %v1419_v6 }
 0x4c1   :  { %11397 = vpow2.f32 %v2338_v53  ;;  %v2340_v40 = vmul.f32 1.442695, %v2309_v26  ;;  %v11390_v45 = vpop.eup %11389  ;;  %v17390_v26 = vld [vmem:[#allocation28_spill] sm:$0xff] }
 0x4c2   :  { %11399 = vrcp.f32 %v1030_v8  ;;  %v1032_v52 = vpop.xlane.xlu1 %1031  ;;  %9766 = vmatprep.mubr.bf16.mxu1 %v1429_v57  ;;  %v11392_v62 = vpop.eup %11391  ;;  %v1072_v60 = vmul.f32 %v11390_v45, %v13391_v31 }
 0x4c3   :  { %11401 = vpow2.f32 %v2340_v40  ;;  %9767 = vmatmul.mubr.bf16.gmra.mrb[44].mxu1 %v1430_v39  ;;  %v1071_v0 = vmul.f32 %v11392_v62, %v13386_v42  ;;  %v17391_v39 = vld [vmem:[#allocation30_spill] sm:$0xff] }
 0x4c4   :  { %11403 = vrcp.f32 %v1032_v52  ;;  %9786 = vmatprep.mubr.bf16.mxu1 %v1085_v10  ;;  %v1034_v58 = vpop.xlane.xlu0 %1033 }
 0x4c5   :  { %11405 = vrcp.f32 %v1034_v58  ;;  %v1086_v44 = vpack.c.bf16 %v1072_v60, %v1071_v0  ;;  %v17392_v60 = vld [vmem:[#allocation31_spill] sm:$0xff] }
 0x4c6   :  { %v1036_v7 = vpop.xlane.xlu1 %1035 }
 0x4c7   :  { %v13625_v59 = vpop.eup %11393  ;;  %11407 = vrcp.f32 %v1036_v7 }
 0x4c8   :  { %2366 = vadd.xlane.f32.xlu0 %v13625_v59  ;;  %v1038_v29 = vpop.xlane.xlu0 %1037 }
 0x4c9   :  { %v13629_v13 = vpop.eup %11395  ;;  %11409 = vrcp.f32 %v1038_v29 }
 0x4ca   :  { %2368 = vadd.xlane.f32.xlu1 %v13629_v13  ;;  %v1040_v34 = vpop.xlane.xlu1 %1039 }
 0x4cb   :  { %v13632_v48 = vpop.eup %11397  ;;  %11411 = vrcp.f32 %v1040_v34  ;;  %9787 = vmatmul.mubr.bf16.vlgmr.msra.gmra.mrb[32].mxu1 %v1086_v44 }
 0x4cc   :  { %v11400_v31 = vpop.eup %11399  ;;  %9835 = vmatpush3.bf16.msra.mxu1 %v17386_v51  ;;  %2370 = vadd.xlane.f32.xlu0 %v13632_v48  ;;  %v1042_v42 = vpop.xlane.xlu0 %1041 }
 0x4cd   :  { %v13636_v41 = vpop.eup %11401  ;;  %9836 = vmatprep.subr.bf16.mxu1 %v17389_v4  ;;  %11413 = vrcp.f32 %v1042_v42  ;;  %v1073_v35 = vmul.f32 %v11400_v31, %v13423_v61  ;;  %v17393_v31 = vld [vmem:[#allocation32_spill] sm:$0xff] }
 0x4ce   :  { %v11404_v12 = vpop.eup %11403  ;;  %2372 = vadd.xlane.f32.xlu1 %v13636_v41  ;;  %v1044_v6 = vpop.xlane.xlu1 %1043 }
 0x4cf   :  { %v11406_v28 = vpop.eup %11405  ;;  %11415 = vrcp.f32 %v1044_v6  ;;  %v1074_v49 = vmul.f32 %v11404_v12, %v13427_v50 }
 0x4d0   :  { %9837 = vmatpush3.bf16.msra.mxu1 %v17389_v4  ;;  %v1046_v51 = vpop.xlane.xlu0 %1045  ;;  %v1075_v57 = vmul.f32 %v11406_v28, %v13432_v27 }
 0x4d1   :  { %v11408_v53 = vpop.eup %11407  ;;  %9838 = vmatprep.subr.bf16.mxu1 %v17390_v26  ;;  %11417 = vrcp.f32 %v1046_v51  ;;  %v1087_v22 = vpack.c.bf16 %v1074_v49, %v1073_v35  ;;  %v17394_v35 = vld [vmem:[#allocation33_spill] sm:$0xff] }
 0x4d2   :  { %v1048_v8 = vpop.xlane.xlu1 %1047  ;;  %v1076_v18 = vmul.f32 %v11408_v53, %v13437_v56 }
 0x4d3   :  { %v11410_v15 = vpop.eup %11409  ;;  %11419 = vrcp.f32 %v1048_v8  ;;  %9790 = vmatprep.mubr.bf16.mxu1 %v1087_v22  ;;  %v17395_v8 = vld [vmem:[#allocation34_spill] sm:$0xff] }
 0x4d4   :  { %9839 = vmatpush3.bf16.msra.mxu1 %v17390_v26  ;;  %v1050_v61 = vpop.xlane.xlu0 %1049  ;;  %v1088_v50 = vpack.c.bf16 %v1076_v18, %v1075_v57  ;;  %v1077_v52 = vmul.f32 %v11410_v15, %v13441_v33 }
 0x4d5   :  { %v11412_v40 = vpop.eup %11411  ;;  %9840 = vmatprep.subr.bf16.mxu1 %v17391_v39  ;;  %11421 = vrcp.f32 %v1050_v61 }
 0x4d6   :  { %v1052_v45 = vpop.xlane.xlu1 %1051  ;;  %9791 = vmatmul.mubr.bf16.gmra.mrb[36].mxu1 %v1088_v50  ;;  %v1078_v10 = vmul.f32 %v11412_v40, %v13445_v2  ;;  %v17396_v40 = vld [vmem:[#allocation35_spill] sm:$0xff] }
 0x4d7   :  { %v11414_v27 = vpop.eup %11413  ;;  %11423 = vrcp.f32 %v1052_v45 }
 0x4d8   :  { %9841 = vmatpush3.bf16.msra.mxu1 %v17391_v39  ;;  %v1892_v56 = vpop.xlane.xlu0 %1891  ;;  %v1089_v62 = vpack.c.bf16 %v1078_v10, %v1077_v52  ;;  %v1079_v0 = vmul.f32 %v11414_v27, %v13450_v9 }
 0x4d9   :  { %v11416_v58 = vpop.eup %11415  ;;  %9842 = vmatprep.subr.bf16.mxu1 %v17392_v60  ;;  %11425 = vrcp.f32 %v1892_v56 }
 0x4da   :  { %v1894_v7 = vpop.xlane.xlu1 %1893  ;;  %9794 = vmatprep.mubr.bf16.mxu1 %v1089_v62  ;;  %v1080_v29 = vmul.f32 %v11416_v58, %v13455_v21 }
 0x4db   :  { %v11418_v44 = vpop.eup %11417  ;;  %11427 = vrcp.f32 %v1894_v7 }
 0x4dc   :  { %9843 = vmatpush3.bf16.msra.mxu1 %v17392_v60  ;;  %v1896_v33 = vpop.xlane.xlu0 %1895  ;;  %v1090_v2 = vpack.c.bf16 %v1080_v29, %v1079_v0  ;;  %v1081_v4 = vmul.f32 %v11418_v44, %v13459_v3 }
 0x4dd   :  { %v11420_v34 = vpop.eup %11419  ;;  %9844 = vmatprep.subr.bf16.mxu1 %v17393_v31  ;;  %11429 = vrcp.f32 %v1896_v33 }
 0x4de   :  { %v1898_v42 = vpop.xlane.xlu1 %1897  ;;  %9795 = vmatmul.mubr.bf16.gmra.mrb[40].mxu1 %v1090_v2  ;;  %v1082_v12 = vmul.f32 %v11420_v34, %v13463_v11 }
 0x4df   :  { %v11422_v6 = vpop.eup %11421  ;;  %11431 = vrcp.f32 %v1898_v42 }
 0x4e0   :  { %9845 = vmatpush3.bf16.msra.mxu1 %v17393_v31  ;;  %v1900_v9 = vpop.xlane.xlu0 %1899  ;;  %v1091_v21 = vpack.c.bf16 %v1082_v12, %v1081_v4  ;;  %v1083_v51 = vmul.f32 %v11422_v6, %v13468_v16 }
 0x4e1   :  { %v11424_v28 = vpop.eup %11423  ;;  %9846 = vmatprep.subr.bf16.mxu1 %v17394_v35  ;;  %11433 = vrcp.f32 %v1900_v9 }
 0x4e2   :  { %v1902_v49 = vpop.xlane.xlu1 %1901  ;;  %9798 = vmatprep.mubr.bf16.mxu1 %v1091_v21  ;;  %v1084_v53 = vmul.f32 %v11424_v28, %v13473_v46 }
 0x4e3   :  { %v11426_v26 = vpop.eup %11425  ;;  %11435 = vrcp.f32 %v1902_v49  ;;  %v17400_v49 = vld [vmem:[#allocation39_spill] sm:$0xff] }
 0x4e4   :  { %9847 = vmatpush3.bf16.msra.mxu1 %v17394_v35  ;;  %v1904_v3 = vpop.xlane.xlu0 %1903  ;;  %v1092_v11 = vpack.c.bf16 %v1084_v53, %v1083_v51  ;;  %v1939_v18 = vmul.f32 %v11426_v26, %v13477_v55 }
 0x4e5   :  { %v11428_v22 = vpop.eup %11427  ;;  %9848 = vmatprep.subr.bf16.mxu1 %v17395_v8  ;;  %11437 = vrcp.f32 %v1904_v3 }
 0x4e6   :  { %v1906_v57 = vpop.xlane.xlu1 %1905  ;;  %9799 = vmatmul.mubr.bf16.gmra.mrb[44].mxu1 %v1092_v11  ;;  %v1940_v15 = vmul.f32 %v11428_v22, %v13481_v5 }
 0x4e7   :  { %v11430_v61 = vpop.eup %11429  ;;  %11439 = vrcp.f32 %v1906_v57 }
 0x4e8   :  { %9849 = vmatpush3.bf16.msra.mxu1 %v17395_v8  ;;  %v1908_v16 = vpop.xlane.xlu0 %1907  ;;  %v1955_v46 = vpack.c.bf16 %v1940_v15, %v1939_v18  ;;  %v1941_v39 = vmul.f32 %v11430_v61, %v13485_v14  ;;  %v17397_v14 = vld [vmem:[#allocation36_spill] sm:$0xff] }
 0x4e9   :  { %v11432_v50 = vpop.eup %11431  ;;  %9898 = vmatprep.subr.bf16.mxu1 %v17396_v40  ;;  %11441 = vrcp.f32 %v1908_v16 }
 0x4ea   :  { %v1942_v45 = vmul.f32 %v11432_v50, %v13489_v30  ;;  %v1910_v52 = vpop.xlane.xlu1 %1909  ;;  %9850 = vmatprep.mubr.bf16.mxu1 %v1955_v46  ;;  %v17403_v50 = vld [vmem:[#allocation42_spill] sm:$0xff] }
 0x4eb   :  { %v11434_v10 = vpop.eup %11433  ;;  %11443 = vrcp.f32 %v1910_v52 }
 0x4ec   :  { %v1912_v55 = vpop.xlane.xlu0 %1911  ;;  %v1956_v5 = vpack.c.bf16 %v1942_v45, %v1941_v39  ;;  %v1943_v62 = vmul.f32 %v11434_v10, %v13493_v25  ;;  %v17398_v25 = vld [vmem:[#allocation37_spill] sm:$0xff] }
 0x4ed   :  { %v11436_v27 = vpop.eup %11435  ;;  %11445 = vrcp.f32 %v1912_v55 }
 0x4ee   :  { %v1914_v56 = vpop.xlane.xlu1 %1913  ;;  %9851 = vmatmul.mubr.bf16.vlgmr.msra.gmra.mrb[32].mxu1 %v1956_v5  ;;  %v1944_v58 = vmul.f32 %v11436_v27, %v13497_v24 }
 0x4ef   :  { %v11438_v60 = vpop.eup %11437  ;;  %11447 = vrcp.f32 %v1914_v56  ;;  %9899 = vmatpush3.bf16.msra.mxu1 %v17396_v40 }
 0x4f0   :  { %9900 = vmatprep.subr.bf16.mxu1 %v17397_v14  ;;  %v1916_v30 = vpop.xlane.xlu0 %1915  ;;  %v1957_v7 = vpack.c.bf16 %v1944_v58, %v1943_v62  ;;  %v1945_v44 = vmul.f32 %v11438_v60, %v13501_v20  ;;  %v17399_v20 = vld [vmem:[#allocation38_spill] sm:$0xff]  ;;  %v17404_v62 = vld [vmem:[#allocation11_spill] sm:$0xff] }
 0x4f1   :  { %v11440_v0 = vpop.eup %11439  ;;  %11449 = vrcp.f32 %v1916_v30 }
 0x4f2   :  { %v1918_v29 = vpop.xlane.xlu1 %1917  ;;  %9854 = vmatprep.mubr.bf16.mxu1 %v1957_v7  ;;  %v1946_v33 = vmul.f32 %v11440_v0, %v13505_v23  ;;  %v17405_v0 = vld [vmem:[#allocation10_spill] sm:$0xff] }
 0x4f3   :  { %v11442_v2 = vpop.eup %11441  ;;  %11451 = vrcp.f32 %v1918_v29  ;;  %9901 = vmatpush3.bf16.msra.mxu1 %v17397_v14 }
 0x4f4   :  { %9902 = vmatprep.subr.bf16.mxu1 %v17398_v25  ;;  %v1920_v24 = vpop.xlane.xlu0 %1919  ;;  %v1958_v34 = vpack.c.bf16 %v1946_v33, %v1945_v44  ;;  %v1947_v4 = vmul.f32 %v11442_v2, %v13508_v43  ;;  %v17406_v44 = vld [vmem:[#allocation12_spill] sm:$0xff] }
 0x4f5   :  { %v11444_v31 = vpop.eup %11443  ;;  %11453 = vrcp.f32 %v1920_v24  ;;  %v17407_v24 = vld [vmem:[#allocation8_spill] sm:$0xff] }
 0x4f6   :  { %v1922_v42 = vpop.xlane.xlu1 %1921  ;;  %9855 = vmatmul.mubr.bf16.gmra.mrb[36].mxu1 %v1958_v34  ;;  %v1948_v12 = vmul.f32 %v11444_v31, %v13511_v17  ;;  %v17408_v31 = vld [vmem:[#allocation14_spill] sm:$0xff] }
 0x4f7   :  { %v11446_v6 = vpop.eup %11445  ;;  %11455 = vrcp.f32 %v1922_v42  ;;  %9903 = vmatpush3.bf16.msra.mxu1 %v17398_v25 }
 0x4f8   :  { %9904 = vmatprep.subr.bf16.mxu1 %v17399_v20  ;;  %v1959_v23 = vpack.c.bf16 %v1948_v12, %v1947_v4  ;;  %v1949_v21 = vmul.f32 %v11446_v6, %v13514_v32  ;;  %v17401_v32 = vld [vmem:[#allocation40_spill] sm:$0xff] }
 0x4f9   :  { %v11448_v9 = vpop.eup %11447 }
 0x4fa   :  { %9858 = vmatprep.mubr.bf16.mxu1 %v1959_v23  ;;  %v1950_v28 = vmul.f32 %v11448_v9, %v13517_v37  ;;  %v17410_v9 = vld [vmem:[#allocation17_spill] sm:$0xff] }
 0x4fb   :  { %v11450_v35 = vpop.eup %11449  ;;  %9905 = vmatpush3.bf16.msra.mxu1 %v17399_v20  ;;  %v17409_v20 = vld [vmem:[#allocation15_spill] sm:$0xff] }
 0x4fc   :  { %9906 = vmatprep.subr.bf16.mxu1 %v17400_v49  ;;  %v2343_v43 = vpop.xlane.xlu0 %2342  ;;  %v1960_v17 = vpack.c.bf16 %v1950_v28, %v1949_v21  ;;  %v1951_v26 = vmul.f32 %v11450_v35, %v13522_v38  ;;  %v17402_v38 = vld [vmem:[#allocation41_spill] sm:$0xff] }
 0x4fd   :  { %v11452_v51 = vpop.eup %11451  ;;  %11457 = vrcp.f32 %v2343_v43  ;;  %v17411_v43 = vld [vmem:[#allocation16_spill] sm:$0xff] }
 0x4fe   :  { %v2345_v53 = vpop.xlane.xlu1 %2344  ;;  %9859 = vmatmul.mubr.bf16.gmra.mrb[40].mxu1 %v1960_v17  ;;  %v1952_v3 = vmul.f32 %v11452_v51, %v13527_v47  ;;  %v17412_v51 = vld [vmem:[#allocation19_spill] sm:$0xff] }
 0x4ff   :  { %v11454_v11 = vpop.eup %11453  ;;  %11459 = vrcp.f32 %v2345_v53  ;;  %9907 = vmatpush3.bf16.msra.mxu1 %v17400_v49 }
 0x500   :  { %9908 = vmatprep.subr.bf16.mxu1 %v17401_v32  ;;  %v2347_v37 = vpop.xlane.xlu0 %2346  ;;  %v1961_v22 = vpack.c.bf16 %v1952_v3, %v1951_v26  ;;  %v1953_v18 = vmul.f32 %v11454_v11, %v13530_v63  ;;  %v11171_v63 = vld [vmem:[%s17096_s2 + $0x30] sm:$0xff]  }
 0x501   :  { %v11456_v8 = vpop.eup %11455  ;;  %11461 = vrcp.f32 %v2347_v37 }
 0x502   :  { %v2349_v57 = vpop.xlane.xlu1 %2348  ;;  %9862 = vmatprep.mubr.bf16.mxu1 %v1961_v22  ;;  %v1954_v15 = vmul.f32 %v11456_v8, %v13533_v1 }
 0x503   :  { %11463 = vrcp.f32 %v2349_v57  ;;  %9909 = vmatpush3.bf16.msra.mxu1 %v17401_v32 }
 0x504   :  { %9910 = vmatprep.subr.bf16.mxu1 %v17402_v38  ;;  %v2351_v47 = vpop.xlane.xlu0 %2350  ;;  %v1962_v61 = vpack.c.bf16 %v1954_v15, %v1953_v18 }
 0x505   :  { %11465 = vrcp.f32 %v2351_v47 }
 0x506   :  { %v2353_v16 = vpop.xlane.xlu1 %2352  ;;  %9863 = vmatmul.mubr.bf16.gmra.mrb[44].mxu1 %v1962_v61 }
 0x507   :  { %v11458_v46 = vpop.eup %11457  ;;  %11467 = vrcp.f32 %v2353_v16  ;;  %9911 = vmatpush3.bf16.msra.mxu1 %v17402_v38 }
 0x508   :  { %9912 = vmatprep.subr.bf16.mxu1 %v17403_v50  ;;  %v2355_v40 = vpop.xlane.xlu0 %2354  ;;  %v2390_v45 = vmul.f32 %v11458_v46, %v13540_v19 }
 0x509   :  { %v11460_v1 = vpop.eup %11459  ;;  %11469 = vrcp.f32 %v2355_v40 }
 0x50a   :  { %v2357_v39 = vpop.xlane.xlu1 %2356  ;;  %v2391_v52 = vmul.f32 %v11460_v1, %v13543_v54 }
 0x50b   :  { %v11462_v10 = vpop.eup %11461  ;;  %11471 = vrcp.f32 %v2357_v39  ;;  %9913 = vmatpush3.bf16.msra.mxu1 %v17403_v50  ;;  %v11172_v50 = vld [vmem:[%s17096_s2 + $0x38] sm:$0xff]  }
 0x50c   :  { %v2359_v55 = vpop.xlane.xlu0 %2358  ;;  %v2406_v5 = vpack.c.bf16 %v2391_v52, %v2390_v45  ;;  %9930 = vmatprep.subr.bf16.mxu1 %v11171_v63  ;;  %v2392_v56 = vmul.f32 %v11462_v10, %v13548_v36 }
 0x50d   :  { %v11464_v27 = vpop.eup %11463  ;;  %11473 = vrcp.f32 %v2359_v55 }
 0x50e   :  { %v2393_v58 = vmul.f32 %v11464_v27, %v17404_v62  ;;  %v2361_v60 = vpop.xlane.xlu1 %2360  ;;  %9914 = vmatprep.mubr.bf16.mxu1 %v2406_v5 }
 0x50f   :  { %v11466_v14 = vpop.eup %11465  ;;  %11475 = vrcp.f32 %v2361_v60 }
 0x510   :  { %v2363_v19 = vpop.xlane.xlu0 %2362  ;;  %v2407_v30 = vpack.c.bf16 %v2393_v58, %v2392_v56  ;;  %v2394_v29 = vmul.f32 %v11466_v14, %v17405_v0 }
 0x511   :  { %v11468_v54 = vpop.eup %11467  ;;  %11477 = vrcp.f32 %v2363_v19 }
 0x512   :  { %v2365_v7 = vpop.xlane.xlu1 %2364  ;;  %9915 = vmatmul.mubr.bf16.vlgmr.msra.gmra.mrb[32].mxu1 %v2407_v30  ;;  %v2395_v33 = vmul.f32 %v11468_v54, %v17406_v44  ;;  %v13730_v44 = vld [vmem:[%s17095_s1 + $0x5] ss:$0 sm:$0xff] }
 0x513   :  { %v11470_v2 = vpop.eup %11469  ;;  %11479 = vrcp.f32 %v2365_v7  ;;  %9931 = vmatpush3.bf16.msra.mxu1 %v11171_v63 }
 0x514   :  { %v2408_v36 = vpack.c.bf16 %v2395_v33, %v2394_v29  ;;  %v2396_v34 = vmul.f32 %v11470_v2, %v17407_v24  ;;  %9932 = vmatprep.subr.bf16.mxu1 %v11172_v50  ;;  %v11969_v2 = vld [vmem:[%s17094_s0 + $0x10] sm:$0xff] }
 0x515   :  { %v11472_v25 = vpop.eup %11471 }
 0x516   :  { %9918 = vmatprep.mubr.bf16.mxu1 %v2408_v36  ;;  %v2397_v42 = vmul.f32 %v11472_v25, %v17408_v31  ;;  %v11970_v25 = vld [vmem:[%s17094_s0] sm:$0xff] }
 0x517   :  { %v11474_v4 = vpop.eup %11473  ;;  %9933 = vmatpush3.bf16.msra.mxu1 %v11172_v50 }
 0x518   :  { %v2409_v12 = vpack.c.bf16 %v2397_v42, %v2396_v34  ;;  %v2398_v23 = vmul.f32 %v11474_v4, %v17409_v20  ;;  %v11971_v4 = vld [vmem:[%s17094_s0 + $0x18] sm:$0xff] }
 0x519   :  { %v11476_v6 = vpop.eup %11475 }
 0x51a   :  { %9919 = vmatmul.mubr.bf16.gmra.mrb[36].mxu1 %v2409_v12  ;;  %v2399_v21 = vmul.f32 %v11476_v6, %v17410_v9  ;;  %v11972_v6 = vld [vmem:[%s17094_s0 + $0x8] sm:$0xff] }
 0x51b   :  { %v11478_v28 = vpop.eup %11477 }
 0x51c   :  { %v2410_v35 = vpack.c.bf16 %v2399_v21, %v2398_v23  ;;  %v2400_v17 = vmul.f32 %v11478_v28, %v17411_v43 }
 0x51d   :  { %v11480_v49 = vpop.eup %11479 }
 0x51e   :  { %9922 = vmatprep.mubr.bf16.mxu1 %v2410_v35  ;;  %v2401_v53 = vmul.f32 %v11480_v49, %v17412_v51 }
 0x520   :  { %v2411_v26 = vpack.c.bf16 %v2401_v53, %v2400_v17  ;;  %v11973_v17 = vld [vmem:[%s17094_s0 + $0x30] sm:$0xff]  ;;  %v11974_v53 = vld [vmem:[%s17094_s0 + $0x20] sm:$0xff] }
 0x522   :  { %9923 = vmatmul.mubr.bf16.gmra.mrb[40].mxu1 %v2411_v26 }
 0x555   :  { %v2367_v3 = vpop.xlane.xlu0 %2366 }
 0x556   :  { %11481 = vrcp.f32 %v2367_v3 }
 0x557   :  { %v2369_v11 = vpop.xlane.xlu1 %2368 }
 0x558   :  { %11483 = vrcp.f32 %v2369_v11 }
 0x559   :  { %v2371_v32 = vpop.xlane.xlu0 %2370 }
 0x55a   :  { %11485 = vrcp.f32 %v2371_v32 }
 0x55b   :  { %v2373_v37 = vpop.xlane.xlu1 %2372 }
 0x55c   :  { %11487 = vrcp.f32 %v2373_v37 }
 0x560   :  { %v11482_v22 = vpop.eup %11481 }
 0x561   :  { %v2402_v57 = vmul.f32 %v11482_v22, %v13625_v59  ;;  %v11975_v22 = vld [vmem:[%s17094_s0 + $0x38] sm:$0xff] }
 0x562   :  { %v11484_v8 = vpop.eup %11483 }
 0x563   :  { %v2403_v18 = vmul.f32 %v11484_v8, %v13629_v13 }
 0x564   :  { %v11486_v15 = vpop.eup %11485 }
 0x565   :  { %v2412_v38 = vpack.c.bf16 %v2403_v18, %v2402_v57  ;;  %v2404_v61 = vmul.f32 %v11486_v15, %v13632_v48  ;;  %v11976_v57 = vld [vmem:[%s17094_s0 + $0x28] sm:$0xff] }
 0x566   :  { %v11488_v47 = vpop.eup %11487 }
 0x567   :  { %9926 = vmatprep.mubr.bf16.mxu1 %v2412_v38  ;;  %v2405_v16 = vmul.f32 %v11488_v47, %v13636_v41 }
 0x569   :  { %v2413_v46 = vpack.c.bf16 %v2405_v16, %v2404_v61 }
 0x56b   :  { %9927 = vmatmul.mubr.bf16.gmra.mrb[44].mxu1 %v2413_v46 }
 0x5e5   :  { %v9916_v40 = vpop.f32.mrb[32].mxu1 }
 0x5e6   :  { %v2448_v59 = vpop.f32.mrb[33].mxu1 }
 0x5e7   :  { %v9917_v63 = vpop.f32.mrb[34].mxu1 }
 0x5e8   :  { %v2528_v13 = vpack.c.bf16 %v9917_v63, %v9916_v40  ;;  %v2451_v1 = vpop.f32.mrb[35].mxu1 }
 0x5e9   :  { %v2527_v39 = vpack.c.bf16 %v2451_v1, %v2448_v59  ;;  %v11977_v59 = vld [vmem:[%s17094_s0 + $0x50] sm:$0xff] }
 0x5eb   :  { %9934 = vmatprep.mubr.msk.bf16.mxu1 %vm89_vm0, %v2527_v39 }
 0x5ec   :  { %9935 = vmatmul.mubr.msk.bf16.vlgmr.msra.gmra.mrb[48].mxu1 %vm89_vm0, %v2528_v13  ;;  %v11978_v13 = vld [vmem:[%s17094_s0 + $0x40] sm:$0xff] }
 0x5ed   :  { %v9920_v48 = vpop.f32.mrb[36].mxu1 }
 0x5ee   :  { %v2464_v41 = vpop.f32.mrb[37].mxu1 }
 0x5ef   :  { %v9921_v45 = vpop.f32.mrb[38].mxu1 }
 0x5f0   :  { %v2530_v52 = vpack.c.bf16 %v9921_v45, %v9920_v48  ;;  %v2467_v10 = vpop.f32.mrb[39].mxu1 }
 0x5f1   :  { %v2529_v55 = vpack.c.bf16 %v2467_v10, %v2464_v41 }
 0x5f3   :  { %9938 = vmatprep.mubr.msk.bf16.mxu1 %vm89_vm0, %v2529_v55  ;;  %v11980_v55 = vld [vmem:[%s17094_s0 + $0x48] sm:$0xff] }
 0x5f4   :  { %9939 = vmatmul.mubr.msk.bf16.gmra.mrb[52].mxu1 %vm89_vm0, %v2530_v52  ;;  %v11979_v52 = vld [vmem:[%s17094_s0 + $0x58] sm:$0xff] }
 0x5f5   :  { %v9924_v5 = vpop.f32.mrb[40].mxu1 }
 0x5f6   :  { %v2480_v27 = vpop.f32.mrb[41].mxu1 }
 0x5f7   :  { %v9925_v56 = vpop.f32.mrb[42].mxu1 }
 0x5f8   :  { %v2532_v62 = vpack.c.bf16 %v9925_v56, %v9924_v5  ;;  %v2483_v58 = vpop.f32.mrb[43].mxu1 }
 0x5f9   :  { %v2531_v60 = vpack.c.bf16 %v2483_v58, %v2480_v27 }
 0x5fb   :  { %9942 = vmatprep.mubr.msk.bf16.mxu1 %vm89_vm0, %v2531_v60 }
 0x5fc   :  { %9943 = vmatmul.mubr.msk.bf16.gmra.mrb[56].mxu1 %vm89_vm0, %v2532_v62 }
 0x63e   :  { %v9928_v14 = vpop.f32.mrb[44].mxu1 }
 0x63f   :  { %v2496_v19 = vpop.f32.mrb[45].mxu1 }
 0x640   :  { %v9929_v30 = vpop.f32.mrb[46].mxu1 }
 0x641   :  { %v2534_v54 = vpack.c.bf16 %v9929_v30, %v9928_v14  ;;  %v2499_v7 = vpop.f32.mrb[47].mxu1 }
 0x642   :  { %v2533_v0 = vpack.c.bf16 %v2499_v7, %v2496_v19 }
 0x644   :  { %9946 = vmatprep.mubr.msk.bf16.mxu1 %vm89_vm0, %v2533_v0  ;;  %v11981_v0 = vld [vmem:[%s17094_s0 + $0x70] sm:$0xff] }
 0x645   :  { %9947 = vmatmul.mubr.msk.bf16.gmra.mrb[60].mxu1 %vm89_vm0, %v2534_v54 }
 0x6bf   :  { %v9936_v29 = vpop.f32.mrb[48].mxu1 }
 0x6c0   :  { %v2610_v33 = vpop.f32.mrb[49].mxu1  ;;  %v2675_v36 = vadd.f32 %v11969_v2, %v9936_v29 }
 0x6c1   :  { %v2673_v24 = vadd.f32 %v11970_v25, %v2610_v33  ;;  %v9937_v34 = vpop.f32.mrb[50].mxu1  ;;  %v11982_v33 = vld [vmem:[%s17094_s0 + $0x60] sm:$0xff] }
 0x6c2   :  { %v2613_v31 = vpop.f32.mrb[51].mxu1  ;;  %v2676_v12 = vadd.f32 %v11971_v4, %v9937_v34  ;;  %v13748_v23 = vadd.f32 %v13730_v44, %v2675_v36  ;;  %v11983_v34 = vld [vmem:[%s17094_s0 + $0x78] sm:$0xff]  ;;  %v11984_v4 = vld [vmem:[%s17094_s0 + $0x68] sm:$0xff] }
 0x6c3   :  { %v13739_v42 = vadd.f32 %v13730_v44, %v2673_v24  ;;  %v2674_v20 = vadd.f32 %v11972_v6, %v2613_v31 }
 0x6c4   :  { %v13756_v28 = vadd.f32 %v13730_v44, %v2676_v12  ;;  %v2715_v11 = vsel %vm89_vm0, %v13748_v23, 0.0 }
 0x6c5   :  { %v13751_v9 = vadd.f32 %v13730_v44, %v2674_v20  ;;  %v2709_v21 = vsel %vm89_vm0, %v13739_v42, 0.0 }
 0x6c6   :  { %2710 = vadd.xlane.f32.xlu0 %v2709_v21  ;;  %v2718_v15 = vsel %vm89_vm0, %v13756_v28, 0.0 }
 0x6c7   :  { %v9940_v35 = vpop.f32.mrb[52].mxu1  ;;  %v2712_v49 = vsel %vm89_vm0, %v13751_v9, 0.0 }
 0x6c8   :  { %2713 = vadd.xlane.f32.xlu1 %v2712_v49  ;;  %v2626_v43 = vpop.f32.mrb[53].mxu1  ;;  %v2679_v51 = vadd.f32 %v11973_v17, %v9940_v35 }
 0x6c9   :  { %v2677_v26 = vadd.f32 %v11974_v53, %v2626_v43  ;;  %v9941_v3 = vpop.f32.mrb[54].mxu1 }
 0x6ca   :  { %2716 = vadd.xlane.f32.xlu0 %v2715_v11  ;;  %v2629_v32 = vpop.f32.mrb[55].mxu1  ;;  %v2680_v8 = vadd.f32 %v11975_v22, %v9941_v3  ;;  %v13780_v38 = vadd.f32 %v13730_v44, %v2679_v51 }
 0x6cb   :  { %v13769_v37 = vadd.f32 %v13730_v44, %v2677_v26  ;;  %v2678_v18 = vadd.f32 %v11976_v57, %v2629_v32 }
 0x6cc   :  { %2719 = vadd.xlane.f32.xlu1 %v2718_v15  ;;  %v13788_v16 = vadd.f32 %v13730_v44, %v2680_v8  ;;  %v2727_v48 = vsel %vm89_vm0, %v13780_v38, 0.0 }
 0x6cd   :  { %v13783_v47 = vadd.f32 %v13730_v44, %v2678_v18  ;;  %v2721_v61 = vsel %vm89_vm0, %v13769_v37, 0.0 }
 0x6ce   :  { %2722 = vadd.xlane.f32.xlu0 %v2721_v61  ;;  %v2730_v27 = vsel %vm89_vm0, %v13788_v16, 0.0 }
 0x6cf   :  { %v9944_v46 = vpop.f32.mrb[56].mxu1  ;;  %v2724_v50 = vsel %vm89_vm0, %v13783_v47, 0.0 }
 0x6d0   :  { %2725 = vadd.xlane.f32.xlu1 %v2724_v50  ;;  %v2642_v40 = vpop.f32.mrb[57].mxu1  ;;  %v2683_v63 = vadd.f32 %v11977_v59, %v9944_v46 }
 0x6d1   :  { %v2681_v1 = vadd.f32 %v11978_v13, %v2642_v40  ;;  %v9945_v39 = vpop.f32.mrb[58].mxu1 }
 0x6d2   :  { %2728 = vadd.xlane.f32.xlu0 %v2727_v48  ;;  %v2645_v41 = vpop.f32.mrb[59].mxu1  ;;  %v2684_v10 = vadd.f32 %v11979_v52, %v9945_v39  ;;  %v13812_v56 = vadd.f32 %v13730_v44, %v2683_v63 }
 0x6d3   :  { %v13801_v45 = vadd.f32 %v13730_v44, %v2681_v1  ;;  %v2682_v5 = vadd.f32 %v11980_v55, %v2645_v41 }
 0x6d4   :  { %2731 = vadd.xlane.f32.xlu1 %v2730_v27  ;;  %17414 = vst [vmem:[#allocation43_spill] sm:$0xff] %v13812_v56  ;;  %v13820_v60 = vadd.f32 %v13730_v44, %v2684_v10  ;;  %v2739_v19 = vsel %vm89_vm0, %v13812_v56, 0.0 }
 0x6d5   :  { %17413 = vst [vmem:[#allocation18_spill] sm:$0xff] %v13801_v45  ;;  %v13815_v62 = vadd.f32 %v13730_v44, %v2682_v5  ;;  %v2733_v58 = vsel %vm89_vm0, %v13801_v45, 0.0 }
 0x6d6   :  { %2734 = vadd.xlane.f32.xlu0 %v2733_v58  ;;  %17416 = vst [vmem:[#allocation13_spill] sm:$0xff] %v13820_v60  ;;  %v2742_v30 = vsel %vm89_vm0, %v13820_v60, 0.0 }
 0x6d7   :  { %17415 = vst [vmem:[#allocation44_spill] sm:$0xff] %v13815_v62  ;;  %v2736_v14 = vsel %vm89_vm0, %v13815_v62, 0.0 }
 0x6d8   :  { %2737 = vadd.xlane.f32.xlu1 %v2736_v14 }
 0x6da   :  { %2740 = vadd.xlane.f32.xlu0 %v2739_v19 }
 0x6dc   :  { %2743 = vadd.xlane.f32.xlu1 %v2742_v30 }
 0x718   :  { %v9948_v54 = vpop.f32.mrb[60].mxu1 }
 0x719   :  { %v2658_v7 = vpop.f32.mrb[61].mxu1  ;;  %v2687_v29 = vadd.f32 %v11981_v0, %v9948_v54 }
 0x71a   :  { %v2685_v2 = vadd.f32 %v11982_v33, %v2658_v7  ;;  %v9949_v36 = vpop.f32.mrb[62].mxu1 }
 0x71b   :  { %v2661_v25 = vpop.f32.mrb[63].mxu1  ;;  %v2688_v31 = vadd.f32 %v11983_v34, %v9949_v36  ;;  %v13844_v6 = vadd.f32 %v13730_v44, %v2687_v29 }
 0x71c   :  { %v13835_v24 = vadd.f32 %v13730_v44, %v2685_v2  ;;  %v2686_v12 = vadd.f32 %v11984_v4, %v2661_v25 }
 0x71d   :  { %17418 = vst [vmem:[#allocation21_spill] sm:$0xff] %v13844_v6  ;;  %v13852_v35 = vadd.f32 %v13730_v44, %v2688_v31  ;;  %v2751_v43 = vsel %vm89_vm0, %v13844_v6, 0.0 }
 0x71e   :  { %17417 = vst [vmem:[#allocation20_spill] sm:$0xff] %v13835_v24  ;;  %v13847_v20 = vadd.f32 %v13730_v44, %v2686_v12  ;;  %v2745_v21 = vsel %vm89_vm0, %v13835_v24, 0.0 }
 0x71f   :  { %2746 = vadd.xlane.f32.xlu0 %v2745_v21  ;;  %17420 = vst [vmem:[#allocation48_spill] sm:$0xff] %v13852_v35  ;;  %v2754_v17 = vsel %vm89_vm0, %v13852_v35, 0.0 }
 0x720   :  { %17419 = vst [vmem:[#allocation22_spill] sm:$0xff] %v13847_v20  ;;  %v2748_v49 = vsel %vm89_vm0, %v13847_v20, 0.0 }
 0x721   :  { %2749 = vadd.xlane.f32.xlu1 %v2748_v49 }
 0x723   :  { %2752 = vadd.xlane.f32.xlu0 %v2751_v43 }
 0x725   :  { %2755 = vadd.xlane.f32.xlu1 %v2754_v17 }
 0x753   :  { %v2711_v51 = vpop.xlane.xlu0 %2710 }
 0x754   :  { %v2757_v53 = vmul.f32 0.03125, %v2711_v51 }
 0x755   :  { %v2714_v26 = vpop.xlane.xlu1 %2713 }
 0x756   :  { %v13861_v3 = vsub.f32 %v13739_v42, %v2757_v53  ;;  %v2758_v44 = vmul.f32 0.03125, %v2714_v26 }
 0x757   :  { %v2717_v11 = vpop.xlane.xlu0 %2716 }
 0x758   :  { %v13864_v32 = vsub.f32 %v13751_v9, %v2758_v44  ;;  %v2759_v22 = vmul.f32 0.03125, %v2717_v11  ;;  %v2789_v8 = vmul.f32 %v13861_v3, %v13861_v3 }
 0x759   :  { %v2720_v57 = vpop.xlane.xlu1 %2719 }
 0x75a   :  { %v13869_v18 = vsub.f32 %v13748_v23, %v2759_v22  ;;  %v2760_v15 = vmul.f32 0.03125, %v2720_v57  ;;  %v2805_v61 = vsel %vm89_vm0, %v2789_v8, 0.0  ;;  %v2790_v46 = vmul.f32 %v13864_v32, %v13864_v32 }
 0x75b   :  { %v2723_v50 = vpop.xlane.xlu0 %2722  ;;  %2806 = vadd.xlane.f32.xlu0 %v2805_v61 }
 0x75c   :  { %v13875_v40 = vsub.f32 %v13756_v28, %v2760_v15  ;;  %v2761_v59 = vmul.f32 0.03125, %v2723_v50  ;;  %v2808_v63 = vsel %vm89_vm0, %v2790_v46, 0.0  ;;  %v2791_v13 = vmul.f32 %v13869_v18, %v13869_v18 }
 0x75d   :  { %v2726_v1 = vpop.xlane.xlu1 %2725  ;;  %2809 = vadd.xlane.f32.xlu1 %v2808_v63  ;;  %v11174_v63 = vld [vmem:[%s17097_s3 + $0x8] sm:$0xff]  }
 0x75e   :  { %v13881_v39 = vsub.f32 %v13769_v37, %v2761_v59  ;;  %v2762_v48 = vmul.f32 0.03125, %v2726_v1  ;;  %v2811_v41 = vsel %vm89_vm0, %v2791_v13, 0.0  ;;  %v2792_v52 = vmul.f32 %v13875_v40, %v13875_v40  ;;  %v11173_v59 = vld [vmem:[%s17097_s3] sm:$0xff]  }
 0x75f   :  { %v2729_v10 = vpop.xlane.xlu0 %2728  ;;  %2812 = vadd.xlane.f32.xlu0 %v2811_v41  ;;  %9950 = vmatprep.subr.bf16.mxu0 %v11173_v59 }
 0x760   :  { %v13887_v55 = vsub.f32 %v13783_v47, %v2762_v48  ;;  %v2763_v5 = vmul.f32 0.03125, %v2729_v10  ;;  %v2814_v27 = vsel %vm89_vm0, %v2792_v52, 0.0  ;;  %v2793_v58 = vmul.f32 %v13881_v39, %v13881_v39  ;;  %9951 = vmatpush3.bf16.msra.mxu0 %v11173_v59 }
 0x761   :  { %v2732_v14 = vpop.xlane.xlu1 %2731  ;;  %2815 = vadd.xlane.f32.xlu1 %v2814_v27  ;;  %9952 = vmatprep.subr.bf16.mxu0 %v11174_v63 }
 0x762   :  { %v13893_v19 = vsub.f32 %v13780_v38, %v2763_v5  ;;  %v2764_v30 = vmul.f32 0.03125, %v2732_v14  ;;  %v2817_v54 = vsel %vm89_vm0, %v2793_v58, 0.0  ;;  %v2794_v7 = vmul.f32 %v13887_v55, %v13887_v55 }
 0x763   :  { %v2735_v0 = vpop.xlane.xlu0 %2734  ;;  %2818 = vadd.xlane.f32.xlu0 %v2817_v54 }
 0x764   :  { %v13899_v29 = vsub.f32 %v13788_v16, %v2764_v30  ;;  %v2765_v33 = vmul.f32 0.03125, %v2735_v0  ;;  %v2820_v2 = vsel %vm89_vm0, %v2794_v7, 0.0  ;;  %v2795_v36 = vmul.f32 %v13893_v19, %v13893_v19  ;;  %9953 = vmatpush3.bf16.msra.mxu0 %v11174_v63 }
 0x765   :  { %v2738_v25 = vpop.xlane.xlu1 %2737  ;;  %2821 = vadd.xlane.f32.xlu1 %v2820_v2 }
 0x766   :  { %v13905_v34 = vsub.f32 %v13801_v45, %v2765_v33  ;;  %v2766_v31 = vmul.f32 0.03125, %v2738_v25  ;;  %v2823_v4 = vsel %vm89_vm0, %v2795_v36, 0.0  ;;  %v2796_v12 = vmul.f32 %v13899_v29, %v13899_v29 }
 0x767   :  { %v2741_v21 = vpop.xlane.xlu0 %2740  ;;  %2824 = vadd.xlane.f32.xlu0 %v2823_v4 }
 0x768   :  { %v13911_v49 = vsub.f32 %v13815_v62, %v2766_v31  ;;  %v2767_v43 = vmul.f32 0.03125, %v2741_v21  ;;  %v2826_v17 = vsel %vm89_vm0, %v2796_v12, 0.0  ;;  %v2797_v51 = vmul.f32 %v13905_v34, %v13905_v34 }
 0x769   :  { %v2744_v53 = vpop.xlane.xlu1 %2743  ;;  %2827 = vadd.xlane.f32.xlu1 %v2826_v17 }
 0x76a   :  { %v13917_v26 = vsub.f32 %v13812_v56, %v2767_v43  ;;  %v2768_v44 = vmul.f32 0.03125, %v2744_v53  ;;  %v2829_v11 = vsel %vm89_vm0, %v2797_v51, 0.0  ;;  %v2798_v22 = vmul.f32 %v13911_v49, %v13911_v49 }
 0x76b   :  { %2830 = vadd.xlane.f32.xlu0 %v2829_v11 }
 0x76c   :  { %v13923_v8 = vsub.f32 %v13820_v60, %v2768_v44  ;;  %v2832_v57 = vsel %vm89_vm0, %v2798_v22, 0.0  ;;  %v2799_v15 = vmul.f32 %v13917_v26, %v13917_v26 }
 0x76d   :  { %2833 = vadd.xlane.f32.xlu1 %v2832_v57 }
 0x76e   :  { %v2835_v61 = vsel %vm89_vm0, %v2799_v15, 0.0  ;;  %v2800_v46 = vmul.f32 %v13923_v8, %v13923_v8 }
 0x76f   :  { %2836 = vadd.xlane.f32.xlu0 %v2835_v61 }
 0x770   :  { %v2838_v50 = vsel %vm89_vm0, %v2800_v46, 0.0 }
 0x771   :  { %2839 = vadd.xlane.f32.xlu1 %v2838_v50 }
 0x7ac   :  { %v2747_v13 = vpop.xlane.xlu0 %2746 }
 0x7ad   :  { %v2769_v1 = vmul.f32 0.03125, %v2747_v13 }
 0x7ae   :  { %v2750_v48 = vpop.xlane.xlu1 %2749 }
 0x7af   :  { %v13939_v41 = vsub.f32 %v13835_v24, %v2769_v1  ;;  %v2770_v52 = vmul.f32 0.03125, %v2750_v48 }
 0x7b0   :  { %v2753_v10 = vpop.xlane.xlu0 %2752 }
 0x7b1   :  { %v13942_v5 = vsub.f32 %v13847_v20, %v2770_v52  ;;  %v2771_v27 = vmul.f32 0.03125, %v2753_v10  ;;  %v2801_v58 = vmul.f32 %v13939_v41, %v13939_v41 }
 0x7b2   :  { %v2756_v14 = vpop.xlane.xlu1 %2755 }
 0x7b3   :  { %v13947_v30 = vsub.f32 %v13844_v6, %v2771_v27  ;;  %v2772_v54 = vmul.f32 0.03125, %v2756_v14  ;;  %v2841_v7 = vsel %vm89_vm0, %v2801_v58, 0.0  ;;  %v2802_v0 = vmul.f32 %v13942_v5, %v13942_v5  ;;  %v13965_v58 = vld [vmem:[%s17095_s1 + $0x6] ss:$0 sm:$0xff] }
 0x7b4   :  { %2842 = vadd.xlane.f32.xlu0 %v2841_v7 }
 0x7b5   :  { %v13953_v33 = vsub.f32 %v13852_v35, %v2772_v54  ;;  %v2844_v2 = vsel %vm89_vm0, %v2802_v0, 0.0  ;;  %v2803_v36 = vmul.f32 %v13947_v30, %v13947_v30 }
 0x7b6   :  { %2845 = vadd.xlane.f32.xlu1 %v2844_v2 }
 0x7b7   :  { %v2847_v25 = vsel %vm89_vm0, %v2803_v36, 0.0  ;;  %v2804_v31 = vmul.f32 %v13953_v33, %v13953_v33 }
 0x7b8   :  { %2848 = vadd.xlane.f32.xlu0 %v2847_v25 }
 0x7b9   :  { %v2850_v4 = vsel %vm89_vm0, %v2804_v31, 0.0 }
 0x7ba   :  { %2851 = vadd.xlane.f32.xlu1 %v2850_v4 }
 0x7e8   :  { %v2807_v12 = vpop.xlane.xlu0 %2806 }
 0x7e9   :  { %v2853_v21 = vmul.f32 0.03125, %v2807_v12 }
 0x7ea   :  { %v2810_v43 = vpop.xlane.xlu1 %2809 }
 0x7eb   :  { %v2869_v17 = vadd.f32 1e-05, %v2853_v21  ;;  %v2854_v51 = vmul.f32 0.03125, %v2810_v43  ;;  %v13973_v43 = vld [vmem:[%s17095_s1 + $0x7] ss:$0 sm:$0xff] }
 0x7ec   :  { %v2813_v53 = vpop.xlane.xlu0 %2812 }
 0x7ed   :  { %11489 = vrsqrt.f32 %v2869_v17  ;;  %v2870_v44 = vadd.f32 1e-05, %v2854_v51  ;;  %v2855_v11 = vmul.f32 0.03125, %v2813_v53 }
 0x7ee   :  { %v2816_v22 = vpop.xlane.xlu1 %2815 }
 0x7ef   :  { %11491 = vrsqrt.f32 %v2870_v44  ;;  %v2871_v57 = vadd.f32 1e-05, %v2855_v11  ;;  %v2856_v15 = vmul.f32 0.03125, %v2816_v22 }
 0x7f0   :  { %v2819_v61 = vpop.xlane.xlu0 %2818 }
 0x7f1   :  { %11493 = vrsqrt.f32 %v2871_v57  ;;  %v2872_v46 = vadd.f32 1e-05, %v2856_v15  ;;  %v2857_v50 = vmul.f32 0.03125, %v2819_v61 }
 0x7f2   :  { %v2822_v59 = vpop.xlane.xlu1 %2821 }
 0x7f3   :  { %11495 = vrsqrt.f32 %v2872_v46  ;;  %v2873_v63 = vadd.f32 1e-05, %v2857_v50  ;;  %v2858_v13 = vmul.f32 0.03125, %v2822_v59 }
 0x7f4   :  { %v2825_v1 = vpop.xlane.xlu0 %2824 }
 0x7f5   :  { %11497 = vrsqrt.f32 %v2873_v63  ;;  %v2874_v48 = vadd.f32 1e-05, %v2858_v13  ;;  %v2859_v52 = vmul.f32 0.03125, %v2825_v1 }
 0x7f6   :  { %v2828_v10 = vpop.xlane.xlu1 %2827 }
 0x7f7   :  { %v11490_v27 = vpop.eup %11489  ;;  %11499 = vrsqrt.f32 %v2874_v48  ;;  %v2875_v14 = vadd.f32 1e-05, %v2859_v52  ;;  %v2860_v54 = vmul.f32 0.03125, %v2828_v10 }
 0x7f8   :  { %v2831_v7 = vpop.xlane.xlu0 %2830  ;;  %v2901_v0 = vmul.f32 %v11490_v27, %v13861_v3 }
 0x7f9   :  { %v11492_v2 = vpop.eup %11491  ;;  %11501 = vrsqrt.f32 %v2875_v14  ;;  %v2876_v36 = vadd.f32 1e-05, %v2860_v54  ;;  %v2861_v25 = vmul.f32 0.03125, %v2831_v7 }
 0x7fa   :  { %v2834_v31 = vpop.xlane.xlu1 %2833  ;;  %v2902_v4 = vmul.f32 %v11492_v2, %v13864_v32  ;;  %v2921_v12 = vmul.f32 %v13965_v58, %v2901_v0 }
 0x7fb   :  { %v11494_v21 = vpop.eup %11493  ;;  %11503 = vrsqrt.f32 %v2876_v36  ;;  %v2877_v17 = vadd.f32 1e-05, %v2861_v25  ;;  %v2862_v51 = vmul.f32 0.03125, %v2834_v31 }
 0x7fc   :  { %v2903_v3 = vmul.f32 %v11494_v21, %v13869_v18  ;;  %v2837_v53 = vpop.xlane.xlu0 %2836  ;;  %v2922_v44 = vmul.f32 %v13965_v58, %v2902_v4  ;;  %v2941_v46 = vadd.f32 %v13973_v43, %v2921_v12 }
 0x7fd   :  { %v11496_v11 = vpop.eup %11495  ;;  %11505 = vrsqrt.f32 %v2877_v17  ;;  %v2878_v22 = vadd.f32 1e-05, %v2862_v51  ;;  %v2863_v32 = vmul.f32 0.03125, %v2837_v53 }
 0x7fe   :  { %v2923_v57 = vmul.f32 %v13965_v58, %v2903_v3  ;;  %v2904_v15 = vmul.f32 %v11496_v11, %v13875_v40  ;;  %v2840_v61 = vpop.xlane.xlu1 %2839  ;;  %v2942_v50 = vadd.f32 %v13973_v43, %v2922_v44 }
 0x7ff   :  { %v11498_v59 = vpop.eup %11497  ;;  %11507 = vrsqrt.f32 %v2878_v22  ;;  %v2879_v63 = vadd.f32 1e-05, %v2863_v32  ;;  %v2864_v18 = vmul.f32 0.03125, %v2840_v61 }
 0x800   :  { %v2924_v13 = vmul.f32 %v13965_v58, %v2904_v15  ;;  %v2957_v1 = vpack.c.bf16 %v2942_v50, %v2941_v46  ;;  %v2905_v48 = vmul.f32 %v11498_v59, %v13881_v39  ;;  %v2943_v27 = vadd.f32 %v13973_v43, %v2923_v57 }
 0x801   :  { %v11500_v52 = vpop.eup %11499  ;;  %11509 = vrsqrt.f32 %v2879_v63  ;;  %v2880_v10 = vadd.f32 1e-05, %v2864_v18 }
 0x802   :  { %v2944_v40 = vadd.f32 %v13973_v43, %v2924_v13  ;;  %9954 = vmatprep.mubr.msk.bf16.mxu0 %vm89_vm0, %v2957_v1  ;;  %v2906_v14 = vmul.f32 %v11500_v52, %v13887_v55  ;;  %v2925_v54 = vmul.f32 %v13965_v58, %v2905_v48 }
 0x803   :  { %v11502_v7 = vpop.eup %11501  ;;  %11511 = vrsqrt.f32 %v2880_v10 }
 0x804   :  { %v2958_v0 = vpack.c.bf16 %v2944_v40, %v2943_v27  ;;  %v2926_v2 = vmul.f32 %v13965_v58, %v2906_v14  ;;  %v2907_v39 = vmul.f32 %v11502_v7, %v13893_v19  ;;  %v2945_v25 = vadd.f32 %v13973_v43, %v2925_v54 }
 0x805   :  { %v11504_v36 = vpop.eup %11503 }
 0x806   :  { %9955 = vmatmul.mubr.msk.bf16.vlgmr.msra.gmra.mrb[80].mxu0 %vm89_vm0, %v2958_v0  ;;  %v2946_v31 = vadd.f32 %v13973_v43, %v2926_v2  ;;  %v2908_v4 = vmul.f32 %v11504_v36, %v13899_v29  ;;  %v2927_v55 = vmul.f32 %v13965_v58, %v2907_v39 }
 0x807   :  { %v11506_v12 = vpop.eup %11505 }
 0x808   :  { %v2959_v21 = vpack.c.bf16 %v2946_v31, %v2945_v25  ;;  %v2928_v17 = vmul.f32 %v13965_v58, %v2908_v4  ;;  %v2909_v51 = vmul.f32 %v11506_v12, %v13905_v34  ;;  %v2947_v19 = vadd.f32 %v13973_v43, %v2927_v55 }
 0x809   :  { %v11508_v3 = vpop.eup %11507 }
 0x80a   :  { %9958 = vmatprep.mubr.msk.bf16.mxu0 %vm89_vm0, %v2959_v21  ;;  %v2948_v53 = vadd.f32 %v13973_v43, %v2928_v17  ;;  %v2910_v44 = vmul.f32 %v11508_v3, %v13911_v49  ;;  %v2929_v11 = vmul.f32 %v13965_v58, %v2909_v51 }
 0x80b   :  { %v11510_v29 = vpop.eup %11509 }
 0x80c   :  { %v2960_v22 = vpack.c.bf16 %v2948_v53, %v2947_v19  ;;  %v2930_v32 = vmul.f32 %v13965_v58, %v2910_v44  ;;  %v2911_v57 = vmul.f32 %v11510_v29, %v13917_v26  ;;  %v2949_v34 = vadd.f32 %v13973_v43, %v2929_v11  ;;  %v11179_v29 = vld [vmem:[%s17098_s4 + $0x20] sm:$0xff]  }
 0x80d   :  { %v11512_v15 = vpop.eup %11511 }
 0x80e   :  { %9959 = vmatmul.mubr.msk.bf16.gmra.mrb[84].mxu0 %vm89_vm0, %v2960_v22  ;;  %v2950_v61 = vadd.f32 %v13973_v43, %v2930_v32  ;;  %v2912_v46 = vmul.f32 %v11512_v15, %v13923_v8  ;;  %v2931_v50 = vmul.f32 %v13965_v58, %v2911_v57  ;;  %v11180_v22 = vld [vmem:[%s17098_s4 + $0x28] sm:$0xff]   ;;  %v11181_v32 = vld [vmem:[%s17098_s4 + $0x30] sm:$0xff]   ;;  %v11182_v57 = vld [vmem:[%s17098_s4 + $0x38] sm:$0xff]  }
 0x80f   :  { %v14055_v15 = vld [vmem:[%s17095_s1 + $0x8] ss:$0 sm:$0xff] }
 0x810   :  { %v2961_v49 = vpack.c.bf16 %v2950_v61, %v2949_v34  ;;  %v2932_v59 = vmul.f32 %v13965_v58, %v2912_v46  ;;  %v2951_v63 = vadd.f32 %v13973_v43, %v2931_v50 }
 0x812   :  { %9962 = vmatprep.mubr.msk.bf16.mxu0 %vm89_vm0, %v2961_v49  ;;  %v2952_v26 = vadd.f32 %v13973_v43, %v2932_v59 }
 0x814   :  { %v2962_v18 = vpack.c.bf16 %v2952_v26, %v2951_v63 }
 0x816   :  { %9963 = vmatmul.mubr.msk.bf16.gmra.mrb[88].mxu0 %vm89_vm0, %v2962_v18 }
 0x841   :  { %v2843_v13 = vpop.xlane.xlu0 %2842 }
 0x842   :  { %v2865_v1 = vmul.f32 0.03125, %v2843_v13 }
 0x843   :  { %v2846_v48 = vpop.xlane.xlu1 %2845 }
 0x844   :  { %v2881_v52 = vadd.f32 1e-05, %v2865_v1  ;;  %v2866_v10 = vmul.f32 0.03125, %v2846_v48 }
 0x845   :  { %v2849_v8 = vpop.xlane.xlu0 %2848 }
 0x846   :  { %11513 = vrsqrt.f32 %v2881_v52  ;;  %v2882_v27 = vadd.f32 1e-05, %v2866_v10  ;;  %v2867_v40 = vmul.f32 0.03125, %v2849_v8 }
 0x847   :  { %v2852_v14 = vpop.xlane.xlu1 %2851 }
 0x848   :  { %11515 = vrsqrt.f32 %v2882_v27  ;;  %v2883_v54 = vadd.f32 1e-05, %v2867_v40  ;;  %v2868_v7 = vmul.f32 0.03125, %v2852_v14 }
 0x84a   :  { %11517 = vrsqrt.f32 %v2883_v54  ;;  %v2884_v0 = vadd.f32 1e-05, %v2868_v7 }
 0x84c   :  { %11519 = vrsqrt.f32 %v2884_v0 }
 0x850   :  { %v11514_v2 = vpop.eup %11513 }
 0x851   :  { %v2913_v39 = vmul.f32 %v11514_v2, %v13939_v41 }
 0x852   :  { %v11516_v36 = vpop.eup %11515 }
 0x853   :  { %v2914_v25 = vmul.f32 %v11516_v36, %v13942_v5  ;;  %v2933_v31 = vmul.f32 %v13965_v58, %v2913_v39 }
 0x854   :  { %v11518_v4 = vpop.eup %11517 }
 0x855   :  { %v2934_v55 = vmul.f32 %v13965_v58, %v2914_v25  ;;  %v2915_v12 = vmul.f32 %v11518_v4, %v13947_v30  ;;  %v2953_v17 = vadd.f32 %v13973_v43, %v2933_v31  ;;  %v11175_v30 = vld [vmem:[%s17098_s4] sm:$0xff]  }
 0x856   :  { %v11520_v21 = vpop.eup %11519  ;;  %9970 = vmatprep.subr.bf16.mxu1 %v11175_v30 }
 0x857   :  { %v2954_v51 = vadd.f32 %v13973_v43, %v2934_v55  ;;  %v2916_v3 = vmul.f32 %v11520_v21, %v13953_v33  ;;  %v2935_v19 = vmul.f32 %v13965_v58, %v2915_v12  ;;  %9971 = vmatpush3.bf16.msra.mxu1 %v11175_v30  ;;  %v11176_v33 = vld [vmem:[%s17098_s4 + $0x8] sm:$0xff]  }
 0x858   :  { %9972 = vmatprep.subr.bf16.mxu1 %v11176_v33 }
 0x859   :  { %v2963_v41 = vpack.c.bf16 %v2954_v51, %v2953_v17  ;;  %v2936_v53 = vmul.f32 %v13965_v58, %v2916_v3  ;;  %v2955_v5 = vadd.f32 %v13973_v43, %v2935_v19  ;;  %v11177_v58 = vld [vmem:[%s17098_s4 + $0x10] sm:$0xff]  }
 0x85b   :  { %9966 = vmatprep.mubr.msk.bf16.mxu0 %vm89_vm0, %v2963_v41  ;;  %v2956_v44 = vadd.f32 %v13973_v43, %v2936_v53  ;;  %9973 = vmatpush3.bf16.msra.mxu1 %v11176_v33  ;;  %v11178_v43 = vld [vmem:[%s17098_s4 + $0x18] sm:$0xff]  }
 0x85c   :  { %9974 = vmatprep.subr.bf16.mxu1 %v11177_v58 }
 0x85d   :  { %v2964_v11 = vpack.c.bf16 %v2956_v44, %v2955_v5 }
 0x85f   :  { %9967 = vmatmul.mubr.msk.bf16.gmra.mrb[92].mxu0 %vm89_vm0, %v2964_v11  ;;  %9975 = vmatpush3.bf16.msra.mxu1 %v11177_v58 }
 0x860   :  { %9976 = vmatprep.subr.bf16.mxu1 %v11178_v43 }
 0x863   :  { %9977 = vmatpush3.bf16.msra.mxu1 %v11178_v43 }
 0x864   :  { %9978 = vmatprep.subr.bf16.mxu1 %v11179_v29 }
 0x867   :  { %9979 = vmatpush3.bf16.msra.mxu1 %v11179_v29 }
 0x868   :  { %9980 = vmatprep.subr.bf16.mxu1 %v11180_v22 }
 0x86b   :  { %9981 = vmatpush3.bf16.msra.mxu1 %v11180_v22 }
 0x86c   :  { %9982 = vmatprep.subr.bf16.mxu1 %v11181_v32 }
 0x86f   :  { %9983 = vmatpush3.bf16.msra.mxu1 %v11181_v32 }
 0x870   :  { %9984 = vmatprep.subr.bf16.mxu1 %v11182_v57 }
 0x873   :  { %9985 = vmatpush3.bf16.msra.mxu1 %v11182_v57 }
 0x8d9   :  { %v9956_v34 = vpop.f32.mrb[80].mxu0 }
 0x8da   :  { %v3052_v61 = vadd.f32 %v9956_v34, %v14055_v15  ;;  %v3043_v46 = vpop.f32.mrb[81].mxu0 }
 0x8db   :  { %v14059_v50 = vadd.f32 %v14055_v15, %v3043_v46  ;;  %v9957_v49 = vpop.f32.mrb[82].mxu0 }
 0x8dc   :  { %v14061_v59 = vmul.f32 0.70710677, %v3052_v61  ;;  %v14064_v63 = vadd.f32 %v9957_v49, %v14055_v15  ;;  %v3046_v26 = vpop.f32.mrb[83].mxu0 }
 0x8dd   :  { %v14067_v18 = vmul.f32 0.70710677, %v14059_v50  ;;  %v14070_v13 = vadd.f32 %v14055_v15, %v3046_v26 }
 0x8de   :  { %v3140_v1 = vand.u32 2147483647, %v14061_v59  ;;  %v14074_v48 = vmul.f32 0.70710677, %v14064_v63  ;;  %vm3460_vm11 = vcmp.lt.f32.partialorder %v14061_v59, 0.0 }
 0x8df   :  { %v3138_v52 = vand.u32 2147483647, %v14067_v18  ;;  %v14078_v10 = vmul.f32 0.70710677, %v14070_v13  ;;  %vm3458_vm14 = vcmp.lt.f32.partialorder %v14067_v18, 0.0 }
 0x8e0   :  { %v3156_v8 = vmul.f32 0.3275911, %v3140_v1  ;;  %v3141_v27 = vand.u32 2147483647, %v14074_v48  ;;  %v3364_v7 = vsub.f32 0.0, %v3140_v1  ;;  %vm3461_vm12 = vcmp.lt.f32.partialorder %v14074_v48, 0.0 }
 0x8e1   :  { %v3154_v40 = vmul.f32 0.3275911, %v3138_v52  ;;  %v3139_v14 = vand.u32 2147483647, %v14078_v10  ;;  %v9960_v2 = vpop.f32.mrb[84].mxu0  ;;  %v3362_v55 = vsub.f32 0.0, %v3138_v52 }
 0x8e2   :  { %v3172_v54 = vadd.f32 1.0, %v3156_v8  ;;  %v3157_v0 = vmul.f32 0.3275911, %v3141_v27  ;;  %v3059_v25 = vpop.f32.mrb[85].mxu0  ;;  %v3380_v21 = vmul.f32 %v3364_v7, %v3140_v1  ;;  %v14083_v51 = vadd.f32 %v9960_v2, %v14055_v15 }
 0x8e3   :  { %v3170_v39 = vadd.f32 1.0, %v3154_v40  ;;  %v3155_v36 = vmul.f32 0.3275911, %v3139_v14  ;;  %v9961_v4 = vpop.f32.mrb[86].mxu0  ;;  %v14086_v3 = vadd.f32 %v14055_v15, %v3059_v25  ;;  %v3365_v19 = vsub.f32 0.0, %v3141_v27 }
 0x8e4   :  { %11521 = vrcp.f32 %v3172_v54  ;;  %v3173_v31 = vadd.f32 1.0, %v3157_v0  ;;  %v3062_v12 = vpop.f32.mrb[87].mxu0  ;;  %v14089_v41 = vadd.f32 %v9961_v4, %v14055_v15  ;;  %v14092_v53 = vmul.f32 0.70710677, %v14083_v51 }
 0x8e5   :  { %11523 = vrcp.f32 %v3170_v39  ;;  %v3171_v17 = vadd.f32 1.0, %v3155_v36  ;;  %v14095_v5 = vadd.f32 %v14055_v15, %v3062_v12  ;;  %v3378_v44 = vmul.f32 %v3362_v55, %v3138_v52 }
 0x8e6   :  { %11525 = vrcp.f32 %v3173_v31  ;;  %v3363_v11 = vsub.f32 0.0, %v3139_v14  ;;  %v14098_v30 = vmul.f32 0.70710677, %v14086_v3  ;;  %v14101_v33 = vmul.f32 0.70710677, %v14089_v41 }
 0x8e7   :  { %v3398_v43 = vmul.f32 1.442695, %v3380_v21  ;;  %11527 = vrcp.f32 %v3171_v17  ;;  %v3144_v29 = vand.u32 2147483647, %v14092_v53  ;;  %v3381_v32 = vmul.f32 %v3365_v19, %v3141_v27 }
 0x8e8   :  { %v3142_v57 = vand.u32 2147483647, %v14098_v30  ;;  %v3145_v34 = vand.u32 2147483647, %v14101_v33  ;;  %v14111_v1 = vmul.f32 0.70710677, %v14095_v5  ;;  %v3379_v8 = vmul.f32 %v3363_v11, %v3139_v14 }
 0x8e9   :  { %v9964_v58 = vpop.f32.mrb[88].mxu0  ;;  %v3160_v49 = vmul.f32 0.3275911, %v3144_v29  ;;  %v3368_v26 = vsub.f32 0.0, %v3144_v29  ;;  %v3394_v52 = vmul.f32 1.442695, %v3378_v44  ;;  %11529 = vpow2.f32 %v3398_v43 }
 0x8ea   :  { %v14104_v22 = vpop.f32.mrb[89].mxu0  ;;  %v3158_v40 = vmul.f32 0.3275911, %v3142_v57  ;;  %v3161_v54 = vmul.f32 0.3275911, %v3145_v34  ;;  %v14115_v0 = vmul.f32 0.5, %v3052_v61 }
 0x8eb   :  { %v14108_v46 = vpop.f32.mrb[90].mxu0  ;;  %v3176_v27 = vadd.f32 1.0, %v3160_v49  ;;  %v3366_v2 = vsub.f32 0.0, %v3142_v57  ;;  %v14118_v39 = vand.u32 2147483647, %v14111_v1  ;;  %v3384_v12 = vmul.f32 %v3368_v26, %v3144_v29 }
 0x8ec   :  { %v14120_v36 = vpop.f32.mrb[91].mxu0  ;;  %v3400_v4 = vmul.f32 1.442695, %v3381_v32  ;;  %v3174_v14 = vadd.f32 1.0, %v3158_v40  ;;  %v3177_v61 = vadd.f32 1.0, %v3161_v54  ;;  %v3369_v20 = vsub.f32 0.0, %v3145_v34 }
 0x8ed   :  { %11531 = vrcp.f32 %v3176_v27  ;;  %v3396_v17 = vmul.f32 1.442695, %v3379_v8  ;;  %v3159_v19 = vmul.f32 0.3275911, %v14118_v39  ;;  %v3382_v49 = vmul.f32 %v3366_v2, %v3142_v57 }
 0x8ee   :  { %v14113_v7 = vpop.eup %11521  ;;  %11533 = vrcp.f32 %v3174_v14  ;;  %v3406_v26 = vmul.f32 1.442695, %v3384_v12  ;;  %v14135_v8 = vadd.f32 %v9964_v58, %v14055_v15  ;;  %v3385_v14 = vmul.f32 %v3369_v20, %v3145_v34 }
 0x8ef   :  { %v14122_v25 = vpop.eup %11523  ;;  %v3220_v31 = vmul.f32 1.0614054, %v14113_v7  ;;  %11535 = vpow2.f32 %v3394_v52  ;;  %v3175_v40 = vadd.f32 1.0, %v3159_v19  ;;  %v3402_v2 = vmul.f32 1.442695, %v3382_v49 }
 0x8f0   :  { %v3218_v55 = vmul.f32 1.0614054, %v14122_v25  ;;  %v14127_v44 = vpop.eup %11525  ;;  %11537 = vpow2.f32 %v3400_v4  ;;  %v14141_v12 = vmul.f32 0.70710677, %v14135_v8  ;;  %v14144_v58 = vmul.f32 0.5, %v14059_v50 }
 0x8f1   :  { %v3236_v21 = vadd.f32 -1.4531521, %v3220_v31  ;;  %v3221_v32 = vmul.f32 1.0614054, %v14127_v44  ;;  %v14131_v27 = vpop.eup %11527  ;;  %11539 = vrcp.f32 %v3177_v61  ;;  %v3408_v50 = vmul.f32 1.442695, %v3385_v14 }
 0x8f2   :  { %v3234_v11 = vadd.f32 -1.4531521, %v3218_v55  ;;  %v3219_v57 = vmul.f32 1.0614054, %v14131_v27  ;;  %11541 = vpow2.f32 %v3396_v17  ;;  %v3367_v17 = vsub.f32 0.0, %v14118_v39 }
 0x8f3   :  { %v3252_v43 = vmul.f32 %v14113_v7, %v3236_v21  ;;  %v3237_v31 = vadd.f32 -1.4531521, %v3221_v32  ;;  %11543 = vrcp.f32 %v3175_v40  ;;  %v11530_v19 = vpop.eup %11529  ;;  %v14150_v49 = vand.u32 2147483647, %v14141_v12 }
 0x8f4   :  { %v3250_v29 = vmul.f32 %v14122_v25, %v3234_v11  ;;  %v3235_v21 = vadd.f32 -1.4531521, %v3219_v57  ;;  %11545 = vpow2.f32 %v3406_v26  ;;  %v14155_v40 = vmul.f32 0.5, %v14064_v63 }
 0x8f5   :  { %v3268_v54 = vadd.f32 1.4214138, %v3252_v43  ;;  %v3253_v55 = vmul.f32 %v14127_v44, %v3237_v31  ;;  %11547 = vpow2.f32 %v3402_v2  ;;  %v3164_v63 = vmul.f32 0.3275911, %v14150_v49 }
 0x8f6   :  { %v3266_v52 = vadd.f32 1.4214138, %v3250_v29  ;;  %v3251_v34 = vmul.f32 %v14131_v27, %v3235_v21  ;;  %v3383_v21 = vmul.f32 %v3367_v17, %v14118_v39  ;;  %11549 = vpow2.f32 %v3408_v50 }
 0x8f7   :  { %v3284_v4 = vmul.f32 %v14113_v7, %v3268_v54  ;;  %v3269_v20 = vadd.f32 1.4214138, %v3253_v55  ;;  %v14152_v43 = vpop.eup %11531  ;;  %vm3459_vm13 = vcmp.lt.f32.partialorder %v14078_v10, 0.0  ;;  %vm3464_vm15 = vcmp.lt.f32.partialorder %v14092_v53, 0.0 }
 0x8f8   :  { %v3282_v61 = vmul.f32 %v14122_v25, %v3266_v52  ;;  %v14157_v29 = vpop.eup %11533  ;;  %v3267_v31 = vadd.f32 1.4214138, %v3251_v34  ;;  %v3224_v57 = vmul.f32 1.0614054, %v14152_v43  ;;  %vm3462_vm1 = vcmp.lt.f32.partialorder %v14098_v30, 0.0 }
 0x8f9   :  { %v3300_v11 = vadd.f32 -0.28449672, %v3284_v4  ;;  %v3285_v54 = vmul.f32 %v14127_v44, %v3269_v20  ;;  %v11536_v52 = vpop.eup %11535  ;;  %v3222_v55 = vmul.f32 1.0614054, %v14157_v29  ;;  %vm3465_vm2 = vcmp.lt.f32.partialorder %v14101_v33, 0.0 }
 0x8fa   :  { %v3298_v32 = vadd.f32 -0.28449672, %v3282_v61  ;;  %v11538_v2 = vpop.eup %11537  ;;  %v3283_v35 = vmul.f32 %v14131_v27, %v3267_v31  ;;  %v14241_v30 = vadd.f32 %v14055_v15, %v14120_v36  ;;  %vm3463_vm3 = vcmp.lt.f32.partialorder %v14111_v1, 0.0 }
 0x8fb   :  { %v3316_v26 = vmul.f32 %v14113_v7, %v3300_v11  ;;  %v3301_v61 = vadd.f32 -0.28449672, %v3285_v54  ;;  %v3240_v11 = vadd.f32 -1.4531521, %v3224_v57  ;;  %v14167_v24 = vpop.eup %11539  ;;  %v3238_v34 = vadd.f32 -1.4531521, %v3222_v55 }
 0x8fc   :  { %v3314_v4 = vmul.f32 %v14122_v25, %v3298_v32  ;;  %v3180_v32 = vadd.f32 1.0, %v3164_v63  ;;  %v11542_v6 = vpop.eup %11541  ;;  %v3299_v17 = vadd.f32 -0.28449672, %v3283_v35  ;;  %v3225_v60 = vmul.f32 1.0614054, %v14167_v24 }
 0x8fd   :  { %v3332_v14 = vadd.f32 0.2548296, %v3316_v26  ;;  %v3317_v39 = vmul.f32 %v14127_v44, %v3301_v61  ;;  %v3256_v26 = vmul.f32 %v14152_v43, %v3240_v11  ;;  %v14173_v54 = vpop.eup %11543  ;;  %v3254_v57 = vmul.f32 %v14157_v29, %v3238_v34 }
 0x8fe   :  { %v3330_v20 = vadd.f32 0.2548296, %v3314_v4  ;;  %11551 = vrcp.f32 %v3180_v32  ;;  %v3315_v55 = vmul.f32 %v14131_v27, %v3299_v17  ;;  %v3241_v35 = vadd.f32 -1.4531521, %v3225_v60 }
 0x8ff   :  { %v3348_v62 = vmul.f32 %v14113_v7, %v3332_v14  ;;  %v3333_v50 = vadd.f32 0.2548296, %v3317_v39  ;;  %v3272_v63 = vadd.f32 1.4214138, %v3256_v26  ;;  %v11546_v7 = vpop.eup %11545  ;;  %v3270_v61 = vadd.f32 1.4214138, %v3254_v57 }
 0x900   :  { %v3346_v31 = vmul.f32 %v14122_v25, %v3330_v20  ;;  %v3223_v11 = vmul.f32 1.0614054, %v14173_v54  ;;  %v3331_v25 = vadd.f32 0.2548296, %v3315_v55  ;;  %v11548_v34 = vpop.eup %11547  ;;  %v3404_v39 = vmul.f32 1.442695, %v3383_v21 }
 0x901   :  { %v3428_v4 = vmul.f32 %v11530_v19, %v3348_v62  ;;  %v3349_v56 = vmul.f32 %v14127_v44, %v3333_v50  ;;  %v3288_v20 = vmul.f32 %v14152_v43, %v3272_v63  ;;  %v3286_v32 = vmul.f32 %v14157_v29, %v3270_v61 }
 0x902   :  { %v3426_v14 = vmul.f32 %v11536_v52, %v3346_v31  ;;  %v3257_v62 = vmul.f32 %v14167_v24, %v3241_v35  ;;  %v3239_v19 = vadd.f32 -1.4531521, %v3223_v11  ;;  %v3347_v52 = vmul.f32 %v14131_v27, %v3331_v25  ;;  %v11550_v35 = vpop.eup %11549 }
 0x903   :  { %v3444_v45 = vsub.f32 1.0, %v3428_v4  ;;  %v3429_v26 = vmul.f32 %v11538_v2, %v3349_v56  ;;  %v3304_v60 = vadd.f32 -0.28449672, %v3288_v20  ;;  %v3302_v57 = vadd.f32 -0.28449672, %v3286_v32 }
 0x904   :  { %v3442_v31 = vsub.f32 1.0, %v3426_v14  ;;  %v3273_v4 = vadd.f32 1.4214138, %v3257_v62  ;;  %v3255_v44 = vmul.f32 %v14173_v54, %v3239_v19  ;;  %v3427_v63 = vmul.f32 %v11542_v6, %v3347_v52 }
 0x905   :  { %v3476_v17 = vsub.f32 0.0, %v3444_v45  ;;  %v3445_v55 = vsub.f32 1.0, %v3429_v26  ;;  %v3320_v61 = vmul.f32 %v14152_v43, %v3304_v60  ;;  %v3318_v56 = vmul.f32 %v14157_v29, %v3302_v57 }
 0x906   :  { %v3289_v27 = vmul.f32 %v14167_v24, %v3273_v4  ;;  %v14194_v21 = vadd.f32 %v14055_v15, %v14104_v22  ;;  %v3443_v11 = vsub.f32 1.0, %v3427_v63  ;;  %v3271_v20 = vadd.f32 1.4214138, %v3255_v44 }
 0x907   :  { %v3492_v50 = vsel %vm3460_vm11, %v3476_v17, %v3444_v45  ;;  %v3477_v14 = vsub.f32 0.0, %v3445_v55  ;;  %v3336_v59 = vadd.f32 0.2548296, %v3320_v61  ;;  %v3334_v6 = vadd.f32 0.2548296, %v3318_v56 }
 0x908   :  { %v3508_v2 = vadd.f32 1.0, %v3492_v50  ;;  %v14196_v45 = vpop.eup %11551  ;;  %v3305_v25 = vadd.f32 -0.28449672, %v3289_v27  ;;  %11553 = vpow2.f32 %v3404_v39  ;;  %v3474_v32 = vsub.f32 0.0, %v3442_v31 }
 0x909   :  { %v3493_v48 = vsel %vm3461_vm12, %v3477_v14, %v3445_v55  ;;  %v3475_v62 = vsub.f32 0.0, %v3443_v11  ;;  %v3352_v19 = vmul.f32 %v14152_v43, %v3336_v59  ;;  %v3350_v26 = vmul.f32 %v14157_v29, %v3334_v6 }
 0x90a   :  { %v3509_v17 = vadd.f32 1.0, %v3493_v48  ;;  %v3321_v22 = vmul.f32 %v14167_v24, %v3305_v25  ;;  %v3287_v52 = vmul.f32 %v14173_v54, %v3271_v20  ;;  %v3228_v57 = vmul.f32 1.0614054, %v14196_v45 }
 0x90b   :  { %v3432_v60 = vmul.f32 %v11546_v7, %v3352_v19  ;;  %v14205_v4 = vmul.f32 0.70710677, %v14194_v21  ;;  %v14208_v39 = vmul.f32 %v3508_v2, %v14115_v0  ;;  %v3430_v44 = vmul.f32 %v11548_v34, %v3350_v26 }
 0x90c   :  { %v14211_v43 = vmul.f32 %v3509_v17, %v14155_v40  ;;  %v3337_v29 = vadd.f32 0.2548296, %v3321_v22  ;;  %v3491_v50 = vsel %vm3459_vm13, %v3475_v62, %v3443_v11  ;;  %v3303_v63 = vadd.f32 -0.28449672, %v3287_v52 }
 0x90d   :  { %v3448_v55 = vsub.f32 1.0, %v3432_v60  ;;  %v3490_v10 = vsel %vm3458_vm14, %v3474_v32, %v3442_v31  ;;  %v3244_v56 = vadd.f32 -1.4531521, %v3228_v57  ;;  %v3446_v0 = vsub.f32 1.0, %v3430_v44 }
 0x90e   :  { %v3539_v7 = vpack.c.bf16 %v14211_v43, %v14208_v39  ;;  %v3353_v61 = vmul.f32 %v14167_v24, %v3337_v29  ;;  %v3319_v2 = vmul.f32 %v14173_v54, %v3303_v63  ;;  %v14219_v40 = vand.u32 2147483647, %v14205_v4 }
 0x90f   :  { %v3480_v27 = vsub.f32 0.0, %v3448_v55  ;;  %v3107_v34 = vmul.f32 0.5, %v14070_v13  ;;  %v3507_v18 = vadd.f32 1.0, %v3491_v50  ;;  %v14224_v31 = vadd.f32 %v14108_v46, %v14055_v15 }
 0x910   :  { %v3433_v14 = vmul.f32 %v11550_v35, %v3353_v61  ;;  %v3112_v11 = vmul.f32 0.5, %v14083_v51  ;;  %v3335_v24 = vadd.f32 0.2548296, %v3319_v2  ;;  %v3162_v59 = vmul.f32 0.3275911, %v14219_v40 }
 0x911   :  { %v3506_v25 = vadd.f32 1.0, %v3490_v10  ;;  %v3496_v20 = vsel %vm3464_vm15, %v3480_v27, %v3448_v55  ;;  %v3260_v48 = vmul.f32 %v14196_v45, %v3244_v56  ;;  %v3478_v13 = vsub.f32 0.0, %v3446_v0 }
 0x912   :  { %v11554_v6 = vpop.eup %11553  ;;  %v3449_v32 = vsub.f32 1.0, %v3433_v14  ;;  %v3113_v35 = vmul.f32 0.5, %v14089_v41  ;;  %v3351_v62 = vmul.f32 %v14173_v54, %v3335_v24  ;;  %v3178_v46 = vadd.f32 1.0, %v3162_v59 }
 0x913   :  { %v3523_v19 = vmul.f32 %v3507_v18, %v3107_v34  ;;  %v14234_v53 = vmul.f32 0.70710677, %v14224_v31  ;;  %v3512_v17 = vadd.f32 1.0, %v3496_v20  ;;  %v3522_v22 = vmul.f32 %v3506_v25, %v14144_v58 }
 0x914   :  { %v3481_v51 = vsub.f32 0.0, %v3449_v32  ;;  %v3431_v26 = vmul.f32 %v11554_v6, %v3351_v62  ;;  %11555 = vrcp.f32 %v3178_v46  ;;  %v3276_v60 = vadd.f32 1.4214138, %v3260_v48 }
 0x915   :  { %v3149_v41 = vand.u32 2147483647, %v14234_v53  ;;  %v3494_v54 = vsel %vm3462_vm1, %v3478_v13, %v3446_v0  ;;  %v3372_v43 = vsub.f32 0.0, %v14150_v49  ;;  %v3538_v29 = vpack.c.bf16 %v3523_v19, %v3522_v22 }
 0x916   :  { %v3497_v52 = vsel %vm3465_vm2, %v3481_v51, %v3449_v32  ;;  %v3447_v39 = vsub.f32 1.0, %v3431_v26  ;;  %v3528_v33 = vmul.f32 %v3512_v17, %v3112_v11  ;;  %v3110_v50 = vmul.f32 0.5, %v14086_v3 }
 0x917   :  { %v3513_v57 = vadd.f32 1.0, %v3497_v52  ;;  %v3165_v44 = vmul.f32 0.3275911, %v3149_v41  ;;  %v3510_v63 = vadd.f32 1.0, %v3494_v54  ;;  %v14247_v61 = vmul.f32 0.70710677, %v14241_v30  ;;  %9986 = vmatprep.mubr.bf16.mxu1 %v3538_v29 }
 0x918   :  { %v3479_v58 = vsub.f32 0.0, %v3447_v39  ;;  %v3111_v36 = vmul.f32 0.5, %v14095_v5  ;;  %v3292_v27 = vmul.f32 %v14196_v45, %v3276_v60  ;;  %9987 = vmatmul.mubr.bf16.vlgmr.msra.gmra.mrb[64].mxu1 %v3539_v7  ;;  %v3388_v3 = vmul.f32 %v3372_v43, %v14150_v49 }
 0x919   :  { %v3529_v55 = vmul.f32 %v3513_v57, %v3113_v35  ;;  %v3181_v10 = vadd.f32 1.0, %v3165_v44  ;;  %v3147_v34 = vand.u32 2147483647, %v14247_v61  ;;  %v3526_v18 = vmul.f32 %v3510_v63, %v3110_v50 }
 0x91a   :  { %v3495_v56 = vsel %vm3463_vm3, %v3479_v58, %v3447_v39  ;;  %v3370_v14 = vsub.f32 0.0, %v14219_v40  ;;  %v3308_v59 = vadd.f32 -0.28449672, %v3292_v27  ;;  %v3414_v6 = vmul.f32 1.442695, %v3388_v3 }
 0x91b   :  { %v3541_v0 = vpack.c.bf16 %v3529_v55, %v3528_v33  ;;  %v3511_v2 = vadd.f32 1.0, %v3495_v56  ;;  %11557 = vrcp.f32 %v3181_v10  ;;  %v3163_v11 = vmul.f32 0.3275911, %v3147_v34 }
 0x91c   :  { %v3386_v7 = vmul.f32 %v3370_v14, %v14219_v40  ;;  %v3373_v48 = vsub.f32 0.0, %v3149_v41  ;;  %v3324_v49 = vmul.f32 %v14196_v45, %v3308_v59  ;;  %v3371_v22 = vsub.f32 0.0, %v3147_v34 }
 0x91d   :  { %v3527_v1 = vmul.f32 %v3511_v2, %v3111_v36  ;;  %v3179_v25 = vadd.f32 1.0, %v3163_v11  ;;  %vm3468_vm4 = vcmp.lt.f32.partialorder %v14141_v12, 0.0  ;;  %vm3469_vm5 = vcmp.lt.f32.partialorder %v14234_v53, 0.0 }
 0x91e   :  { %v11556_v24 = vpop.eup %11555  ;;  %v3410_v46 = vmul.f32 1.442695, %v3386_v7  ;;  %v3389_v19 = vmul.f32 %v3373_v48, %v3149_v41  ;;  %v3340_v51 = vadd.f32 0.2548296, %v3324_v49  ;;  %v3387_v44 = vmul.f32 %v3371_v22, %v3147_v34 }
 0x91f   :  { %v3226_v5 = vmul.f32 1.0614054, %v11556_v24  ;;  %v3540_v20 = vpack.c.bf16 %v3527_v1, %v3526_v18  ;;  %11559 = vrcp.f32 %v3179_v25  ;;  %v3116_v12 = vmul.f32 0.5, %v14135_v8 }
 0x920   :  { %11561 = vpow2.f32 %v3414_v6  ;;  %v3416_v40 = vmul.f32 1.442695, %v3389_v19  ;;  %v3356_v54 = vmul.f32 %v14196_v45, %v3340_v51  ;;  %v3412_v10 = vmul.f32 1.442695, %v3387_v44 }
 0x921   :  { %v3242_v32 = vadd.f32 -1.4531521, %v3226_v5  ;;  %9990 = vmatprep.mubr.bf16.mxu1 %v3540_v20  ;;  %11563 = vpow2.f32 %v3410_v46  ;;  %vm3466_vm6 = vcmp.lt.f32.partialorder %v14205_v4, 0.0  ;;  %vm3467_vm7 = vcmp.lt.f32.partialorder %v14247_v61, 0.0 }
 0x922   :  { %9991 = vmatmul.mubr.bf16.gmra.mrb[68].mxu1 %v3541_v0  ;;  %11565 = vpow2.f32 %v3416_v40 }
 0x923   :  { %v3258_v13 = vmul.f32 %v11556_v24, %v3242_v32  ;;  %11567 = vpow2.f32 %v3412_v10 }
 0x925   :  { %v11558_v35 = vpop.eup %11557  ;;  %v3274_v62 = vadd.f32 1.4214138, %v3258_v13 }
 0x926   :  { %v3229_v17 = vmul.f32 1.0614054, %v11558_v35 }
 0x927   :  { %v3290_v26 = vmul.f32 %v11556_v24, %v3274_v62 }
 0x928   :  { %v3245_v52 = vadd.f32 -1.4531521, %v3229_v17 }
 0x929   :  { %v3306_v60 = vadd.f32 -0.28449672, %v3290_v26  ;;  %v11560_v39 = vpop.eup %11559 }
 0x92a   :  { %v3261_v57 = vmul.f32 %v11558_v35, %v3245_v52  ;;  %v3227_v33 = vmul.f32 1.0614054, %v11560_v39  ;;  %v11562_v50 = vpop.eup %11561 }
 0x92b   :  { %v3322_v43 = vmul.f32 %v11556_v24, %v3306_v60  ;;  %v3436_v41 = vmul.f32 %v11562_v50, %v3356_v54  ;;  %v11564_v6 = vpop.eup %11563 }
 0x92c   :  { %v3277_v29 = vadd.f32 1.4214138, %v3261_v57  ;;  %v3243_v63 = vadd.f32 -1.4531521, %v3227_v33  ;;  %v11566_v19 = vpop.eup %11565 }
 0x92d   :  { %v3338_v55 = vadd.f32 0.2548296, %v3322_v43  ;;  %v3452_v18 = vsub.f32 1.0, %v3436_v41 }
 0x92e   :  { %v3293_v58 = vmul.f32 %v11558_v35, %v3277_v29  ;;  %v3259_v0 = vmul.f32 %v11560_v39, %v3243_v63 }
 0x92f   :  { %v3354_v56 = vmul.f32 %v11556_v24, %v3338_v55  ;;  %v3484_v49 = vsub.f32 0.0, %v3452_v18  ;;  %v11568_v55 = vpop.eup %11567 }
 0x930   :  { %v3309_v27 = vadd.f32 -0.28449672, %v3293_v58  ;;  %v3275_v14 = vadd.f32 1.4214138, %v3259_v0 }
 0x931   :  { %v3434_v25 = vmul.f32 %v11564_v6, %v3354_v56  ;;  %v3500_v57 = vsel %vm3468_vm4, %v3484_v49, %v3452_v18  ;;  %v3117_v56 = vmul.f32 0.5, %v14224_v31  ;;  %v3114_v6 = vmul.f32 0.5, %v14194_v21 }
 0x932   :  { %v9968_v36 = vpop.f32.mrb[92].mxu0  ;;  %v3325_v1 = vmul.f32 %v11558_v35, %v3309_v27  ;;  %v3291_v32 = vmul.f32 %v11560_v39, %v3275_v14  ;;  %v3516_v41 = vadd.f32 1.0, %v3500_v57 }
 0x933   :  { %v14258_v2 = vadd.f32 %v9968_v36, %v14055_v15  ;;  %v3091_v45 = vpop.f32.mrb[93].mxu0  ;;  %v3450_v26 = vsub.f32 1.0, %v3434_v25  ;;  %v3115_v25 = vmul.f32 0.5, %v14241_v30 }
 0x934   :  { %v14261_v3 = vadd.f32 %v14055_v15, %v3091_v45  ;;  %v9969_v34 = vpop.f32.mrb[94].mxu0  ;;  %v3341_v20 = vadd.f32 0.2548296, %v3325_v1  ;;  %v3307_v62 = vadd.f32 -0.28449672, %v3291_v32 }
 0x935   :  { %v14264_v11 = vmul.f32 0.70710677, %v14258_v2  ;;  %v3094_v59 = vpop.f32.mrb[95].mxu0  ;;  %v14270_v5 = vadd.f32 %v9969_v34, %v14055_v15  ;;  %v3482_v29 = vsub.f32 0.0, %v3450_v26  ;;  %v3532_v34 = vmul.f32 %v3516_v41, %v3116_v12 }
 0x936   :  { %v14267_v24 = vmul.f32 0.70710677, %v14261_v3  ;;  %v3357_v13 = vmul.f32 %v11558_v35, %v3341_v20  ;;  %v3323_v52 = vmul.f32 %v11560_v39, %v3307_v62  ;;  %v14281_v63 = vadd.f32 %v14055_v15, %v3094_v59 }
 0x937   :  { %v3152_v7 = vand.u32 2147483647, %v14264_v11  ;;  %v14275_v17 = vmul.f32 0.70710677, %v14270_v5  ;;  %v3498_v0 = vsel %vm3466_vm6, %v3482_v29, %v3450_v26  ;;  %vm3472_vm8 = vcmp.lt.f32.partialorder %v14264_v11, 0.0 }
 0x938   :  { %v3150_v48 = vand.u32 2147483647, %v14267_v24  ;;  %v3437_v22 = vmul.f32 %v11566_v19, %v3357_v13  ;;  %v3339_v44 = vadd.f32 0.2548296, %v3323_v52  ;;  %v3514_v14 = vadd.f32 1.0, %v3498_v0 }
 0x939   :  { %v3168_v46 = vmul.f32 0.3275911, %v3152_v7  ;;  %v3153_v54 = vand.u32 2147483647, %v14275_v17  ;;  %v3376_v53 = vsub.f32 0.0, %v3152_v7  ;;  %vm3473_vm9 = vcmp.lt.f32.partialorder %v14275_v17, 0.0 }
 0x93a   :  { %v3166_v51 = vmul.f32 0.3275911, %v3150_v48  ;;  %v3453_v43 = vsub.f32 1.0, %v3437_v22  ;;  %v3355_v50 = vmul.f32 %v11560_v39, %v3339_v44  ;;  %v14287_v39 = vmul.f32 0.70710677, %v14281_v63 }
 0x93b   :  { %v3184_v60 = vadd.f32 1.0, %v3168_v46  ;;  %v3169_v35 = vmul.f32 0.3275911, %v3153_v54  ;;  %v3374_v8 = vsub.f32 0.0, %v3150_v48  ;;  %v3392_v32 = vmul.f32 %v3376_v53, %v3152_v7 }
 0x93c   :  { %v3182_v40 = vadd.f32 1.0, %v3166_v51  ;;  %v3485_v33 = vsub.f32 0.0, %v3453_v43  ;;  %v3435_v36 = vmul.f32 %v11568_v55, %v3355_v50  ;;  %v3151_v15 = vand.u32 2147483647, %v14287_v39 }
 0x93d   :  { %11569 = vrcp.f32 %v3184_v60  ;;  %v3185_v58 = vadd.f32 1.0, %v3169_v35  ;;  %v3377_v46 = vsub.f32 0.0, %v3153_v54  ;;  %v3390_v26 = vmul.f32 %v3374_v8, %v3150_v48 }
 0x93e   :  { %11571 = vrcp.f32 %v3182_v40  ;;  %v3501_v10 = vsel %vm3469_vm5, %v3485_v33, %v3453_v43  ;;  %v3451_v45 = vsub.f32 1.0, %v3435_v36  ;;  %v3167_v59 = vmul.f32 0.3275911, %v3151_v15 }
 0x93f   :  { %v3517_v27 = vadd.f32 1.0, %v3501_v10  ;;  %11573 = vrcp.f32 %v3185_v58  ;;  %v3530_v22 = vmul.f32 %v3514_v14, %v3114_v6  ;;  %v3422_v61 = vmul.f32 1.442695, %v3392_v32 }
 0x940   :  { %v3483_v1 = vsub.f32 0.0, %v3451_v45  ;;  %v3183_v19 = vadd.f32 1.0, %v3167_v59  ;;  %v3393_v44 = vmul.f32 %v3377_v46, %v3153_v54  ;;  %v3418_v29 = vmul.f32 1.442695, %v3390_v26 }
 0x941   :  { %v3533_v18 = vmul.f32 %v3517_v27, %v3117_v56  ;;  %v3375_v41 = vsub.f32 0.0, %v3151_v15  ;;  %vm3470_vm10 = vcmp.lt.f32.partialorder %v14267_v24, 0.0  ;;  %vm3471_vm11 = vcmp.lt.f32.partialorder %v14287_v39, 0.0  ;;  %v3743_v24 = vld [vmem:[%s17100_s6] sm:$0xff] }
 0x942   :  { %v3499_v20 = vsel %vm3467_vm7, %v3483_v1, %v3451_v45  ;;  %11575 = vrcp.f32 %v3183_v19  ;;  %v3424_v55 = vmul.f32 1.442695, %v3393_v44 }
 0x943   :  { %v3543_v4 = vpack.c.bf16 %v3533_v18, %v3532_v34  ;;  %v3515_v13 = vadd.f32 1.0, %v3499_v20  ;;  %11577 = vpow2.f32 %v3422_v61  ;;  %v3391_v0 = vmul.f32 %v3375_v41, %v3151_v15 }
 0x944   :  { %11579 = vpow2.f32 %v3418_v29 }
 0x945   :  { %v3531_v52 = vmul.f32 %v3515_v13, %v3115_v25  ;;  %11581 = vpow2.f32 %v3424_v55  ;;  %v3420_v59 = vmul.f32 1.442695, %v3391_v0 }
 0x947   :  { %v11570_v31 = vpop.eup %11569  ;;  %v3542_v43 = vpack.c.bf16 %v3531_v52, %v3530_v22  ;;  %11583 = vpow2.f32 %v3420_v59 }
 0x948   :  { %v11572_v49 = vpop.eup %11571  ;;  %v3232_v62 = vmul.f32 1.0614054, %v11570_v31 }
 0x949   :  { %v3230_v51 = vmul.f32 1.0614054, %v11572_v49  ;;  %v11574_v57 = vpop.eup %11573  ;;  %9994 = vmatprep.mubr.bf16.mxu1 %v3542_v43 }
 0x94a   :  { %v3248_v60 = vadd.f32 -1.4531521, %v3232_v62  ;;  %v3233_v35 = vmul.f32 1.0614054, %v11574_v57  ;;  %9995 = vmatmul.mubr.bf16.gmra.mrb[72].mxu1 %v3543_v4 }
 0x94b   :  { %v3246_v40 = vadd.f32 -1.4531521, %v3230_v51 }
 0x94c   :  { %v3264_v21 = vmul.f32 %v11570_v31, %v3248_v60  ;;  %v3249_v50 = vadd.f32 -1.4531521, %v3233_v35  ;;  %v11576_v27 = vpop.eup %11575 }
 0x94d   :  { %v3262_v30 = vmul.f32 %v11572_v49, %v3246_v40  ;;  %v3231_v34 = vmul.f32 1.0614054, %v11576_v27  ;;  %v11578_v6 = vpop.eup %11577 }
 0x94e   :  { %v3280_v7 = vadd.f32 1.4214138, %v3264_v21  ;;  %v3265_v12 = vmul.f32 %v11574_v57, %v3249_v50  ;;  %v11580_v19 = vpop.eup %11579  ;;  %v3120_v50 = vmul.f32 0.5, %v14258_v2  ;;  %v3119_v2 = vmul.f32 0.5, %v14281_v63 }
 0x94f   :  { %v3278_v33 = vadd.f32 1.4214138, %v3262_v30  ;;  %v3247_v14 = vadd.f32 -1.4531521, %v3231_v34  ;;  %v11582_v52 = vpop.eup %11581  ;;  %v14304_v34 = vand.u32 4294901760, %v3743_v24 }
 0x950   :  { %v3296_v48 = vmul.f32 %v11570_v31, %v3280_v7  ;;  %v3281_v56 = vadd.f32 1.4214138, %v3265_v12 }
 0x951   :  { %v3294_v58 = vmul.f32 %v11572_v49, %v3278_v33  ;;  %v3263_v32 = vmul.f32 %v11576_v27, %v3247_v14 }
 0x952   :  { %v3312_v10 = vadd.f32 -0.28449672, %v3296_v48  ;;  %v3297_v53 = vmul.f32 %v11574_v57, %v3281_v56  ;;  %v3121_v48 = vmul.f32 0.5, %v14270_v5 }
 0x953   :  { %v3310_v36 = vadd.f32 -0.28449672, %v3294_v58  ;;  %v3279_v46 = vadd.f32 1.4214138, %v3263_v32 }
 0x954   :  { %v3328_v54 = vmul.f32 %v11570_v31, %v3312_v10  ;;  %v3313_v8 = vadd.f32 -0.28449672, %v3297_v53 }
 0x955   :  { %v3326_v45 = vmul.f32 %v11572_v49, %v3310_v36  ;;  %v3295_v22 = vmul.f32 %v11576_v27, %v3279_v46 }
 0x956   :  { %v3344_v18 = vadd.f32 0.2548296, %v3328_v54  ;;  %v3329_v20 = vmul.f32 %v11574_v57, %v3313_v8 }
 0x957   :  { %v3342_v1 = vadd.f32 0.2548296, %v3326_v45  ;;  %v3311_v40 = vadd.f32 -0.28449672, %v3295_v22 }
 0x958   :  { %v3360_v4 = vmul.f32 %v11570_v31, %v3344_v18  ;;  %v3345_v62 = vadd.f32 0.2548296, %v3329_v20  ;;  %v14307_v18 = vsub.f32 %v3743_v24, %v14304_v34 }
 0x959   :  { %v3358_v25 = vmul.f32 %v11572_v49, %v3342_v1  ;;  %v3327_v21 = vmul.f32 %v11576_v27, %v3311_v40  ;;  %v14316_v1 = vld [vmem:[%s17095_s1 + $0x9] ss:$0 sm:$0xff] }
 0x95a   :  { %v3440_v13 = vmul.f32 %v11578_v6, %v3360_v4  ;;  %v3361_v26 = vmul.f32 %v11574_v57, %v3345_v62  ;;  %v11584_v57 = vpop.eup %11583  ;;  %v17185_v39 = vand.u32 4294901760, %v14307_v18 }
 0x95b   :  { %v3438_v15 = vmul.f32 %v11580_v19, %v3358_v25  ;;  %v3343_v30 = vadd.f32 0.2548296, %v3327_v21 }
 0x95c   :  { %v3456_v51 = vsub.f32 1.0, %v3440_v13  ;;  %v3441_v61 = vmul.f32 %v11582_v52, %v3361_v26 }
 0x95d   :  { %v3454_v43 = vsub.f32 1.0, %v3438_v15  ;;  %v3359_v33 = vmul.f32 %v11576_v27, %v3343_v30  ;;  %v3118_v27 = vmul.f32 0.5, %v14261_v3  ;;  %v3843_v3 = vsub.f32 %v14307_v18, %v17185_v39  ;;  %v3753_v39 = vld [vmem:[%s17100_s6 + $0x50] sm:$0xff] }
 0x95e   :  { %v3488_v60 = vsub.f32 0.0, %v3456_v51  ;;  %v3457_v49 = vsub.f32 1.0, %v3441_v61 }
 0x95f   :  { %v3486_v7 = vsub.f32 0.0, %v3454_v43  ;;  %v3439_v41 = vmul.f32 %v11584_v57, %v3359_v33  ;;  %v3844_v63 = vand.u32 4294901760, %v3843_v3 }
 0x960   :  { %v3504_v31 = vsel %vm3472_vm8, %v3488_v60, %v3456_v51  ;;  %v3489_v44 = vsub.f32 0.0, %v3457_v49 }
 0x961   :  { %v3520_v35 = vadd.f32 1.0, %v3504_v31  ;;  %v3502_v12 = vsel %vm3470_vm10, %v3486_v7, %v3454_v43  ;;  %v3455_v10 = vsub.f32 1.0, %v3439_v41  ;;  %10034 = vmatprep.mubr.f32.mxu0 %v3844_v63 }
 0x962   :  { %v3505_v29 = vsel %vm3473_vm9, %v3489_v44, %v3457_v49  ;;  %v3518_v54 = vadd.f32 1.0, %v3502_v12 }
 0x963   :  { %v3521_v55 = vadd.f32 1.0, %v3505_v29  ;;  %v3536_v11 = vmul.f32 %v3520_v35, %v3120_v50  ;;  %v3487_v56 = vsub.f32 0.0, %v3455_v10 }
 0x964   :  { %v3534_v5 = vmul.f32 %v3518_v54, %v3118_v27 }
 0x965   :  { %v3537_v58 = vmul.f32 %v3521_v55, %v3121_v48  ;;  %v3503_v17 = vsel %vm3471_vm11, %v3487_v56, %v3455_v10 }
 0x966   :  { %v3519_v0 = vadd.f32 1.0, %v3503_v17 }
 0x967   :  { %v3545_v36 = vpack.c.bf16 %v3537_v58, %v3536_v11 }
 0x968   :  { %v3535_v45 = vmul.f32 %v3519_v0, %v3119_v2 }
 0x96a   :  { %v3544_v53 = vpack.c.bf16 %v3535_v45, %v3534_v5 }
 0x96c   :  { %9998 = vmatprep.mubr.bf16.mxu1 %v3544_v53 }
 0x96d   :  { %9999 = vmatmul.mubr.bf16.gmra.mrb[76].mxu1 %v3545_v36 }
 0x9eb   :  { %v9988_v8 = vpop.f32.mrb[64].mxu1 }
 0x9ec   :  { %v3709_v14 = vadd.f32 %v9988_v8, %v13748_v23  ;;  %v3644_v4 = vpop.f32.mrb[65].mxu1 }
 0x9ed   :  { %v3707_v59 = vadd.f32 %v3644_v4, %v13739_v42  ;;  %v9989_v6 = vpop.f32.mrb[66].mxu1 }
 0x9ee   :  { %v3729_v25 = vadd.f32 %v14316_v1, %v3709_v14  ;;  %v3710_v20 = vadd.f32 %v9989_v6, %v13756_v28  ;;  %v3647_v32 = vpop.f32.mrb[67].mxu1 }
 0x9ef   :  { %v3727_v13 = vadd.f32 %v14316_v1, %v3707_v59  ;;  %v3708_v62 = vadd.f32 %v3647_v32, %v13751_v9 }
 0x9f0   :  { %v3766_v46 = vand.u32 4294901760, %v3729_v25  ;;  %v3730_v19 = vadd.f32 %v14316_v1, %v3710_v20 }
 0x9f1   :  { %v3760_v51 = vand.u32 4294901760, %v3727_v13  ;;  %v3728_v15 = vadd.f32 %v14316_v1, %v3708_v62 }
 0x9f2   :  { %v14326_v23 = vsub.f32 %v3729_v25, %v3766_v46  ;;  %v3769_v26 = vand.u32 4294901760, %v3730_v19 }
 0x9f3   :  { %v14328_v42 = vsub.f32 %v3727_v13, %v3760_v51  ;;  %v3763_v22 = vand.u32 4294901760, %v3728_v15 }
 0x9f4   :  { %v14330_v60 = vpack.c.bf16 %v3769_v26, %v3766_v46  ;;  %v14332_v28 = vsub.f32 %v3730_v19, %v3769_v26  ;;  %v4017_v40 = vand.u32 4294901760, %v14326_v23 }
 0x9f5   :  { %v9992_v52 = vpop.f32.mrb[68].mxu1  ;;  %v14336_v31 = vpack.c.bf16 %v3763_v22, %v3760_v51  ;;  %v4009_v43 = vsub.f32 %v3728_v15, %v3763_v22  ;;  %v4003_v44 = vand.u32 4294901760, %v14328_v42 }
 0x9f6   :  { %v3713_v61 = vadd.f32 %v9992_v52, %v13780_v38  ;;  %v3660_v9 = vpop.f32.mrb[69].mxu1  ;;  %v4018_v29 = vsub.f32 %v14326_v23, %v4017_v40  ;;  %v4024_v38 = vand.u32 4294901760, %v14332_v28  ;;  %v14370_v62 = vpack.c.bf16 %v14332_v28, %v14326_v23 }
 0x9f7   :  { %v3711_v49 = vadd.f32 %v3660_v9, %v13769_v37  ;;  %v9993_v21 = vpop.f32.mrb[70].mxu1  ;;  %10727 = vmatprep.subr.bf16.mxu0 %v14336_v31  ;;  %v4004_v37 = vsub.f32 %v14328_v42, %v4003_v44  ;;  %v4010_v50 = vand.u32 4294901760, %v4009_v43  ;;  %v14366_v13 = vpack.c.bf16 %v4009_v43, %v14328_v42  ;;  %v17425_v9 = vld [vmem:[#allocation43_spill] sm:$0xff] }
 0x9f8   :  { %v3733_v30 = vadd.f32 %v14316_v1, %v3713_v61  ;;  %v3714_v35 = vadd.f32 %v9993_v21, %v13788_v16  ;;  %v3663_v7 = vpop.f32.mrb[71].mxu1  ;;  %10729 = vmatpush3.bf16.msra.mxu0 %v14336_v31  ;;  %v4025_v16 = vsub.f32 %v14332_v28, %v4024_v38  ;;  %v4019_v10 = vand.u32 4294901760, %v4018_v29  ;;  %v17426_v21 = vld [vmem:[#allocation18_spill] sm:$0xff]  ;;  %v17427_v29 = vld [vmem:[#allocation13_spill] sm:$0xff] }
 0x9f9   :  { %v3731_v33 = vadd.f32 %v14316_v1, %v3711_v49  ;;  %v3712_v57 = vadd.f32 %v3663_v7, %v13783_v47  ;;  %10731 = vmatprep.subr.bf16.mxu0 %v14330_v60  ;;  %v4011_v58 = vsub.f32 %v4009_v43, %v4010_v50  ;;  %v4005_v17 = vand.u32 4294901760, %v4004_v37 }
 0x9fa   :  { %v3778_v48 = vand.u32 4294901760, %v3733_v30  ;;  %v3734_v55 = vadd.f32 %v14316_v1, %v3714_v35  ;;  %v4026_v36 = vand.u32 4294901760, %v4025_v16  ;;  %v14379_v22 = vpack.c.bf16 %v4010_v50, %v4003_v44 }
 0x9fb   :  { %v3772_v41 = vand.u32 4294901760, %v3731_v33  ;;  %v3732_v11 = vadd.f32 %v14316_v1, %v3712_v57  ;;  %v4012_v27 = vand.u32 4294901760, %v4011_v58  ;;  %v14381_v52 = vpack.c.bf16 %v4024_v38, %v4017_v40  ;;  %v17428_v38 = vld [vmem:[#allocation44_spill] sm:$0xff] }
 0x9fc   :  { %v4044_v12 = vsub.f32 %v3733_v30, %v3778_v48  ;;  %v3781_v47 = vand.u32 4294901760, %v3734_v55  ;;  %10733 = vmatpush3.bf16.msra.mxu0 %v14330_v60  ;;  %v14356_v5 = vpack.c.bf16 %v4026_v36, %v4019_v10  ;;  %17421 = vst [vmem:[#allocation49_spill] sm:$0xff] %v14379_v22 }
 0x9fd   :  { %v4030_v56 = vsub.f32 %v3731_v33, %v3772_v41  ;;  %v3775_v54 = vand.u32 4294901760, %v3732_v11  ;;  %v14360_v3 = vpack.c.bf16 %v4012_v27, %v4005_v17  ;;  %17422 = vst [vmem:[#allocation50_spill] sm:$0xff] %v14381_v52 }
 0x9fe   :  { %v14353_v2 = vpack.c.bf16 %v3781_v47, %v3778_v48  ;;  %v4051_v0 = vsub.f32 %v3734_v55, %v3781_v47  ;;  %v4045_v45 = vand.u32 4294901760, %v4044_v12 }
 0x9ff   :  { %v14358_v53 = vpack.c.bf16 %v3775_v54, %v3772_v41  ;;  %v4037_v24 = vsub.f32 %v3732_v11, %v3775_v54  ;;  %v4031_v63 = vand.u32 4294901760, %v4030_v56 }
 0xa00   :  { %v4046_v8 = vsub.f32 %v4044_v12, %v4045_v45  ;;  %v4052_v14 = vand.u32 4294901760, %v4051_v0  ;;  %v14374_v15 = vpack.c.bf16 %v4051_v0, %v4044_v12 }
 0xa01   :  { %10735 = vmatprep.subr.bf16.mxu0 %v14358_v53  ;;  %v4032_v4 = vsub.f32 %v4030_v56, %v4031_v63  ;;  %v4038_v59 = vand.u32 4294901760, %v4037_v24  ;;  %v14372_v46 = vpack.c.bf16 %v4037_v24, %v4030_v56 }
 0xa02   :  { %10737 = vmatpush3.bf16.msra.mxu0 %v14358_v53  ;;  %v4053_v6 = vsub.f32 %v4051_v0, %v4052_v14  ;;  %v4047_v20 = vand.u32 4294901760, %v4046_v8  ;;  %v14387_v23 = vpack.c.bf16 %v4052_v14, %v4045_v45 }
 0xa03   :  { %10739 = vmatprep.subr.bf16.mxu0 %v14353_v2  ;;  %v4039_v25 = vsub.f32 %v4037_v24, %v4038_v59  ;;  %v4033_v19 = vand.u32 4294901760, %v4032_v4  ;;  %v14383_v42 = vpack.c.bf16 %v4038_v59, %v4031_v63 }
 0xa04   :  { %v4054_v32 = vand.u32 4294901760, %v4053_v6  ;;  %17424 = vst [vmem:[#allocation23_spill] sm:$0xff] %v14387_v23 }
 0xa05   :  { %v4040_v51 = vand.u32 4294901760, %v4039_v25  ;;  %17423 = vst [vmem:[#allocation47_spill] sm:$0xff] %v14383_v42 }
 0xa06   :  { %10741 = vmatpush3.bf16.msra.mxu0 %v14353_v2  ;;  %v14377_v26 = vpack.c.bf16 %v4054_v32, %v4047_v20 }
 0xa07   :  { %v14385_v61 = vpack.c.bf16 %v4040_v51, %v4033_v19 }
 0xa1d   :  { %v9996_v28 = vpop.f32.mrb[72].mxu1 }
 0xa1e   :  { %v3717_v43 = vadd.f32 %v9996_v28, %v17425_v9  ;;  %v3676_v49 = vpop.f32.mrb[73].mxu1  ;;  %v3744_v28 = vld [vmem:[%s17100_s6 + $0x8] sm:$0xff] }
 0xa1f   :  { %v3715_v30 = vadd.f32 %v3676_v49, %v17426_v21  ;;  %v9997_v35 = vpop.f32.mrb[74].mxu1  ;;  %v14420_v9 = vand.u32 4294901760, %v3744_v28 }
 0xa20   :  { %v3737_v7 = vadd.f32 %v14316_v1, %v3717_v43  ;;  %v3718_v44 = vadd.f32 %v9997_v35, %v17427_v29  ;;  %v3679_v33 = vpop.f32.mrb[75].mxu1  ;;  %v3745_v43 = vld [vmem:[%s17100_s6 + $0x10] sm:$0xff] }
 0xa21   :  { %v3735_v40 = vadd.f32 %v14316_v1, %v3715_v30  ;;  %v3716_v57 = vadd.f32 %v3679_v33, %v17428_v38  ;;  %v14426_v49 = vsub.f32 %v3744_v28, %v14420_v9  ;;  %v14428_v21 = vand.u32 4294901760, %v3745_v43  ;;  %v3746_v30 = vld [vmem:[%s17100_s6 + $0x18] sm:$0xff]  ;;  %v17431_v33 = vld [vmem:[#allocation21_spill] sm:$0xff] }
 0xa22   :  { %v3790_v37 = vand.u32 4294901760, %v3737_v7  ;;  %v3738_v50 = vadd.f32 %v14316_v1, %v3718_v44 }
 0xa23   :  { %v3784_v48 = vand.u32 4294901760, %v3735_v40  ;;  %v3736_v55 = vadd.f32 %v14316_v1, %v3716_v57  ;;  %v17184_v35 = vand.u32 4294901760, %v14426_v49  ;;  %v14437_v44 = vsub.f32 %v3745_v43, %v14428_v21  ;;  %v17432_v57 = vld [vmem:[#allocation20_spill] sm:$0xff] }
 0xa24   :  { %v4072_v16 = vsub.f32 %v3737_v7, %v3790_v37  ;;  %v3793_v41 = vand.u32 4294901760, %v3738_v50  ;;  %v14434_v7 = vand.u32 4294901760, %v3746_v30 }
 0xa25   :  { %v4058_v11 = vsub.f32 %v3735_v40, %v3784_v48  ;;  %v3787_v58 = vand.u32 4294901760, %v3736_v55 }
 0xa26   :  { %v14397_v12 = vpack.c.bf16 %v3793_v41, %v3790_v37  ;;  %v4079_v47 = vsub.f32 %v3738_v50, %v3793_v41  ;;  %v4073_v10 = vand.u32 4294901760, %v4072_v16 }
 0xa27   :  { %v14399_v36 = vpack.c.bf16 %v3787_v58, %v3784_v48  ;;  %v4065_v56 = vsub.f32 %v3736_v55, %v3787_v58  ;;  %v4059_v54 = vand.u32 4294901760, %v4058_v11  ;;  %v3747_v48 = vld [vmem:[%s17100_s6 + $0x20] sm:$0xff]  ;;  %v14449_v58 = vsub.f32 %v14426_v49, %v17184_v35 }
 0xa28   :  { %v4074_v17 = vsub.f32 %v4072_v16, %v4073_v10  ;;  %v4080_v27 = vand.u32 4294901760, %v4079_v47  ;;  %v14401_v0 = vpack.c.bf16 %v4079_v47, %v4072_v16  ;;  %v17433_v16 = vld [vmem:[#allocation48_spill] sm:$0xff] }
 0xa29   :  { %10743 = vmatprep.subr.bf16.mxu0 %v14399_v36  ;;  %v4060_v45 = vsub.f32 %v4058_v11, %v4059_v54  ;;  %v4066_v24 = vand.u32 4294901760, %v4065_v56  ;;  %v14404_v63 = vpack.c.bf16 %v4065_v56, %v4058_v11  ;;  %v3854_v43 = vand.u32 4294901760, %v14449_v58  ;;  %v3751_v58 = vld [vmem:[%s17100_s6 + $0x40] sm:$0xff] }
 0xa2a   :  { %10745 = vmatpush3.bf16.msra.mxu0 %v14399_v36  ;;  %v4081_v8 = vsub.f32 %v4079_v47, %v4080_v27  ;;  %v14407_v14 = vpack.c.bf16 %v4080_v27, %v4073_v10  ;;  %v4075_v6 = vand.u32 4294901760, %v4074_v17  ;;  %v14452_v47 = vsub.f32 %v3746_v30, %v14434_v7  ;;  %v3748_v10 = vld [vmem:[%s17100_s6 + $0x28] sm:$0xff] }
 0xa2b   :  { %10747 = vmatprep.subr.bf16.mxu0 %v14397_v12  ;;  %v4067_v4 = vsub.f32 %v4065_v56, %v4066_v24  ;;  %v14410_v59 = vpack.c.bf16 %v4066_v24, %v4059_v54  ;;  %v4061_v20 = vand.u32 4294901760, %v4060_v45  ;;  %v17434_v54 = vld [vmem:[#allocation22_spill] sm:$0xff]  ;;  %v17183_v27 = vand.u32 4294901760, %v14437_v44 }
 0xa2c   :  { %17429 = vst [vmem:[#allocation24_spill] sm:$0xff] %v14407_v14  ;;  %v4082_v25 = vand.u32 4294901760, %v4081_v8  ;;  %v14461_v8 = vand.u32 4294901760, %v3747_v48  ;;  %v17190_v30 = vand.u32 4294901760, %v14452_v47 }
 0xa2d   :  { %17430 = vst [vmem:[#allocation29_spill] sm:$0xff] %v14410_v59  ;;  %v4068_v32 = vand.u32 4294901760, %v4067_v4  ;;  %v3749_v4 = vld [vmem:[%s17100_s6 + $0x30] sm:$0xff] }
 0xa2e   :  { %10749 = vmatpush3.bf16.msra.mxu0 %v14397_v12  ;;  %v14413_v19 = vpack.c.bf16 %v4082_v25, %v4075_v6 }
 0xa2f   :  { %v14415_v51 = vpack.c.bf16 %v4068_v32, %v4061_v20  ;;  %v14467_v20 = vand.u32 4294901760, %v3748_v10 }
 0xa40   :  { %v10000_v29 = vpop.f32.mrb[76].mxu1 }
 0xa41   :  { %v3721_v40 = vadd.f32 %v10000_v29, %v17431_v33  ;;  %v3692_v38 = vpop.f32.mrb[77].mxu1 }
 0xa42   :  { %v3719_v37 = vadd.f32 %v3692_v38, %v17432_v57  ;;  %v10001_v50 = vpop.f32.mrb[78].mxu1  ;;  %v14474_v38 = vand.u32 4294901760, %v3749_v4 }
 0xa43   :  { %v3741_v55 = vadd.f32 %v14316_v1, %v3721_v40  ;;  %v3722_v41 = vadd.f32 %v10001_v50, %v17433_v16  ;;  %v3695_v11 = vpop.f32.mrb[79].mxu1  ;;  %v3863_v40 = vsub.f32 %v14437_v44, %v17183_v27  ;;  %v14482_v50 = vsub.f32 %v3747_v48, %v14461_v8 }
 0xa44   :  { %v3739_v56 = vadd.f32 %v14316_v1, %v3719_v37  ;;  %v3720_v17 = vadd.f32 %v3695_v11, %v17434_v54  ;;  %v14487_v11 = vsub.f32 %v3748_v10, %v14467_v20  ;;  %v14498_v48 = vsub.f32 %v3749_v4, %v14474_v38 }
 0xa45   :  { %v3802_v45 = vand.u32 4294901760, %v3741_v55  ;;  %v3742_v24 = vadd.f32 %v14316_v1, %v3722_v41  ;;  %v3864_v4 = vand.u32 4294901760, %v3863_v40  ;;  %v17439_v42 = vand.u32 4294901760, %v14482_v50 }
 0xa46   :  { %v3796_v6 = vand.u32 4294901760, %v3739_v56  ;;  %v3740_v25 = vadd.f32 %v14316_v1, %v3720_v17  ;;  %v3750_v1 = vld [vmem:[%s17100_s6 + $0x38] sm:$0xff]  ;;  %v17193_v59 = vand.u32 4294901760, %v14487_v11  ;;  %v17194_v40 = vand.u32 4294901760, %v14498_v48 }
 0xa47   :  { %v4100_v32 = vsub.f32 %v3741_v55, %v3802_v45  ;;  %v3805_v28 = vand.u32 4294901760, %v3742_v24  ;;  %v14492_v54 = vand.u32 4294901760, %v3750_v1 }
 0xa48   :  { %v4086_v29 = vsub.f32 %v3739_v56, %v3796_v6  ;;  %v3799_v33 = vand.u32 4294901760, %v3740_v25 }
 0xa49   :  { %v14479_v57 = vpack.c.bf16 %v3805_v28, %v3802_v45  ;;  %v4107_v37 = vsub.f32 %v3742_v24, %v3805_v28  ;;  %v4101_v55 = vand.u32 4294901760, %v4100_v32 }
 0xa4a   :  { %v14484_v16 = vpack.c.bf16 %v3799_v33, %v3796_v6  ;;  %v4093_v41 = vsub.f32 %v3740_v25, %v3799_v33  ;;  %v4087_v56 = vand.u32 4294901760, %v4086_v29  ;;  %v14504_v33 = vand.u32 4294901760, %v3751_v58 }
 0xa4b   :  { %17435 = vst [vmem:[#allocation27_spill] sm:$0xff] %v14479_v57  ;;  %v4102_v17 = vsub.f32 %v4100_v32, %v4101_v55  ;;  %v4108_v45 = vand.u32 4294901760, %v4107_v37  ;;  %v14494_v24 = vpack.c.bf16 %v4107_v37, %v4100_v32  ;;  %v3752_v32 = vld [vmem:[%s17100_s6 + $0x48] sm:$0xff] }
 0xa4c   :  { %17436 = vst [vmem:[#allocation52_spill] sm:$0xff] %v14484_v16  ;;  %10751 = vmatprep.subr.bf16.mxu0 %v14484_v16  ;;  %v4088_v6 = vsub.f32 %v4086_v29, %v4087_v56  ;;  %v4094_v25 = vand.u32 4294901760, %v4093_v41  ;;  %v14500_v10 = vpack.c.bf16 %v4093_v41, %v4086_v29  ;;  %v3873_v29 = vsub.f32 %v14452_v47, %v17190_v30 }
 0xa4d   :  { %10753 = vmatpush3.bf16.msra.mxu0 %v14484_v16  ;;  %v4109_v27 = vsub.f32 %v4107_v37, %v4108_v45  ;;  %v14509_v35 = vpack.c.bf16 %v4108_v45, %v4101_v55  ;;  %v14522_v37 = vsub.f32 %v3750_v1, %v14492_v54  ;;  %v4103_v55 = vand.u32 4294901760, %v4102_v17 }
 0xa4e   :  { %10755 = vmatprep.subr.bf16.mxu0 %v14479_v57  ;;  %v4095_v28 = vsub.f32 %v4093_v41, %v4094_v25  ;;  %v14518_v14 = vpack.c.bf16 %v4094_v25, %v4087_v56  ;;  %v4089_v23 = vand.u32 4294901760, %v4088_v6  ;;  %v3883_v41 = vsub.f32 %v14482_v50, %v17439_v42  ;;  %v3755_v6 = vld [vmem:[%s17100_s6 + $0x60] sm:$0xff] }
 0xa4f   :  { %17437 = vst [vmem:[#allocation53_spill] sm:$0xff] %v14509_v35  ;;  %v4110_v45 = vand.u32 4294901760, %v4109_v27  ;;  %v14525_v35 = vand.u32 4294901760, %v3752_v32  ;;  %v14532_v56 = vsub.f32 %v3751_v58, %v14504_v33  ;;  %v14534_v25 = vand.u32 4294901760, %v3753_v39  ;;  %v3754_v27 = vld [vmem:[%s17100_s6 + $0x58] sm:$0xff] }
 0xa50   :  { %17438 = vst [vmem:[#allocation51_spill] sm:$0xff] %v14518_v14  ;;  %v4096_v30 = vand.u32 4294901760, %v4095_v28  ;;  %v3893_v42 = vsub.f32 %v14487_v11, %v17193_v59  ;;  %v17197_v58 = vand.u32 4294901760, %v14522_v37  ;;  %v3874_v28 = vand.u32 4294901760, %v3873_v29  ;;  %v3756_v29 = vld [vmem:[%s17100_s6 + $0x68] sm:$0xff] }
 0xa51   :  { %10757 = vmatpush3.bf16.msra.mxu0 %v14479_v57  ;;  %v14539_v1 = vpack.c.bf16 %v4110_v45, %v4103_v55  ;;  %v3903_v55 = vsub.f32 %v14498_v48, %v17194_v40  ;;  %v14555_v45 = vsub.f32 %v3752_v32, %v14525_v35  ;;  %v14562_v59 = vsub.f32 %v3753_v39, %v14534_v25  ;;  %v3757_v32 = vld [vmem:[%s17100_s6 + $0x70] sm:$0xff] }
 0xa52   :  { %10759 = vmatprep.subr.bf16.mxu0 %v14360_v3  ;;  %v14542_v17 = vpack.c.bf16 %v4096_v30, %v4089_v23  ;;  %v14557_v23 = vand.u32 4294901760, %v3754_v27  ;;  %v3884_v30 = vand.u32 4294901760, %v3883_v41  ;;  %v14580_v14 = vand.u32 4294901760, %v3756_v29 }
 0xa53   :  { %v3904_v39 = vand.u32 4294901760, %v3903_v55  ;;  %v17202_v41 = vand.u32 4294901760, %v14555_v45  ;;  %v17440_v52 = vand.u32 4294901760, %v14532_v56  ;;  %v17441_v57 = vand.u32 4294901760, %v14562_v59 }
 0xa54   :  { %10035 = vmatmul.mubr.f32.vlgmr.msra.gmra.mrb[96].mxu0 %v3854_v43  ;;  %v14564_v43 = vand.u32 4294901760, %v3755_v6  ;;  %v14578_v40 = vsub.f32 %v3754_v27, %v14557_v23  ;;  %v3758_v27 = vld [vmem:[%s17100_s6 + $0x78] sm:$0xff]  ;;  %s12014_s6 = smov 64  }
 0xa55   :  { %10761 = vmatpush3.bf16.msra.mxu0 %v14360_v3  ;;  %10037 = vmatprep.mubr.f32.mxu0 %v3864_v4  ;;  %v3894_v3 = vand.u32 4294901760, %v3893_v42  ;;  %v3913_v4 = vsub.f32 %v14522_v37, %v17197_v58  ;;  %v3923_v42 = vsub.f32 %v14532_v56, %v17440_v52 }
 0xa56   :  { %10763 = vmatprep.subr.bf16.mxu0 %v14356_v5  ;;  %v14588_v58 = vsub.f32 %v3755_v6, %v14564_v43  ;;  %v3952_v52 = vand.u32 4294901760, %v14578_v40  ;;  %v14603_v6 = vand.u32 4294901760, %v3758_v27 }
 0xa57   :  { %v3914_v55 = vand.u32 4294901760, %v3913_v4  ;;  %v3924_v22 = vand.u32 4294901760, %v3923_v42  ;;  %v3943_v4 = vsub.f32 %v14562_v59, %v17441_v57 }
 0xa58   :  { %10038 = vmatmul.mubr.f32.gmra.mrb[98].mxu0 %v3874_v28  ;;  %v14590_v28 = vand.u32 4294901760, %v3757_v32 }
 0xa59   :  { %10765 = vmatpush3.bf16.msra.mxu0 %v14356_v5  ;;  %10040 = vmatprep.mubr.f32.mxu0 %v3884_v30  ;;  %v3933_v5 = vsub.f32 %v14555_v45, %v17202_v41  ;;  %v14601_v30 = vsub.f32 %v3756_v29, %v14580_v14  ;;  %v3953_v41 = vsub.f32 %v14578_v40, %v3952_v52  ;;  %v3944_v57 = vand.u32 4294901760, %v3943_v4 }
 0xa5a   :  { %10767 = vmatprep.subr.bf16.mxu0 %v14385_v61  ;;  %v14611_v16 = vsub.f32 %v3757_v32, %v14590_v28 }
 0xa5b   :  { %v3934_v29 = vand.u32 4294901760, %v3933_v5 }
 0xa5c   :  { %10041 = vmatmul.mubr.f32.gmra.mrb[100].mxu0 %v3894_v3  ;;  %v3962_v3 = vand.u32 4294901760, %v14588_v58  ;;  %v3982_v42 = vand.u32 4294901760, %v14611_v16 }
 0xa5d   :  { %10769 = vmatpush3.bf16.msra.mxu0 %v14385_v61  ;;  %10043 = vmatprep.mubr.f32.mxu0 %v3904_v39  ;;  %v3972_v61 = vand.u32 4294901760, %v14601_v30  ;;  %v14619_v39 = vsub.f32 %v3758_v27, %v14603_v6 }
 0xa5e   :  { %10771 = vmatprep.subr.bf16.mxu0 %v14377_v26  ;;  %v3963_v32 = vsub.f32 %v14588_v58, %v3962_v3 }
 0xa5f   :  { %v3973_v5 = vsub.f32 %v14601_v30, %v3972_v61  ;;  %v3992_v27 = vand.u32 4294901760, %v14619_v39 }
 0xa60   :  { %10044 = vmatmul.mubr.f32.gmra.mrb[102].mxu0 %v3914_v55  ;;  %v3954_v55 = vand.u32 4294901760, %v3953_v41 }
 0xa61   :  { %10773 = vmatpush3.bf16.msra.mxu0 %v14377_v26  ;;  %10046 = vmatprep.mubr.f32.mxu0 %v3924_v22  ;;  %v3964_v26 = vand.u32 4294901760, %v3963_v32  ;;  %v3983_v22 = vsub.f32 %v14611_v16, %v3982_v42  ;;  %v3974_v4 = vand.u32 4294901760, %v3973_v5  ;;  %v3993_v41 = vsub.f32 %v14619_v39, %v3992_v27  ;;  %v11183_v32 = vld [vmem:[%s17096_s2 + $0x40] sm:$0xff]  }
 0xa62   :  { %10775 = vmatprep.subr.bf16.mxu0 %v14415_v51  ;;  %10338 = vmatprep.subr.bf16.mxu1 %v11183_v32 }
 0xa63   :  { %10339 = vmatpush3.bf16.msra.mxu1 %v11183_v32 }
 0xa64   :  { %10047 = vmatmul.mubr.f32.gmra.mrb[104].mxu0 %v3934_v29  ;;  %v3984_v29 = vand.u32 4294901760, %v3983_v22 }
 0xa65   :  { %10777 = vmatpush3.bf16.msra.mxu0 %v14415_v51  ;;  %10049 = vmatprep.mubr.f32.mxu0 %v3944_v57  ;;  %v3994_v51 = vand.u32 4294901760, %v3993_v41  ;;  %v17460_v57 = vld [vmem:[#allocation24_spill] sm:$0xff] }
 0xa66   :  { %10779 = vmatprep.subr.bf16.mxu0 %v14413_v19 }
 0xa68   :  { %10050 = vmatmul.mubr.f32.gmra.mrb[106].mxu0 %v3954_v55 }
 0xa69   :  { %10781 = vmatpush3.bf16.msra.mxu0 %v14413_v19  ;;  %10052 = vmatprep.mubr.f32.mxu0 %v3964_v26  ;;  %v17448_v19 = vld [vmem:[#allocation50_spill] sm:$0xff] }
 0xa6a   :  { %10783 = vmatprep.subr.bf16.mxu0 %v14542_v17 }
 0xa6c   :  { %10053 = vmatmul.mubr.f32.gmra.mrb[108].mxu0 %v3974_v4 }
 0xa6d   :  { %10785 = vmatpush3.bf16.msra.mxu0 %v14542_v17  ;;  %10055 = vmatprep.mubr.f32.mxu0 %v3984_v29  ;;  %v17457_v17 = vld [vmem:[#allocation29_spill] sm:$0xff] }
 0xa6e   :  { %10787 = vmatprep.subr.bf16.mxu0 %v14539_v1 }
 0xa70   :  { %10056 = vmatmul.mubr.f32.gmra.mrb[110].mxu0 %v3994_v51 }
 0xa71   :  { %10789 = vmatpush3.bf16.msra.mxu0 %v14539_v1  ;;  %10090 = vmatprep.mubr.f32.mxu0 %v14304_v34  ;;  %v17454_v1 = vld [vmem:[#allocation23_spill] sm:$0xff] }
 0xa72   :  { %10791 = vmatprep.subr.bf16.mxu0 %v14366_v13 }
 0xa74   :  { %10091 = vmatmul.mubr.f32.vlgmr.msra.gmra.mrb[96].mxu0 %v14420_v9 }
 0xa75   :  { %10793 = vmatpush3.bf16.msra.mxu0 %v14366_v13  ;;  %10093 = vmatprep.mubr.f32.mxu0 %v14428_v21  ;;  %v17442_v13 = vld [vmem:[#allocation52_spill] sm:$0xff] }
 0xa76   :  { %10795 = vmatprep.subr.bf16.mxu0 %v14370_v62 }
 0xa78   :  { %10094 = vmatmul.mubr.f32.gmra.mrb[98].mxu0 %v14434_v7 }
 0xa79   :  { %10797 = vmatpush3.bf16.msra.mxu0 %v14370_v62  ;;  %10096 = vmatprep.mubr.f32.mxu0 %v14461_v8  ;;  %v17443_v62 = vld [vmem:[#allocation27_spill] sm:$0xff] }
 0xa7a   :  { %10799 = vmatprep.subr.bf16.mxu0 %v14372_v46 }
 0xa7c   :  { %10097 = vmatmul.mubr.f32.gmra.mrb[100].mxu0 %v14467_v20 }
 0xa7d   :  { %10801 = vmatpush3.bf16.msra.mxu0 %v14372_v46  ;;  %10099 = vmatprep.mubr.f32.mxu0 %v14474_v38  ;;  %v17444_v46 = vand.u32 4294901760, %v14307_v18 }
 0xa7e   :  { %10803 = vmatprep.subr.bf16.mxu0 %v14374_v15 }
 0xa80   :  { %10100 = vmatmul.mubr.f32.gmra.mrb[102].mxu0 %v14492_v54 }
 0xa81   :  { %10805 = vmatpush3.bf16.msra.mxu0 %v14374_v15  ;;  %10102 = vmatprep.mubr.f32.mxu0 %v14504_v33  ;;  %v17445_v15 = vld [vmem:[#allocation49_spill] sm:$0xff] }
 0xa82   :  { %10807 = vmatprep.subr.bf16.mxu0 %v14404_v63 }
 0xa84   :  { %10103 = vmatmul.mubr.f32.gmra.mrb[104].mxu0 %v14525_v35 }
 0xa85   :  { %10809 = vmatpush3.bf16.msra.mxu0 %v14404_v63  ;;  %10105 = vmatprep.mubr.f32.mxu0 %v14534_v25  ;;  %v17447_v63 = vand.u32 4294901760, %v14437_v44 }
 0xa86   :  { %10811 = vmatprep.subr.bf16.mxu0 %v14401_v0 }
 0xa88   :  { %10106 = vmatmul.mubr.f32.gmra.mrb[106].mxu0 %v14557_v23 }
 0xa89   :  { %10813 = vmatpush3.bf16.msra.mxu0 %v14401_v0  ;;  %10108 = vmatprep.mubr.f32.mxu0 %v14564_v43  ;;  %v17446_v0 = vand.u32 4294901760, %v14426_v49 }
 0xa8a   :  { %10815 = vmatprep.subr.bf16.mxu0 %v14500_v10 }
 0xa8c   :  { %10109 = vmatmul.mubr.f32.gmra.mrb[108].mxu0 %v14580_v14 }
 0xa8d   :  { %10817 = vmatpush3.bf16.msra.mxu0 %v14500_v10  ;;  %10111 = vmatprep.mubr.f32.mxu0 %v14590_v28  ;;  %v17451_v10 = vld [vmem:[#allocation47_spill] sm:$0xff] }
 0xa8e   :  { %10819 = vmatprep.subr.bf16.mxu0 %v14494_v24 }
 0xa90   :  { %10112 = vmatmul.mubr.f32.gmra.mrb[110].mxu0 %v14603_v6 }
 0xa91   :  { %10821 = vmatpush3.bf16.msra.mxu0 %v14494_v24  ;;  %10146 = vmatprep.mubr.f32.mxu0 %v14307_v18  ;;  %v17449_v24 = vand.u32 4294901760, %v14452_v47  ;;  %v17450_v18 = vand.u32 4294901760, %v14482_v50 }
 0xa92   :  { %10823 = vmatprep.subr.bf16.mxu0 %v14336_v31 }
 0xa94   :  { %10147 = vmatmul.mubr.f32.vlgmr.msra.gmra.mrb[96].mxu0 %v14426_v49  ;;  %v17452_v49 = vand.u32 4294901760, %v14487_v11 }
 0xa95   :  { %10825 = vmatpush3.bf16.msra.mxu0 %v14336_v31  ;;  %10149 = vmatprep.mubr.f32.mxu0 %v14437_v44  ;;  %v17453_v44 = vand.u32 4294901760, %v14498_v48 }
 0xa96   :  { %10827 = vmatprep.subr.bf16.mxu0 %v14330_v60 }
 0xa98   :  { %10150 = vmatmul.mubr.f32.gmra.mrb[98].mxu0 %v14452_v47  ;;  %v17455_v47 = vand.u32 4294901760, %v14522_v37 }
 0xa99   :  { %10829 = vmatpush3.bf16.msra.mxu0 %v14330_v60  ;;  %10152 = vmatprep.mubr.f32.mxu0 %v14482_v50  ;;  %v17456_v50 = vand.u32 4294901760, %v14532_v56 }
 0xa9a   :  { %10831 = vmatprep.subr.bf16.mxu0 %v14358_v53 }
 0xa9c   :  { %10153 = vmatmul.mubr.f32.gmra.mrb[100].mxu0 %v14487_v11  ;;  %v17458_v11 = vand.u32 4294901760, %v14555_v45 }
 0xa9d   :  { %10833 = vmatpush3.bf16.msra.mxu0 %v14358_v53  ;;  %10155 = vmatprep.mubr.f32.mxu0 %v14498_v48  ;;  %v17459_v48 = vand.u32 4294901760, %v14562_v59 }
 0xa9e   :  { %10835 = vmatprep.subr.bf16.mxu0 %v14353_v2 }
 0xaa0   :  { %10156 = vmatmul.mubr.f32.gmra.mrb[102].mxu0 %v14522_v37  ;;  %v17461_v37 = vld [vmem:[#allocation51_spill] sm:$0xff] }
 0xaa1   :  { %10837 = vmatpush3.bf16.msra.mxu0 %v14353_v2  ;;  %10158 = vmatprep.mubr.f32.mxu0 %v14532_v56 }
 0xaa2   :  { %10839 = vmatprep.subr.bf16.mxu0 %v14399_v36 }
 0xaa4   :  { %10159 = vmatmul.mubr.f32.gmra.mrb[104].mxu0 %v14555_v45 }
 0xaa5   :  { %10841 = vmatpush3.bf16.msra.mxu0 %v14399_v36  ;;  %10161 = vmatprep.mubr.f32.mxu0 %v14562_v59  ;;  %v17462_v59 = vld [vmem:[#allocation53_spill] sm:$0xff] }
 0xaa6   :  { %10843 = vmatprep.subr.bf16.mxu0 %v14397_v12 }
 0xaa8   :  { %10162 = vmatmul.mubr.f32.gmra.mrb[106].mxu0 %v14578_v40 }
 0xaa9   :  { %10845 = vmatpush3.bf16.msra.mxu0 %v14397_v12  ;;  %10164 = vmatprep.mubr.f32.mxu0 %v14588_v58 }
 0xaaa   :  { %10847 = vmatprep.subr.bf16.mxu0 %v17442_v13 }
 0xaac   :  { %10165 = vmatmul.mubr.f32.gmra.mrb[108].mxu0 %v14601_v30 }
 0xaad   :  { %10849 = vmatpush3.bf16.msra.mxu0 %v17442_v13  ;;  %10167 = vmatprep.mubr.f32.mxu0 %v14611_v16 }
 0xaae   :  { %10851 = vmatprep.subr.bf16.mxu0 %v17443_v62 }
 0xab0   :  { %10168 = vmatmul.mubr.f32.gmra.mrb[110].mxu0 %v14619_v39 }
 0xab1   :  { %10853 = vmatpush3.bf16.msra.mxu0 %v17443_v62  ;;  %10202 = vmatprep.mubr.f32.mxu0 %v17444_v46 }
 0xab2   :  { %10855 = vmatprep.subr.bf16.mxu0 %v17445_v15 }
 0xab4   :  { %10203 = vmatmul.mubr.f32.vlgmr.msra.gmra.mrb[96].mxu0 %v17446_v0 }
 0xab5   :  { %10857 = vmatpush3.bf16.msra.mxu0 %v17445_v15  ;;  %10205 = vmatprep.mubr.f32.mxu0 %v17447_v63 }
 0xab6   :  { %10859 = vmatprep.subr.bf16.mxu0 %v17448_v19 }
 0xab8   :  { %10206 = vmatmul.mubr.f32.gmra.mrb[98].mxu0 %v17449_v24 }
 0xab9   :  { %10861 = vmatpush3.bf16.msra.mxu0 %v17448_v19  ;;  %10208 = vmatprep.mubr.f32.mxu0 %v17450_v18 }
 0xaba   :  { %10863 = vmatprep.subr.bf16.mxu0 %v17451_v10 }
 0xabc   :  { %10209 = vmatmul.mubr.f32.gmra.mrb[100].mxu0 %v17452_v49 }
 0xabd   :  { %10865 = vmatpush3.bf16.msra.mxu0 %v17451_v10  ;;  %10211 = vmatprep.mubr.f32.mxu0 %v17453_v44 }
 0xabe   :  { %10867 = vmatprep.subr.bf16.mxu0 %v17454_v1 }
 0xac0   :  { %10212 = vmatmul.mubr.f32.gmra.mrb[102].mxu0 %v17455_v47 }
 0xac1   :  { %10869 = vmatpush3.bf16.msra.mxu0 %v17454_v1  ;;  %10214 = vmatprep.mubr.f32.mxu0 %v17456_v50 }
 0xac2   :  { %10871 = vmatprep.subr.bf16.mxu0 %v17457_v17 }
 0xac4   :  { %10215 = vmatmul.mubr.f32.gmra.mrb[104].mxu0 %v17458_v11 }
 0xac5   :  { %10873 = vmatpush3.bf16.msra.mxu0 %v17457_v17  ;;  %10217 = vmatprep.mubr.f32.mxu0 %v17459_v48 }
 0xac6   :  { %10875 = vmatprep.subr.bf16.mxu0 %v17460_v57 }
 0xac8   :  { %10218 = vmatmul.mubr.f32.gmra.mrb[106].mxu0 %v3952_v52 }
 0xac9   :  { %10877 = vmatpush3.bf16.msra.mxu0 %v17460_v57  ;;  %10220 = vmatprep.mubr.f32.mxu0 %v3962_v3 }
 0xaca   :  { %10879 = vmatprep.subr.bf16.mxu0 %v17461_v37 }
 0xacc   :  { %10221 = vmatmul.mubr.f32.gmra.mrb[108].mxu0 %v3972_v61 }
 0xacd   :  { %10881 = vmatpush3.bf16.msra.mxu0 %v17461_v37  ;;  %10223 = vmatprep.mubr.f32.mxu0 %v3982_v42 }
 0xace   :  { %10883 = vmatprep.subr.bf16.mxu0 %v17462_v59 }
 0xad0   :  { %10224 = vmatmul.mubr.f32.gmra.mrb[110].mxu0 %v3992_v27 }
 0xad1   :  { %10885 = vmatpush3.bf16.msra.mxu0 %v17462_v59  ;;  %10258 = vmatprep.mubr.f32.mxu0 %v14304_v34 }
 0xad2   :  { %10887 = vmatprep.subr.bf16.mxu0 %v14336_v31 }
 0xad4   :  { %10259 = vmatmul.mubr.f32.vlgmr.msra.gmra.mrb[96].mxu0 %v14420_v9 }
 0xad5   :  { %10889 = vmatpush3.bf16.msra.mxu0 %v14336_v31  ;;  %10261 = vmatprep.mubr.f32.mxu0 %v14428_v21 }
 0xad6   :  { %10891 = vmatprep.subr.bf16.mxu0 %v14330_v60 }
 0xad8   :  { %10262 = vmatmul.mubr.f32.gmra.mrb[98].mxu0 %v14434_v7 }
 0xad9   :  { %10893 = vmatpush3.bf16.msra.mxu0 %v14330_v60  ;;  %10264 = vmatprep.mubr.f32.mxu0 %v14461_v8 }
 0xada   :  { %10895 = vmatprep.subr.bf16.mxu0 %v14358_v53 }
 0xadc   :  { %10265 = vmatmul.mubr.f32.gmra.mrb[100].mxu0 %v14467_v20 }
 0xadd   :  { %10897 = vmatpush3.bf16.msra.mxu0 %v14358_v53  ;;  %10267 = vmatprep.mubr.f32.mxu0 %v14474_v38 }
 0xade   :  { %10899 = vmatprep.subr.bf16.mxu0 %v14353_v2 }
 0xae0   :  { %10268 = vmatmul.mubr.f32.gmra.mrb[102].mxu0 %v14492_v54 }
 0xae1   :  { %10901 = vmatpush3.bf16.msra.mxu0 %v14353_v2  ;;  %10270 = vmatprep.mubr.f32.mxu0 %v14504_v33 }
 0xae2   :  { %10903 = vmatprep.subr.bf16.mxu0 %v14399_v36 }
 0xae4   :  { %10271 = vmatmul.mubr.f32.gmra.mrb[104].mxu0 %v14525_v35 }
 0xae5   :  { %10905 = vmatpush3.bf16.msra.mxu0 %v14399_v36  ;;  %10273 = vmatprep.mubr.f32.mxu0 %v14534_v25 }
 0xae6   :  { %10907 = vmatprep.subr.bf16.mxu0 %v14397_v12 }
 0xae8   :  { %10274 = vmatmul.mubr.f32.gmra.mrb[106].mxu0 %v14557_v23 }
 0xae9   :  { %10909 = vmatpush3.bf16.msra.mxu0 %v14397_v12  ;;  %10276 = vmatprep.mubr.f32.mxu0 %v14564_v43 }
 0xaea   :  { %10911 = vmatprep.subr.bf16.mxu0 %v17442_v13 }
 0xaec   :  { %10277 = vmatmul.mubr.f32.gmra.mrb[108].mxu0 %v14580_v14 }
 0xaed   :  { %10913 = vmatpush3.bf16.msra.mxu0 %v17442_v13  ;;  %10279 = vmatprep.mubr.f32.mxu0 %v14590_v28 }
 0xaee   :  { %10915 = vmatprep.subr.bf16.mxu0 %v17443_v62 }
 0xaf0   :  { %10280 = vmatmul.mubr.f32.gmra.mrb[110].mxu0 %v14603_v6 }
 0xaf1   :  { %10917 = vmatpush3.bf16.msra.mxu0 %v17443_v62  ;;  %10314 = vmatprep.mubr.f32.mxu0 %v14304_v34 }
 0xaf4   :  { %10315 = vmatmul.mubr.f32.vlgmr.msra.gmra.mrb[96].mxu0 %v14420_v9 }
 0xaf5   :  { %10317 = vmatprep.mubr.f32.mxu0 %v14428_v21 }
 0xaf8   :  { %10318 = vmatmul.mubr.f32.gmra.mrb[98].mxu0 %v14434_v7 }
 0xaf9   :  { %10320 = vmatprep.mubr.f32.mxu0 %v14461_v8 }
 0xafc   :  { %10321 = vmatmul.mubr.f32.gmra.mrb[100].mxu0 %v14467_v20 }
 0xafd   :  { %10323 = vmatprep.mubr.f32.mxu0 %v14474_v38 }
 0xb00   :  { %10324 = vmatmul.mubr.f32.gmra.mrb[102].mxu0 %v14492_v54 }
 0xb01   :  { %10326 = vmatprep.mubr.f32.mxu0 %v14504_v33 }
 0xb04   :  { %10327 = vmatmul.mubr.f32.gmra.mrb[104].mxu0 %v14525_v35 }
 0xb05   :  { %10329 = vmatprep.mubr.f32.mxu0 %v14534_v25 }
 0xb08   :  { %10330 = vmatmul.mubr.f32.gmra.mrb[106].mxu0 %v14557_v23 }
 0xb09   :  { %10332 = vmatprep.mubr.f32.mxu0 %v14564_v43 }
 0xb0c   :  { %10333 = vmatmul.mubr.f32.gmra.mrb[108].mxu0 %v14580_v14 }
 0xb0d   :  { %10335 = vmatprep.mubr.f32.mxu0 %v14590_v28 }
 0xb10   :  { %10336 = vmatmul.mubr.f32.gmra.mrb[110].mxu0 %v14603_v6 }
 0xbc7   :  { %v14804_v34 = vpop.f32.mrb[96].mxu0 }
 0xbc8   :  { %17463 = vst [vmem:[#allocation25_spill] sm:$0xff] %v14804_v34  ;;  %v14806_v60 = vpop.f32.mrb[97].mxu0  ;;  %v5058_v31 = vsel %vm89_vm0, %v14804_v34, 0.0 }
 0xbc9   :  { %17464 = vst [vmem:[#allocation46_spill] sm:$0xff] %v14806_v60  ;;  %5059 = vadd.xlane.f32.xlu1 %v5058_v31  ;;  %v5055_v2 = vsel %vm89_vm0, %v14806_v60, 0.0 }
 0xbca   :  { %5056 = vadd.xlane.f32.xlu0 %v5055_v2 }
 0xbcb   :  { %v14812_v53 = vpop.f32.mrb[98].mxu0 }
 0xbcc   :  { %17465 = vst [vmem:[#allocation45_spill] sm:$0xff] %v14812_v53  ;;  %v14814_v12 = vpop.f32.mrb[99].mxu0  ;;  %v5064_v36 = vsel %vm89_vm0, %v14812_v53, 0.0 }
 0xbcd   :  { %17466 = vst [vmem:[#allocation26_spill] sm:$0xff] %v14814_v12  ;;  %5065 = vadd.xlane.f32.xlu1 %v5064_v36  ;;  %v5061_v14 = vsel %vm89_vm0, %v14814_v12, 0.0 }
 0xbce   :  { %5062 = vadd.xlane.f32.xlu0 %v5061_v14 }
 0xbcf   :  { %v14820_v9 = vpop.f32.mrb[100].mxu0 }
 0xbd0   :  { %17467 = vst [vmem:[#allocation28_spill] sm:$0xff] %v14820_v9  ;;  %v14822_v21 = vpop.f32.mrb[101].mxu0  ;;  %v5070_v35 = vsel %vm89_vm0, %v14820_v9, 0.0 }
 0xbd1   :  { %17468 = vst [vmem:[#allocation30_spill] sm:$0xff] %v14822_v21  ;;  %5071 = vadd.xlane.f32.xlu1 %v5070_v35  ;;  %v5067_v7 = vsel %vm89_vm0, %v14822_v21, 0.0 }
 0xbd2   :  { %5068 = vadd.xlane.f32.xlu0 %v5067_v7 }
 0xbd3   :  { %v14828_v8 = vpop.f32.mrb[102].mxu0 }
 0xbd4   :  { %17469 = vst [vmem:[#allocation31_spill] sm:$0xff] %v14828_v8  ;;  %v14830_v20 = vpop.f32.mrb[103].mxu0  ;;  %v5076_v38 = vsel %vm89_vm0, %v14828_v8, 0.0 }
 0xbd5   :  { %17470 = vst [vmem:[#allocation32_spill] sm:$0xff] %v14830_v20  ;;  %5077 = vadd.xlane.f32.xlu1 %v5076_v38  ;;  %v5073_v16 = vsel %vm89_vm0, %v14830_v20, 0.0 }
 0xbd6   :  { %5074 = vadd.xlane.f32.xlu0 %v5073_v16 }
 0xbd7   :  { %v14836_v54 = vpop.f32.mrb[104].mxu0 }
 0xbd8   :  { %17471 = vst [vmem:[#allocation33_spill] sm:$0xff] %v14836_v54  ;;  %v14838_v33 = vpop.f32.mrb[105].mxu0  ;;  %v5082_v40 = vsel %vm89_vm0, %v14836_v54, 0.0 }
 0xbd9   :  { %17472 = vst [vmem:[#allocation34_spill] sm:$0xff] %v14838_v33  ;;  %5083 = vadd.xlane.f32.xlu1 %v5082_v40  ;;  %v5079_v56 = vsel %vm89_vm0, %v14838_v33, 0.0 }
 0xbda   :  { %5080 = vadd.xlane.f32.xlu0 %v5079_v56 }
 0xbdb   :  { %v14844_v25 = vpop.f32.mrb[106].mxu0 }
 0xbdc   :  { %17473 = vst [vmem:[#allocation35_spill] sm:$0xff] %v14844_v25  ;;  %v14846_v58 = vpop.f32.mrb[107].mxu0  ;;  %v5088_v45 = vsel %vm89_vm0, %v14844_v25, 0.0 }
 0xbdd   :  { %17474 = vst [vmem:[#allocation36_spill] sm:$0xff] %v14846_v58  ;;  %5089 = vadd.xlane.f32.xlu1 %v5088_v45  ;;  %v5085_v23 = vsel %vm89_vm0, %v14846_v58, 0.0 }
 0xbde   :  { %5086 = vadd.xlane.f32.xlu0 %v5085_v23 }
 0xbdf   :  { %v14852_v43 = vpop.f32.mrb[108].mxu0 }
 0xbe0   :  { %17475 = vst [vmem:[#allocation37_spill] sm:$0xff] %v14852_v43  ;;  %v14854_v28 = vpop.f32.mrb[109].mxu0  ;;  %v5094_v52 = vsel %vm89_vm0, %v14852_v43, 0.0 }
 0xbe1   :  { %17476 = vst [vmem:[#allocation38_spill] sm:$0xff] %v14854_v28  ;;  %5095 = vadd.xlane.f32.xlu1 %v5094_v52  ;;  %v5091_v30 = vsel %vm89_vm0, %v14854_v28, 0.0 }
 0xbe2   :  { %5092 = vadd.xlane.f32.xlu0 %v5091_v30 }
 0xbe3   :  { %v14860_v6 = vpop.f32.mrb[110].mxu0 }
 0xbe4   :  { %17477 = vst [vmem:[#allocation39_spill] sm:$0xff] %v14860_v6  ;;  %v14862_v3 = vpop.f32.mrb[111].mxu0  ;;  %v5100_v61 = vsel %vm89_vm0, %v14860_v6, 0.0 }
 0xbe5   :  { %17478 = vst [vmem:[#allocation40_spill] sm:$0xff] %v14862_v3  ;;  %5101 = vadd.xlane.f32.xlu1 %v5100_v61  ;;  %v5097_v39 = vsel %vm89_vm0, %v14862_v3, 0.0 }
 0xbe6   :  { %5098 = vadd.xlane.f32.xlu0 %v5097_v39 }
 0xc56   :  { %v5060_v42 = vpop.xlane.xlu1 %5059 }
 0xc57   :  { %v5104_v55 = vmul.f32 0.03125, %v5060_v42  ;;  %v5057_v5 = vpop.xlane.xlu0 %5056 }
 0xc58   :  { %v5103_v27 = vmul.f32 0.03125, %v5057_v5 }
 0xc59   :  { %v14872_v26 = vsub.f32 %v14804_v34, %v5104_v55 }
 0xc5a   :  { %v14875_v22 = vsub.f32 %v14806_v60, %v5103_v27  ;;  %v5066_v4 = vpop.xlane.xlu1 %5065 }
 0xc5b   :  { %v5106_v41 = vmul.f32 0.03125, %v5066_v4  ;;  %v5063_v29 = vpop.xlane.xlu0 %5062  ;;  %v5136_v51 = vmul.f32 %v14872_v26, %v14872_v26 }
 0xc5c   :  { %v5105_v13 = vmul.f32 0.03125, %v5063_v29  ;;  %v5135_v62 = vmul.f32 %v14875_v22, %v14875_v22 }
 0xc5d   :  { %v14882_v46 = vsub.f32 %v14812_v53, %v5106_v41  ;;  %v5154_v15 = vsel %vm89_vm0, %v5136_v51, 0.0 }
 0xc5e   :  { %v14886_v0 = vsub.f32 %v14814_v12, %v5105_v13  ;;  %v5072_v63 = vpop.xlane.xlu1 %5071  ;;  %5155 = vadd.xlane.f32.xlu1 %v5154_v15  ;;  %v5151_v19 = vsel %vm89_vm0, %v5135_v62, 0.0 }
 0xc5f   :  { %v5108_v24 = vmul.f32 0.03125, %v5072_v63  ;;  %v5069_v18 = vpop.xlane.xlu0 %5068  ;;  %5152 = vadd.xlane.f32.xlu0 %v5151_v19  ;;  %v5138_v10 = vmul.f32 %v14882_v46, %v14882_v46 }
 0xc60   :  { %v5107_v49 = vmul.f32 0.03125, %v5069_v18  ;;  %v5137_v44 = vmul.f32 %v14886_v0, %v14886_v0 }
 0xc61   :  { %v14894_v1 = vsub.f32 %v14820_v9, %v5108_v24  ;;  %v5160_v47 = vsel %vm89_vm0, %v5138_v10, 0.0 }
 0xc62   :  { %v14898_v50 = vsub.f32 %v14822_v21, %v5107_v49  ;;  %v5078_v17 = vpop.xlane.xlu1 %5077  ;;  %5161 = vadd.xlane.f32.xlu1 %v5160_v47  ;;  %v5157_v11 = vsel %vm89_vm0, %v5137_v44, 0.0 }
 0xc63   :  { %v5110_v48 = vmul.f32 0.03125, %v5078_v17  ;;  %v5075_v57 = vpop.xlane.xlu0 %5074  ;;  %5158 = vadd.xlane.f32.xlu0 %v5157_v11  ;;  %v5140_v37 = vmul.f32 %v14894_v1, %v14894_v1 }
 0xc64   :  { %v5109_v59 = vmul.f32 0.03125, %v5075_v57  ;;  %v5139_v31 = vmul.f32 %v14898_v50, %v14898_v50 }
 0xc65   :  { %v14906_v2 = vsub.f32 %v14828_v8, %v5110_v48  ;;  %v5166_v36 = vsel %vm89_vm0, %v5140_v37, 0.0  ;;  %v17496_v8 = vld [vmem:[#allocation5_spill] sm:$0xff] }
 0xc66   :  { %v14910_v14 = vsub.f32 %v14830_v20, %v5109_v59  ;;  %v5084_v35 = vpop.xlane.xlu1 %5083  ;;  %5167 = vadd.xlane.f32.xlu1 %v5166_v36  ;;  %v5163_v7 = vsel %vm89_vm0, %v5139_v31, 0.0 }
 0xc67   :  { %v5112_v38 = vmul.f32 0.03125, %v5084_v35  ;;  %v5081_v16 = vpop.xlane.xlu0 %5080  ;;  %5164 = vadd.xlane.f32.xlu0 %v5163_v7  ;;  %v5142_v40 = vmul.f32 %v14906_v2, %v14906_v2 }
 0xc68   :  { %v5111_v56 = vmul.f32 0.03125, %v5081_v16  ;;  %v5141_v45 = vmul.f32 %v14910_v14, %v14910_v14 }
 0xc69   :  { %v14918_v23 = vsub.f32 %v14836_v54, %v5112_v38  ;;  %v5172_v52 = vsel %vm89_vm0, %v5142_v40, 0.0 }
 0xc6a   :  { %v14922_v30 = vsub.f32 %v14838_v33, %v5111_v56  ;;  %v5090_v61 = vpop.xlane.xlu1 %5089  ;;  %5173 = vadd.xlane.f32.xlu1 %v5172_v52  ;;  %v5169_v39 = vsel %vm89_vm0, %v5141_v45, 0.0  ;;  %v11184_v56 = vld [vmem:[%s17096_s2 + $0x48] sm:$0xff]   ;;  %v14973_v45 = vld [vmem:[%s17096_s2 + $0x50] sm:$0xff]  }
 0xc6b   :  { %v5114_v32 = vmul.f32 0.03125, %v5090_v61  ;;  %v5087_v42 = vpop.xlane.xlu0 %5086  ;;  %5170 = vadd.xlane.f32.xlu0 %v5169_v39  ;;  %v5144_v55 = vmul.f32 %v14918_v23, %v14918_v23  ;;  %10340 = vmatprep.subr.bf16.mxu1 %v11184_v56 }
 0xc6c   :  { %v5113_v5 = vmul.f32 0.03125, %v5087_v42  ;;  %v5143_v27 = vmul.f32 %v14922_v30, %v14922_v30  ;;  %10341 = vmatpush3.bf16.msra.mxu1 %v11184_v56 }
 0xc6d   :  { %v14930_v4 = vsub.f32 %v14844_v25, %v5114_v32  ;;  %v5178_v41 = vsel %vm89_vm0, %v5144_v55, 0.0  ;;  %10358 = vmatprep.subr.bf16.mxu1 %v14973_v45 }
 0xc6e   :  { %v14934_v29 = vsub.f32 %v14846_v58, %v5113_v5  ;;  %v5096_v51 = vpop.xlane.xlu1 %5095  ;;  %5179 = vadd.xlane.f32.xlu1 %v5178_v41  ;;  %v5175_v13 = vsel %vm89_vm0, %v5143_v27, 0.0 }
 0xc6f   :  { %v5116_v62 = vmul.f32 0.03125, %v5096_v51  ;;  %v5093_v15 = vpop.xlane.xlu0 %5092  ;;  %5176 = vadd.xlane.f32.xlu0 %v5175_v13  ;;  %v5146_v63 = vmul.f32 %v14930_v4, %v14930_v4 }
 0xc70   :  { %v5115_v19 = vmul.f32 0.03125, %v5093_v15  ;;  %v5145_v24 = vmul.f32 %v14934_v29, %v14934_v29 }
 0xc71   :  { %v14942_v18 = vsub.f32 %v14852_v43, %v5116_v62  ;;  %v5184_v10 = vsel %vm89_vm0, %v5146_v63, 0.0 }
 0xc72   :  { %v14946_v49 = vsub.f32 %v14854_v28, %v5115_v19  ;;  %5185 = vadd.xlane.f32.xlu1 %v5184_v10  ;;  %v5102_v44 = vpop.xlane.xlu1 %5101  ;;  %v5181_v47 = vsel %vm89_vm0, %v5145_v24, 0.0 }
 0xc73   :  { %v5118_v17 = vmul.f32 0.03125, %v5102_v44  ;;  %5182 = vadd.xlane.f32.xlu0 %v5181_v47  ;;  %v5099_v11 = vpop.xlane.xlu0 %5098  ;;  %v5148_v48 = vmul.f32 %v14942_v18, %v14942_v18 }
 0xc74   :  { %v5117_v57 = vmul.f32 0.03125, %v5099_v11  ;;  %v5147_v37 = vmul.f32 %v14946_v49, %v14946_v49 }
 0xc75   :  { %v14954_v59 = vsub.f32 %v14860_v6, %v5118_v17  ;;  %v5190_v31 = vsel %vm89_vm0, %v5148_v48, 0.0 }
 0xc76   :  { %v14958_v36 = vsub.f32 %v14862_v3, %v5117_v57  ;;  %5191 = vadd.xlane.f32.xlu1 %v5190_v31  ;;  %v5187_v35 = vsel %vm89_vm0, %v5147_v37, 0.0  ;;  %v14979_v37 = vld [vmem:[%s17095_s1 + $0xa] ss:$0 sm:$0xff] }
 0xc77   :  { %5188 = vadd.xlane.f32.xlu0 %v5187_v35  ;;  %v5150_v7 = vmul.f32 %v14954_v59, %v14954_v59 }
 0xc78   :  { %v5149_v38 = vmul.f32 %v14958_v36, %v14958_v36 }
 0xc79   :  { %v5196_v16 = vsel %vm89_vm0, %v5150_v7, 0.0 }
 0xc7a   :  { %5197 = vadd.xlane.f32.xlu1 %v5196_v16  ;;  %v5193_v40 = vsel %vm89_vm0, %v5149_v38, 0.0 }
 0xc7b   :  { %5194 = vadd.xlane.f32.xlu0 %v5193_v40  ;;  %v14985_v40 = vld [vmem:[%s17095_s1 + $0xb] ss:$0 sm:$0xff] }
 0xceb   :  { %v5156_v52 = vpop.xlane.xlu1 %5155 }
 0xcec   :  { %v5200_v61 = vmul.f32 0.03125, %v5156_v52  ;;  %v5153_v39 = vpop.xlane.xlu0 %5152 }
 0xced   :  { %v5199_v32 = vmul.f32 0.03125, %v5153_v39 }
 0xcee   :  { %v5216_v42 = vadd.f32 1e-05, %v5200_v61 }
 0xcef   :  { %v5215_v55 = vadd.f32 1e-05, %v5199_v32  ;;  %v5162_v5 = vpop.xlane.xlu1 %5161 }
 0xcf0   :  { %11585 = vrsqrt.f32 %v5216_v42  ;;  %v5202_v27 = vmul.f32 0.03125, %v5162_v5  ;;  %v5159_v41 = vpop.xlane.xlu0 %5158 }
 0xcf1   :  { %11587 = vrsqrt.f32 %v5215_v55  ;;  %v5201_v51 = vmul.f32 0.03125, %v5159_v41 }
 0xcf2   :  { %v5218_v13 = vadd.f32 1e-05, %v5202_v27 }
 0xcf3   :  { %v5217_v62 = vadd.f32 1e-05, %v5201_v51  ;;  %v5168_v15 = vpop.xlane.xlu1 %5167 }
 0xcf4   :  { %11589 = vrsqrt.f32 %v5218_v13  ;;  %v5204_v63 = vmul.f32 0.03125, %v5168_v15  ;;  %v5165_v19 = vpop.xlane.xlu0 %5164 }
 0xcf5   :  { %11591 = vrsqrt.f32 %v5217_v62  ;;  %v5203_v24 = vmul.f32 0.03125, %v5165_v19 }
 0xcf6   :  { %v5220_v10 = vadd.f32 1e-05, %v5204_v63 }
 0xcf7   :  { %v5219_v44 = vadd.f32 1e-05, %v5203_v24  ;;  %v5174_v47 = vpop.xlane.xlu1 %5173 }
 0xcf8   :  { %11593 = vrsqrt.f32 %v5220_v10  ;;  %v5206_v17 = vmul.f32 0.03125, %v5174_v47  ;;  %v5171_v11 = vpop.xlane.xlu0 %5170 }
 0xcf9   :  { %11595 = vrsqrt.f32 %v5219_v44  ;;  %v5205_v48 = vmul.f32 0.03125, %v5171_v11 }
 0xcfa   :  { %v11586_v57 = vpop.eup %11585  ;;  %v5222_v31 = vadd.f32 1e-05, %v5206_v17 }
 0xcfb   :  { %v11588_v35 = vpop.eup %11587  ;;  %v5221_v7 = vadd.f32 1e-05, %v5205_v48  ;;  %v5180_v38 = vpop.xlane.xlu1 %5179  ;;  %v5248_v16 = vmul.f32 %v11586_v57, %v14872_v26 }
 0xcfc   :  { %11597 = vrsqrt.f32 %v5222_v31  ;;  %v5208_v56 = vmul.f32 0.03125, %v5180_v38  ;;  %v5177_v52 = vpop.xlane.xlu0 %5176  ;;  %v5247_v61 = vmul.f32 %v11588_v35, %v14875_v22 }
 0xcfd   :  { %11599 = vrsqrt.f32 %v5221_v7  ;;  %v5207_v39 = vmul.f32 0.03125, %v5177_v52  ;;  %v5268_v32 = vmul.f32 %v14979_v37, %v5248_v16 }
 0xcfe   :  { %v11590_v42 = vpop.eup %11589  ;;  %v5224_v55 = vadd.f32 1e-05, %v5208_v56  ;;  %v5267_v5 = vmul.f32 %v14979_v37, %v5247_v61 }
 0xcff   :  { %v11592_v27 = vpop.eup %11591  ;;  %v5250_v26 = vmul.f32 %v11590_v42, %v14882_v46  ;;  %v5223_v41 = vadd.f32 1e-05, %v5207_v39  ;;  %v5186_v51 = vpop.xlane.xlu1 %5185  ;;  %v5288_v13 = vadd.f32 %v14985_v40, %v5268_v32  ;;  %v11186_v32 = vld [vmem:[%s17096_s2 + $0x58] sm:$0xff]  }
 0xd00   :  { %v5249_v62 = vmul.f32 %v11592_v27, %v14886_v0  ;;  %11601 = vrsqrt.f32 %v5224_v55  ;;  %v5210_v15 = vmul.f32 0.03125, %v5186_v51  ;;  %v5183_v22 = vpop.xlane.xlu0 %5182  ;;  %v5287_v63 = vadd.f32 %v14985_v40, %v5267_v5 }
 0xd01   :  { %v5270_v19 = vmul.f32 %v14979_v37, %v5250_v26  ;;  %11603 = vrsqrt.f32 %v5223_v41  ;;  %v5209_v24 = vmul.f32 0.03125, %v5183_v22 }
 0xd02   :  { %v11594_v10 = vpop.eup %11593  ;;  %v5269_v44 = vmul.f32 %v14979_v37, %v5249_v62  ;;  %v5226_v47 = vadd.f32 1e-05, %v5210_v15  ;;  %v14996_v46 = vpack.c.bf16 %v5288_v13, %v5287_v63 }
 0xd03   :  { %v11596_v17 = vpop.eup %11595  ;;  %v5290_v11 = vadd.f32 %v14985_v40, %v5270_v19  ;;  %v5225_v48 = vadd.f32 1e-05, %v5209_v24  ;;  %v5192_v0 = vpop.xlane.xlu1 %5191  ;;  %v5252_v57 = vmul.f32 %v11594_v10, %v14894_v1  ;;  %v11187_v24 = vld [vmem:[%s17096_s2 + $0x60] sm:$0xff]  }
 0xd04   :  { %v5289_v31 = vadd.f32 %v14985_v40, %v5269_v44  ;;  %11605 = vrsqrt.f32 %v5226_v47  ;;  %v5212_v35 = vmul.f32 0.03125, %v5192_v0  ;;  %10342 = vmatprep.mubr.msk.bf16.mxu1 %vm89_vm0, %v14996_v46  ;;  %v5189_v7 = vpop.xlane.xlu0 %5188  ;;  %v5251_v38 = vmul.f32 %v11596_v17, %v14898_v50 }
 0xd05   :  { %11607 = vrsqrt.f32 %v5225_v48  ;;  %v5211_v16 = vmul.f32 0.03125, %v5189_v7  ;;  %v5272_v56 = vmul.f32 %v14979_v37, %v5252_v57 }
 0xd06   :  { %v11598_v52 = vpop.eup %11597  ;;  %v5228_v61 = vadd.f32 1e-05, %v5212_v35  ;;  %v15005_v39 = vpack.c.bf16 %v5290_v11, %v5289_v31  ;;  %v5271_v1 = vmul.f32 %v14979_v37, %v5251_v38 }
 0xd07   :  { %v11600_v42 = vpop.eup %11599  ;;  %v5227_v55 = vadd.f32 1e-05, %v5211_v16  ;;  %v5198_v5 = vpop.xlane.xlu1 %5197  ;;  %v5292_v27 = vadd.f32 %v14985_v40, %v5272_v56  ;;  %v5254_v50 = vmul.f32 %v11598_v52, %v14906_v2 }
 0xd08   :  { %11609 = vrsqrt.f32 %v5228_v61  ;;  %v5214_v26 = vmul.f32 0.03125, %v5198_v5  ;;  %10343 = vmatmul.mubr.msk.bf16.vlgmr.msra.gmra.mrb[80].mxu1 %vm89_vm0, %v15005_v39  ;;  %v5195_v41 = vpop.xlane.xlu0 %5194  ;;  %v5291_v51 = vadd.f32 %v14985_v40, %v5271_v1  ;;  %v5253_v13 = vmul.f32 %v11600_v42, %v14910_v14 }
 0xd09   :  { %11611 = vrsqrt.f32 %v5227_v55  ;;  %v5213_v62 = vmul.f32 0.03125, %v5195_v41  ;;  %10359 = vmatpush3.bf16.msra.mxu1 %v14973_v45  ;;  %v5274_v15 = vmul.f32 %v14979_v37, %v5254_v50 }
 0xd0a   :  { %v11602_v22 = vpop.eup %11601  ;;  %v5230_v63 = vadd.f32 1e-05, %v5214_v26  ;;  %v15019_v19 = vpack.c.bf16 %v5292_v27, %v5291_v51  ;;  %v5273_v2 = vmul.f32 %v14979_v37, %v5253_v13  ;;  %10360 = vmatprep.subr.bf16.mxu1 %v11186_v32 }
 0xd0b   :  { %v11604_v10 = vpop.eup %11603  ;;  %v5229_v44 = vadd.f32 1e-05, %v5213_v62  ;;  %v5294_v14 = vadd.f32 %v14985_v40, %v5274_v15  ;;  %v5256_v47 = vmul.f32 %v11602_v22, %v14918_v23 }
 0xd0c   :  { %11613 = vrsqrt.f32 %v5230_v63  ;;  %10346 = vmatprep.mubr.msk.bf16.mxu1 %vm89_vm0, %v15019_v19  ;;  %v5293_v45 = vadd.f32 %v14985_v40, %v5273_v2  ;;  %v5255_v17 = vmul.f32 %v11604_v10, %v14922_v30 }
 0xd0d   :  { %11615 = vrsqrt.f32 %v5229_v44  ;;  %v5276_v11 = vmul.f32 %v14979_v37, %v5256_v47  ;;  %10361 = vmatpush3.bf16.msra.mxu1 %v11186_v32 }
 0xd0e   :  { %v11606_v48 = vpop.eup %11605  ;;  %v5306_v0 = vpack.c.bf16 %v5294_v14, %v5293_v45  ;;  %v5275_v57 = vmul.f32 %v14979_v37, %v5255_v17  ;;  %10378 = vmatprep.subr.bf16.mxu1 %v11187_v24 }
 0xd0f   :  { %v11608_v31 = vpop.eup %11607  ;;  %v5296_v23 = vadd.f32 %v14985_v40, %v5276_v11  ;;  %v5258_v35 = vmul.f32 %v11606_v48, %v14930_v4 }
 0xd10   :  { %10347 = vmatmul.mubr.msk.bf16.gmra.mrb[84].mxu1 %vm89_vm0, %v5306_v0  ;;  %v5295_v7 = vadd.f32 %v14985_v40, %v5275_v57  ;;  %v5257_v30 = vmul.f32 %v11608_v31, %v14934_v29 }
 0xd11   :  { %v5278_v38 = vmul.f32 %v14979_v37, %v5258_v35 }
 0xd12   :  { %v11610_v16 = vpop.eup %11609  ;;  %v5307_v56 = vpack.c.bf16 %v5296_v23, %v5295_v7  ;;  %v5277_v52 = vmul.f32 %v14979_v37, %v5257_v30 }
 0xd13   :  { %v11612_v61 = vpop.eup %11611  ;;  %v5298_v1 = vadd.f32 %v14985_v40, %v5278_v38  ;;  %v5260_v32 = vmul.f32 %v11610_v16, %v14942_v18 }
 0xd14   :  { %10350 = vmatprep.mubr.msk.bf16.mxu1 %vm89_vm0, %v5307_v56  ;;  %v5297_v4 = vadd.f32 %v14985_v40, %v5277_v52  ;;  %v5259_v42 = vmul.f32 %v11612_v61, %v14946_v49 }
 0xd15   :  { %v5280_v55 = vmul.f32 %v14979_v37, %v5260_v32 }
 0xd16   :  { %v11614_v29 = vpop.eup %11613  ;;  %v5308_v5 = vpack.c.bf16 %v5298_v1, %v5297_v4  ;;  %v5279_v27 = vmul.f32 %v14979_v37, %v5259_v42 }
 0xd17   :  { %v11616_v50 = vpop.eup %11615  ;;  %v5300_v26 = vadd.f32 %v14985_v40, %v5280_v55  ;;  %v5262_v41 = vmul.f32 %v11614_v29, %v14954_v59  ;;  %v11188_v59 = vld [vmem:[%s17096_s2 + $0x68] sm:$0xff]  }
 0xd18   :  { %10351 = vmatmul.mubr.msk.bf16.gmra.mrb[88].mxu1 %vm89_vm0, %v5308_v5  ;;  %v5299_v18 = vadd.f32 %v14985_v40, %v5279_v27  ;;  %v5261_v51 = vmul.f32 %v11616_v50, %v14958_v36  ;;  %v8904_v36 = vld [vmem:[%s17095_s1 + $0xc] ss:$0 sm:$0xff] }
 0xd19   :  { %v5282_v13 = vmul.f32 %v14979_v37, %v5262_v41 }
 0xd1a   :  { %v5309_v49 = vpack.c.bf16 %v5300_v26, %v5299_v18  ;;  %v5281_v62 = vmul.f32 %v14979_v37, %v5261_v51 }
 0xd1b   :  { %v5302_v15 = vadd.f32 %v14985_v40, %v5282_v13  ;;  %v15107_v13 = vld [vmem:[%s17095_s1 + $0xd] ss:$0 sm:$0xff] }
 0xd1c   :  { %10354 = vmatprep.mubr.msk.bf16.mxu1 %vm89_vm0, %v5309_v49  ;;  %v5301_v22 = vadd.f32 %v14985_v40, %v5281_v62 }
 0xd1e   :  { %v5310_v63 = vpack.c.bf16 %v5302_v15, %v5301_v22 }
 0xd20   :  { %10355 = vmatmul.mubr.msk.bf16.gmra.mrb[92].mxu1 %vm89_vm0, %v5310_v63 }
 0xd21   :  { %10362 = vmatprep.mubr.msk.bf16.mxu1 %vm89_vm0, %v14996_v46 }
 0xd28   :  { %10363 = vmatmul.mubr.msk.bf16.vlgmr.msra.gmra.mrb[96].mxu1 %vm89_vm0, %v15005_v39 }
 0xd29   :  { %10366 = vmatprep.mubr.msk.bf16.mxu1 %vm89_vm0, %v15019_v19  ;;  %10379 = vmatpush3.bf16.msra.mxu1 %v11187_v24 }
 0xd2a   :  { %10380 = vmatprep.subr.bf16.mxu1 %v11188_v59 }
 0xd2d   :  { %10381 = vmatpush3.bf16.msra.mxu1 %v11188_v59 }
 0xd30   :  { %10367 = vmatmul.mubr.msk.bf16.gmra.mrb[100].mxu1 %vm89_vm0, %v5306_v0 }
 0xd31   :  { %10370 = vmatprep.mubr.msk.bf16.mxu1 %vm89_vm0, %v5307_v56 }
 0xd38   :  { %10371 = vmatmul.mubr.msk.bf16.gmra.mrb[104].mxu1 %vm89_vm0, %v5308_v5 }
 0xd39   :  { %10374 = vmatprep.mubr.msk.bf16.mxu1 %vm89_vm0, %v5309_v49 }
 0xd40   :  { %10375 = vmatmul.mubr.msk.bf16.gmra.mrb[108].mxu1 %vm89_vm0, %v5310_v63 }
 0xd41   :  { %10382 = vmatprep.mubr.msk.bf16.mxu1 %vm89_vm0, %v14996_v46 }
 0xd48   :  { %10383 = vmatmul.mubr.msk.bf16.vlgmr.msra.gmra.mrb[112].mxu1 %vm89_vm0, %v15005_v39 }
 0xd49   :  { %10386 = vmatprep.mubr.msk.bf16.mxu1 %vm89_vm0, %v15019_v19 }
 0xd50   :  { %10387 = vmatmul.mubr.msk.bf16.gmra.mrb[116].mxu1 %vm89_vm0, %v5306_v0 }
 0xd51   :  { %10390 = vmatprep.mubr.msk.bf16.mxu1 %vm89_vm0, %v5307_v56 }
 0xd58   :  { %10391 = vmatmul.mubr.msk.bf16.gmra.mrb[120].mxu1 %vm89_vm0, %v5308_v5 }
 0xd59   :  { %10394 = vmatprep.mubr.msk.bf16.mxu1 %vm89_vm0, %v5309_v49 }
 0xd60   :  { %10395 = vmatmul.mubr.msk.bf16.gmra.mrb[124].mxu1 %vm89_vm0, %v5310_v63 }
 0xddb   :  { %v10344_v37 = vpop.f32.mrb[80].mxu1 }
 0xddc   :  { %v5399_v40 = vadd.f32 %v10344_v37, %v8904_v36  ;;  %v5390_v46 = vpop.f32.mrb[81].mxu1 }
 0xddd   :  { %v10345_v39 = vpop.f32.mrb[82].mxu1  ;;  %v5391_v24 = vadd.f32 %v8904_v36, %v5390_v46 }
 0xdde   :  { %v5402_v2 = vadd.f32 %v10345_v39, %v8904_v36  ;;  %v5393_v19 = vpop.f32.mrb[83].mxu1  ;;  %v17488_v39 = vld [vmem:[#allocation7_spill] sm:$0xff] }
 0xddf   :  { %v5394_v10 = vadd.f32 %v8904_v36, %v5393_v19  ;;  %v17489_v19 = vld [vmem:[#allocation9_spill] sm:$0xff] }
 0xde0   :  { %v15086_v44 = vpack.c.bf16 %v5402_v2, %v5399_v40  ;;  %v17487_v40 = vld [vmem:[#allocation6_spill] sm:$0xff] }
 0xde1   :  { %v15088_v14 = vpack.c.bf16 %v5394_v10, %v5391_v24 }
 0xde2   :  { %17479 = vst [vmem:[#allocation41_spill] sm:$0xff] %v15086_v44 }
 0xde3   :  { %17480 = vst [vmem:[#allocation42_spill] sm:$0xff] %v15088_v14  ;;  %v10348_v47 = vpop.f32.mrb[84].mxu1  ;;  %10414 = vmatprep.mubr.msk.bf16.mxu1 %vm89_vm0, %v15088_v14 }
 0xde4   :  { %v5415_v45 = vadd.f32 %v10348_v47, %v8904_v36  ;;  %v5406_v17 = vpop.f32.mrb[85].mxu1 }
 0xde5   :  { %v5407_v11 = vadd.f32 %v8904_v36, %v5406_v17  ;;  %v10349_v48 = vpop.f32.mrb[86].mxu1 }
 0xde6   :  { %v5418_v0 = vadd.f32 %v10349_v48, %v8904_v36  ;;  %v5409_v57 = vpop.f32.mrb[87].mxu1 }
 0xde7   :  { %v5410_v31 = vadd.f32 %v8904_v36, %v5409_v57 }
 0xde8   :  { %v15092_v23 = vpack.c.bf16 %v5418_v0, %v5415_v45 }
 0xde9   :  { %v15094_v35 = vpack.c.bf16 %v5410_v31, %v5407_v11 }
 0xdea   :  { %17481 = vst [vmem:[#allocation11_spill] sm:$0xff] %v15092_v23 }
 0xdeb   :  { %17482 = vst [vmem:[#allocation10_spill] sm:$0xff] %v15094_v35  ;;  %v10352_v7 = vpop.f32.mrb[88].mxu1 }
 0xdec   :  { %v5431_v30 = vadd.f32 %v10352_v7, %v8904_v36  ;;  %v5422_v38 = vpop.f32.mrb[89].mxu1 }
 0xded   :  { %v5423_v16 = vadd.f32 %v8904_v36, %v5422_v38  ;;  %v10353_v56 = vpop.f32.mrb[90].mxu1 }
 0xdee   :  { %v5434_v52 = vadd.f32 %v10353_v56, %v8904_v36  ;;  %v5425_v61 = vpop.f32.mrb[91].mxu1 }
 0xdef   :  { %v5426_v1 = vadd.f32 %v8904_v36, %v5425_v61 }
 0xdf0   :  { %v15096_v32 = vpack.c.bf16 %v5434_v52, %v5431_v30 }
 0xdf1   :  { %v15098_v4 = vpack.c.bf16 %v5426_v1, %v5423_v16 }
 0xdf2   :  { %17483 = vst [vmem:[#allocation12_spill] sm:$0xff] %v15096_v32 }
 0xdf3   :  { %17484 = vst [vmem:[#allocation8_spill] sm:$0xff] %v15098_v4  ;;  %v10356_v42 = vpop.f32.mrb[92].mxu1 }
 0xdf4   :  { %v5447_v55 = vadd.f32 %v10356_v42, %v8904_v36  ;;  %v5438_v29 = vpop.f32.mrb[93].mxu1 }
 0xdf5   :  { %v5439_v5 = vadd.f32 %v8904_v36, %v5438_v29  ;;  %v10357_v27 = vpop.f32.mrb[94].mxu1 }
 0xdf6   :  { %v5450_v50 = vadd.f32 %v10357_v27, %v8904_v36  ;;  %v5441_v26 = vpop.f32.mrb[95].mxu1 }
 0xdf7   :  { %v5442_v41 = vadd.f32 %v8904_v36, %v5441_v26 }
 0xdf8   :  { %v15100_v18 = vpack.c.bf16 %v5450_v50, %v5447_v55 }
 0xdf9   :  { %v15102_v51 = vpack.c.bf16 %v5442_v41, %v5439_v5 }
 0xdfa   :  { %17485 = vst [vmem:[#allocation14_spill] sm:$0xff] %v15100_v18 }
 0xdfb   :  { %17486 = vst [vmem:[#allocation15_spill] sm:$0xff] %v15102_v51  ;;  %v10364_v49 = vpop.f32.mrb[96].mxu1 }
 0xdfc   :  { %v5516_v62 = vpop.f32.mrb[97].mxu1  ;;  %v15110_v15 = vadd.f32 %v10364_v49, %v15107_v13 }
 0xdfd   :  { %v15113_v22 = vadd.f32 %v15107_v13, %v5516_v62  ;;  %v10365_v63 = vpop.f32.mrb[98].mxu1 }
 0xdfe   :  { %v5519_v59 = vpop.f32.mrb[99].mxu1  ;;  %v15116_v36 = vadd.f32 %v10365_v63, %v15107_v13  ;;  %v5699_v46 = vmul.f32 %v17487_v40, %v15110_v15  ;;  %v6061_v2 = vmul.f32 %v17488_v39, %v15110_v15  ;;  %v6593_v24 = vmul.f32 %v17489_v19, %v15110_v15 }
 0xdff   :  { %v15119_v37 = vadd.f32 %v15107_v13, %v5519_v59  ;;  %v5697_v10 = vmul.f32 %v17487_v40, %v15113_v22  ;;  %v6059_v47 = vmul.f32 %v17488_v39, %v15113_v22  ;;  %v6591_v48 = vmul.f32 %v17489_v19, %v15113_v22 }
 0xe00   :  { %v5700_v45 = vmul.f32 %v17487_v40, %v15116_v36  ;;  %v6062_v17 = vmul.f32 %v17488_v39, %v15116_v36  ;;  %v6594_v11 = vmul.f32 %v17489_v19, %v15116_v36  ;;  %v15251_v21 = vmul.f32 %v17496_v8, %v15110_v15 }
 0xe01   :  { %v5698_v0 = vmul.f32 %v17487_v40, %v15119_v37  ;;  %v6060_v57 = vmul.f32 %v17488_v39, %v15119_v37  ;;  %v6592_v31 = vmul.f32 %v17489_v19, %v15119_v37 }
 0xe02   :  { %v5714_v16 = vpack.c.bf16 %v5700_v45, %v5699_v46  ;;  %v15148_v56 = vpack.c.bf16 %v6062_v17, %v6061_v2  ;;  %v15150_v52 = vpack.c.bf16 %v6594_v11, %v6593_v24 }
 0xe03   :  { %v10368_v7 = vpop.f32.mrb[100].mxu1  ;;  %v5713_v42 = vpack.c.bf16 %v5698_v0, %v5697_v10  ;;  %v15155_v55 = vpack.c.bf16 %v6060_v57, %v6059_v47  ;;  %v15157_v29 = vpack.c.bf16 %v6592_v31, %v6591_v48 }
 0xe04   :  { %v15146_v30 = vadd.f32 %v10368_v7, %v15107_v13  ;;  %v5532_v38 = vpop.f32.mrb[101].mxu1  ;;  %17490 = vst [vmem:[#allocation17_spill] sm:$0xff] %v15150_v52 }
 0xe05   :  { %v15153_v61 = vadd.f32 %v15107_v13, %v5532_v38  ;;  %v10369_v1 = vpop.f32.mrb[102].mxu1  ;;  %17491 = vst [vmem:[#allocation16_spill] sm:$0xff] %v15157_v29  ;;  %11126 = vmatprep.subr.msk.bf16.mxu1 %vm89_vm0, %v5713_v42  ;;  %v5787_v26 = vsel %vm89_vm0, %v5713_v42, 0 }
 0xe06   :  { %v5535_v5 = vpop.f32.mrb[103].mxu1  ;;  %v15161_v27 = vadd.f32 %v10369_v1, %v15107_v13  ;;  %v5703_v41 = vmul.f32 %v17487_v40, %v15146_v30  ;;  %v6065_v49 = vmul.f32 %v17488_v39, %v15146_v30  ;;  %v6597_v62 = vmul.f32 %v17489_v19, %v15146_v30  ;;  %10399 = vmatpush3.bf16.xpose.msra.mxu1 %v5787_v26 }
 0xe07   :  { %v15164_v50 = vadd.f32 %v15107_v13, %v5535_v5  ;;  %v5701_v63 = vmul.f32 %v17487_v40, %v15153_v61  ;;  %v6063_v59 = vmul.f32 %v17488_v39, %v15153_v61  ;;  %11127 = vmatprep.subr.msk.bf16.mxu1 %vm89_vm0, %v5714_v16  ;;  %v6595_v10 = vmul.f32 %v17489_v19, %v15153_v61 }
 0xe08   :  { %v5704_v46 = vmul.f32 %v17487_v40, %v15161_v27  ;;  %v6066_v2 = vmul.f32 %v17488_v39, %v15161_v27  ;;  %v6598_v24 = vmul.f32 %v17489_v19, %v15161_v27  ;;  %v15271_v15 = vmul.f32 %v17496_v8, %v15153_v61 }
 0xe09   :  { %v5702_v47 = vmul.f32 %v17487_v40, %v15164_v50  ;;  %v6064_v45 = vmul.f32 %v17488_v39, %v15164_v50  ;;  %v6596_v17 = vmul.f32 %v17489_v19, %v15164_v50 }
 0xe0a   :  { %v15193_v57 = vpack.c.bf16 %v5704_v46, %v5703_v41  ;;  %v15195_v31 = vpack.c.bf16 %v6066_v2, %v6065_v49  ;;  %v15197_v7 = vpack.c.bf16 %v6598_v24, %v6597_v62  ;;  %v5790_v49 = vsel %vm89_vm0, %v5714_v16, 0 }
 0xe0b   :  { %v10372_v11 = vpop.f32.mrb[104].mxu1  ;;  %v5715_v42 = vpack.c.bf16 %v5702_v47, %v5701_v63  ;;  %v15202_v5 = vpack.c.bf16 %v6064_v45, %v6063_v59  ;;  %v15204_v26 = vpack.c.bf16 %v6596_v17, %v6595_v10 }
 0xe0c   :  { %v5557_v48 = vadd.f32 %v10372_v11, %v15107_v13  ;;  %v5548_v0 = vpop.f32.mrb[105].mxu1  ;;  %17492 = vst [vmem:[#allocation19_spill] sm:$0xff] %v15197_v7 }
 0xe0d   :  { %v15200_v38 = vadd.f32 %v15107_v13, %v5548_v0  ;;  %v10373_v1 = vpop.f32.mrb[106].mxu1  ;;  %17493 = vst [vmem:[#allocation43_spill] sm:$0xff] %v15204_v26  ;;  %v5793_v61 = vsel %vm89_vm0, %v5715_v42, 0 }
 0xe0e   :  { %v5551_v43 = vpop.f32.mrb[107].mxu1  ;;  %v15207_v6 = vadd.f32 %v10373_v1, %v15107_v13  ;;  %v5707_v62 = vmul.f32 %v17487_v40, %v5557_v48  ;;  %v6069_v46 = vmul.f32 %v17488_v39, %v5557_v48  ;;  %v6601_v2 = vmul.f32 %v17489_v19, %v5557_v48  ;;  %10401 = vmatpush3.bf16.xpose.msra.mxu1 %v5790_v49 }
 0xe0f   :  { %v15210_v41 = vadd.f32 %v15107_v13, %v5551_v43  ;;  %v5705_v63 = vmul.f32 %v17487_v40, %v15200_v38  ;;  %v6067_v59 = vmul.f32 %v17488_v39, %v15200_v38  ;;  %11128 = vmatprep.subr.msk.bf16.mxu1 %vm89_vm0, %v5715_v42  ;;  %v6599_v10 = vmul.f32 %v17489_v19, %v15200_v38 }
 0xe10   :  { %v5708_v24 = vmul.f32 %v17487_v40, %v15207_v6  ;;  %v6070_v43 = vmul.f32 %v17488_v39, %v15207_v6  ;;  %v6602_v16 = vmul.f32 %v17489_v19, %v15207_v6 }
 0xe11   :  { %v5706_v47 = vmul.f32 %v17487_v40, %v15210_v41  ;;  %v6068_v45 = vmul.f32 %v17488_v39, %v15210_v41  ;;  %v6600_v17 = vmul.f32 %v17489_v19, %v15210_v41 }
 0xe12   :  { %v15238_v49 = vpack.c.bf16 %v5708_v24, %v5707_v62  ;;  %v15240_v28 = vpack.c.bf16 %v6070_v43, %v6069_v46  ;;  %v15242_v3 = vpack.c.bf16 %v6602_v16, %v6601_v2  ;;  %v15255_v62 = vmul.f32 %v17496_v8, %v15113_v22 }
 0xe13   :  { %v10376_v11 = vpop.f32.mrb[108].mxu1  ;;  %v5717_v33 = vpack.c.bf16 %v5706_v47, %v5705_v63  ;;  %v15245_v58 = vpack.c.bf16 %v6068_v45, %v6067_v59  ;;  %v15247_v9 = vpack.c.bf16 %v6600_v17, %v6599_v10  ;;  %v15259_v46 = vmul.f32 %v17496_v8, %v15116_v36 }
 0xe14   :  { %v15236_v0 = vadd.f32 %v10376_v11, %v15107_v13  ;;  %v5564_v1 = vpop.f32.mrb[109].mxu1  ;;  %17494 = vst [vmem:[#allocation18_spill] sm:$0xff] %v15242_v3  ;;  %v15263_v2 = vmul.f32 %v17496_v8, %v15119_v37  ;;  %v15267_v59 = vmul.f32 %v17496_v8, %v15146_v30  ;;  %v15275_v22 = vmul.f32 %v17496_v8, %v15161_v27 }
 0xe15   :  { %v5565_v54 = vadd.f32 %v15107_v13, %v5564_v1  ;;  %v10377_v25 = vpop.f32.mrb[110].mxu1  ;;  %17495 = vst [vmem:[#allocation13_spill] sm:$0xff] %v15247_v9  ;;  %v15279_v36 = vmul.f32 %v17496_v8, %v15164_v50  ;;  %v15282_v37 = vmul.f32 %v17496_v8, %v5557_v48 }
 0xe16   :  { %v5567_v63 = vpop.f32.mrb[111].mxu1  ;;  %v15285_v24 = vadd.f32 %v10377_v25, %v15107_v13  ;;  %v5711_v43 = vmul.f32 %v17487_v40, %v15236_v0  ;;  %v6073_v27 = vmul.f32 %v17488_v39, %v15236_v0  ;;  %v6605_v50 = vmul.f32 %v17489_v19, %v15236_v0  ;;  %10403 = vmatpush3.bf16.xpose.msra.mxu1 %v5793_v61  ;;  %v15301_v25 = vld [vmem:[%s17095_s1 + $0xe] ss:$0 sm:$0xff] }
 0xe17   :  { %v15288_v30 = vadd.f32 %v15107_v13, %v5567_v63  ;;  %v5709_v48 = vmul.f32 %v17487_v40, %v5565_v54  ;;  %v6071_v13 = vmul.f32 %v17488_v39, %v5565_v54  ;;  %11129 = vmatprep.subr.msk.bf16.mxu1 %vm89_vm0, %v15193_v57  ;;  %v6603_v47 = vmul.f32 %v17489_v19, %v5565_v54 }
 0xe18   :  { %v5712_v42 = vmul.f32 %v17487_v40, %v15285_v24  ;;  %v6074_v16 = vmul.f32 %v17488_v39, %v15285_v24  ;;  %v6606_v10 = vmul.f32 %v17489_v19, %v15285_v24  ;;  %v15397_v29 = vpack.c.bf16 %v15263_v2, %v15255_v62 }
 0xe19   :  { %v5710_v45 = vmul.f32 %v17487_v40, %v15288_v30  ;;  %v6072_v17 = vmul.f32 %v17488_v39, %v15288_v30  ;;  %v6604_v11 = vmul.f32 %v17489_v19, %v15288_v30  ;;  %v7057_v62 = vmul.f32 %v17496_v8, %v15285_v24 }
 0xe1a   :  { %v15322_v20 = vpack.c.bf16 %v5712_v42, %v5711_v43  ;;  %v15324_v34 = vpack.c.bf16 %v6074_v16, %v6073_v27  ;;  %v15326_v53 = vpack.c.bf16 %v6606_v10, %v6605_v50  ;;  %v15343_v43 = vmul.f32 %v17496_v8, %v15207_v6  ;;  %17501 = vst [vmem:[#allocation22_spill] sm:$0xff] %v15397_v29 }
 0xe1b   :  { %v10384_v1 = vpop.f32.mrb[112].mxu1  ;;  %v15331_v3 = vpack.c.bf16 %v5710_v45, %v5709_v48  ;;  %v15333_v9 = vpack.c.bf16 %v6072_v17, %v6071_v13  ;;  %v15335_v7 = vpack.c.bf16 %v6604_v11, %v6603_v47  ;;  %v5796_v48 = vsel %vm89_vm0, %v15193_v57, 0 }
 0xe1c   :  { %v15320_v63 = vadd.f32 %v10384_v1, %v15301_v25  ;;  %v5634_v61 = vpop.f32.mrb[113].mxu1  ;;  %17497 = vst [vmem:[#allocation44_spill] sm:$0xff] %v15326_v53  ;;  %v15339_v1 = vmul.f32 %v17496_v8, %v15200_v38  ;;  %v15352_v13 = vmul.f32 %v17496_v8, %v15210_v41  ;;  %v15355_v42 = vmul.f32 %v17496_v8, %v5565_v54 }
 0xe1d   :  { %v15329_v60 = vadd.f32 %v15301_v25, %v5634_v61  ;;  %v10385_v12 = vpop.f32.mrb[114].mxu1  ;;  %17498 = vst [vmem:[#allocation21_spill] sm:$0xff] %v15335_v7  ;;  %v5799_v6 = vsel %vm89_vm0, %v5717_v33, 0 }
 0xe1e   :  { %v15346_v27 = vadd.f32 %v10385_v12, %v15301_v25  ;;  %v5637_v50 = vpop.f32.mrb[115].mxu1  ;;  %v6085_v16 = vmul.f32 %v17488_v39, %v15320_v63  ;;  %10405 = vmatpush3.bf16.xpose.msra.mxu1 %v5796_v48  ;;  %v5723_v47 = vmul.f32 %v17487_v40, %v15320_v63 }
 0xe1f   :  { %v15358_v38 = vadd.f32 %v15301_v25, %v5637_v50  ;;  %v6083_v12 = vmul.f32 %v17488_v39, %v15329_v60  ;;  %v5721_v41 = vmul.f32 %v17487_v40, %v15329_v60  ;;  %11130 = vmatprep.subr.msk.bf16.mxu1 %vm89_vm0, %v5717_v33  ;;  %v6615_v11 = vmul.f32 %v17489_v19, %v15329_v60 }
 0xe20   :  { %v6086_v57 = vmul.f32 %v17488_v39, %v15346_v27  ;;  %v5724_v45 = vmul.f32 %v17487_v40, %v15346_v27  ;;  %v6617_v50 = vmul.f32 %v17489_v19, %v15320_v63  ;;  %v6618_v52 = vmul.f32 %v17489_v19, %v15346_v27 }
 0xe21   :  { %v6084_v54 = vmul.f32 %v17488_v39, %v15358_v38  ;;  %v5722_v10 = vmul.f32 %v17487_v40, %v15358_v38  ;;  %v6616_v61 = vmul.f32 %v17489_v19, %v15358_v38 }
 0xe22   :  { %v6100_v17 = vpack.c.bf16 %v6086_v57, %v6085_v16  ;;  %v15386_v26 = vpack.c.bf16 %v5724_v45, %v5723_v47  ;;  %v15410_v47 = vpack.c.bf16 %v15279_v36, %v15271_v15  ;;  %v15414_v45 = vpack.c.bf16 %v15275_v22, %v15267_v59 }
 0xe23   :  { %v10388_v48 = vpop.f32.mrb[116].mxu1  ;;  %v6099_v53 = vpack.c.bf16 %v6084_v54, %v6083_v12  ;;  %v15384_v7 = vpack.c.bf16 %v5722_v10, %v5721_v41  ;;  %v15393_v57 = vpack.c.bf16 %v6616_v61, %v6615_v11  ;;  %v15401_v12 = vpack.c.bf16 %v15259_v46, %v15251_v21 }
 0xe24   :  { %17499 = vst [vmem:[#allocation20_spill] sm:$0xff] %v15386_v26  ;;  %v15391_v33 = vadd.f32 %v10388_v48, %v15301_v25  ;;  %v5650_v16 = vpop.f32.mrb[117].mxu1  ;;  %v15406_v10 = vpack.c.bf16 %v6618_v52, %v6617_v50  ;;  %17504 = vst [vmem:[#allocation49_spill] sm:$0xff] %v15410_v47  ;;  %v7055_v21 = vmul.f32 %v17496_v8, %v15288_v30 }
 0xe25   :  { %17500 = vst [vmem:[#allocation48_spill] sm:$0xff] %v15393_v57  ;;  %17502 = vst [vmem:[#allocation52_spill] sm:$0xff] %v15401_v12  ;;  %v15404_v41 = vadd.f32 %v15301_v25, %v5650_v16  ;;  %v10389_v54 = vpop.f32.mrb[118].mxu1  ;;  %10462 = vmatprep.subr.bf16.mxu0 %v6099_v53 }
 0xe26   :  { %17503 = vst [vmem:[#allocation27_spill] sm:$0xff] %v15406_v10  ;;  %17505 = vst [vmem:[#allocation50_spill] sm:$0xff] %v15414_v45  ;;  %v15421_v46 = vadd.f32 %v10389_v54, %v15301_v25  ;;  %v5653_v2 = vpop.f32.mrb[119].mxu1  ;;  %10463 = vmatpush3.bf16.msra.mxu0 %v6099_v53  ;;  %v6089_v52 = vmul.f32 %v17488_v39, %v15391_v33  ;;  %v5727_v22 = vmul.f32 %v17487_v40, %v15391_v33 }
 0xe27   :  { %v15426_v15 = vadd.f32 %v15301_v25, %v5653_v2  ;;  %10464 = vmatprep.subr.bf16.mxu0 %v6100_v17  ;;  %v6087_v59 = vmul.f32 %v17488_v39, %v15404_v41  ;;  %v6621_v36 = vmul.f32 %v17489_v19, %v15391_v33  ;;  %v5725_v53 = vmul.f32 %v17487_v40, %v15404_v41 }
 0xe28   :  { %v6090_v24 = vmul.f32 %v17488_v39, %v15421_v46  ;;  %v5728_v30 = vmul.f32 %v17487_v40, %v15421_v46  ;;  %v6622_v11 = vmul.f32 %v17489_v19, %v15421_v46  ;;  %10407 = vmatpush3.bf16.xpose.msra.mxu1 %v5799_v6  ;;  %v6619_v48 = vmul.f32 %v17489_v19, %v15404_v41 }
 0xe29   :  { %v6088_v61 = vmul.f32 %v17488_v39, %v15426_v15  ;;  %v5726_v50 = vmul.f32 %v17487_v40, %v15426_v15  ;;  %v6620_v16 = vmul.f32 %v17489_v19, %v15426_v15  ;;  %11131 = vmatprep.subr.msk.bf16.mxu1 %vm89_vm0, %v15238_v49  ;;  %v7056_v45 = vmul.f32 %v17496_v8, %v15236_v0 }
 0xe2a   :  { %10465 = vmatpush3.bf16.msra.mxu0 %v6100_v17  ;;  %v6102_v54 = vpack.c.bf16 %v6090_v24, %v6089_v52  ;;  %v15452_v2 = vpack.c.bf16 %v5728_v30, %v5727_v22  ;;  %v15454_v6 = vpack.c.bf16 %v6622_v11, %v6621_v36  ;;  %v15467_v17 = vpack.c.bf16 %v15352_v13, %v15339_v1 }
 0xe2b   :  { %v10392_v47 = vpop.f32.mrb[120].mxu1  ;;  %v6101_v12 = vpack.c.bf16 %v6088_v61, %v6087_v59  ;;  %v15458_v29 = vpack.c.bf16 %v5726_v50, %v5725_v53  ;;  %v15460_v10 = vpack.c.bf16 %v6620_v16, %v6619_v48  ;;  %v15471_v52 = vpack.c.bf16 %v15343_v43, %v15282_v37 }
 0xe2c   :  { %17506 = vst [vmem:[#allocation47_spill] sm:$0xff] %v15452_v2  ;;  %17507 = vst [vmem:[#allocation23_spill] sm:$0xff] %v15454_v6  ;;  %v15463_v57 = vadd.f32 %v10392_v47, %v15301_v25  ;;  %v5666_v26 = vpop.f32.mrb[121].mxu1  ;;  %v15474_v0 = vpack.c.bf16 %v7055_v21, %v15355_v42  ;;  %v5802_v47 = vsel %vm89_vm0, %v15238_v49, 0  ;;  %v15481_v36 = vpack.c.bf16 %v7057_v62, %v7056_v45 }
 0xe2d   :  { %17508 = vst [vmem:[#allocation29_spill] sm:$0xff] %v15460_v10  ;;  %17509 = vst [vmem:[#allocation24_spill] sm:$0xff] %v15467_v17  ;;  %v15477_v59 = vadd.f32 %v15301_v25, %v5666_v26  ;;  %v10393_v22 = vpop.f32.mrb[122].mxu1  ;;  %10466 = vmatprep.subr.bf16.mxu0 %v6101_v12  ;;  %v7066_v43 = vmul.f32 %v17496_v8, %v15329_v60  ;;  %v7067_v26 = vmul.f32 %v17496_v8, %v15358_v38 }
 0xe2e   :  { %17510 = vst [vmem:[#allocation51_spill] sm:$0xff] %v15471_v52  ;;  %17511 = vst [vmem:[#allocation53_spill] sm:$0xff] %v15474_v0  ;;  %v15484_v1 = vadd.f32 %v10393_v22, %v15301_v25  ;;  %v5669_v13 = vpop.f32.mrb[123].mxu1  ;;  %10467 = vmatpush3.bf16.msra.mxu0 %v6101_v12  ;;  %v6093_v37 = vmul.f32 %v17488_v39, %v15463_v57  ;;  %v5731_v45 = vmul.f32 %v17487_v40, %v15463_v57 }
 0xe2f   :  { %17512 = vst [vmem:[#allocation6_spill] sm:$0xff] %v15481_v36  ;;  %v15493_v42 = vadd.f32 %v15301_v25, %v5669_v13  ;;  %10468 = vmatprep.subr.bf16.mxu0 %v6102_v54  ;;  %v6091_v49 = vmul.f32 %v17488_v39, %v15477_v59  ;;  %v6625_v12 = vmul.f32 %v17489_v19, %v15463_v57 }
 0xe30   :  { %v6094_v62 = vmul.f32 %v17488_v39, %v15484_v1  ;;  %v5729_v60 = vmul.f32 %v17487_v40, %v15477_v59  ;;  %v5732_v38 = vmul.f32 %v17487_v40, %v15484_v1  ;;  %v6626_v21 = vmul.f32 %v17489_v19, %v15484_v1  ;;  %10409 = vmatpush3.bf16.xpose.msra.mxu1 %v5802_v47 }
 0xe31   :  { %v6092_v24 = vmul.f32 %v17488_v39, %v15493_v42  ;;  %v5730_v53 = vmul.f32 %v17487_v40, %v15493_v42  ;;  %v6623_v30 = vmul.f32 %v17489_v19, %v15477_v59  ;;  %v6624_v11 = vmul.f32 %v17489_v19, %v15493_v42  ;;  %11132 = vmatprep.subr.msk.bf16.mxu1 %vm89_vm0, %v15331_v3 }
 0xe32   :  { %10469 = vmatpush3.bf16.msra.mxu0 %v6102_v54  ;;  %v6104_v61 = vpack.c.bf16 %v6094_v62, %v6093_v37  ;;  %v15519_v50 = vpack.c.bf16 %v5732_v38, %v5731_v45  ;;  %v15521_v48 = vpack.c.bf16 %v6626_v21, %v6625_v12  ;;  %v5805_v47 = vsel %vm89_vm0, %v15331_v3, 0 }
 0xe33   :  { %v10396_v16 = vpop.f32.mrb[124].mxu1  ;;  %v6103_v22 = vpack.c.bf16 %v6092_v24, %v6091_v49  ;;  %v15525_v13 = vpack.c.bf16 %v5730_v53, %v5729_v60  ;;  %v15527_v36 = vpack.c.bf16 %v6624_v11, %v6623_v30  ;;  %v15530_v17 = vpack.c.bf16 %v7067_v26, %v7066_v43 }
 0xe34   :  { %17513 = vst [vmem:[#allocation7_spill] sm:$0xff] %v15519_v50  ;;  %17514 = vst [vmem:[#allocation9_spill] sm:$0xff] %v15521_v48  ;;  %v5691_v0 = vadd.f32 %v10396_v16, %v15301_v25  ;;  %v5682_v52 = vpop.f32.mrb[125].mxu1  ;;  %v7068_v54 = vmul.f32 %v17496_v8, %v15320_v63  ;;  %v7069_v37 = vmul.f32 %v17496_v8, %v15346_v27 }
 0xe35   :  { %17515 = vst [vmem:[#allocation5_spill] sm:$0xff] %v15525_v13  ;;  %17516 = vst [vmem:[#allocation54_spill] sm:$0xff] %v15527_v36  ;;  %v5683_v49 = vadd.f32 %v15301_v25, %v5682_v52  ;;  %v10397_v45 = vpop.f32.mrb[126].mxu1  ;;  %10470 = vmatprep.subr.bf16.mxu0 %v6103_v22  ;;  %v7070_v3 = vmul.f32 %v17496_v8, %v15404_v41  ;;  %v7071_v12 = vmul.f32 %v17496_v8, %v15426_v15 }
 0xe36   :  { %17517 = vst [vmem:[#allocation55_spill] sm:$0xff] %v15530_v17  ;;  %v7072_v43 = vmul.f32 %v17496_v8, %v15391_v33  ;;  %v5694_v26 = vadd.f32 %v10397_v45, %v15301_v25  ;;  %v5685_v62 = vpop.f32.mrb[127].mxu1  ;;  %10471 = vmatpush3.bf16.msra.mxu0 %v6103_v22  ;;  %v6097_v63 = vmul.f32 %v17488_v39, %v5691_v0 }
 0xe37   :  { %v5735_v27 = vmul.f32 %v17487_v40, %v5691_v0  ;;  %v6629_v52 = vmul.f32 %v17489_v19, %v5691_v0  ;;  %v5686_v60 = vadd.f32 %v15301_v25, %v5685_v62  ;;  %10472 = vmatprep.subr.bf16.mxu0 %v6104_v61  ;;  %v6095_v41 = vmul.f32 %v17488_v39, %v5683_v49 }
 0xe38   :  { %v5733_v15 = vmul.f32 %v17487_v40, %v5683_v49  ;;  %v6627_v38 = vmul.f32 %v17489_v19, %v5683_v49  ;;  %v6098_v33 = vmul.f32 %v17488_v39, %v5694_v26  ;;  %v5736_v21 = vmul.f32 %v17487_v40, %v5694_v26  ;;  %10411 = vmatpush3.bf16.xpose.msra.mxu1 %v5805_v47 }
 0xe39   :  { %v6630_v24 = vmul.f32 %v17489_v19, %v5694_v26  ;;  %v15554_v53 = vpack.c.bf16 %v7069_v37, %v7068_v54  ;;  %v6096_v30 = vmul.f32 %v17488_v39, %v5686_v60  ;;  %v5734_v25 = vmul.f32 %v17487_v40, %v5686_v60  ;;  %11133 = vmatprep.subr.msk.bf16.mxu1 %vm89_vm0, %v15322_v20 }
 0xe3a   :  { %v6628_v11 = vmul.f32 %v17489_v19, %v5686_v60  ;;  %v15559_v16 = vpack.c.bf16 %v7071_v12, %v7070_v3  ;;  %10473 = vmatpush3.bf16.msra.mxu0 %v6104_v61  ;;  %v6106_v22 = vpack.c.bf16 %v6098_v33, %v6097_v63  ;;  %v15563_v45 = vpack.c.bf16 %v5736_v21, %v5735_v27  ;;  %v17534_v21 = vld [vmem:[#allocation18_spill] sm:$0xff] }
 0xe3b   :  { %17518 = vst [vmem:[#allocation56_spill] sm:$0xff] %v15554_v53  ;;  %v15565_v62 = vpack.c.bf16 %v6630_v24, %v6629_v52  ;;  %v6105_v54 = vpack.c.bf16 %v6096_v30, %v6095_v41  ;;  %v15567_v37 = vpack.c.bf16 %v5734_v25, %v5733_v15  ;;  %v7073_v40 = vmul.f32 %v17496_v8, %v15421_v46  ;;  %v17532_v41 = vld [vmem:[#allocation19_spill] sm:$0xff]  ;;  %v17535_v30 = vld [vmem:[#allocation21_spill] sm:$0xff] }
 0xe3c   :  { %17519 = vst [vmem:[#allocation57_spill] sm:$0xff] %v15559_v16  ;;  %17520 = vst [vmem:[#allocation58_spill] sm:$0xff] %v15563_v45  ;;  %v15569_v47 = vpack.c.bf16 %v6628_v11, %v6627_v38  ;;  %v7074_v39 = vmul.f32 %v17496_v8, %v15477_v59  ;;  %v7075_v19 = vmul.f32 %v17496_v8, %v15493_v42  ;;  %v6666_v15 = vsel %vm89_vm0, %v17532_v41, 0  ;;  %v17533_v38 = vld [vmem:[#allocation13_spill] sm:$0xff]  ;;  %v17536_v11 = vld [vmem:[#allocation44_spill] sm:$0xff] }
 0xe3d   :  { %17521 = vst [vmem:[#allocation59_spill] sm:$0xff] %v15565_v62  ;;  %17522 = vst [vmem:[#allocation60_spill] sm:$0xff] %v15567_v37  ;;  %v7076_v61 = vmul.f32 %v17496_v8, %v15463_v57  ;;  %v7077_v3 = vmul.f32 %v17496_v8, %v15484_v1  ;;  %10474 = vmatprep.subr.bf16.mxu0 %v6105_v54  ;;  %v15581_v12 = vpack.c.bf16 %v7073_v40, %v7072_v43 }
 0xe3e   :  { %17523 = vst [vmem:[#allocation61_spill] sm:$0xff] %v15569_v47  ;;  %v7078_v63 = vmul.f32 %v17496_v8, %v5683_v49  ;;  %v7079_v27 = vmul.f32 %v17496_v8, %v5686_v60  ;;  %10475 = vmatpush3.bf16.msra.mxu0 %v6105_v54  ;;  %v15585_v46 = vpack.c.bf16 %v7075_v19, %v7074_v39  ;;  %v5808_v1 = vsel %vm89_vm0, %v15322_v20, 0  ;;  %v17529_v49 = vld [vmem:[#allocation16_spill] sm:$0xff] }
 0xe3f   :  { %17524 = vst [vmem:[#allocation62_spill] sm:$0xff] %v15581_v12  ;;  %v15587_v59 = vpack.c.bf16 %v7077_v3, %v7076_v61  ;;  %v7080_v42 = vmul.f32 %v17496_v8, %v5691_v0  ;;  %v7081_v52 = vmul.f32 %v17496_v8, %v5694_v26  ;;  %10476 = vmatprep.subr.bf16.mxu0 %v6106_v22  ;;  %v6125_v8 = vsel %vm89_vm0, %v15155_v55, 0  ;;  %v17531_v26 = vld [vmem:[#allocation43_spill] sm:$0xff] }
 0xe40   :  { %17525 = vst [vmem:[#allocation63_spill] sm:$0xff] %v15585_v46  ;;  %v15591_v57 = vpack.c.bf16 %v7079_v27, %v7078_v63  ;;  %10413 = vmatpush3.bf16.xpose.msra.mxu1 %v5808_v1  ;;  %v6128_v20 = vsel %vm89_vm0, %v15148_v56, 0  ;;  %v6140_v0 = vsel %vm89_vm0, %v15240_v28, 0  ;;  %v6663_v60 = vsel %vm89_vm0, %v17531_v26, 0 }
 0xe41   :  { %17526 = vst [vmem:[#allocation64_spill] sm:$0xff] %v15587_v59  ;;  %v15595_v43 = vpack.c.bf16 %v7081_v52, %v7080_v42  ;;  %11134 = vmatprep.subr.msk.bf16.mxu1 %vm89_vm0, %v15155_v55  ;;  %v6131_v55 = vsel %vm89_vm0, %v15202_v5, 0  ;;  %v6669_v33 = vsel %vm89_vm0, %v17533_v38, 0  ;;  %v6672_v24 = vsel %vm89_vm0, %v17534_v21, 0 }
 0xe42   :  { %17527 = vst [vmem:[#allocation65_spill] sm:$0xff] %v15591_v57  ;;  %10477 = vmatpush3.bf16.msra.mxu0 %v6106_v22  ;;  %v6675_v25 = vsel %vm89_vm0, %v17535_v30, 0  ;;  %v6678_v22 = vsel %vm89_vm0, %v17536_v11, 0 }
 0xe43   :  { %17528 = vst [vmem:[#allocation66_spill] sm:$0xff] %v15595_v43  ;;  %10494 = vmatprep.subr.bf16.mxu0 %v15384_v7 }
 0xe47   :  { %10415 = vmatmul.mubr.msk.bf16.vlgmr.msra.gmra.mrb[128].mxu1 %vm89_vm0, %v15086_v44 }
 0xe48   :  { %10418 = vmatprep.mubr.msk.bf16.mxu1 %vm89_vm0, %v15094_v35  ;;  %10431 = vmatpush3.bf16.xpose.msra.mxu1 %v6125_v8 }
 0xe49   :  { %11135 = vmatprep.subr.msk.bf16.mxu1 %vm89_vm0, %v15148_v56  ;;  %v6134_v56 = vsel %vm89_vm0, %v15195_v31, 0 }
 0xe4f   :  { %10419 = vmatmul.mubr.msk.bf16.gmra.mrb[132].mxu1 %vm89_vm0, %v15092_v23 }
 0xe50   :  { %10422 = vmatprep.mubr.msk.bf16.mxu1 %vm89_vm0, %v15098_v4  ;;  %10433 = vmatpush3.bf16.xpose.msra.mxu1 %v6128_v20 }
 0xe51   :  { %11136 = vmatprep.subr.msk.bf16.mxu1 %vm89_vm0, %v15202_v5  ;;  %v6137_v5 = vsel %vm89_vm0, %v15245_v58, 0 }
 0xe57   :  { %10423 = vmatmul.mubr.msk.bf16.gmra.mrb[136].mxu1 %vm89_vm0, %v15096_v32 }
 0xe58   :  { %10426 = vmatprep.mubr.msk.bf16.mxu1 %vm89_vm0, %v15102_v51  ;;  %10435 = vmatpush3.bf16.xpose.msra.mxu1 %v6131_v55 }
 0xe59   :  { %11137 = vmatprep.subr.msk.bf16.mxu1 %vm89_vm0, %v15195_v31  ;;  %v6143_v31 = vsel %vm89_vm0, %v15333_v9, 0 }
 0xe5f   :  { %10427 = vmatmul.mubr.msk.bf16.gmra.mrb[140].mxu1 %vm89_vm0, %v15100_v18 }
 0xe60   :  { %10437 = vmatpush3.bf16.xpose.msra.mxu1 %v6134_v56  ;;  %10446 = vmatprep.mubr.msk.bf16.mxu1 %vm89_vm0, %v15088_v14 }
 0xe61   :  { %11138 = vmatprep.subr.msk.bf16.mxu1 %vm89_vm0, %v15245_v58  ;;  %v6146_v58 = vsel %vm89_vm0, %v15324_v34, 0 }
 0xe68   :  { %10439 = vmatpush3.bf16.xpose.msra.mxu1 %v6137_v5 }
 0xe69   :  { %11139 = vmatprep.subr.msk.bf16.mxu1 %vm89_vm0, %v15240_v28  ;;  %v6657_v28 = vsel %vm89_vm0, %v17529_v49, 0 }
 0xe70   :  { %10441 = vmatpush3.bf16.xpose.msra.mxu1 %v6140_v0  ;;  %v6110_v0 = vld [vmem:[#allocation2 + $0x290] sm:$0xff] }
 0xe71   :  { %11140 = vmatprep.subr.msk.bf16.mxu1 %vm89_vm0, %v15333_v9  ;;  %v17530_v9 = vld [vmem:[#allocation17_spill] sm:$0xff] }
 0xe78   :  { %10443 = vmatpush3.bf16.xpose.msra.mxu1 %v6143_v31 }
 0xe79   :  { %11141 = vmatprep.subr.msk.bf16.mxu1 %vm89_vm0, %v15324_v34  ;;  %v6660_v34 = vsel %vm89_vm0, %v17530_v9, 0 }
 0xe80   :  { %10445 = vmatpush3.bf16.xpose.msra.mxu1 %v6146_v58  ;;  %v6111_v58 = vld [vmem:[#allocation2 + $0x298] sm:$0xff] }
 0xe81   :  { %11142 = vmatprep.subr.msk.bf16.mxu1 %vm89_vm0, %v17529_v49 }
 0xe87   :  { %10447 = vmatmul.mubr.msk.bf16.vlgmr.msra.gmra.mrb[144].mxu1 %vm89_vm0, %v15086_v44 }
 0xe88   :  { %10450 = vmatprep.mubr.msk.bf16.mxu1 %vm89_vm0, %v15094_v35  ;;  %10527 = vmatpush3.bf16.xpose.msra.mxu1 %v6657_v28 }
 0xe89   :  { %11143 = vmatprep.subr.msk.bf16.mxu1 %vm89_vm0, %v17530_v9  ;;  %v6108_v9 = vld [vmem:[#allocation2 + $0x280] sm:$0xff] }
 0xe8f   :  { %10451 = vmatmul.mubr.msk.bf16.gmra.mrb[148].mxu1 %vm89_vm0, %v15092_v23 }
 0xe90   :  { %10454 = vmatprep.mubr.msk.bf16.mxu1 %vm89_vm0, %v15098_v4  ;;  %10529 = vmatpush3.bf16.xpose.msra.mxu1 %v6660_v34 }
 0xe91   :  { %11144 = vmatprep.subr.msk.bf16.mxu1 %vm89_vm0, %v17531_v26 }
 0xe97   :  { %10455 = vmatmul.mubr.msk.bf16.gmra.mrb[152].mxu1 %vm89_vm0, %v15096_v32 }
 0xe98   :  { %10458 = vmatprep.mubr.msk.bf16.mxu1 %vm89_vm0, %v15102_v51  ;;  %10531 = vmatpush3.bf16.xpose.msra.mxu1 %v6663_v60 }
 0xe99   :  { %11145 = vmatprep.subr.msk.bf16.mxu1 %vm89_vm0, %v17532_v41  ;;  %v6109_v41 = vld [vmem:[#allocation2 + $0x288] sm:$0xff] }
 0xe9f   :  { %10459 = vmatmul.mubr.msk.bf16.gmra.mrb[156].mxu1 %vm89_vm0, %v15100_v18 }
 0xea0   :  { %10533 = vmatpush3.bf16.xpose.msra.mxu1 %v6666_v15  ;;  %10542 = vmatprep.mubr.msk.bf16.mxu1 %vm89_vm0, %v15088_v14 }
 0xea1   :  { %11146 = vmatprep.subr.msk.bf16.mxu1 %vm89_vm0, %v17533_v38  ;;  %v6114_v38 = vld [vmem:[#allocation2 + $0x2b0] sm:$0xff] }
 0xea8   :  { %10535 = vmatpush3.bf16.xpose.msra.mxu1 %v6669_v33 }
 0xea9   :  { %11147 = vmatprep.subr.msk.bf16.mxu1 %vm89_vm0, %v17534_v21 }
 0xeb0   :  { %10537 = vmatpush3.bf16.xpose.msra.mxu1 %v6672_v24  ;;  %v6115_v24 = vld [vmem:[#allocation2 + $0x2b8] sm:$0xff] }
 0xeb1   :  { %11148 = vmatprep.subr.msk.bf16.mxu1 %vm89_vm0, %v17535_v30 }
 0xeb8   :  { %10539 = vmatpush3.bf16.xpose.msra.mxu1 %v6675_v25 }
 0xeb9   :  { %11149 = vmatprep.subr.msk.bf16.mxu1 %vm89_vm0, %v17536_v11  ;;  %v6112_v11 = vld [vmem:[#allocation2 + $0x2a0] sm:$0xff] }
 0xec0   :  { %10541 = vmatpush3.bf16.xpose.msra.mxu1 %v6678_v22 }
 0xec7   :  { %10543 = vmatmul.mubr.msk.bf16.vlgmr.msra.gmra.mrb[160].mxu1 %vm89_vm0, %v15086_v44 }
 0xec8   :  { %10546 = vmatprep.mubr.msk.bf16.mxu1 %vm89_vm0, %v15094_v35 }
 0xecf   :  { %10547 = vmatmul.mubr.msk.bf16.gmra.mrb[164].mxu1 %vm89_vm0, %v15092_v23 }
 0xed0   :  { %10550 = vmatprep.mubr.msk.bf16.mxu1 %vm89_vm0, %v15098_v4 }
 0xed7   :  { %10551 = vmatmul.mubr.msk.bf16.gmra.mrb[168].mxu1 %vm89_vm0, %v15096_v32 }
 0xed8   :  { %10554 = vmatprep.mubr.msk.bf16.mxu1 %vm89_vm0, %v15102_v51 }
 0xedf   :  { %10555 = vmatmul.mubr.msk.bf16.gmra.mrb[172].mxu1 %vm89_vm0, %v15100_v18 }
 0xf1a   :  { %v15708_v54 = vpop.f32.mrb[128].mxu1 }
 0xf1b   :  { %v15710_v40 = vpop.f32.mrb[129].mxu1 }
 0xf1c   :  { %v15712_v39 = vpop.f32.mrb[130].mxu1 }
 0xf1d   :  { %v15714_v19 = vpop.f32.mrb[131].mxu1 }
 0xf22   :  { %v15716_v61 = vpop.f32.mrb[132].mxu1 }
 0xf23   :  { %v15718_v3 = vpop.f32.mrb[133].mxu1 }
 0xf24   :  { %v15720_v63 = vpop.f32.mrb[134].mxu1 }
 0xf25   :  { %v15722_v27 = vpop.f32.mrb[135].mxu1 }
 0xf2a   :  { %v15724_v42 = vpop.f32.mrb[136].mxu1 }
 0xf2b   :  { %v15726_v52 = vpop.f32.mrb[137].mxu1 }
 0xf2c   :  { %v15728_v1 = vpop.f32.mrb[138].mxu1 }
 0xf2d   :  { %v15730_v8 = vpop.f32.mrb[139].mxu1 }
 0xf32   :  { %v15732_v20 = vpop.f32.mrb[140].mxu1 }
 0xf33   :  { %v15734_v55 = vpop.f32.mrb[141].mxu1 }
 0xf34   :  { %v15736_v56 = vpop.f32.mrb[142].mxu1 }
 0xf35   :  { %v15738_v5 = vpop.f32.mrb[143].mxu1 }
 0xf5a   :  { %v10448_v31 = vpop.f32.mrb[144].mxu1 }
 0xf5b   :  { %v15740_v49 = vadd.f32 %v10448_v31, %v6110_v0  ;;  %v6182_v28 = vpop.f32.mrb[145].mxu1 }
 0xf5c   :  { %v10449_v34 = vpop.f32.mrb[146].mxu1  ;;  %v15745_v15 = vadd.f32 %v6182_v28, %v6108_v9  ;;  %v6118_v9 = vld [vmem:[#allocation2 + $0x2d0] sm:$0xff] }
 0xf5d   :  { %v15742_v26 = vadd.f32 %v10449_v34, %v6111_v58  ;;  %6249 = vmax.xlane.f32.xlu0 %v15740_v49  ;;  %v6185_v60 = vpop.f32.mrb[147].mxu1  ;;  %v6113_v58 = vld [vmem:[#allocation2 + $0x2a8] sm:$0xff] }
 0xf5e   :  { %v15748_v33 = vadd.f32 %v6185_v60, %v6109_v41  ;;  %v6119_v41 = vld [vmem:[#allocation2 + $0x2d8] sm:$0xff] }
 0xf5f   :  { %6251 = vmax.xlane.f32.xlu1 %v15742_v26 }
 0xf61   :  { %6245 = vmax.xlane.f32.xlu0 %v15745_v15 }
 0xf62   :  { %v10452_v21 = vpop.f32.mrb[148].mxu1 }
 0xf63   :  { %v15751_v30 = vadd.f32 %v10452_v21, %v6114_v38  ;;  %v6198_v25 = vpop.f32.mrb[149].mxu1  ;;  %6247 = vmax.xlane.f32.xlu1 %v15748_v33 }
 0xf64   :  { %v10453_v22 = vpop.f32.mrb[150].mxu1  ;;  %v15757_v28 = vadd.f32 %v6198_v25, %v6112_v11  ;;  %v6117_v11 = vld [vmem:[#allocation2 + $0x2c8] sm:$0xff] }
 0xf65   :  { %v15754_v0 = vadd.f32 %v10453_v22, %v6115_v24  ;;  %v6201_v31 = vpop.f32.mrb[151].mxu1  ;;  %6257 = vmax.xlane.f32.xlu0 %v15751_v30  ;;  %v6116_v24 = vld [vmem:[#allocation2 + $0x2c0] sm:$0xff] }
 0xf66   :  { %v15760_v34 = vadd.f32 %v6201_v31, %v6113_v58  ;;  %v6122_v31 = vld [vmem:[#allocation2 + $0x2f0] sm:$0xff] }
 0xf67   :  { %6259 = vmax.xlane.f32.xlu1 %v15754_v0 }
 0xf69   :  { %6253 = vmax.xlane.f32.xlu0 %v15757_v28 }
 0xf6a   :  { %v10456_v60 = vpop.f32.mrb[152].mxu1 }
 0xf6b   :  { %v15763_v38 = vadd.f32 %v10456_v60, %v6118_v9  ;;  %v6214_v21 = vpop.f32.mrb[153].mxu1  ;;  %6255 = vmax.xlane.f32.xlu1 %v15760_v34  ;;  %v6123_v60 = vld [vmem:[#allocation2 + $0x2f8] sm:$0xff] }
 0xf6c   :  { %v10457_v22 = vpop.f32.mrb[154].mxu1  ;;  %v15769_v18 = vadd.f32 %v6214_v21, %v6116_v24  ;;  %v6121_v24 = vld [vmem:[#allocation2 + $0x2e8] sm:$0xff] }
 0xf6d   :  { %v15766_v43 = vadd.f32 %v10457_v22, %v6119_v41  ;;  %v6217_v25 = vpop.f32.mrb[155].mxu1  ;;  %6265 = vmax.xlane.f32.xlu0 %v15763_v38  ;;  %v6120_v41 = vld [vmem:[#allocation2 + $0x2e0] sm:$0xff] }
 0xf6e   :  { %v15772_v58 = vadd.f32 %v6217_v25, %v6117_v11  ;;  %v5746_v25 = vld [vmem:[#allocation2 + $0x200] sm:$0xff] }
 0xf6f   :  { %6267 = vmax.xlane.f32.xlu1 %v15766_v43 }
 0xf71   :  { %6261 = vmax.xlane.f32.xlu0 %v15769_v18 }
 0xf72   :  { %v10460_v9 = vpop.f32.mrb[156].mxu1 }
 0xf73   :  { %v15775_v57 = vadd.f32 %v10460_v9, %v6122_v31  ;;  %v6230_v59 = vpop.f32.mrb[157].mxu1  ;;  %6263 = vmax.xlane.f32.xlu1 %v15772_v58  ;;  %v5747_v31 = vld [vmem:[#allocation2 + $0x208] sm:$0xff]  ;;  %v15788_v9 = vadd.f32 %v15710_v40, %v5746_v25 }
 0xf74   :  { %v10461_v22 = vpop.f32.mrb[158].mxu1  ;;  %v15781_v32 = vadd.f32 %v6230_v59, %v6120_v41  ;;  %v5749_v59 = vld [vmem:[#allocation2 + $0x218] sm:$0xff]  ;;  %v5751_v40 = vld [vmem:[#allocation2 + $0x228] sm:$0xff] }
 0xf75   :  { %v15778_v51 = vadd.f32 %v10461_v22, %v6123_v60  ;;  %v6233_v21 = vpop.f32.mrb[159].mxu1  ;;  %6273 = vmax.xlane.f32.xlu0 %v15775_v57  ;;  %v5748_v60 = vld [vmem:[#allocation2 + $0x210] sm:$0xff]  ;;  %v15792_v22 = vadd.f32 %v15714_v19, %v5747_v31  ;;  %v15808_v31 = vadd.f32 %v15722_v27, %v5751_v40 }
 0xf76   :  { %v15784_v11 = vadd.f32 %v6233_v21, %v6121_v24  ;;  %v15796_v41 = vadd.f32 %v15708_v54, %v5748_v60  ;;  %v5750_v21 = vld [vmem:[#allocation2 + $0x220] sm:$0xff]  ;;  %v15800_v24 = vadd.f32 %v15712_v39, %v5749_v59  ;;  %v5752_v19 = vld [vmem:[#allocation2 + $0x230] sm:$0xff]  ;;  %v5753_v54 = vld [vmem:[#allocation2 + $0x238] sm:$0xff] }
 0xf77   :  { %6275 = vmax.xlane.f32.xlu1 %v15778_v51  ;;  %v15804_v25 = vadd.f32 %v15718_v3, %v5750_v21  ;;  %v15812_v60 = vadd.f32 %v15716_v61, %v5752_v19  ;;  %v5754_v39 = vld [vmem:[#allocation2 + $0x240] sm:$0xff]  ;;  %v15816_v59 = vadd.f32 %v15720_v63, %v5753_v54  ;;  %v5755_v3 = vld [vmem:[#allocation2 + $0x248] sm:$0xff]  ;;  %v5756_v27 = vld [vmem:[#allocation2 + $0x250] sm:$0xff] }
 0xf78   :  { %v15820_v21 = vadd.f32 %v15726_v52, %v5754_v39  ;;  %v15824_v40 = vadd.f32 %v15730_v8, %v5755_v3  ;;  %v5757_v61 = vld [vmem:[#allocation2 + $0x258] sm:$0xff]  ;;  %v15828_v19 = vadd.f32 %v15724_v42, %v5756_v27  ;;  %v5758_v63 = vld [vmem:[#allocation2 + $0x260] sm:$0xff]  ;;  %v5759_v52 = vld [vmem:[#allocation2 + $0x268] sm:$0xff] }
 0xf79   :  { %6269 = vmax.xlane.f32.xlu0 %v15781_v32  ;;  %v15832_v54 = vadd.f32 %v15728_v1, %v5757_v61  ;;  %v15836_v39 = vadd.f32 %v15734_v55, %v5758_v63  ;;  %v5760_v8 = vld [vmem:[#allocation2 + $0x270] sm:$0xff]  ;;  %v15840_v3 = vadd.f32 %v15738_v5, %v5759_v52  ;;  %v5761_v42 = vld [vmem:[#allocation2 + $0x278] sm:$0xff]  ;;  %v6640_v52 = vld [vmem:[#allocation2 + $0x300] sm:$0xff] }
 0xf7a   :  { %v15844_v27 = vadd.f32 %v15732_v20, %v5760_v8  ;;  %v6642_v1 = vld [vmem:[#allocation2 + $0x310] sm:$0xff]  ;;  %v15848_v61 = vadd.f32 %v15736_v56, %v5761_v42  ;;  %v6643_v63 = vld [vmem:[#allocation2 + $0x318] sm:$0xff]  ;;  %v6641_v8 = vld [vmem:[#allocation2 + $0x308] sm:$0xff] }
 0xf7b   :  { %6271 = vmax.xlane.f32.xlu1 %v15784_v11  ;;  %v6646_v56 = vld [vmem:[#allocation2 + $0x330] sm:$0xff] }
 0xf7d   :  { %5907 = vmax.xlane.f32.xlu0 %v15788_v9 }
 0xf7f   :  { %5909 = vmax.xlane.f32.xlu1 %v15792_v22 }
 0xf81   :  { %5911 = vmax.xlane.f32.xlu0 %v15796_v41 }
 0xf83   :  { %5913 = vmax.xlane.f32.xlu1 %v15800_v24 }
 0xf85   :  { %5915 = vmax.xlane.f32.xlu0 %v15804_v25 }
 0xf87   :  { %5917 = vmax.xlane.f32.xlu1 %v15808_v31 }
 0xf89   :  { %5919 = vmax.xlane.f32.xlu0 %v15812_v60 }
 0xf8b   :  { %5921 = vmax.xlane.f32.xlu1 %v15816_v59 }
 0xf8d   :  { %5923 = vmax.xlane.f32.xlu0 %v15820_v21 }
 0xf8f   :  { %5925 = vmax.xlane.f32.xlu1 %v15824_v40 }
 0xf91   :  { %5927 = vmax.xlane.f32.xlu0 %v15828_v19 }
 0xf93   :  { %5929 = vmax.xlane.f32.xlu1 %v15832_v54 }
 0xf95   :  { %5931 = vmax.xlane.f32.xlu0 %v15836_v39 }
 0xf97   :  { %5933 = vmax.xlane.f32.xlu1 %v15840_v3 }
 0xf99   :  { %5935 = vmax.xlane.f32.xlu0 %v15844_v27 }
 0xf9a   :  { %v10544_v55 = vpop.f32.mrb[160].mxu1 }
 0xf9b   :  { %v15851_v46 = vadd.f32 %v10544_v55, %v6642_v1  ;;  %v6714_v5 = vpop.f32.mrb[161].mxu1  ;;  %5937 = vmax.xlane.f32.xlu1 %v15848_v61  ;;  %v6647_v55 = vld [vmem:[#allocation2 + $0x338] sm:$0xff] }
 0xf9c   :  { %v10545_v12 = vpop.f32.mrb[162].mxu1  ;;  %v15857_v23 = vadd.f32 %v6714_v5, %v6640_v52  ;;  %v6645_v52 = vld [vmem:[#allocation2 + $0x328] sm:$0xff] }
 0xf9d   :  { %v15854_v4 = vadd.f32 %v10545_v12, %v6643_v63  ;;  %v6717_v20 = vpop.f32.mrb[163].mxu1  ;;  %6781 = vmax.xlane.f32.xlu0 %v15851_v46  ;;  %v6644_v12 = vld [vmem:[#allocation2 + $0x320] sm:$0xff] }
 0xf9e   :  { %v15860_v42 = vadd.f32 %v6717_v20, %v6641_v8  ;;  %v6650_v20 = vld [vmem:[#allocation2 + $0x350] sm:$0xff] }
 0xf9f   :  { %6783 = vmax.xlane.f32.xlu1 %v15854_v4 }
 0xfa1   :  { %6777 = vmax.xlane.f32.xlu0 %v15857_v23 }
 0xfa2   :  { %v10548_v1 = vpop.f32.mrb[164].mxu1 }
 0xfa3   :  { %v15863_v16 = vadd.f32 %v10548_v1, %v6646_v56  ;;  %v6730_v53 = vpop.f32.mrb[165].mxu1  ;;  %6779 = vmax.xlane.f32.xlu1 %v15860_v42  ;;  %v6651_v1 = vld [vmem:[#allocation2 + $0x358] sm:$0xff] }
 0xfa4   :  { %v10549_v63 = vpop.f32.mrb[166].mxu1  ;;  %v15869_v44 = vadd.f32 %v6730_v53, %v6644_v12  ;;  %v6649_v12 = vld [vmem:[#allocation2 + $0x348] sm:$0xff] }
 0xfa5   :  { %v15866_v35 = vadd.f32 %v10549_v63, %v6647_v55  ;;  %v6733_v5 = vpop.f32.mrb[167].mxu1  ;;  %6789 = vmax.xlane.f32.xlu0 %v15863_v16  ;;  %v6648_v55 = vld [vmem:[#allocation2 + $0x340] sm:$0xff] }
 0xfa6   :  { %v15872_v8 = vadd.f32 %v6733_v5, %v6645_v52 }
 0xfa7   :  { %6791 = vmax.xlane.f32.xlu1 %v15866_v35 }
 0xfa9   :  { %6785 = vmax.xlane.f32.xlu0 %v15869_v44 }
 0xfaa   :  { %v10552_v56 = vpop.f32.mrb[168].mxu1 }
 0xfab   :  { %v15875_v14 = vadd.f32 %v10552_v56, %v6650_v20  ;;  %v6746_v17 = vpop.f32.mrb[169].mxu1  ;;  %6787 = vmax.xlane.f32.xlu1 %v15872_v8 }
 0xfac   :  { %v10553_v63 = vpop.f32.mrb[170].mxu1  ;;  %v15881_v47 = vadd.f32 %v6746_v17, %v6648_v55 }
 0xfad   :  { %v15878_v62 = vadd.f32 %v10553_v63, %v6651_v1  ;;  %v6749_v53 = vpop.f32.mrb[171].mxu1  ;;  %6797 = vmax.xlane.f32.xlu0 %v15875_v14 }
 0xfae   :  { %v15884_v5 = vadd.f32 %v6749_v53, %v6649_v12 }
 0xfaf   :  { %6799 = vmax.xlane.f32.xlu1 %v15878_v62 }
 0xfb1   :  { %6793 = vmax.xlane.f32.xlu0 %v15881_v47 }
 0xfb2   :  { %v15887_v52 = vpop.f32.mrb[172].mxu1 }
 0xfb3   :  { %v15889_v20 = vpop.f32.mrb[173].mxu1  ;;  %6795 = vmax.xlane.f32.xlu1 %v15884_v5 }
 0xfb4   :  { %v15892_v56 = vpop.f32.mrb[174].mxu1 }
 0xfb5   :  { %v15894_v1 = vpop.f32.mrb[175].mxu1 }
 0xfea   :  { %v6250_v63 = vpop.xlane.xlu0 %6249 }
 0xfeb   :  { %v6279_v17 = vsub.f32 %v15740_v49, %v6250_v63 }
 0xfec   :  { %v6252_v55 = vpop.xlane.xlu1 %6251 }
 0xfed   :  { %v6297_v48 = vmul.f32 1.442695, %v6279_v17  ;;  %v6280_v53 = vsub.f32 %v15742_v26, %v6252_v55 }
 0xfee   :  { %v6246_v12 = vpop.xlane.xlu0 %6245 }
 0xfef   :  { %11617 = vpow2.f32 %v6297_v48  ;;  %v6299_v36 = vmul.f32 1.442695, %v6280_v53  ;;  %v6277_v6 = vsub.f32 %v15745_v15, %v6246_v12 }
 0xff0   :  { %v6248_v10 = vpop.xlane.xlu1 %6247 }
 0xff1   :  { %11619 = vpow2.f32 %v6299_v36  ;;  %v6293_v45 = vmul.f32 1.442695, %v6277_v6  ;;  %v6278_v37 = vsub.f32 %v15748_v33, %v6248_v10 }
 0xff2   :  { %v6258_v50 = vpop.xlane.xlu0 %6257 }
 0xff3   :  { %11621 = vpow2.f32 %v6293_v45  ;;  %v6295_v13 = vmul.f32 1.442695, %v6278_v37  ;;  %v6283_v2 = vsub.f32 %v15751_v30, %v6258_v50 }
 0xff4   :  { %v6260_v49 = vpop.xlane.xlu1 %6259 }
 0xff5   :  { %11623 = vpow2.f32 %v6295_v13  ;;  %v6305_v63 = vmul.f32 1.442695, %v6283_v2  ;;  %v6284_v26 = vsub.f32 %v15754_v0, %v6260_v49 }
 0xff6   :  { %v6254_v17 = vpop.xlane.xlu0 %6253 }
 0xff7   :  { %11625 = vpow2.f32 %v6305_v63  ;;  %v6307_v48 = vmul.f32 1.442695, %v6284_v26  ;;  %v6281_v15 = vsub.f32 %v15757_v28, %v6254_v17 }
 0xff8   :  { %v6256_v55 = vpop.xlane.xlu1 %6255 }
 0xff9   :  { %v15903_v36 = vpop.eup %11617  ;;  %11627 = vpow2.f32 %v6307_v48  ;;  %v6301_v10 = vmul.f32 1.442695, %v6281_v15  ;;  %v6282_v6 = vsub.f32 %v15760_v34, %v6256_v55 }
 0xffa   :  { %v6266_v45 = vpop.xlane.xlu0 %6265  ;;  %6329 = vadd.xlane.f32.xlu0 %v15903_v36 }
 0xffb   :  { %v15907_v50 = vpop.eup %11619  ;;  %11629 = vpow2.f32 %v6301_v10  ;;  %v6303_v2 = vmul.f32 1.442695, %v6282_v6  ;;  %v6287_v13 = vsub.f32 %v15763_v38, %v6266_v45 }
 0xffc   :  { %v6268_v37 = vpop.xlane.xlu1 %6267  ;;  %6331 = vadd.xlane.f32.xlu1 %v15907_v50 }
 0xffd   :  { %v15911_v33 = vpop.eup %11621  ;;  %11631 = vpow2.f32 %v6303_v2  ;;  %v6313_v30 = vmul.f32 1.442695, %v6287_v13  ;;  %v6288_v0 = vsub.f32 %v15766_v43, %v6268_v37 }
 0xffe   :  { %v6262_v28 = vpop.xlane.xlu0 %6261  ;;  %6325 = vadd.xlane.f32.xlu0 %v15911_v33 }
 0xfff   :  { %v15915_v34 = vpop.eup %11623  ;;  %11633 = vpow2.f32 %v6313_v30  ;;  %v6315_v53 = vmul.f32 1.442695, %v6288_v0  ;;  %v6285_v12 = vsub.f32 %v15769_v18, %v6262_v28 }
0x1000   :  { %v6264_v49 = vpop.xlane.xlu1 %6263  ;;  %6327 = vadd.xlane.f32.xlu1 %v15915_v34 }
0x1001   :  { %v15919_v38 = vpop.eup %11625  ;;  %11635 = vpow2.f32 %v6315_v53  ;;  %v6309_v63 = vmul.f32 1.442695, %v6285_v12  ;;  %v6286_v26 = vsub.f32 %v15772_v58, %v6264_v49 }
0x1002   :  { %v6274_v17 = vpop.xlane.xlu0 %6273  ;;  %6337 = vadd.xlane.f32.xlu0 %v15919_v38 }
0x1003   :  { %v15923_v43 = vpop.eup %11627  ;;  %11637 = vpow2.f32 %v6309_v63  ;;  %v6311_v48 = vmul.f32 1.442695, %v6286_v26  ;;  %v6291_v15 = vsub.f32 %v15775_v57, %v6274_v17 }
0x1004   :  { %v6276_v55 = vpop.xlane.xlu1 %6275  ;;  %6339 = vadd.xlane.f32.xlu1 %v15923_v43 }
0x1005   :  { %v15927_v18 = vpop.eup %11629  ;;  %11639 = vpow2.f32 %v6311_v48  ;;  %v6321_v10 = vmul.f32 1.442695, %v6291_v15  ;;  %v6292_v6 = vsub.f32 %v15778_v51, %v6276_v55 }
0x1006   :  { %v6270_v45 = vpop.xlane.xlu0 %6269  ;;  %6333 = vadd.xlane.f32.xlu0 %v15927_v18 }
0x1007   :  { %v15931_v58 = vpop.eup %11631  ;;  %11641 = vpow2.f32 %v6321_v10  ;;  %v6323_v2 = vmul.f32 1.442695, %v6292_v6  ;;  %v6289_v13 = vsub.f32 %v15781_v32, %v6270_v45 }
0x1008   :  { %v6272_v37 = vpop.xlane.xlu1 %6271  ;;  %6335 = vadd.xlane.f32.xlu1 %v15931_v58 }
0x1009   :  { %v15935_v57 = vpop.eup %11633  ;;  %11643 = vpow2.f32 %v6323_v2  ;;  %v6317_v30 = vmul.f32 1.442695, %v6289_v13  ;;  %v6290_v0 = vsub.f32 %v15784_v11, %v6272_v37 }
0x100a   :  { %v5908_v28 = vpop.xlane.xlu0 %5907  ;;  %6345 = vadd.xlane.f32.xlu0 %v15935_v57 }
0x100b   :  { %v15939_v51 = vpop.eup %11635  ;;  %11645 = vpow2.f32 %v6317_v30  ;;  %v6319_v53 = vmul.f32 1.442695, %v6290_v0  ;;  %v5939_v12 = vsub.f32 %v15788_v9, %v5908_v28 }
0x100c   :  { %v5910_v49 = vpop.xlane.xlu1 %5909  ;;  %6347 = vadd.xlane.f32.xlu1 %v15939_v51 }
0x100d   :  { %v15943_v32 = vpop.eup %11637  ;;  %11647 = vpow2.f32 %v6319_v53  ;;  %v5955_v63 = vmul.f32 1.442695, %v5939_v12  ;;  %v5940_v26 = vsub.f32 %v15792_v22, %v5910_v49 }
0x100e   :  { %v5912_v17 = vpop.xlane.xlu0 %5911  ;;  %6341 = vadd.xlane.f32.xlu0 %v15943_v32 }
0x100f   :  { %v15947_v11 = vpop.eup %11639  ;;  %11649 = vpow2.f32 %v5955_v63  ;;  %v5957_v48 = vmul.f32 1.442695, %v5940_v26  ;;  %v5941_v15 = vsub.f32 %v15796_v41, %v5912_v17 }
0x1010   :  { %v5914_v55 = vpop.xlane.xlu1 %5913  ;;  %6343 = vadd.xlane.f32.xlu1 %v15947_v11 }
0x1011   :  { %v15951_v9 = vpop.eup %11641  ;;  %11651 = vpow2.f32 %v5957_v48  ;;  %v5959_v10 = vmul.f32 1.442695, %v5941_v15  ;;  %v5942_v6 = vsub.f32 %v15800_v24, %v5914_v55 }
0x1012   :  { %v5916_v45 = vpop.xlane.xlu0 %5915  ;;  %6353 = vadd.xlane.f32.xlu0 %v15951_v9 }
0x1013   :  { %v15955_v22 = vpop.eup %11643  ;;  %11653 = vpow2.f32 %v5959_v10  ;;  %v5961_v2 = vmul.f32 1.442695, %v5942_v6  ;;  %v5943_v24 = vsub.f32 %v15804_v25, %v5916_v45  ;;  %v6652_v25 = vld [vmem:[#allocation2 + $0x360] sm:$0xff]  ;;  %v6653_v6 = vld [vmem:[#allocation2 + $0x368] sm:$0xff] }
0x1014   :  { %v5918_v13 = vpop.xlane.xlu1 %5917  ;;  %6355 = vadd.xlane.f32.xlu1 %v15955_v22 }
0x1015   :  { %v15958_v41 = vpop.eup %11645  ;;  %11655 = vpow2.f32 %v5961_v2  ;;  %v5944_v53 = vsub.f32 %v15808_v31, %v5918_v13  ;;  %v5963_v63 = vmul.f32 1.442695, %v5943_v24 }
0x1016   :  { %v5920_v37 = vpop.xlane.xlu0 %5919  ;;  %6349 = vadd.xlane.f32.xlu0 %v15958_v41 }
0x1017   :  { %v15961_v30 = vpop.eup %11647  ;;  %v5945_v26 = vsub.f32 %v15812_v60, %v5920_v37  ;;  %v5965_v15 = vmul.f32 1.442695, %v5944_v53  ;;  %11657 = vpow2.f32 %v5963_v63  ;;  %v15981_v60 = vadd.f32 %v15889_v20, %v6652_v25  ;;  %v6654_v37 = vld [vmem:[#allocation2 + $0x370] sm:$0xff]  ;;  %v6655_v63 = vld [vmem:[#allocation2 + $0x378] sm:$0xff] }
0x1018   :  { %v5922_v0 = vpop.xlane.xlu1 %5921  ;;  %6351 = vadd.xlane.f32.xlu1 %v15961_v30 }
0x1019   :  { %v15965_v28 = vpop.eup %11649  ;;  %v5946_v55 = vsub.f32 %v15816_v59, %v5922_v0  ;;  %v5967_v45 = vmul.f32 1.442695, %v5945_v26  ;;  %11659 = vpow2.f32 %v5965_v15  ;;  %v15986_v0 = vadd.f32 %v15894_v1, %v6653_v6 }
0x101a   :  { %v5924_v12 = vpop.xlane.xlu0 %5923  ;;  %5987 = vadd.xlane.f32.xlu0 %v15965_v28  ;;  %v15996_v1 = vadd.f32 %v15892_v56, %v6655_v63 }
0x101b   :  { %v15969_v49 = vpop.eup %11651  ;;  %v5947_v2 = vsub.f32 %v15820_v21, %v5924_v12  ;;  %v5969_v24 = vmul.f32 1.442695, %v5946_v55  ;;  %11661 = vpow2.f32 %v5967_v45  ;;  %v15991_v12 = vadd.f32 %v15887_v52, %v6654_v37 }
0x101c   :  { %v5926_v17 = vpop.xlane.xlu1 %5925  ;;  %5989 = vadd.xlane.f32.xlu1 %v15969_v49 }
0x101d   :  { %v15973_v48 = vpop.eup %11653  ;;  %v5948_v59 = vsub.f32 %v15824_v40, %v5926_v17  ;;  %v5971_v21 = vmul.f32 1.442695, %v5947_v2  ;;  %11663 = vpow2.f32 %v5969_v24 }
0x101e   :  { %v5928_v10 = vpop.xlane.xlu0 %5927  ;;  %5991 = vadd.xlane.f32.xlu0 %v15973_v48 }
0x101f   :  { %v15977_v31 = vpop.eup %11655  ;;  %v5949_v20 = vsub.f32 %v15828_v19, %v5928_v10  ;;  %v5973_v25 = vmul.f32 1.442695, %v5948_v59  ;;  %11665 = vpow2.f32 %v5971_v21 }
0x1020   :  { %v5930_v13 = vpop.xlane.xlu1 %5929  ;;  %5993 = vadd.xlane.f32.xlu1 %v15977_v31 }
0x1021   :  { %v5950_v40 = vsub.f32 %v15832_v54, %v5930_v13  ;;  %v5975_v15 = vmul.f32 1.442695, %v5949_v20  ;;  %v16001_v55 = vpop.eup %11657  ;;  %11667 = vpow2.f32 %v5973_v25 }
0x1022   :  { %6801 = vmax.xlane.f32.xlu0 %v15981_v60  ;;  %v5932_v53 = vpop.xlane.xlu0 %5931 }
0x1023   :  { %v5951_v19 = vsub.f32 %v15836_v39, %v5932_v53  ;;  %v5977_v10 = vmul.f32 1.442695, %v5950_v40  ;;  %v16005_v56 = vpop.eup %11659  ;;  %11669 = vpow2.f32 %v5975_v15 }
0x1024   :  { %6803 = vmax.xlane.f32.xlu1 %v15986_v0  ;;  %v5934_v26 = vpop.xlane.xlu1 %5933 }
0x1025   :  { %v5952_v6 = vsub.f32 %v15840_v3, %v5934_v26  ;;  %v5979_v45 = vmul.f32 1.442695, %v5951_v19  ;;  %v16009_v13 = vpop.eup %11661  ;;  %11671 = vpow2.f32 %v5977_v10 }
0x1026   :  { %6805 = vmax.xlane.f32.xlu0 %v15991_v12  ;;  %v5936_v17 = vpop.xlane.xlu0 %5935 }
0x1027   :  { %v5953_v2 = vsub.f32 %v15844_v27, %v5936_v17  ;;  %v5981_v37 = vmul.f32 1.442695, %v5952_v6  ;;  %v16013_v59 = vpop.eup %11663  ;;  %11673 = vpow2.f32 %v5979_v45 }
0x1028   :  { %6807 = vmax.xlane.f32.xlu1 %v15996_v1  ;;  %v5938_v52 = vpop.xlane.xlu1 %5937 }
0x1029   :  { %v5954_v24 = vsub.f32 %v15848_v61, %v5938_v52  ;;  %v5983_v53 = vmul.f32 1.442695, %v5953_v2  ;;  %v16017_v21 = vpop.eup %11665  ;;  %11675 = vpow2.f32 %v5981_v37 }
0x102a   :  { %5995 = vadd.xlane.f32.xlu0 %v16001_v55  ;;  %v6782_v54 = vpop.xlane.xlu0 %6781 }
0x102b   :  { %v5985_v20 = vmul.f32 1.442695, %v5954_v24  ;;  %v16021_v25 = vpop.eup %11667  ;;  %11677 = vpow2.f32 %v5983_v53  ;;  %v6811_v40 = vsub.f32 %v15851_v46, %v6782_v54 }
0x102c   :  { %5997 = vadd.xlane.f32.xlu1 %v16005_v56  ;;  %v6784_v39 = vpop.xlane.xlu1 %6783 }
0x102d   :  { %v16025_v15 = vpop.eup %11669  ;;  %11679 = vpow2.f32 %v5985_v20  ;;  %v6812_v19 = vsub.f32 %v15854_v4, %v6784_v39  ;;  %v6829_v6 = vmul.f32 1.442695, %v6811_v40 }
0x102e   :  { %5999 = vadd.xlane.f32.xlu0 %v16009_v13  ;;  %v6778_v3 = vpop.xlane.xlu0 %6777 }
0x102f   :  { %v6809_v63 = vsub.f32 %v15857_v23, %v6778_v3  ;;  %v16029_v10 = vpop.eup %11671  ;;  %v6831_v2 = vmul.f32 1.442695, %v6812_v19 }
0x1030   :  { %6001 = vadd.xlane.f32.xlu1 %v16013_v59  ;;  %v6780_v27 = vpop.xlane.xlu1 %6779 }
0x1031   :  { %v6810_v26 = vsub.f32 %v15860_v42, %v6780_v27  ;;  %v6825_v17 = vmul.f32 1.442695, %v6809_v63  ;;  %v16033_v54 = vpop.eup %11673 }
0x1032   :  { %6003 = vadd.xlane.f32.xlu0 %v16017_v21  ;;  %v6790_v61 = vpop.xlane.xlu0 %6789 }
0x1033   :  { %v6827_v52 = vmul.f32 1.442695, %v6810_v26  ;;  %11681 = vpow2.f32 %v6825_v17  ;;  %v16037_v39 = vpop.eup %11675  ;;  %v6815_v24 = vsub.f32 %v15863_v16, %v6790_v61 }
0x1034   :  { %6005 = vadd.xlane.f32.xlu1 %v16021_v25  ;;  %v6792_v23 = vpop.xlane.xlu1 %6791 }
0x1035   :  { %11683 = vpow2.f32 %v6827_v52  ;;  %v16041_v53 = vpop.eup %11677  ;;  %v6816_v63 = vsub.f32 %v15866_v35, %v6792_v23  ;;  %v6837_v26 = vmul.f32 1.442695, %v6815_v24 }
0x1036   :  { %6007 = vadd.xlane.f32.xlu0 %v16025_v15  ;;  %v6786_v42 = vpop.xlane.xlu0 %6785  ;;  %11685 = vpow2.f32 %v6829_v6 }
0x1037   :  { %v6813_v45 = vsub.f32 %v15869_v44, %v6786_v42  ;;  %11687 = vpow2.f32 %v6831_v2  ;;  %v16045_v20 = vpop.eup %11679  ;;  %v6839_v17 = vmul.f32 1.442695, %v6816_v63 }
0x1038   :  { %6009 = vadd.xlane.f32.xlu1 %v16029_v10  ;;  %v6788_v46 = vpop.xlane.xlu1 %6787 }
0x1039   :  { %v6814_v37 = vsub.f32 %v15872_v8, %v6788_v46  ;;  %v6833_v3 = vmul.f32 1.442695, %v6813_v45 }
0x103a   :  { %6011 = vadd.xlane.f32.xlu0 %v16033_v54  ;;  %v6798_v4 = vpop.xlane.xlu0 %6797 }
0x103b   :  { %v6835_v27 = vmul.f32 1.442695, %v6814_v37  ;;  %11689 = vpow2.f32 %v6833_v3  ;;  %v6819_v23 = vsub.f32 %v15875_v14, %v6798_v4 }
0x103c   :  { %6013 = vadd.xlane.f32.xlu1 %v16037_v39  ;;  %v6800_v44 = vpop.xlane.xlu1 %6799 }
0x103d   :  { %v16049_v61 = vpop.eup %11681  ;;  %11691 = vpow2.f32 %v6835_v27  ;;  %v6820_v42 = vsub.f32 %v15878_v62, %v6800_v44 }
0x103e   :  { %6015 = vadd.xlane.f32.xlu0 %v16041_v53  ;;  %v6794_v8 = vpop.xlane.xlu0 %6793  ;;  %11693 = vpow2.f32 %v6837_v26 }
0x103f   :  { %v6817_v40 = vsub.f32 %v15881_v47, %v6794_v8  ;;  %v16053_v35 = vpop.eup %11683  ;;  %11695 = vpow2.f32 %v6839_v17  ;;  %v6847_v14 = vmul.f32 1.442695, %v6820_v42 }
0x1040   :  { %6017 = vadd.xlane.f32.xlu1 %v16045_v20  ;;  %v6796_v16 = vpop.xlane.xlu1 %6795  ;;  %v16057_v47 = vpop.eup %11685 }
0x1041   :  { %v6818_v19 = vsub.f32 %v15884_v5, %v6796_v16  ;;  %v6841_v52 = vmul.f32 1.442695, %v6817_v40  ;;  %v16061_v45 = vpop.eup %11687  ;;  %v6845_v5 = vmul.f32 1.442695, %v6819_v23 }
0x1042   :  { %6857 = vadd.xlane.f32.xlu0 %v16049_v61 }
0x1043   :  { %v6843_v6 = vmul.f32 1.442695, %v6818_v19  ;;  %11697 = vpow2.f32 %v6841_v52 }
0x1044   :  { %6859 = vadd.xlane.f32.xlu1 %v16053_v35 }
0x1045   :  { %v16064_v46 = vpop.eup %11689  ;;  %11699 = vpow2.f32 %v6843_v6 }
0x1046   :  { %6861 = vadd.xlane.f32.xlu0 %v16057_v47  ;;  %11701 = vpow2.f32 %v6845_v5 }
0x1047   :  { %v16067_v2 = vpop.eup %11691  ;;  %11703 = vpow2.f32 %v6847_v14 }
0x1048   :  { %6863 = vadd.xlane.f32.xlu1 %v16061_v45  ;;  %v16070_v62 = vpop.eup %11693 }
0x1049   :  { %v16073_v37 = vpop.eup %11695 }
0x104a   :  { %6865 = vadd.xlane.f32.xlu0 %v16064_v46 }
0x104c   :  { %6867 = vadd.xlane.f32.xlu1 %v16067_v2 }
0x104d   :  { %v16076_v4 = vpop.eup %11697 }
0x104e   :  { %6869 = vadd.xlane.f32.xlu0 %v16070_v62 }
0x104f   :  { %v16079_v24 = vpop.eup %11699 }
0x1050   :  { %6871 = vadd.xlane.f32.xlu1 %v16073_v37  ;;  %v16082_v3 = vpop.eup %11701 }
0x1051   :  { %17537 = vst [vmem:[#allocation16_spill] sm:$0xff] %v16082_v3  ;;  %v16085_v44 = vpop.eup %11703 }
0x1052   :  { %6873 = vadd.xlane.f32.xlu0 %v16076_v4  ;;  %17538 = vst [vmem:[#allocation17_spill] sm:$0xff] %v16085_v44 }
0x1054   :  { %6875 = vadd.xlane.f32.xlu1 %v16079_v24 }
0x1056   :  { %6877 = vadd.xlane.f32.xlu0 %v16082_v3 }
0x1058   :  { %6879 = vadd.xlane.f32.xlu1 %v16085_v44 }
0x1087   :  { %v6330_v63 = vpop.xlane.xlu0 %6329 }
0x1089   :  { %v6332_v27 = vpop.xlane.xlu1 %6331 }
0x108a   :  { %11705 = vrcp.f32 %v6332_v27 }
0x108b   :  { %v6326_v8 = vpop.xlane.xlu0 %6325 }
0x108c   :  { %11707 = vrcp.f32 %v6326_v8 }
0x108d   :  { %11709 = vrcp.f32 %v6330_v63  ;;  %v6328_v26 = vpop.xlane.xlu1 %6327 }
0x108e   :  { %11711 = vrcp.f32 %v6328_v26 }
0x108f   :  { %v6338_v40 = vpop.xlane.xlu0 %6337 }
0x1091   :  { %v6340_v16 = vpop.xlane.xlu1 %6339 }
0x1092   :  { %11713 = vrcp.f32 %v6340_v16 }
0x1093   :  { %v6334_v17 = vpop.xlane.xlu0 %6333 }
0x1094   :  { %11715 = vrcp.f32 %v6334_v17  ;;  %v11706_v19 = vpop.eup %11705 }
0x1095   :  { %11717 = vrcp.f32 %v6338_v40  ;;  %v6336_v23 = vpop.xlane.xlu1 %6335  ;;  %v6376_v14 = vmul.f32 %v11706_v19, %v15907_v50 }
0x1096   :  { %v11708_v52 = vpop.eup %11707  ;;  %11719 = vrcp.f32 %v6336_v23 }
0x1097   :  { %v11710_v42 = vpop.eup %11709  ;;  %v6346_v6 = vpop.xlane.xlu0 %6345  ;;  %v6373_v63 = vmul.f32 %v11708_v52, %v15911_v33 }
0x1098   :  { %v11712_v5 = vpop.eup %11711  ;;  %v6375_v26 = vmul.f32 %v11710_v42, %v15903_v36 }
0x1099   :  { %v6348_v27 = vpop.xlane.xlu1 %6347  ;;  %v6374_v8 = vmul.f32 %v11712_v5, %v15915_v34  ;;  %v17539_v34 = vld [vmem:[#allocation20_spill] sm:$0xff] }
0x109a   :  { %11721 = vrcp.f32 %v6348_v27  ;;  %v6390_v40 = vpack.c.bf16 %v6376_v14, %v6375_v26 }
0x109b   :  { %v6342_v16 = vpop.xlane.xlu0 %6341  ;;  %v6389_v17 = vpack.c.bf16 %v6374_v8, %v6373_v63 }
0x109c   :  { %11723 = vrcp.f32 %v6342_v16  ;;  %v11714_v44 = vpop.eup %11713 }
0x109d   :  { %11725 = vrcp.f32 %v6346_v6  ;;  %v6344_v23 = vpop.xlane.xlu1 %6343  ;;  %10478 = vmatprep.mubr.bf16.mxu0 %v6389_v17  ;;  %v6380_v36 = vmul.f32 %v11714_v44, %v15923_v43 }
0x109e   :  { %v11716_v3 = vpop.eup %11715  ;;  %11727 = vrcp.f32 %v6344_v23  ;;  %10479 = vmatmul.mubr.bf16.vlgmr.msra.gmra.mrb[112].mxu0 %v6390_v40 }
0x109f   :  { %v11718_v50 = vpop.eup %11717  ;;  %10495 = vmatpush3.bf16.msra.mxu0 %v15384_v7  ;;  %v6354_v33 = vpop.xlane.xlu0 %6353  ;;  %v6377_v42 = vmul.f32 %v11716_v3, %v15927_v18  ;;  %v17540_v3 = vld [vmem:[#allocation47_spill] sm:$0xff] }
0x10a0   :  { %v11720_v19 = vpop.eup %11719  ;;  %10496 = vmatprep.subr.bf16.mxu0 %v17539_v34  ;;  %v6379_v6 = vmul.f32 %v11718_v50, %v15919_v38 }
0x10a1   :  { %v6356_v52 = vpop.xlane.xlu1 %6355  ;;  %v6378_v5 = vmul.f32 %v11720_v19, %v15931_v58 }
0x10a2   :  { %11729 = vrcp.f32 %v6356_v52  ;;  %v6392_v7 = vpack.c.bf16 %v6380_v36, %v6379_v6 }
0x10a3   :  { %10497 = vmatpush3.bf16.msra.mxu0 %v17539_v34  ;;  %v6350_v14 = vpop.xlane.xlu0 %6349  ;;  %v6391_v27 = vpack.c.bf16 %v6378_v5, %v6377_v42 }
0x10a4   :  { %10498 = vmatprep.subr.bf16.mxu0 %v15458_v29  ;;  %11731 = vrcp.f32 %v6350_v14  ;;  %v11722_v63 = vpop.eup %11721 }
0x10a5   :  { %11733 = vrcp.f32 %v6354_v33  ;;  %v6352_v8 = vpop.xlane.xlu1 %6351  ;;  %10482 = vmatprep.mubr.bf16.mxu0 %v6391_v27  ;;  %v6384_v44 = vmul.f32 %v11722_v63, %v15939_v51 }
0x10a6   :  { %v11724_v43 = vpop.eup %11723  ;;  %11735 = vrcp.f32 %v6352_v8  ;;  %10483 = vmatmul.mubr.bf16.gmra.mrb[116].mxu0 %v6392_v7 }
0x10a7   :  { %v11726_v18 = vpop.eup %11725  ;;  %10499 = vmatpush3.bf16.msra.mxu0 %v15458_v29  ;;  %v5988_v38 = vpop.xlane.xlu0 %5987  ;;  %v6381_v16 = vmul.f32 %v11724_v43, %v15943_v32  ;;  %v17541_v29 = vld [vmem:[#allocation5_spill] sm:$0xff] }
0x10a8   :  { %v11728_v58 = vpop.eup %11727  ;;  %10500 = vmatprep.subr.bf16.mxu0 %v17540_v3  ;;  %11737 = vrcp.f32 %v5988_v38  ;;  %v6383_v40 = vmul.f32 %v11726_v18, %v15935_v57  ;;  %v17542_v57 = vld [vmem:[#allocation7_spill] sm:$0xff] }
0x10a9   :  { %v5990_v26 = vpop.xlane.xlu1 %5989  ;;  %v6382_v17 = vmul.f32 %v11728_v58, %v15947_v11  ;;  %v17543_v58 = vld [vmem:[#allocation60_spill] sm:$0xff] }
0x10aa   :  { %11739 = vrcp.f32 %v5990_v26  ;;  %v6394_v33 = vpack.c.bf16 %v6384_v44, %v6383_v40 }
0x10ab   :  { %10501 = vmatpush3.bf16.msra.mxu0 %v17540_v3  ;;  %v5992_v23 = vpop.xlane.xlu0 %5991  ;;  %v6393_v50 = vpack.c.bf16 %v6382_v17, %v6381_v16 }
0x10ac   :  { %10502 = vmatprep.subr.bf16.mxu0 %v17541_v29  ;;  %11741 = vrcp.f32 %v5992_v23  ;;  %v11730_v19 = vpop.eup %11729  ;;  %v17544_v23 = vld [vmem:[#allocation58_spill] sm:$0xff] }
0x10ad   :  { %v5994_v34 = vpop.xlane.xlu1 %5993  ;;  %10486 = vmatprep.mubr.bf16.mxu0 %v6393_v50  ;;  %v6388_v42 = vmul.f32 %v11730_v19, %v15955_v22 }
0x10ae   :  { %v11732_v51 = vpop.eup %11731  ;;  %11743 = vrcp.f32 %v5994_v34  ;;  %10487 = vmatmul.mubr.bf16.gmra.mrb[120].mxu0 %v6394_v33  ;;  %v17545_v33 = vld [vmem:[#allocation48_spill] sm:$0xff] }
0x10af   :  { %v11734_v32 = vpop.eup %11733  ;;  %10503 = vmatpush3.bf16.msra.mxu0 %v17541_v29  ;;  %v6802_v11 = vpop.xlane.xlu0 %6801  ;;  %v6385_v6 = vmul.f32 %v11732_v51, %v15958_v41  ;;  %v17546_v51 = vld [vmem:[#allocation27_spill] sm:$0xff] }
0x10b0   :  { %v11736_v36 = vpop.eup %11735  ;;  %10504 = vmatprep.subr.bf16.mxu0 %v17542_v57  ;;  %v6821_v52 = vsub.f32 %v15981_v60, %v6802_v11  ;;  %v6387_v8 = vmul.f32 %v11734_v32, %v15951_v9 }
0x10b1   :  { %v6804_v5 = vpop.xlane.xlu1 %6803  ;;  %v6386_v14 = vmul.f32 %v11736_v36, %v15961_v30 }
0x10b2   :  { %v11738_v27 = vpop.eup %11737  ;;  %v6849_v7 = vmul.f32 1.442695, %v6821_v52  ;;  %v6822_v63 = vsub.f32 %v15986_v0, %v6804_v5  ;;  %v6396_v41 = vpack.c.bf16 %v6388_v42, %v6387_v8  ;;  %v17547_v42 = vld [vmem:[#allocation29_spill] sm:$0xff] }
0x10b3   :  { %10505 = vmatpush3.bf16.msra.mxu0 %v17542_v57  ;;  %v6806_v43 = vpop.xlane.xlu0 %6805  ;;  %v6395_v18 = vpack.c.bf16 %v6386_v14, %v6385_v6  ;;  %v6035_v30 = vmul.f32 %v11738_v27, %v15965_v28 }
0x10b4   :  { %v11740_v38 = vpop.eup %11739  ;;  %11745 = vpow2.f32 %v6849_v7  ;;  %v6851_v60 = vmul.f32 1.442695, %v6822_v63  ;;  %10506 = vmatprep.subr.bf16.mxu0 %v17543_v58  ;;  %v6823_v22 = vsub.f32 %v15991_v12, %v6806_v43  ;;  %v17548_v43 = vld [vmem:[#allocation23_spill] sm:$0xff] }
0x10b5   :  { %v6808_v3 = vpop.xlane.xlu1 %6807  ;;  %10490 = vmatprep.mubr.bf16.mxu0 %v6395_v18  ;;  %v6036_v0 = vmul.f32 %v11740_v38, %v15969_v49 }
0x10b6   :  { %v11742_v44 = vpop.eup %11741  ;;  %11747 = vpow2.f32 %v6851_v60  ;;  %v6853_v9 = vmul.f32 1.442695, %v6823_v22  ;;  %v6824_v26 = vsub.f32 %v15996_v1, %v6808_v3  ;;  %10491 = vmatmul.mubr.bf16.gmra.mrb[124].mxu0 %v6396_v41  ;;  %v17549_v3 = vld [vmem:[#allocation54_spill] sm:$0xff] }
0x10b7   :  { %10507 = vmatpush3.bf16.msra.mxu0 %v17543_v58  ;;  %v5996_v16 = vpop.xlane.xlu0 %5995  ;;  %v6051_v17 = vpack.c.bf16 %v6036_v0, %v6035_v30  ;;  %v6037_v50 = vmul.f32 %v11742_v44, %v15973_v48 }
0x10b8   :  { %v11744_v40 = vpop.eup %11743  ;;  %11749 = vpow2.f32 %v6853_v9  ;;  %v6855_v12 = vmul.f32 1.442695, %v6824_v26  ;;  %10508 = vmatprep.subr.bf16.mxu0 %v17544_v23 }
0x10b9   :  { %v6038_v28 = vmul.f32 %v11744_v40, %v15977_v31  ;;  %11751 = vrcp.f32 %v5996_v16  ;;  %v5998_v49 = vpop.xlane.xlu1 %5997  ;;  %10510 = vmatprep.mubr.bf16.mxu0 %v6051_v17  ;;  %v17550_v16 = vld [vmem:[#allocation9_spill] sm:$0xff] }
0x10ba   :  { %11753 = vpow2.f32 %v6855_v12 }
0x10bb   :  { %11755 = vrcp.f32 %v5998_v49  ;;  %10509 = vmatpush3.bf16.msra.mxu0 %v17544_v23  ;;  %v6000_v1 = vpop.xlane.xlu0 %5999  ;;  %v6052_v29 = vpack.c.bf16 %v6038_v28, %v6037_v50  ;;  %v17551_v28 = vld [vmem:[#allocation61_spill] sm:$0xff] }
0x10bc   :  { %10558 = vmatprep.subr.bf16.mxu0 %v17545_v33  ;;  %11757 = vrcp.f32 %v6000_v1 }
0x10bd   :  { %v6002_v19 = vpop.xlane.xlu1 %6001 }
0x10be   :  { %v16128_v34 = vpop.eup %11745  ;;  %11759 = vrcp.f32 %v6002_v19  ;;  %10511 = vmatmul.mubr.bf16.vlgmr.msra.gmra.mrb[112].mxu0 %v6052_v29 }
0x10bf   :  { %10559 = vmatpush3.bf16.msra.mxu0 %v17545_v33  ;;  %6881 = vadd.xlane.f32.xlu0 %v16128_v34  ;;  %v6004_v48 = vpop.xlane.xlu0 %6003 }
0x10c0   :  { %v16132_v31 = vpop.eup %11747  ;;  %10560 = vmatprep.subr.bf16.mxu0 %v17546_v51  ;;  %11761 = vrcp.f32 %v6004_v48  ;;  %v17552_v48 = vld [vmem:[#allocation59_spill] sm:$0xff] }
0x10c1   :  { %6883 = vadd.xlane.f32.xlu1 %v16132_v31  ;;  %v6006_v32 = vpop.xlane.xlu1 %6005 }
0x10c2   :  { %v16136_v11 = vpop.eup %11749  ;;  %11763 = vrcp.f32 %v6006_v32 }
0x10c3   :  { %v11752_v36 = vpop.eup %11751  ;;  %10561 = vmatpush3.bf16.msra.mxu0 %v17546_v51  ;;  %6885 = vadd.xlane.f32.xlu0 %v16136_v11  ;;  %v6008_v57 = vpop.xlane.xlu0 %6007 }
0x10c4   :  { %v16140_v52 = vpop.eup %11753  ;;  %10562 = vmatprep.subr.bf16.mxu0 %v17547_v42  ;;  %11765 = vrcp.f32 %v6008_v57  ;;  %v6039_v27 = vmul.f32 %v11752_v36, %v16001_v55 }
0x10c5   :  { %v11756_v5 = vpop.eup %11755  ;;  %6887 = vadd.xlane.f32.xlu1 %v16140_v52  ;;  %v6010_v6 = vpop.xlane.xlu1 %6009 }
0x10c6   :  { %v11758_v14 = vpop.eup %11757  ;;  %11767 = vrcp.f32 %v6010_v6  ;;  %v6040_v7 = vmul.f32 %v11756_v5, %v16005_v56  ;;  %v17553_v5 = vld [vmem:[#allocation22_spill] sm:$0xff] }
0x10c7   :  { %10563 = vmatpush3.bf16.msra.mxu0 %v17547_v42  ;;  %v6012_v63 = vpop.xlane.xlu0 %6011  ;;  %v6041_v60 = vmul.f32 %v11758_v14, %v16009_v13 }
0x10c8   :  { %v11760_v8 = vpop.eup %11759  ;;  %10564 = vmatprep.subr.bf16.mxu0 %v17548_v43  ;;  %11769 = vrcp.f32 %v6012_v63  ;;  %v6053_v18 = vpack.c.bf16 %v6040_v7, %v6039_v27 }
0x10c9   :  { %v6014_v38 = vpop.xlane.xlu1 %6013  ;;  %v6042_v58 = vmul.f32 %v11760_v8, %v16013_v59 }
0x10ca   :  { %v11762_v22 = vpop.eup %11761  ;;  %11771 = vrcp.f32 %v6014_v38  ;;  %10514 = vmatprep.mubr.bf16.mxu0 %v6053_v18 }
0x10cb   :  { %10565 = vmatpush3.bf16.msra.mxu0 %v17548_v43  ;;  %v6016_v55 = vpop.xlane.xlu0 %6015  ;;  %v6054_v56 = vpack.c.bf16 %v6042_v58, %v6041_v60  ;;  %v6043_v0 = vmul.f32 %v11762_v22, %v16017_v21 }
0x10cc   :  { %v11764_v41 = vpop.eup %11763  ;;  %10566 = vmatprep.subr.bf16.mxu0 %v17549_v3  ;;  %11773 = vrcp.f32 %v6016_v55 }
0x10cd   :  { %v6018_v30 = vpop.xlane.xlu1 %6017  ;;  %10515 = vmatmul.mubr.bf16.gmra.mrb[116].mxu0 %v6054_v56  ;;  %v6044_v44 = vmul.f32 %v11764_v41, %v16021_v25 }
0x10ce   :  { %v11766_v13 = vpop.eup %11765  ;;  %11775 = vrcp.f32 %v6018_v30 }
0x10cf   :  { %10567 = vmatpush3.bf16.msra.mxu0 %v17549_v3  ;;  %v6858_v59 = vpop.xlane.xlu0 %6857  ;;  %v6055_v9 = vpack.c.bf16 %v6044_v44, %v6043_v0  ;;  %v6045_v40 = vmul.f32 %v11766_v13, %v16025_v15 }
0x10d0   :  { %v11768_v26 = vpop.eup %11767  ;;  %10568 = vmatprep.subr.bf16.mxu0 %v17550_v16  ;;  %11777 = vrcp.f32 %v6858_v59 }
0x10d1   :  { %v6860_v17 = vpop.xlane.xlu1 %6859  ;;  %10518 = vmatprep.mubr.bf16.mxu0 %v6055_v9  ;;  %v6046_v12 = vmul.f32 %v11768_v26, %v16029_v10 }
0x10d2   :  { %v11770_v23 = vpop.eup %11769  ;;  %11779 = vrcp.f32 %v6860_v17 }
0x10d3   :  { %10569 = vmatpush3.bf16.msra.mxu0 %v17550_v16  ;;  %v6862_v21 = vpop.xlane.xlu0 %6861  ;;  %v6056_v25 = vpack.c.bf16 %v6046_v12, %v6045_v40  ;;  %v6047_v1 = vmul.f32 %v11770_v23, %v16033_v54  ;;  %v17555_v16 = vld [vmem:[#allocation49_spill] sm:$0xff] }
0x10d4   :  { %v11772_v50 = vpop.eup %11771  ;;  %10570 = vmatprep.subr.bf16.mxu0 %v17551_v28  ;;  %11781 = vrcp.f32 %v6862_v21  ;;  %v17557_v12 = vld [vmem:[#allocation17_spill] sm:$0xff] }
0x10d5   :  { %v6864_v49 = vpop.xlane.xlu1 %6863  ;;  %10519 = vmatmul.mubr.bf16.gmra.mrb[120].mxu0 %v6056_v25  ;;  %v6048_v29 = vmul.f32 %v11772_v50, %v16037_v39  ;;  %v7114_v25 = vsel %vm89_vm0, %v17555_v16, 0  ;;  %v17559_v50 = vld [vmem:[#allocation24_spill] sm:$0xff] }
0x10d6   :  { %v11774_v33 = vpop.eup %11773  ;;  %11783 = vrcp.f32 %v6864_v49  ;;  %v17560_v49 = vld [vmem:[#allocation51_spill] sm:$0xff] }
0x10d7   :  { %10571 = vmatpush3.bf16.msra.mxu0 %v17551_v28  ;;  %v6866_v15 = vpop.xlane.xlu0 %6865  ;;  %v6057_v10 = vpack.c.bf16 %v6048_v29, %v6047_v1  ;;  %v6049_v32 = vmul.f32 %v11774_v33, %v16041_v53  ;;  %v7120_v28 = vsel %vm89_vm0, %v17559_v50, 0  ;;  %v7123_v1 = vsel %vm89_vm0, %v17560_v49, 0  ;;  %v17561_v29 = vld [vmem:[#allocation53_spill] sm:$0xff] }
0x10d8   :  { %v11776_v19 = vpop.eup %11775  ;;  %10572 = vmatprep.subr.bf16.mxu0 %v17552_v48  ;;  %11785 = vrcp.f32 %v6866_v15  ;;  %v7126_v33 = vsel %vm89_vm0, %v17561_v29, 0  ;;  %v17562_v15 = vld [vmem:[#allocation6_spill] sm:$0xff] }
0x10d9   :  { %v6868_v51 = vpop.xlane.xlu1 %6867  ;;  %10522 = vmatprep.mubr.bf16.mxu0 %v6057_v10  ;;  %v6050_v36 = vmul.f32 %v11776_v19, %v16045_v20  ;;  %v7129_v10 = vsel %vm89_vm0, %v17562_v15, 0  ;;  %v17563_v19 = vld [vmem:[#allocation55_spill] sm:$0xff] }
0x10da   :  { %v11778_v57 = vpop.eup %11777  ;;  %11787 = vrcp.f32 %v6868_v51 }
0x10db   :  { %10573 = vmatpush3.bf16.msra.mxu0 %v17552_v48  ;;  %v6870_v54 = vpop.xlane.xlu0 %6869  ;;  %v6058_v39 = vpack.c.bf16 %v6050_v36, %v6049_v32  ;;  %v6905_v14 = vmul.f32 %v11778_v57, %v16049_v61 }
0x10dc   :  { %v11780_v42 = vpop.eup %11779  ;;  %11150 = vmatprep.subr.msk.bf16.mxu0 %vm89_vm0, %v17553_v5  ;;  %11789 = vrcp.f32 %v6870_v54 }
0x10dd   :  { %v6872_v6 = vpop.xlane.xlu1 %6871  ;;  %10523 = vmatmul.mubr.bf16.gmra.mrb[124].mxu0 %v6058_v39  ;;  %v6906_v27 = vmul.f32 %v11780_v42, %v16053_v35  ;;  %v7108_v35 = vsel %vm89_vm0, %v17553_v5, 0 }
0x10de   :  { %v11782_v53 = vpop.eup %11781  ;;  %11791 = vrcp.f32 %v6872_v6 }
0x10df   :  { %v6874_v20 = vpop.xlane.xlu0 %6873  ;;  %v6921_v7 = vpack.c.bf16 %v6906_v27, %v6905_v14  ;;  %v6907_v8 = vmul.f32 %v11782_v53, %v16057_v47 }
0x10e0   :  { %v11784_v63 = vpop.eup %11783  ;;  %11793 = vrcp.f32 %v6874_v20 }
0x10e1   :  { %v6908_v43 = vmul.f32 %v11784_v63, %v16061_v45  ;;  %v6876_v18 = vpop.xlane.xlu1 %6875  ;;  %10574 = vmatprep.mubr.bf16.mxu0 %v6921_v7  ;;  %v17554_v45 = vld [vmem:[#allocation52_spill] sm:$0xff]  ;;  %v17564_v7 = vld [vmem:[#allocation42_spill] sm:$0xff]  ;;  %v17565_v63 = vld [vmem:[#allocation41_spill] sm:$0xff] }
0x10e2   :  { %v11786_v38 = vpop.eup %11785  ;;  %11795 = vrcp.f32 %v6876_v18  ;;  %v17572_v18 = vld [vmem:[#allocation63_spill] sm:$0xff] }
0x10e3   :  { %v6878_v60 = vpop.xlane.xlu0 %6877  ;;  %v6922_v58 = vpack.c.bf16 %v6908_v43, %v6907_v8  ;;  %v6909_v55 = vmul.f32 %v11786_v38, %v16064_v46  ;;  %v7111_v46 = vsel %vm89_vm0, %v17554_v45, 0  ;;  %v17570_v8 = vld [vmem:[#allocation8_spill] sm:$0xff]  ;;  %v17571_v43 = vld [vmem:[#allocation62_spill] sm:$0xff] }
0x10e4   :  { %v11788_v22 = vpop.eup %11787  ;;  %11797 = vrcp.f32 %v6878_v60  ;;  %v17573_v38 = vld [vmem:[#allocation12_spill] sm:$0xff]  ;;  %v17574_v60 = vld [vmem:[#allocation15_spill] sm:$0xff] }
0x10e5   :  { %v6880_v61 = vpop.xlane.xlu1 %6879  ;;  %10575 = vmatmul.mubr.bf16.vlgmr.msra.gmra.mrb[112].mxu0 %v6922_v58  ;;  %v6910_v56 = vmul.f32 %v11788_v22, %v16067_v2  ;;  %v17575_v58 = vld [vmem:[#allocation64_spill] sm:$0xff]  ;;  %v17576_v22 = vld [vmem:[#allocation65_spill] sm:$0xff] }
0x10e6   :  { %v11790_v47 = vpop.eup %11789  ;;  %11799 = vrcp.f32 %v6880_v61  ;;  %10591 = vmatpush3.bf16.xpose.msra.mxu0 %v7108_v35  ;;  %v17577_v61 = vld [vmem:[#allocation14_spill] sm:$0xff] }
0x10e7   :  { %11151 = vmatprep.subr.msk.bf16.mxu0 %vm89_vm0, %v17554_v45  ;;  %v6923_v41 = vpack.c.bf16 %v6910_v56, %v6909_v55  ;;  %v6911_v30 = vmul.f32 %v11790_v47, %v16070_v62  ;;  %v17578_v35 = vld [vmem:[#allocation66_spill] sm:$0xff]  ;;  %v7091_v55 = vld [vmem:[#allocation2 + $0x380] sm:$0xff] }
0x10e8   :  { %v11792_v3 = vpop.eup %11791  ;;  %v7092_v45 = vld [vmem:[#allocation2 + $0x388] sm:$0xff] }
0x10e9   :  { %10578 = vmatprep.mubr.bf16.mxu0 %v6923_v41  ;;  %v6912_v0 = vmul.f32 %v11792_v3, %v16073_v37  ;;  %v17556_v37 = vld [vmem:[#allocation16_spill] sm:$0xff] }
0x10ea   :  { %v11794_v44 = vpop.eup %11793 }
0x10eb   :  { %v6924_v13 = vpack.c.bf16 %v6912_v0, %v6911_v30  ;;  %v6913_v2 = vmul.f32 %v11794_v44, %v16076_v4  ;;  %v17558_v4 = vld [vmem:[#allocation50_spill] sm:$0xff]  ;;  %v7093_v30 = vld [vmem:[#allocation2 + $0x390] sm:$0xff] }
0x10ec   :  { %v11796_v59 = vpop.eup %11795 }
0x10ed   :  { %10579 = vmatmul.mubr.bf16.gmra.mrb[116].mxu0 %v6924_v13  ;;  %v6914_v9 = vmul.f32 %v11796_v59, %v16079_v24  ;;  %v7117_v24 = vsel %vm89_vm0, %v17558_v4, 0  ;;  %v7094_v13 = vld [vmem:[#allocation2 + $0x398] sm:$0xff] }
0x10ee   :  { %v11798_v26 = vpop.eup %11797  ;;  %10593 = vmatpush3.bf16.xpose.msra.mxu0 %v7111_v46  ;;  %v7095_v46 = vld [vmem:[#allocation2 + $0x3a0] sm:$0xff] }
0x10ef   :  { %11152 = vmatprep.subr.msk.bf16.mxu0 %vm89_vm0, %v17555_v16  ;;  %v6925_v17 = vpack.c.bf16 %v6914_v9, %v6913_v2  ;;  %v6915_v40 = vmul.f32 %v11798_v26, %v17556_v37  ;;  %v7096_v16 = vld [vmem:[#allocation2 + $0x3a8] sm:$0xff]  ;;  %v7097_v37 = vld [vmem:[#allocation2 + $0x3b0] sm:$0xff] }
0x10f0   :  { %v11800_v62 = vpop.eup %11799 }
0x10f1   :  { %10582 = vmatprep.mubr.bf16.mxu0 %v6925_v17  ;;  %v6916_v23 = vmul.f32 %v11800_v62, %v17557_v12 }
0x10f3   :  { %v6926_v21 = vpack.c.bf16 %v6916_v23, %v6915_v40  ;;  %v7098_v23 = vld [vmem:[#allocation2 + $0x3b8] sm:$0xff] }
0x10f5   :  { %10583 = vmatmul.mubr.bf16.gmra.mrb[120].mxu0 %v6926_v21 }
0x10f6   :  { %10595 = vmatpush3.bf16.xpose.msra.mxu0 %v7114_v25  ;;  %v7099_v25 = vld [vmem:[#allocation2 + $0x3c0] sm:$0xff] }
0x10f7   :  { %11153 = vmatprep.subr.msk.bf16.mxu0 %vm89_vm0, %v17558_v4 }
0x10fe   :  { %10597 = vmatpush3.bf16.xpose.msra.mxu0 %v7117_v24 }
0x10ff   :  { %11154 = vmatprep.subr.msk.bf16.mxu0 %vm89_vm0, %v17559_v50 }
0x1106   :  { %10599 = vmatpush3.bf16.xpose.msra.mxu0 %v7120_v28  ;;  %v7100_v28 = vld [vmem:[#allocation2 + $0x3c8] sm:$0xff] }
0x1107   :  { %11155 = vmatprep.subr.msk.bf16.mxu0 %vm89_vm0, %v17560_v49 }
0x110e   :  { %10601 = vmatpush3.bf16.xpose.msra.mxu0 %v7123_v1 }
0x110f   :  { %11156 = vmatprep.subr.msk.bf16.mxu0 %vm89_vm0, %v17561_v29  ;;  %v7101_v29 = vld [vmem:[#allocation2 + $0x3d0] sm:$0xff] }
0x1116   :  { %10603 = vmatpush3.bf16.xpose.msra.mxu0 %v7126_v33 }
0x1117   :  { %11157 = vmatprep.subr.msk.bf16.mxu0 %vm89_vm0, %v17562_v15 }
0x111e   :  { %10605 = vmatpush3.bf16.xpose.msra.mxu0 %v7129_v10  ;;  %v7102_v10 = vld [vmem:[#allocation2 + $0x3d8] sm:$0xff] }
0x111f   :  { %10622 = vmatprep.subr.bf16.mxu0 %v17563_v19 }
0x114c   :  { %v6882_v48 = vpop.xlane.xlu0 %6881 }
0x114d   :  { %11801 = vrcp.f32 %v6882_v48  ;;  %v7103_v48 = vld [vmem:[#allocation2 + $0x3e0] sm:$0xff] }
0x114e   :  { %v6884_v51 = vpop.xlane.xlu1 %6883 }
0x114f   :  { %11803 = vrcp.f32 %v6884_v51 }
0x1150   :  { %v6886_v32 = vpop.xlane.xlu0 %6885 }
0x1151   :  { %11805 = vrcp.f32 %v6886_v32 }
0x1152   :  { %v6888_v36 = vpop.xlane.xlu1 %6887 }
0x1153   :  { %11807 = vrcp.f32 %v6888_v36 }
0x1157   :  { %v11802_v57 = vpop.eup %11801 }
0x1158   :  { %v6917_v39 = vmul.f32 %v11802_v57, %v16128_v34  ;;  %v17566_v34 = vld [vmem:[#allocation10_spill] sm:$0xff] }
0x1159   :  { %v11804_v54 = vpop.eup %11803  ;;  %v7104_v57 = vld [vmem:[#allocation2 + $0x3e8] sm:$0xff] }
0x115a   :  { %v6918_v42 = vmul.f32 %v11804_v54, %v16132_v31  ;;  %v17567_v31 = vld [vmem:[#allocation56_spill] sm:$0xff] }
0x115b   :  { %v11806_v5 = vpop.eup %11805 }
0x115c   :  { %v6927_v6 = vpack.c.bf16 %v6918_v42, %v6917_v39  ;;  %v6919_v27 = vmul.f32 %v11806_v5, %v16136_v11  ;;  %v17568_v11 = vld [vmem:[#allocation57_spill] sm:$0xff]  ;;  %v7105_v42 = vld [vmem:[#allocation2 + $0x3f0] sm:$0xff] }
0x115d   :  { %v11808_v14 = vpop.eup %11807 }
0x115e   :  { %10586 = vmatprep.mubr.bf16.mxu0 %v6927_v6  ;;  %v6920_v53 = vmul.f32 %v11808_v14, %v16140_v52  ;;  %v17569_v52 = vld [vmem:[#allocation11_spill] sm:$0xff]  ;;  %v7106_v14 = vld [vmem:[#allocation2 + $0x3f8] sm:$0xff] }
0x1160   :  { %v6928_v20 = vpack.c.bf16 %v6920_v53, %v6919_v27 }
0x1162   :  { %10587 = vmatmul.mubr.bf16.gmra.mrb[124].mxu0 %v6928_v20 }
0x1163   :  { %10606 = vmatprep.mubr.msk.bf16.mxu0 %vm89_vm0, %v17564_v7 }
0x116a   :  { %10607 = vmatmul.mubr.msk.bf16.vlgmr.msra.gmra.mrb[128].mxu0 %vm89_vm0, %v17565_v63 }
0x116b   :  { %10623 = vmatpush3.bf16.msra.mxu0 %v17563_v19  ;;  %10610 = vmatprep.mubr.msk.bf16.mxu0 %vm89_vm0, %v17566_v34 }
0x116c   :  { %10624 = vmatprep.subr.bf16.mxu0 %v17567_v31 }
0x116f   :  { %10625 = vmatpush3.bf16.msra.mxu0 %v17567_v31 }
0x1170   :  { %10626 = vmatprep.subr.bf16.mxu0 %v17568_v11 }
0x1172   :  { %10611 = vmatmul.mubr.msk.bf16.gmra.mrb[132].mxu0 %vm89_vm0, %v17569_v52 }
0x1173   :  { %10627 = vmatpush3.bf16.msra.mxu0 %v17568_v11  ;;  %10614 = vmatprep.mubr.msk.bf16.mxu0 %vm89_vm0, %v17570_v8 }
0x1174   :  { %10628 = vmatprep.subr.bf16.mxu0 %v17571_v43 }
0x1177   :  { %10629 = vmatpush3.bf16.msra.mxu0 %v17571_v43 }
0x1178   :  { %10630 = vmatprep.subr.bf16.mxu0 %v17572_v18 }
0x117a   :  { %10615 = vmatmul.mubr.msk.bf16.gmra.mrb[136].mxu0 %vm89_vm0, %v17573_v38 }
0x117b   :  { %10631 = vmatpush3.bf16.msra.mxu0 %v17572_v18  ;;  %10618 = vmatprep.mubr.msk.bf16.mxu0 %vm89_vm0, %v17574_v60 }
0x117c   :  { %10632 = vmatprep.subr.bf16.mxu0 %v17575_v58 }
0x117f   :  { %10633 = vmatpush3.bf16.msra.mxu0 %v17575_v58 }
0x1180   :  { %10634 = vmatprep.subr.bf16.mxu0 %v17576_v22 }
0x1182   :  { %10619 = vmatmul.mubr.msk.bf16.gmra.mrb[140].mxu0 %vm89_vm0, %v17577_v61 }
0x1183   :  { %10635 = vmatpush3.bf16.msra.mxu0 %v17576_v22 }
0x1184   :  { %10636 = vmatprep.subr.bf16.mxu0 %v17578_v35 }
0x1187   :  { %10637 = vmatpush3.bf16.msra.mxu0 %v17578_v35 }
0x123d   :  { %v10608_v56 = vpop.f32.mrb[128].mxu0 }
0x123e   :  { %v7165_v47 = vpop.f32.mrb[129].mxu0  ;;  %v16252_v59 = vadd.f32 %v10608_v56, %v7093_v30 }
0x123f   :  { %v16247_v41 = vadd.f32 %v7165_v47, %v7091_v55  ;;  %v10609_v3 = vpop.f32.mrb[130].mxu0 }
0x1240   :  { %v7168_v0 = vpop.f32.mrb[131].mxu0  ;;  %v16255_v2 = vadd.f32 %v10609_v3, %v7094_v13 }
0x1241   :  { %v16249_v44 = vadd.f32 %v7168_v0, %v7092_v45  ;;  %7228 = vmax.xlane.f32.xlu0 %v16247_v41 }
0x1243   :  { %7230 = vmax.xlane.f32.xlu1 %v16249_v44 }
0x1245   :  { %v10612_v9 = vpop.f32.mrb[132].mxu0  ;;  %7232 = vmax.xlane.f32.xlu0 %v16252_v59 }
0x1246   :  { %v7181_v26 = vpop.f32.mrb[133].mxu0  ;;  %v16264_v21 = vadd.f32 %v10612_v9, %v7097_v37 }
0x1247   :  { %v16258_v17 = vadd.f32 %v7181_v26, %v7095_v46  ;;  %v10613_v62 = vpop.f32.mrb[134].mxu0  ;;  %7234 = vmax.xlane.f32.xlu1 %v16255_v2 }
0x1248   :  { %v7184_v40 = vpop.f32.mrb[135].mxu0  ;;  %v16267_v4 = vadd.f32 %v10613_v62, %v7098_v23 }
0x1249   :  { %v16261_v12 = vadd.f32 %v7184_v40, %v7096_v16  ;;  %7236 = vmax.xlane.f32.xlu0 %v16258_v17 }
0x124b   :  { %7238 = vmax.xlane.f32.xlu1 %v16261_v12 }
0x124d   :  { %v10616_v24 = vpop.f32.mrb[136].mxu0  ;;  %7240 = vmax.xlane.f32.xlu0 %v16264_v21 }
0x124e   :  { %v7197_v50 = vpop.f32.mrb[137].mxu0  ;;  %v16276_v19 = vadd.f32 %v10616_v24, %v7101_v29 }
0x124f   :  { %v16270_v49 = vadd.f32 %v7197_v50, %v7099_v25  ;;  %v10617_v1 = vpop.f32.mrb[138].mxu0  ;;  %7242 = vmax.xlane.f32.xlu1 %v16267_v4 }
0x1250   :  { %v7200_v33 = vpop.f32.mrb[139].mxu0  ;;  %v16279_v51 = vadd.f32 %v10617_v1, %v7102_v10 }
0x1251   :  { %v16273_v15 = vadd.f32 %v7200_v33, %v7100_v28  ;;  %7244 = vmax.xlane.f32.xlu0 %v16270_v49 }
0x1253   :  { %7246 = vmax.xlane.f32.xlu1 %v16273_v15 }
0x1255   :  { %v10620_v32 = vpop.f32.mrb[140].mxu0  ;;  %7248 = vmax.xlane.f32.xlu0 %v16276_v19 }
0x1256   :  { %v7213_v36 = vpop.f32.mrb[141].mxu0  ;;  %v16288_v27 = vadd.f32 %v10620_v32, %v7105_v42 }
0x1257   :  { %v16282_v54 = vadd.f32 %v7213_v36, %v7103_v48  ;;  %v10621_v39 = vpop.f32.mrb[142].mxu0  ;;  %7250 = vmax.xlane.f32.xlu1 %v16279_v51 }
0x1258   :  { %v7216_v5 = vpop.f32.mrb[143].mxu0  ;;  %v16291_v53 = vadd.f32 %v10621_v39, %v7106_v14 }
0x1259   :  { %v16285_v6 = vadd.f32 %v7216_v5, %v7104_v57  ;;  %7252 = vmax.xlane.f32.xlu0 %v16282_v54 }
0x125b   :  { %7254 = vmax.xlane.f32.xlu1 %v16285_v6 }
0x125d   :  { %7256 = vmax.xlane.f32.xlu0 %v16288_v27 }
0x125f   :  { %7258 = vmax.xlane.f32.xlu1 %v16291_v53 }
0x12ce   :  { %v7229_v20 = vpop.xlane.xlu0 %7228 }
0x12cf   :  { %v7260_v7 = vsub.f32 %v16247_v41, %v7229_v20  ;;  %v11189_v20 = vld [vmem:[%s17096_s2 + $0x70] sm:$0xff]  }
0x12d0   :  { %v7231_v63 = vpop.xlane.xlu1 %7230  ;;  %10654 = vmatprep.subr.bf16.mxu1 %v11189_v20 }
0x12d1   :  { %v7276_v34 = vmul.f32 1.442695, %v7260_v7  ;;  %v7261_v31 = vsub.f32 %v16249_v44, %v7231_v63  ;;  %v11190_v7 = vld [vmem:[%s17096_s2 + $0x78] sm:$0xff]   ;;  %10655 = vmatpush3.bf16.msra.mxu1 %v11189_v20 }
0x12d2   :  { %v7233_v11 = vpop.xlane.xlu0 %7232  ;;  %10656 = vmatprep.subr.bf16.mxu1 %v11190_v7 }
0x12d3   :  { %11809 = vpow2.f32 %v7276_v34  ;;  %v7278_v52 = vmul.f32 1.442695, %v7261_v31  ;;  %v7262_v8 = vsub.f32 %v16252_v59, %v7233_v11 }
0x12d4   :  { %v7235_v43 = vpop.xlane.xlu1 %7234 }
0x12d5   :  { %11811 = vpow2.f32 %v7278_v52  ;;  %v7280_v18 = vmul.f32 1.442695, %v7262_v8  ;;  %v7263_v38 = vsub.f32 %v16255_v2, %v7235_v43  ;;  %10657 = vmatpush3.bf16.msra.mxu1 %v11190_v7 }
0x12d6   :  { %v7237_v60 = vpop.xlane.xlu0 %7236 }
0x12d7   :  { %11813 = vpow2.f32 %v7280_v18  ;;  %v7282_v58 = vmul.f32 1.442695, %v7263_v38  ;;  %v7264_v22 = vsub.f32 %v16258_v17, %v7237_v60 }
0x12d8   :  { %v7239_v61 = vpop.xlane.xlu1 %7238 }
0x12d9   :  { %11815 = vpow2.f32 %v7282_v58  ;;  %v7284_v35 = vmul.f32 1.442695, %v7264_v22  ;;  %v7265_v55 = vsub.f32 %v16261_v12, %v7239_v61 }
0x12da   :  { %v7241_v56 = vpop.xlane.xlu0 %7240 }
0x12db   :  { %11817 = vpow2.f32 %v7284_v35  ;;  %v7286_v47 = vmul.f32 1.442695, %v7265_v55  ;;  %v7266_v45 = vsub.f32 %v16264_v21, %v7241_v56 }
0x12dc   :  { %v7243_v41 = vpop.xlane.xlu1 %7242 }
0x12dd   :  { %v16302_v3 = vpop.eup %11809  ;;  %11819 = vpow2.f32 %v7286_v47  ;;  %v7288_v30 = vmul.f32 1.442695, %v7266_v45  ;;  %v7267_v0 = vsub.f32 %v16267_v4, %v7243_v41 }
0x12de   :  { %7308 = vadd.xlane.f32.xlu0 %v16302_v3  ;;  %v7245_v44 = vpop.xlane.xlu0 %7244 }
0x12df   :  { %v16306_v13 = vpop.eup %11811  ;;  %11821 = vpow2.f32 %v7288_v30  ;;  %v7290_v59 = vmul.f32 1.442695, %v7267_v0  ;;  %v7268_v46 = vsub.f32 %v16270_v49, %v7245_v44 }
0x12e0   :  { %7310 = vadd.xlane.f32.xlu1 %v16306_v13  ;;  %v7247_v2 = vpop.xlane.xlu1 %7246 }
0x12e1   :  { %v16310_v9 = vpop.eup %11813  ;;  %11823 = vpow2.f32 %v7290_v59  ;;  %v7292_v26 = vmul.f32 1.442695, %v7268_v46  ;;  %v7269_v16 = vsub.f32 %v16273_v15, %v7247_v2 }
0x12e2   :  { %7312 = vadd.xlane.f32.xlu0 %v16310_v9  ;;  %v7249_v17 = vpop.xlane.xlu0 %7248 }
0x12e3   :  { %v16314_v62 = vpop.eup %11815  ;;  %11825 = vpow2.f32 %v7292_v26  ;;  %v7294_v37 = vmul.f32 1.442695, %v7269_v16  ;;  %v7270_v40 = vsub.f32 %v16276_v19, %v7249_v17 }
0x12e4   :  { %7314 = vadd.xlane.f32.xlu1 %v16314_v62  ;;  %v7251_v12 = vpop.xlane.xlu1 %7250 }
0x12e5   :  { %v16318_v23 = vpop.eup %11817  ;;  %11827 = vpow2.f32 %v7294_v37  ;;  %v7296_v21 = vmul.f32 1.442695, %v7270_v40  ;;  %v7271_v25 = vsub.f32 %v16279_v51, %v7251_v12 }
0x12e6   :  { %7316 = vadd.xlane.f32.xlu0 %v16318_v23  ;;  %v7253_v4 = vpop.xlane.xlu0 %7252 }
0x12e7   :  { %v16322_v24 = vpop.eup %11819  ;;  %11829 = vpow2.f32 %v7296_v21  ;;  %v7298_v50 = vmul.f32 1.442695, %v7271_v25  ;;  %v7272_v28 = vsub.f32 %v16282_v54, %v7253_v4 }
0x12e8   :  { %7318 = vadd.xlane.f32.xlu1 %v16322_v24  ;;  %v7255_v49 = vpop.xlane.xlu1 %7254 }
0x12e9   :  { %v16326_v1 = vpop.eup %11821  ;;  %11831 = vpow2.f32 %v7298_v50  ;;  %v7300_v29 = vmul.f32 1.442695, %v7272_v28  ;;  %v7273_v33 = vsub.f32 %v16285_v6, %v7255_v49 }
0x12ea   :  { %7320 = vadd.xlane.f32.xlu0 %v16326_v1  ;;  %v7257_v15 = vpop.xlane.xlu0 %7256 }
0x12eb   :  { %v16330_v10 = vpop.eup %11823  ;;  %11833 = vpow2.f32 %v7300_v29  ;;  %v7302_v19 = vmul.f32 1.442695, %v7273_v33  ;;  %v7274_v48 = vsub.f32 %v16288_v27, %v7257_v15 }
0x12ec   :  { %7322 = vadd.xlane.f32.xlu1 %v16330_v10  ;;  %v7259_v51 = vpop.xlane.xlu1 %7258 }
0x12ed   :  { %v16334_v32 = vpop.eup %11825  ;;  %11835 = vpow2.f32 %v7302_v19  ;;  %v7304_v36 = vmul.f32 1.442695, %v7274_v48  ;;  %v7275_v57 = vsub.f32 %v16291_v53, %v7259_v51 }
0x12ee   :  { %7324 = vadd.xlane.f32.xlu0 %v16334_v32 }
0x12ef   :  { %v16338_v54 = vpop.eup %11827  ;;  %11837 = vpow2.f32 %v7304_v36  ;;  %v7306_v39 = vmul.f32 1.442695, %v7275_v57 }
0x12f0   :  { %7326 = vadd.xlane.f32.xlu1 %v16338_v54 }
0x12f1   :  { %v16341_v42 = vpop.eup %11829  ;;  %11839 = vpow2.f32 %v7306_v39 }
0x12f2   :  { %7328 = vadd.xlane.f32.xlu0 %v16341_v42 }
0x12f3   :  { %v16344_v5 = vpop.eup %11831 }
0x12f4   :  { %7330 = vadd.xlane.f32.xlu1 %v16344_v5 }
0x12f5   :  { %v16347_v6 = vpop.eup %11833 }
0x12f6   :  { %7332 = vadd.xlane.f32.xlu0 %v16347_v6 }
0x12f7   :  { %v16350_v14 = vpop.eup %11835 }
0x12f8   :  { %7334 = vadd.xlane.f32.xlu1 %v16350_v14 }
0x12f9   :  { %v16353_v27 = vpop.eup %11837 }
0x12fa   :  { %7336 = vadd.xlane.f32.xlu0 %v16353_v27 }
0x12fb   :  { %v16356_v53 = vpop.eup %11839 }
0x12fc   :  { %7338 = vadd.xlane.f32.xlu1 %v16356_v53 }
0x136b   :  { %v7309_v63 = vpop.xlane.xlu0 %7308 }
0x136c   :  { %11841 = vrcp.f32 %v7309_v63 }
0x136d   :  { %v7311_v34 = vpop.xlane.xlu1 %7310 }
0x136e   :  { %11843 = vrcp.f32 %v7311_v34 }
0x136f   :  { %v7313_v31 = vpop.xlane.xlu0 %7312 }
0x1370   :  { %11845 = vrcp.f32 %v7313_v31 }
0x1371   :  { %v7315_v11 = vpop.xlane.xlu1 %7314 }
0x1372   :  { %11847 = vrcp.f32 %v7315_v11 }
0x1373   :  { %v7317_v52 = vpop.xlane.xlu0 %7316 }
0x1374   :  { %11849 = vrcp.f32 %v7317_v52 }
0x1375   :  { %v7319_v8 = vpop.xlane.xlu1 %7318 }
0x1376   :  { %v11842_v43 = vpop.eup %11841  ;;  %11851 = vrcp.f32 %v7319_v8 }
0x1377   :  { %v7321_v18 = vpop.xlane.xlu0 %7320  ;;  %v7356_v58 = vmul.f32 %v11842_v43, %v16302_v3 }
0x1378   :  { %v11844_v38 = vpop.eup %11843  ;;  %11853 = vrcp.f32 %v7321_v18 }
0x1379   :  { %v7323_v60 = vpop.xlane.xlu1 %7322  ;;  %v7357_v22 = vmul.f32 %v11844_v38, %v16306_v13 }
0x137a   :  { %v11846_v61 = vpop.eup %11845  ;;  %11855 = vrcp.f32 %v7323_v60 }
0x137b   :  { %v7325_v35 = vpop.xlane.xlu0 %7324  ;;  %v7372_v55 = vpack.c.bf16 %v7357_v22, %v7356_v58  ;;  %v7358_v47 = vmul.f32 %v11846_v61, %v16310_v9 }
0x137c   :  { %v11848_v56 = vpop.eup %11847  ;;  %11857 = vrcp.f32 %v7325_v35 }
0x137d   :  { %v7359_v45 = vmul.f32 %v11848_v56, %v16314_v62  ;;  %v7327_v41 = vpop.xlane.xlu1 %7326  ;;  %10638 = vmatprep.mubr.bf16.mxu0 %v7372_v55 }
0x137e   :  { %v11850_v30 = vpop.eup %11849  ;;  %11859 = vrcp.f32 %v7327_v41  ;;  %v17579_v41 = vld [vmem:[#allocation26_spill] sm:$0xff] }
0x137f   :  { %v7329_v0 = vpop.xlane.xlu0 %7328  ;;  %v7373_v44 = vpack.c.bf16 %v7359_v45, %v7358_v47  ;;  %v7360_v13 = vmul.f32 %v11850_v30, %v16318_v23  ;;  %v16392_v45 = vld [vmem:[%s17095_s1 + $0xf] ss:$0 sm:$0xff] }
0x1380   :  { %v11852_v59 = vpop.eup %11851  ;;  %11861 = vrcp.f32 %v7329_v0 }
0x1381   :  { %v7331_v3 = vpop.xlane.xlu1 %7330  ;;  %10639 = vmatmul.mubr.bf16.vlgmr.msra.gmra.mrb[112].mxu0 %v7373_v44  ;;  %v7361_v46 = vmul.f32 %v11852_v59, %v16322_v24  ;;  %v17580_v44 = vld [vmem:[#allocation46_spill] sm:$0xff] }
0x1382   :  { %v11854_v2 = vpop.eup %11853  ;;  %11863 = vrcp.f32 %v7331_v3 }
0x1383   :  { %v7333_v26 = vpop.xlane.xlu0 %7332  ;;  %v7374_v9 = vpack.c.bf16 %v7361_v46, %v7360_v13  ;;  %v7362_v62 = vmul.f32 %v11854_v2, %v16326_v1  ;;  %v17581_v13 = vld [vmem:[#allocation45_spill] sm:$0xff] }
0x1384   :  { %v11856_v16 = vpop.eup %11855  ;;  %11865 = vrcp.f32 %v7333_v26 }
0x1385   :  { %v7335_v17 = vpop.xlane.xlu1 %7334  ;;  %10642 = vmatprep.mubr.bf16.mxu0 %v7374_v9  ;;  %v7363_v37 = vmul.f32 %v11856_v16, %v16330_v10  ;;  %v17582_v9 = vld [vmem:[#allocation25_spill] sm:$0xff] }
0x1386   :  { %v11858_v40 = vpop.eup %11857  ;;  %11867 = vrcp.f32 %v7335_v17 }
0x1387   :  { %v7337_v12 = vpop.xlane.xlu0 %7336  ;;  %v7375_v21 = vpack.c.bf16 %v7363_v37, %v7362_v62  ;;  %v7364_v4 = vmul.f32 %v11858_v40, %v16334_v32 }
0x1388   :  { %v11860_v25 = vpop.eup %11859  ;;  %11869 = vrcp.f32 %v7337_v12 }
0x1389   :  { %v7339_v23 = vpop.xlane.xlu1 %7338  ;;  %10643 = vmatmul.mubr.bf16.gmra.mrb[116].mxu0 %v7375_v21  ;;  %v7365_v24 = vmul.f32 %v11860_v25, %v16338_v54  ;;  %v17585_v25 = vld [vmem:[#allocation32_spill] sm:$0xff] }
0x138a   :  { %v11862_v50 = vpop.eup %11861  ;;  %11871 = vrcp.f32 %v7339_v23 }
0x138b   :  { %v7376_v28 = vpack.c.bf16 %v7365_v24, %v7364_v4  ;;  %v7366_v1 = vmul.f32 %v11862_v50, %v16341_v42  ;;  %v17586_v24 = vld [vmem:[#allocation30_spill] sm:$0xff] }
0x138c   :  { %v11864_v49 = vpop.eup %11863 }
0x138d   :  { %10646 = vmatprep.mubr.bf16.mxu0 %v7376_v28  ;;  %v7367_v29 = vmul.f32 %v11864_v49, %v16344_v5 }
0x138e   :  { %v11866_v33 = vpop.eup %11865 }
0x138f   :  { %v7377_v15 = vpack.c.bf16 %v7367_v29, %v7366_v1  ;;  %v7368_v19 = vmul.f32 %v11866_v33, %v16347_v6  ;;  %v17587_v1 = vld [vmem:[#allocation31_spill] sm:$0xff] }
0x1390   :  { %v11868_v10 = vpop.eup %11867 }
0x1391   :  { %10647 = vmatmul.mubr.bf16.gmra.mrb[120].mxu0 %v7377_v15  ;;  %v7369_v48 = vmul.f32 %v11868_v10, %v16350_v14  ;;  %v17589_v10 = vld [vmem:[#allocation28_spill] sm:$0xff] }
0x1392   :  { %v11870_v51 = vpop.eup %11869 }
0x1393   :  { %v7378_v32 = vpack.c.bf16 %v7369_v48, %v7368_v19  ;;  %v7370_v57 = vmul.f32 %v11870_v51, %v16353_v27 }
0x1394   :  { %v11872_v36 = vpop.eup %11871 }
0x1395   :  { %10650 = vmatprep.mubr.bf16.mxu0 %v7378_v32  ;;  %v7371_v54 = vmul.f32 %v11872_v36, %v16356_v53 }
0x1397   :  { %v7379_v39 = vpack.c.bf16 %v7371_v54, %v7370_v57 }
0x1399   :  { %10651 = vmatmul.mubr.bf16.gmra.mrb[124].mxu0 %v7379_v39 }
0x1454   :  { %v10640_v42 = vpop.f32.mrb[112].mxu0 }
0x1455   :  { %v7414_v5 = vpop.f32.mrb[113].mxu0 }
0x1456   :  { %v10641_v20 = vpop.f32.mrb[114].mxu0 }
0x1457   :  { %v7494_v7 = vpack.c.bf16 %v10641_v20, %v10640_v42  ;;  %v7417_v63 = vpop.f32.mrb[115].mxu0  ;;  %v17593_v42 = vld [vmem:[#allocation36_spill] sm:$0xff] }
0x1458   :  { %v7493_v34 = vpack.c.bf16 %v7417_v63, %v7414_v5 }
0x145a   :  { %10658 = vmatprep.mubr.msk.bf16.mxu1 %vm89_vm0, %v7493_v34 }
0x145b   :  { %10659 = vmatmul.mubr.msk.bf16.vlgmr.msra.gmra.mrb[176].mxu1 %vm89_vm0, %v7494_v7  ;;  %v17594_v7 = vld [vmem:[#allocation34_spill] sm:$0xff] }
0x145c   :  { %v10644_v6 = vpop.f32.mrb[116].mxu0 }
0x145d   :  { %v7430_v14 = vpop.f32.mrb[117].mxu0 }
0x145e   :  { %v10645_v31 = vpop.f32.mrb[118].mxu0 }
0x145f   :  { %v7496_v11 = vpack.c.bf16 %v10645_v31, %v10644_v6  ;;  %v7433_v52 = vpop.f32.mrb[119].mxu0 }
0x1460   :  { %v7495_v27 = vpack.c.bf16 %v7433_v52, %v7430_v14  ;;  %v17595_v14 = vld [vmem:[#allocation35_spill] sm:$0xff] }
0x1462   :  { %10662 = vmatprep.mubr.msk.bf16.mxu1 %vm89_vm0, %v7495_v27  ;;  %v17597_v27 = vld [vmem:[#allocation33_spill] sm:$0xff] }
0x1463   :  { %10663 = vmatmul.mubr.msk.bf16.gmra.mrb[180].mxu1 %vm89_vm0, %v7496_v11 }
0x1464   :  { %v10648_v53 = vpop.f32.mrb[120].mxu0 }
0x1465   :  { %v7446_v8 = vpop.f32.mrb[121].mxu0 }
0x1466   :  { %v10649_v43 = vpop.f32.mrb[122].mxu0 }
0x1467   :  { %v7498_v18 = vpack.c.bf16 %v10649_v43, %v10648_v53  ;;  %v7449_v38 = vpop.f32.mrb[123].mxu0 }
0x1468   :  { %v7497_v60 = vpack.c.bf16 %v7449_v38, %v7446_v8 }
0x146a   :  { %10666 = vmatprep.mubr.msk.bf16.mxu1 %vm89_vm0, %v7497_v60 }
0x146b   :  { %10667 = vmatmul.mubr.msk.bf16.gmra.mrb[184].mxu1 %vm89_vm0, %v7498_v18 }
0x146c   :  { %v10652_v58 = vpop.f32.mrb[124].mxu0 }
0x146d   :  { %v7462_v22 = vpop.f32.mrb[125].mxu0 }
0x146e   :  { %v10653_v61 = vpop.f32.mrb[126].mxu0 }
0x146f   :  { %v7500_v35 = vpack.c.bf16 %v10653_v61, %v10652_v58  ;;  %v7465_v55 = vpop.f32.mrb[127].mxu0  ;;  %v17601_v61 = vld [vmem:[#allocation40_spill] sm:$0xff] }
0x1470   :  { %v7499_v56 = vpack.c.bf16 %v7465_v55, %v7462_v22 }
0x1472   :  { %10670 = vmatprep.mubr.msk.bf16.mxu1 %vm89_vm0, %v7499_v56  ;;  %v17602_v56 = vld [vmem:[#allocation38_spill] sm:$0xff] }
0x1473   :  { %10671 = vmatmul.mubr.msk.bf16.gmra.mrb[188].mxu1 %vm89_vm0, %v7500_v35 }
0x152e   :  { %v10660_v47 = vpop.f32.mrb[176].mxu1 }
0x152f   :  { %v7641_v30 = vadd.f32 %v10660_v47, %v17579_v41  ;;  %v7576_v0 = vpop.f32.mrb[177].mxu1 }
0x1530   :  { %v7639_v59 = vadd.f32 %v7576_v0, %v17580_v44  ;;  %v10661_v3 = vpop.f32.mrb[178].mxu1  ;;  %v17603_v0 = vld [vmem:[#allocation39_spill] sm:$0xff] }
0x1531   :  { %v7642_v46 = vadd.f32 %v10661_v3, %v17581_v13  ;;  %v7579_v2 = vpop.f32.mrb[179].mxu1  ;;  %v16402_v17 = vadd.f32 %v16392_v45, %v7641_v30  ;;  %v17605_v13 = vld [vmem:[#allocation37_spill] sm:$0xff] }
0x1532   :  { %v16398_v26 = vadd.f32 %v16392_v45, %v7639_v59  ;;  %v7640_v16 = vadd.f32 %v17582_v9, %v7579_v2 }
0x1533   :  { %v16410_v40 = vadd.f32 %v16392_v45, %v7642_v46  ;;  %v7681_v49 = vsel %vm89_vm0, %v16402_v17, 0.0 }
0x1534   :  { %v16405_v62 = vadd.f32 %v16392_v45, %v7640_v16  ;;  %v7675_v37 = vsel %vm89_vm0, %v16398_v26, 0.0 }
0x1535   :  { %7676 = vadd.xlane.f32.xlu0 %v7675_v37  ;;  %17584 = vst [vmem:[#allocation19_spill] sm:$0xff] %v16410_v40  ;;  %v7684_v48 = vsel %vm89_vm0, %v16410_v40, 0.0 }
0x1536   :  { %17583 = vst [vmem:[#allocation43_spill] sm:$0xff] %v16405_v62  ;;  %v10664_v12 = vpop.f32.mrb[180].mxu1  ;;  %v7678_v21 = vsel %vm89_vm0, %v16405_v62, 0.0 }
0x1537   :  { %v7645_v23 = vadd.f32 %v10664_v12, %v17585_v25  ;;  %7679 = vadd.xlane.f32.xlu1 %v7678_v21  ;;  %v7592_v4 = vpop.f32.mrb[181].mxu1 }
0x1538   :  { %v7643_v50 = vadd.f32 %v7592_v4, %v17586_v24  ;;  %v10665_v28 = vpop.f32.mrb[182].mxu1  ;;  %v11191_v4 = vld [vmem:[%s17097_s3 + $0x10] sm:$0xff]  }
0x1539   :  { %v7646_v29 = vadd.f32 %v10665_v28, %v17587_v1  ;;  %7682 = vadd.xlane.f32.xlu0 %v7681_v49  ;;  %v7595_v33 = vpop.f32.mrb[183].mxu1  ;;  %v16426_v51 = vadd.f32 %v16392_v45, %v7645_v23  ;;  %10674 = vmatprep.subr.bf16.mxu1 %v11191_v4 }
0x153a   :  { %v16420_v15 = vadd.f32 %v16392_v45, %v7643_v50  ;;  %v7644_v19 = vadd.f32 %v17589_v10, %v7595_v33  ;;  %10675 = vmatpush3.bf16.msra.mxu1 %v11191_v4 }
0x153b   :  { %7685 = vadd.xlane.f32.xlu1 %v7684_v48  ;;  %17590 = vst [vmem:[#allocation18_spill] sm:$0xff] %v16426_v51  ;;  %v16434_v57 = vadd.f32 %v16392_v45, %v7646_v29  ;;  %v7693_v6 = vsel %vm89_vm0, %v16426_v51, 0.0 }
0x153c   :  { %17588 = vst [vmem:[#allocation13_spill] sm:$0xff] %v16420_v15  ;;  %v16429_v32 = vadd.f32 %v16392_v45, %v7644_v19  ;;  %v7687_v36 = vsel %vm89_vm0, %v16420_v15, 0.0 }
0x153d   :  { %7688 = vadd.xlane.f32.xlu0 %v7687_v36  ;;  %17592 = vst [vmem:[#allocation44_spill] sm:$0xff] %v16434_v57  ;;  %v7696_v8 = vsel %vm89_vm0, %v16434_v57, 0.0 }
0x153e   :  { %17591 = vst [vmem:[#allocation21_spill] sm:$0xff] %v16429_v32  ;;  %v10668_v54 = vpop.f32.mrb[184].mxu1  ;;  %v7690_v39 = vsel %vm89_vm0, %v16429_v32, 0.0 }
0x153f   :  { %v7649_v5 = vadd.f32 %v10668_v54, %v17593_v42  ;;  %7691 = vadd.xlane.f32.xlu1 %v7690_v39  ;;  %v7608_v20 = vpop.f32.mrb[185].mxu1 }
0x1540   :  { %v7647_v63 = vadd.f32 %v7608_v20, %v17594_v7  ;;  %v10669_v34 = vpop.f32.mrb[186].mxu1 }
0x1541   :  { %v7650_v31 = vadd.f32 %v10669_v34, %v17595_v14  ;;  %7694 = vadd.xlane.f32.xlu0 %v7693_v6  ;;  %v7611_v11 = vpop.f32.mrb[187].mxu1  ;;  %v16450_v43 = vadd.f32 %v16392_v45, %v7649_v5 }
0x1542   :  { %v16444_v52 = vadd.f32 %v16392_v45, %v7647_v63  ;;  %v7648_v53 = vadd.f32 %v17597_v27, %v7611_v11 }
0x1543   :  { %7697 = vadd.xlane.f32.xlu1 %v7696_v8  ;;  %17598 = vst [vmem:[#allocation47_spill] sm:$0xff] %v16450_v43  ;;  %v16458_v60 = vadd.f32 %v16392_v45, %v7650_v31  ;;  %v7705_v30 = vsel %vm89_vm0, %v16450_v43, 0.0 }
0x1544   :  { %17596 = vst [vmem:[#allocation20_spill] sm:$0xff] %v16444_v52  ;;  %v16453_v18 = vadd.f32 %v16392_v45, %v7648_v53  ;;  %v7699_v38 = vsel %vm89_vm0, %v16444_v52, 0.0 }
0x1545   :  { %7700 = vadd.xlane.f32.xlu0 %v7699_v38  ;;  %17600 = vst [vmem:[#allocation7_spill] sm:$0xff] %v16458_v60  ;;  %v7708_v2 = vsel %vm89_vm0, %v16458_v60, 0.0 }
0x1546   :  { %17599 = vst [vmem:[#allocation5_spill] sm:$0xff] %v16453_v18  ;;  %v10672_v58 = vpop.f32.mrb[188].mxu1  ;;  %v7702_v22 = vsel %vm89_vm0, %v16453_v18, 0.0 }
0x1547   :  { %v7653_v35 = vadd.f32 %v10672_v58, %v17601_v61  ;;  %7703 = vadd.xlane.f32.xlu1 %v7702_v22  ;;  %v7624_v55 = vpop.f32.mrb[189].mxu1 }
0x1548   :  { %v7651_v47 = vadd.f32 %v7624_v55, %v17602_v56  ;;  %v10673_v41 = vpop.f32.mrb[190].mxu1 }
0x1549   :  { %v7654_v44 = vadd.f32 %v10673_v41, %v17603_v0  ;;  %7706 = vadd.xlane.f32.xlu0 %v7705_v30  ;;  %v7627_v59 = vpop.f32.mrb[191].mxu1  ;;  %v16474_v9 = vadd.f32 %v16392_v45, %v7653_v35 }
0x154a   :  { %v16468_v3 = vadd.f32 %v16392_v45, %v7651_v47  ;;  %v7652_v46 = vadd.f32 %v17605_v13, %v7627_v59 }
0x154b   :  { %7709 = vadd.xlane.f32.xlu1 %v7708_v2  ;;  %17606 = vst [vmem:[#allocation58_spill] sm:$0xff] %v16474_v9  ;;  %v16482_v12 = vadd.f32 %v16392_v45, %v7654_v44  ;;  %v7717_v25 = vsel %vm89_vm0, %v16474_v9, 0.0 }
0x154c   :  { %17604 = vst [vmem:[#allocation60_spill] sm:$0xff] %v16468_v3  ;;  %v16477_v16 = vadd.f32 %v16392_v45, %v7652_v46  ;;  %v7711_v37 = vsel %vm89_vm0, %v16468_v3, 0.0 }
0x154d   :  { %7712 = vadd.xlane.f32.xlu0 %v7711_v37  ;;  %17608 = vst [vmem:[#allocation27_spill] sm:$0xff] %v16482_v12  ;;  %v7720_v23 = vsel %vm89_vm0, %v16482_v12, 0.0 }
0x154e   :  { %17607 = vst [vmem:[#allocation48_spill] sm:$0xff] %v16477_v16  ;;  %v7714_v21 = vsel %vm89_vm0, %v16477_v16, 0.0 }
0x154f   :  { %7715 = vadd.xlane.f32.xlu1 %v7714_v21 }
0x1551   :  { %7718 = vadd.xlane.f32.xlu0 %v7717_v25 }
0x1553   :  { %7721 = vadd.xlane.f32.xlu1 %v7720_v23 }
0x15c2   :  { %v7677_v45 = vpop.xlane.xlu0 %7676 }
0x15c3   :  { %v7723_v24 = vmul.f32 0.03125, %v7677_v45 }
0x15c4   :  { %v7680_v50 = vpop.xlane.xlu1 %7679 }
0x15c5   :  { %v16494_v28 = vsub.f32 %v16398_v26, %v7723_v24  ;;  %v7724_v49 = vmul.f32 0.03125, %v7680_v50 }
0x15c6   :  { %v7683_v1 = vpop.xlane.xlu0 %7682 }
0x15c7   :  { %v16497_v29 = vsub.f32 %v16405_v62, %v7724_v49  ;;  %v7725_v33 = vmul.f32 0.03125, %v7683_v1  ;;  %v7755_v10 = vmul.f32 %v16494_v28, %v16494_v28 }
0x15c8   :  { %v7686_v19 = vpop.xlane.xlu1 %7685 }
0x15c9   :  { %v16502_v48 = vsub.f32 %v16402_v17, %v7725_v33  ;;  %v7726_v36 = vmul.f32 0.03125, %v7686_v19  ;;  %v7771_v54 = vsel %vm89_vm0, %v7755_v10, 0.0  ;;  %v7756_v39 = vmul.f32 %v16497_v29, %v16497_v29 }
0x15ca   :  { %7772 = vadd.xlane.f32.xlu0 %v7771_v54  ;;  %v7689_v42 = vpop.xlane.xlu0 %7688 }
0x15cb   :  { %v16508_v5 = vsub.f32 %v16410_v40, %v7726_v36  ;;  %v7727_v20 = vmul.f32 0.03125, %v7689_v42  ;;  %v7774_v7 = vsel %vm89_vm0, %v7756_v39, 0.0  ;;  %v7757_v63 = vmul.f32 %v16502_v48, %v16502_v48 }
0x15cc   :  { %v7692_v34 = vpop.xlane.xlu1 %7691  ;;  %7775 = vadd.xlane.f32.xlu1 %v7774_v7 }
0x15cd   :  { %v16514_v6 = vsub.f32 %v16420_v15, %v7727_v20  ;;  %v7728_v14 = vmul.f32 0.03125, %v7692_v34  ;;  %v7777_v31 = vsel %vm89_vm0, %v7757_v63, 0.0  ;;  %v7758_v11 = vmul.f32 %v16508_v5, %v16508_v5 }
0x15ce   :  { %7778 = vadd.xlane.f32.xlu0 %v7777_v31  ;;  %v7695_v27 = vpop.xlane.xlu0 %7694 }
0x15cf   :  { %v16520_v53 = vsub.f32 %v16429_v32, %v7728_v14  ;;  %v7729_v8 = vmul.f32 0.03125, %v7695_v27  ;;  %v7780_v38 = vsel %vm89_vm0, %v7758_v11, 0.0  ;;  %v7759_v58 = vmul.f32 %v16514_v6, %v16514_v6 }
0x15d0   :  { %v7698_v22 = vpop.xlane.xlu1 %7697  ;;  %7781 = vadd.xlane.f32.xlu1 %v7780_v38 }
0x15d1   :  { %v16526_v61 = vsub.f32 %v16426_v51, %v7729_v8  ;;  %v7730_v35 = vmul.f32 0.03125, %v7698_v22  ;;  %v7783_v55 = vsel %vm89_vm0, %v7759_v58, 0.0  ;;  %v7760_v56 = vmul.f32 %v16520_v53, %v16520_v53 }
0x15d2   :  { %7784 = vadd.xlane.f32.xlu0 %v7783_v55  ;;  %v7701_v47 = vpop.xlane.xlu0 %7700 }
0x15d3   :  { %v16532_v41 = vsub.f32 %v16434_v57, %v7730_v35  ;;  %v7731_v30 = vmul.f32 0.03125, %v7701_v47  ;;  %v7786_v0 = vsel %vm89_vm0, %v7760_v56, 0.0  ;;  %v7761_v44 = vmul.f32 %v16526_v61, %v16526_v61 }
0x15d4   :  { %v7704_v59 = vpop.xlane.xlu1 %7703  ;;  %7787 = vadd.xlane.f32.xlu1 %v7786_v0 }
0x15d5   :  { %v16538_v13 = vsub.f32 %v16444_v52, %v7731_v30  ;;  %v7732_v46 = vmul.f32 0.03125, %v7704_v59  ;;  %v7789_v2 = vsel %vm89_vm0, %v7761_v44, 0.0  ;;  %v7762_v37 = vmul.f32 %v16532_v41, %v16532_v41 }
0x15d6   :  { %7790 = vadd.xlane.f32.xlu0 %v7789_v2  ;;  %v7707_v21 = vpop.xlane.xlu0 %7706 }
0x15d7   :  { %v16544_v25 = vsub.f32 %v16453_v18, %v7732_v46  ;;  %v7733_v23 = vmul.f32 0.03125, %v7707_v21  ;;  %v7792_v4 = vsel %vm89_vm0, %v7762_v37, 0.0  ;;  %v7763_v45 = vmul.f32 %v16538_v13, %v16538_v13  ;;  %v11192_v46 = vld [vmem:[%s17097_s3 + $0x18] sm:$0xff]  }
0x15d8   :  { %v7710_v24 = vpop.xlane.xlu1 %7709  ;;  %7793 = vadd.xlane.f32.xlu1 %v7792_v4  ;;  %10676 = vmatprep.subr.bf16.mxu1 %v11192_v46 }
0x15d9   :  { %v16550_v50 = vsub.f32 %v16450_v43, %v7733_v23  ;;  %v7734_v49 = vmul.f32 0.03125, %v7710_v24  ;;  %v7795_v1 = vsel %vm89_vm0, %v7763_v45, 0.0  ;;  %v7764_v33 = vmul.f32 %v16544_v25, %v16544_v25  ;;  %10677 = vmatpush3.bf16.msra.mxu1 %v11192_v46 }
0x15da   :  { %7796 = vadd.xlane.f32.xlu0 %v7795_v1  ;;  %v7713_v10 = vpop.xlane.xlu0 %7712 }
0x15db   :  { %v16556_v19 = vsub.f32 %v16458_v60, %v7734_v49  ;;  %v7735_v36 = vmul.f32 0.03125, %v7713_v10  ;;  %v7798_v54 = vsel %vm89_vm0, %v7764_v33, 0.0  ;;  %v7765_v39 = vmul.f32 %v16550_v50, %v16550_v50 }
0x15dc   :  { %7799 = vadd.xlane.f32.xlu1 %v7798_v54  ;;  %v7716_v42 = vpop.xlane.xlu1 %7715 }
0x15dd   :  { %v16562_v20 = vsub.f32 %v16468_v3, %v7735_v36  ;;  %v7736_v7 = vmul.f32 0.03125, %v7716_v42  ;;  %v7801_v63 = vsel %vm89_vm0, %v7765_v39, 0.0  ;;  %v7766_v34 = vmul.f32 %v16556_v19, %v16556_v19 }
0x15de   :  { %7802 = vadd.xlane.f32.xlu0 %v7801_v63  ;;  %v7719_v14 = vpop.xlane.xlu0 %7718 }
0x15df   :  { %v16568_v31 = vsub.f32 %v16477_v16, %v7736_v7  ;;  %v7737_v11 = vmul.f32 0.03125, %v7719_v14  ;;  %v7804_v27 = vsel %vm89_vm0, %v7766_v34, 0.0  ;;  %v7767_v8 = vmul.f32 %v16562_v20, %v16562_v20 }
0x15e0   :  { %7805 = vadd.xlane.f32.xlu1 %v7804_v27  ;;  %v7722_v38 = vpop.xlane.xlu1 %7721 }
0x15e1   :  { %v16574_v58 = vsub.f32 %v16474_v9, %v7737_v11  ;;  %v7738_v22 = vmul.f32 0.03125, %v7722_v38  ;;  %v7807_v35 = vsel %vm89_vm0, %v7767_v8, 0.0  ;;  %v7768_v55 = vmul.f32 %v16568_v31, %v16568_v31  ;;  %v16595_v38 = vld [vmem:[%s17095_s1 + $0x10] ss:$0 sm:$0xff] }
0x15e2   :  { %7808 = vadd.xlane.f32.xlu0 %v7807_v35 }
0x15e3   :  { %v16580_v56 = vsub.f32 %v16482_v12, %v7738_v22  ;;  %v7810_v47 = vsel %vm89_vm0, %v7768_v55, 0.0  ;;  %v7769_v30 = vmul.f32 %v16574_v58, %v16574_v58 }
0x15e4   :  { %7811 = vadd.xlane.f32.xlu1 %v7810_v47 }
0x15e5   :  { %v7813_v0 = vsel %vm89_vm0, %v7769_v30, 0.0  ;;  %v7770_v44 = vmul.f32 %v16580_v56, %v16580_v56 }
0x15e6   :  { %7814 = vadd.xlane.f32.xlu0 %v7813_v0 }
0x15e7   :  { %v7816_v59 = vsel %vm89_vm0, %v7770_v44, 0.0 }
0x15e8   :  { %7817 = vadd.xlane.f32.xlu1 %v7816_v59 }
0x1657   :  { %v7773_v2 = vpop.xlane.xlu0 %7772 }
0x1658   :  { %v7819_v37 = vmul.f32 0.03125, %v7773_v2 }
0x1659   :  { %v7776_v21 = vpop.xlane.xlu1 %7775 }
0x165a   :  { %v7835_v23 = vadd.f32 1e-05, %v7819_v37  ;;  %v7820_v4 = vmul.f32 0.03125, %v7776_v21  ;;  %v16603_v21 = vld [vmem:[%s17095_s1 + $0x11] ss:$0 sm:$0xff] }
0x165b   :  { %v7779_v45 = vpop.xlane.xlu0 %7778 }
0x165c   :  { %11873 = vrsqrt.f32 %v7835_v23  ;;  %v7836_v24 = vadd.f32 1e-05, %v7820_v4  ;;  %v7821_v49 = vmul.f32 0.03125, %v7779_v45 }
0x165d   :  { %v7782_v1 = vpop.xlane.xlu1 %7781 }
0x165e   :  { %11875 = vrsqrt.f32 %v7836_v24  ;;  %v7837_v33 = vadd.f32 1e-05, %v7821_v49  ;;  %v7822_v10 = vmul.f32 0.03125, %v7782_v1 }
0x165f   :  { %v7785_v36 = vpop.xlane.xlu0 %7784 }
0x1660   :  { %11877 = vrsqrt.f32 %v7837_v33  ;;  %v7838_v54 = vadd.f32 1e-05, %v7822_v10  ;;  %v7823_v39 = vmul.f32 0.03125, %v7785_v36 }
0x1661   :  { %v7788_v42 = vpop.xlane.xlu1 %7787 }
0x1662   :  { %11879 = vrsqrt.f32 %v7838_v54  ;;  %v7839_v7 = vadd.f32 1e-05, %v7823_v39  ;;  %v7824_v63 = vmul.f32 0.03125, %v7788_v42 }
0x1663   :  { %v7791_v34 = vpop.xlane.xlu0 %7790 }
0x1664   :  { %11881 = vrsqrt.f32 %v7839_v7  ;;  %v7840_v14 = vadd.f32 1e-05, %v7824_v63  ;;  %v7825_v11 = vmul.f32 0.03125, %v7791_v34 }
0x1665   :  { %v7794_v27 = vpop.xlane.xlu1 %7793 }
0x1666   :  { %v11874_v8 = vpop.eup %11873  ;;  %11883 = vrsqrt.f32 %v7840_v14  ;;  %v7841_v22 = vadd.f32 1e-05, %v7825_v11  ;;  %v7826_v35 = vmul.f32 0.03125, %v7794_v27 }
0x1667   :  { %v7867_v55 = vmul.f32 %v11874_v8, %v16494_v28  ;;  %v7797_v47 = vpop.xlane.xlu0 %7796 }
0x1668   :  { %v11876_v30 = vpop.eup %11875  ;;  %11885 = vrsqrt.f32 %v7841_v22  ;;  %v7842_v0 = vadd.f32 1e-05, %v7826_v35  ;;  %v7827_v44 = vmul.f32 0.03125, %v7797_v47 }
0x1669   :  { %v7868_v59 = vmul.f32 %v11876_v30, %v16497_v29  ;;  %v7800_v46 = vpop.xlane.xlu1 %7799  ;;  %v7887_v2 = vmul.f32 %v16595_v38, %v7867_v55 }
0x166a   :  { %v11878_v37 = vpop.eup %11877  ;;  %11887 = vrsqrt.f32 %v7842_v0  ;;  %v7843_v23 = vadd.f32 1e-05, %v7827_v44  ;;  %v7828_v4 = vmul.f32 0.03125, %v7800_v46 }
0x166b   :  { %v7869_v28 = vmul.f32 %v11878_v37, %v16502_v48  ;;  %v7803_v45 = vpop.xlane.xlu0 %7802  ;;  %v7888_v24 = vmul.f32 %v16595_v38, %v7868_v59  ;;  %v7907_v54 = vadd.f32 %v16603_v21, %v7887_v2 }
0x166c   :  { %v11880_v49 = vpop.eup %11879  ;;  %11889 = vrsqrt.f32 %v7843_v23  ;;  %v7844_v29 = vadd.f32 1e-05, %v7828_v4  ;;  %v7829_v1 = vmul.f32 0.03125, %v7803_v45 }
0x166d   :  { %v7889_v33 = vmul.f32 %v16595_v38, %v7869_v28  ;;  %v7870_v10 = vmul.f32 %v11880_v49, %v16508_v5  ;;  %v7806_v36 = vpop.xlane.xlu1 %7805  ;;  %v7908_v39 = vadd.f32 %v16603_v21, %v7888_v24 }
0x166e   :  { %v11882_v42 = vpop.eup %11881  ;;  %11891 = vrsqrt.f32 %v7844_v29  ;;  %v7845_v7 = vadd.f32 1e-05, %v7829_v1  ;;  %v7830_v48 = vmul.f32 0.03125, %v7806_v36 }
0x166f   :  { %v7890_v63 = vmul.f32 %v16595_v38, %v7870_v10  ;;  %v7871_v34 = vmul.f32 %v11882_v42, %v16514_v6  ;;  %v7809_v14 = vpop.xlane.xlu0 %7808  ;;  %v7923_v11 = vpack.c.bf16 %v7908_v39, %v7907_v54  ;;  %v7909_v5 = vadd.f32 %v16603_v21, %v7889_v33 }
0x1670   :  { %v11884_v27 = vpop.eup %11883  ;;  %11893 = vrsqrt.f32 %v7845_v7  ;;  %v7846_v8 = vadd.f32 1e-05, %v7830_v48  ;;  %v7831_v22 = vmul.f32 0.03125, %v7809_v14 }
0x1671   :  { %v7910_v35 = vadd.f32 %v16603_v21, %v7890_v63  ;;  %v7872_v55 = vmul.f32 %v11884_v27, %v16520_v53  ;;  %v7812_v47 = vpop.xlane.xlu1 %7811  ;;  %10678 = vmatprep.mubr.msk.bf16.mxu1 %vm89_vm0, %v7923_v11  ;;  %v7891_v30 = vmul.f32 %v16595_v38, %v7871_v34 }
0x1672   :  { %v11886_v0 = vpop.eup %11885  ;;  %11895 = vrsqrt.f32 %v7846_v8  ;;  %v7847_v6 = vadd.f32 1e-05, %v7831_v22  ;;  %v7832_v44 = vmul.f32 0.03125, %v7812_v47 }
0x1673   :  { %v7873_v59 = vmul.f32 %v11886_v0, %v16526_v61  ;;  %v7815_v46 = vpop.xlane.xlu0 %7814  ;;  %v7924_v2 = vpack.c.bf16 %v7910_v35, %v7909_v5  ;;  %v7892_v37 = vmul.f32 %v16595_v38, %v7872_v55  ;;  %v7911_v24 = vadd.f32 %v16603_v21, %v7891_v30 }
0x1674   :  { %v11888_v23 = vpop.eup %11887  ;;  %11897 = vrsqrt.f32 %v7847_v6  ;;  %v7848_v4 = vadd.f32 1e-05, %v7832_v44  ;;  %v7833_v28 = vmul.f32 0.03125, %v7815_v46 }
0x1675   :  { %v7874_v53 = vmul.f32 %v11888_v23, %v16532_v41  ;;  %v7818_v45 = vpop.xlane.xlu1 %7817  ;;  %10679 = vmatmul.mubr.msk.bf16.vlgmr.msra.gmra.mrb[192].mxu1 %vm89_vm0, %v7924_v2  ;;  %v7912_v49 = vadd.f32 %v16603_v21, %v7892_v37  ;;  %v7893_v29 = vmul.f32 %v16595_v38, %v7873_v59 }
0x1676   :  { %v11890_v61 = vpop.eup %11889  ;;  %11899 = vrsqrt.f32 %v7848_v4  ;;  %v7849_v1 = vadd.f32 1e-05, %v7833_v28  ;;  %v7834_v33 = vmul.f32 0.03125, %v7818_v45 }
0x1677   :  { %v7875_v10 = vmul.f32 %v11890_v61, %v16538_v13  ;;  %v7925_v36 = vpack.c.bf16 %v7912_v49, %v7911_v24  ;;  %v7894_v54 = vmul.f32 %v16595_v38, %v7874_v53  ;;  %v7913_v7 = vadd.f32 %v16603_v21, %v7893_v29  ;;  %v11194_v29 = vld [vmem:[%s17098_s4 + $0x48] sm:$0xff]   ;;  %v11197_v61 = vld [vmem:[%s17098_s4 + $0x60] sm:$0xff]  }
0x1678   :  { %v11892_v39 = vpop.eup %11891  ;;  %11901 = vrsqrt.f32 %v7849_v1  ;;  %v7850_v41 = vadd.f32 1e-05, %v7834_v33  ;;  %v11198_v1 = vld [vmem:[%s17098_s4 + $0x68] sm:$0xff]   ;;  %v11199_v33 = vld [vmem:[%s17098_s4 + $0x70] sm:$0xff]  }
0x1679   :  { %v7876_v42 = vmul.f32 %v11892_v39, %v16544_v25  ;;  %10682 = vmatprep.mubr.msk.bf16.mxu1 %vm89_vm0, %v7925_v36  ;;  %v7914_v48 = vadd.f32 %v16603_v21, %v7894_v54  ;;  %v7895_v63 = vmul.f32 %v16595_v38, %v7875_v10  ;;  %v11200_v10 = vld [vmem:[%s17098_s4 + $0x78] sm:$0xff]   ;;  %v16685_v36 = vld [vmem:[%s17095_s1 + $0x12] ss:$0 sm:$0xff] }
0x167a   :  { %v11894_v34 = vpop.eup %11893  ;;  %11903 = vrsqrt.f32 %v7850_v41 }
0x167b   :  { %v7877_v13 = vmul.f32 %v11894_v34, %v16550_v50  ;;  %v7926_v14 = vpack.c.bf16 %v7914_v48, %v7913_v7  ;;  %v7896_v11 = vmul.f32 %v16595_v38, %v7876_v42  ;;  %v7915_v25 = vadd.f32 %v16603_v21, %v7895_v63 }
0x167c   :  { %v11896_v27 = vpop.eup %11895 }
0x167d   :  { %v7878_v8 = vmul.f32 %v11896_v27, %v16556_v19  ;;  %10683 = vmatmul.mubr.msk.bf16.gmra.mrb[196].mxu1 %vm89_vm0, %v7926_v14  ;;  %v7916_v22 = vadd.f32 %v16603_v21, %v7896_v11  ;;  %v7897_v5 = vmul.f32 %v16595_v38, %v7877_v13 }
0x167e   :  { %v11898_v35 = vpop.eup %11897 }
0x167f   :  { %v7879_v55 = vmul.f32 %v11898_v35, %v16562_v20  ;;  %v7927_v47 = vpack.c.bf16 %v7916_v22, %v7915_v25  ;;  %v7898_v50 = vmul.f32 %v16595_v38, %v7878_v8  ;;  %v7917_v19 = vadd.f32 %v16603_v21, %v7897_v5 }
0x1680   :  { %v11900_v30 = vpop.eup %11899 }
0x1681   :  { %v7880_v0 = vmul.f32 %v11900_v30, %v16568_v31  ;;  %10686 = vmatprep.mubr.msk.bf16.mxu1 %vm89_vm0, %v7927_v47  ;;  %v7918_v6 = vadd.f32 %v16603_v21, %v7898_v50  ;;  %v7899_v44 = vmul.f32 %v16595_v38, %v7879_v55 }
0x1682   :  { %v11902_v59 = vpop.eup %11901 }
0x1683   :  { %v7881_v46 = vmul.f32 %v11902_v59, %v16574_v58  ;;  %v7928_v2 = vpack.c.bf16 %v7918_v6, %v7917_v19  ;;  %v7900_v20 = vmul.f32 %v16595_v38, %v7880_v0  ;;  %v7919_v31 = vadd.f32 %v16603_v21, %v7899_v44 }
0x1684   :  { %v11904_v37 = vpop.eup %11903 }
0x1685   :  { %v7882_v23 = vmul.f32 %v11904_v37, %v16580_v56  ;;  %10687 = vmatmul.mubr.msk.bf16.gmra.mrb[200].mxu1 %vm89_vm0, %v7928_v2  ;;  %v7920_v4 = vadd.f32 %v16603_v21, %v7900_v20  ;;  %v7901_v28 = vmul.f32 %v16595_v38, %v7881_v46  ;;  %v11193_v56 = vld [vmem:[%s17098_s4 + $0x40] sm:$0xff]  }
0x1686   :  { %10694 = vmatprep.subr.bf16.mxu1 %v11193_v56 }
0x1687   :  { %v7929_v53 = vpack.c.bf16 %v7920_v4, %v7919_v31  ;;  %v7902_v45 = vmul.f32 %v16595_v38, %v7882_v23  ;;  %v7921_v58 = vadd.f32 %v16603_v21, %v7901_v28  ;;  %10695 = vmatpush3.bf16.msra.mxu1 %v11193_v56  ;;  %v11195_v38 = vld [vmem:[%s17098_s4 + $0x50] sm:$0xff]  }
0x1688   :  { %10696 = vmatprep.subr.bf16.mxu1 %v11194_v29 }
0x1689   :  { %10690 = vmatprep.mubr.msk.bf16.mxu1 %vm89_vm0, %v7929_v53  ;;  %v7922_v24 = vadd.f32 %v16603_v21, %v7902_v45  ;;  %v11196_v21 = vld [vmem:[%s17098_s4 + $0x58] sm:$0xff]  }
0x168b   :  { %v7930_v49 = vpack.c.bf16 %v7922_v24, %v7921_v58  ;;  %10697 = vmatpush3.bf16.msra.mxu1 %v11194_v29 }
0x168c   :  { %10698 = vmatprep.subr.bf16.mxu1 %v11195_v38 }
0x168d   :  { %10691 = vmatmul.mubr.msk.bf16.gmra.mrb[204].mxu1 %vm89_vm0, %v7930_v49 }
0x168f   :  { %10699 = vmatpush3.bf16.msra.mxu1 %v11195_v38 }
0x1690   :  { %10700 = vmatprep.subr.bf16.mxu1 %v11196_v21 }
0x1693   :  { %10701 = vmatpush3.bf16.msra.mxu1 %v11196_v21 }
0x1694   :  { %10702 = vmatprep.subr.bf16.mxu1 %v11197_v61 }
0x1697   :  { %10703 = vmatpush3.bf16.msra.mxu1 %v11197_v61 }
0x1698   :  { %10704 = vmatprep.subr.bf16.mxu1 %v11198_v1 }
0x169b   :  { %10705 = vmatpush3.bf16.msra.mxu1 %v11198_v1 }
0x169c   :  { %10706 = vmatprep.subr.bf16.mxu1 %v11199_v33 }
0x169f   :  { %10707 = vmatpush3.bf16.msra.mxu1 %v11199_v33 }
0x16a0   :  { %10708 = vmatprep.subr.bf16.mxu1 %v11200_v10 }
0x16a3   :  { %10709 = vmatpush3.bf16.msra.mxu1 %v11200_v10 }
0x1748   :  { %v10680_v54 = vpop.f32.mrb[192].mxu1 }
0x1749   :  { %v8019_v39 = vadd.f32 %v10680_v54, %v16685_v36  ;;  %v8010_v41 = vpop.f32.mrb[193].mxu1 }
0x174a   :  { %v16689_v42 = vadd.f32 %v16685_v36, %v8010_v41  ;;  %v10681_v7 = vpop.f32.mrb[194].mxu1 }
0x174b   :  { %v16691_v48 = vmul.f32 0.70710677, %v8019_v39  ;;  %v8022_v63 = vadd.f32 %v10681_v7, %v16685_v36  ;;  %v8013_v34 = vpop.f32.mrb[195].mxu1 }
0x174c   :  { %v16695_v13 = vmul.f32 0.70710677, %v16689_v42  ;;  %v16698_v14 = vadd.f32 %v16685_v36, %v8013_v34  ;;  %v16745_v34 = vmul.f32 0.5, %v8019_v39 }
0x174d   :  { %v8107_v11 = vand.u32 2147483647, %v16691_v48  ;;  %v16701_v27 = vmul.f32 0.70710677, %v8022_v63  ;;  %vm8427_vm12 = vcmp.lt.f32.partialorder %v16691_v48, 0.0 }
0x174e   :  { %v8105_v8 = vand.u32 2147483647, %v16695_v13  ;;  %v16705_v25 = vmul.f32 0.70710677, %v16698_v14  ;;  %vm8425_vm14 = vcmp.lt.f32.partialorder %v16695_v13, 0.0 }
0x174f   :  { %v8123_v22 = vmul.f32 0.3275911, %v8107_v11  ;;  %v8108_v5 = vand.u32 2147483647, %v16701_v27  ;;  %v8331_v28 = vsub.f32 0.0, %v8107_v11  ;;  %vm8428_vm13 = vcmp.lt.f32.partialorder %v16701_v27, 0.0 }
0x1750   :  { %v8121_v35 = vmul.f32 0.3275911, %v8105_v8  ;;  %v8106_v55 = vand.u32 2147483647, %v16705_v25  ;;  %v10684_v30 = vpop.f32.mrb[196].mxu1  ;;  %v8329_v61 = vsub.f32 0.0, %v8105_v8 }
0x1751   :  { %v8139_v47 = vadd.f32 1.0, %v8123_v22  ;;  %v8124_v50 = vmul.f32 0.3275911, %v8108_v5  ;;  %v8026_v6 = vpop.f32.mrb[197].mxu1  ;;  %v16710_v20 = vadd.f32 %v10684_v30, %v16685_v36  ;;  %v8332_v56 = vsub.f32 0.0, %v8108_v5 }
0x1752   :  { %v8137_v0 = vadd.f32 1.0, %v8121_v35  ;;  %v8122_v19 = vmul.f32 0.3275911, %v8106_v55  ;;  %v10685_v59 = vpop.f32.mrb[198].mxu1  ;;  %v16713_v37 = vadd.f32 %v16685_v36, %v8026_v6  ;;  %v8347_v10 = vmul.f32 %v8331_v28, %v8107_v11 }
0x1753   :  { %11905 = vrcp.f32 %v8139_v47  ;;  %v8140_v44 = vadd.f32 1.0, %v8124_v50  ;;  %v8029_v46 = vpop.f32.mrb[199].mxu1  ;;  %v16716_v23 = vadd.f32 %v10685_v59, %v16685_v36  ;;  %v16719_v31 = vmul.f32 0.70710677, %v16710_v20 }
0x1754   :  { %11907 = vrcp.f32 %v8137_v0  ;;  %v8138_v2 = vadd.f32 1.0, %v8122_v19  ;;  %v16722_v4 = vadd.f32 %v16685_v36, %v8029_v46  ;;  %v16725_v53 = vmul.f32 0.70710677, %v16713_v37 }
0x1755   :  { %11909 = vrcp.f32 %v8140_v44  ;;  %v16728_v45 = vmul.f32 0.70710677, %v16716_v23  ;;  %v8111_v24 = vand.u32 2147483647, %v16719_v31  ;;  %v8330_v22 = vsub.f32 0.0, %v8106_v55 }
0x1756   :  { %11911 = vrcp.f32 %v8138_v2  ;;  %v8109_v29 = vand.u32 2147483647, %v16725_v53  ;;  %v16740_v33 = vmul.f32 0.70710677, %v16722_v4  ;;  %v16755_v19 = vmul.f32 0.5, %v8022_v63 }
0x1757   :  { %v16735_v38 = vand.u32 2147483647, %v16728_v45  ;;  %v8127_v1 = vmul.f32 0.3275911, %v8111_v24  ;;  %v8348_v11 = vmul.f32 %v8332_v56, %v8108_v5  ;;  %v8345_v59 = vmul.f32 %v8329_v61, %v8105_v8 }
0x1758   :  { %v10688_v58 = vpop.f32.mrb[200].mxu1  ;;  %v8125_v54 = vmul.f32 0.3275911, %v8109_v29  ;;  %v16748_v47 = vand.u32 2147483647, %v16740_v33  ;;  %v8346_v16 = vmul.f32 %v8330_v22, %v8106_v55  ;;  %v8335_v9 = vsub.f32 0.0, %v8111_v24 }
0x1759   :  { %v16731_v49 = vpop.f32.mrb[201].mxu1  ;;  %v8128_v41 = vmul.f32 0.3275911, %v16735_v38  ;;  %v8143_v35 = vadd.f32 1.0, %v8127_v1  ;;  %v8365_v2 = vmul.f32 1.442695, %v8347_v10  ;;  %v16772_v55 = vadd.f32 %v10688_v58, %v16685_v36 }
0x175a   :  { %v16737_v21 = vpop.f32.mrb[202].mxu1  ;;  %v8141_v6 = vadd.f32 1.0, %v8125_v54  ;;  %v8126_v28 = vmul.f32 0.3275911, %v16748_v47  ;;  %v8333_v3 = vsub.f32 0.0, %v8109_v29  ;;  %vm8426_vm15 = vcmp.lt.f32.partialorder %v16705_v25, 0.0 }
0x175b   :  { %v16750_v50 = vpop.f32.mrb[203].mxu1  ;;  %11913 = vrcp.f32 %v8143_v35  ;;  %v8144_v39 = vadd.f32 1.0, %v8128_v41  ;;  %v8367_v8 = vmul.f32 1.442695, %v8348_v11  ;;  %v8336_v35 = vsub.f32 0.0, %v16735_v38 }
0x175c   :  { %11915 = vrcp.f32 %v8141_v6  ;;  %v8142_v61 = vadd.f32 1.0, %v8126_v28  ;;  %v8349_v28 = vmul.f32 %v8333_v3, %v8109_v29  ;;  %v16782_v58 = vmul.f32 0.70710677, %v16772_v55 }
0x175d   :  { %v16743_v7 = vpop.eup %11905  ;;  %11917 = vrcp.f32 %v8144_v39  ;;  %vm8431_vm1 = vcmp.lt.f32.partialorder %v16719_v31, 0.0  ;;  %vm8429_vm2 = vcmp.lt.f32.partialorder %v16725_v53, 0.0  ;;  %vm8432_vm3 = vcmp.lt.f32.partialorder %v16728_v45, 0.0 }
0x175e   :  { %v16752_v30 = vpop.eup %11907  ;;  %v8187_v0 = vmul.f32 1.0614054, %v16743_v7  ;;  %11919 = vpow2.f32 %v8365_v2  ;;  %v8361_v2 = vmul.f32 1.442695, %v8345_v59  ;;  %vm8430_vm4 = vcmp.lt.f32.partialorder %v16740_v33, 0.0 }
0x175f   :  { %v8185_v44 = vmul.f32 1.0614054, %v16752_v30  ;;  %v16759_v1 = vpop.eup %11909  ;;  %11921 = vrcp.f32 %v8142_v61  ;;  %vm8435_vm5 = vcmp.lt.f32.partialorder %v16782_v58, 0.0 }
0x1760   :  { %v8203_v46 = vadd.f32 -1.4531521, %v8187_v0  ;;  %v16761_v63 = vpop.f32.mrb[204].mxu1  ;;  %v8188_v56 = vmul.f32 1.0614054, %v16759_v1  ;;  %v16767_v10 = vpop.eup %11911  ;;  %11923 = vpow2.f32 %v8367_v8 }
0x1761   :  { %v8201_v12 = vadd.f32 -1.4531521, %v8185_v44  ;;  %v16765_v54 = vpop.f32.mrb[205].mxu1  ;;  %v8186_v11 = vmul.f32 1.0614054, %v16767_v10  ;;  %11925 = vpow2.f32 %v8361_v2  ;;  %v16894_v13 = vadd.f32 %v16761_v63, %v16685_v36 }
0x1762   :  { %v8219_v5 = vmul.f32 %v16743_v7, %v8203_v46  ;;  %v16774_v22 = vpop.f32.mrb[206].mxu1  ;;  %v8204_v6 = vadd.f32 -1.4531521, %v8188_v56  ;;  %v8351_v46 = vmul.f32 %v8335_v9, %v8111_v24  ;;  %v8363_v56 = vmul.f32 1.442695, %v8346_v16 }
0x1763   :  { %v8217_v41 = vmul.f32 %v16752_v30, %v8201_v12  ;;  %v16777_v18 = vpop.f32.mrb[207].mxu1  ;;  %v8202_v60 = vadd.f32 -1.4531521, %v8186_v11  ;;  %v16787_v9 = vand.u32 2147483647, %v16782_v58  ;;  %v16928_v31 = vadd.f32 %v16774_v22, %v16685_v36 }
0x1764   :  { %v8235_v0 = vadd.f32 1.4214138, %v8219_v5  ;;  %v8220_v39 = vmul.f32 %v16759_v1, %v8204_v6  ;;  %v8373_v61 = vmul.f32 1.442695, %v8351_v46  ;;  %v8352_v6 = vmul.f32 %v8336_v35, %v16735_v38 }
0x1765   :  { %v8233_v44 = vadd.f32 1.4214138, %v8217_v41  ;;  %v8218_v3 = vmul.f32 %v16767_v10, %v8202_v60  ;;  %v16789_v24 = vpop.eup %11913  ;;  %v8131_v46 = vmul.f32 0.3275911, %v16787_v9 }
0x1766   :  { %v8251_v12 = vmul.f32 %v16743_v7, %v8235_v0  ;;  %v8236_v41 = vadd.f32 1.4214138, %v8220_v39  ;;  %v8369_v0 = vmul.f32 1.442695, %v8349_v28  ;;  %v16792_v11 = vpop.eup %11915  ;;  %v8334_v39 = vsub.f32 0.0, %v16748_v47 }
0x1767   :  { %v8249_v5 = vmul.f32 %v16752_v30, %v8233_v44  ;;  %v8234_v8 = vadd.f32 1.4214138, %v8218_v3  ;;  %v8191_v44 = vmul.f32 1.0614054, %v16789_v24  ;;  %v16802_v43 = vpop.eup %11917  ;;  %v8147_v3 = vadd.f32 1.0, %v8131_v46 }
0x1768   :  { %v8267_v52 = vadd.f32 -0.28449672, %v8251_v12  ;;  %v8252_v16 = vmul.f32 %v16759_v1, %v8236_v41  ;;  %v8189_v12 = vmul.f32 1.0614054, %v16792_v11  ;;  %v8375_v41 = vmul.f32 1.442695, %v8352_v6 }
0x1769   :  { %v8265_v29 = vadd.f32 -0.28449672, %v8249_v5  ;;  %v8250_v38 = vmul.f32 %v16767_v10, %v8234_v8  ;;  %v8207_v35 = vadd.f32 -1.4531521, %v8191_v44  ;;  %v8192_v44 = vmul.f32 1.0614054, %v16802_v43 }
0x176a   :  { %v8283_v59 = vmul.f32 %v16743_v7, %v8267_v52  ;;  %v8268_v5 = vadd.f32 -0.28449672, %v8252_v16  ;;  %v8205_v52 = vadd.f32 -1.4531521, %v8189_v12  ;;  %v8350_v51 = vmul.f32 %v8334_v39, %v16748_v47 }
0x176b   :  { %v8281_v60 = vmul.f32 %v16752_v30, %v8265_v29  ;;  %v11920_v29 = vpop.eup %11919  ;;  %v8266_v15 = vadd.f32 -0.28449672, %v8250_v38  ;;  %11927 = vrcp.f32 %v8147_v3 }
0x176c   :  { %v8299_v28 = vadd.f32 0.2548296, %v8283_v59  ;;  %v8284_v57 = vmul.f32 %v16759_v1, %v8268_v5  ;;  %v8223_v59 = vmul.f32 %v16789_v24, %v8207_v35  ;;  %v16808_v16 = vpop.eup %11921  ;;  %v8221_v8 = vmul.f32 %v16792_v11, %v8205_v52 }
0x176d   :  { %v8297_v6 = vadd.f32 0.2548296, %v8281_v60  ;;  %v11924_v62 = vpop.eup %11923  ;;  %11929 = vpow2.f32 %v8363_v56  ;;  %v8190_v5 = vmul.f32 1.0614054, %v16808_v16  ;;  %v8282_v52 = vmul.f32 %v16767_v10, %v8266_v15 }
0x176e   :  { %v8315_v32 = vmul.f32 %v16743_v7, %v8299_v28  ;;  %v8300_v12 = vadd.f32 0.2548296, %v8284_v57  ;;  %v8239_v46 = vadd.f32 1.4214138, %v8223_v59  ;;  %v8237_v7 = vadd.f32 1.4214138, %v8221_v8 }
0x176f   :  { %v8208_v28 = vadd.f32 -1.4531521, %v8192_v44  ;;  %11931 = vpow2.f32 %v8369_v0  ;;  %v8206_v57 = vadd.f32 -1.4531521, %v8190_v5  ;;  %v8371_v3 = vmul.f32 1.442695, %v8350_v51 }
0x1770   :  { %v8395_v2 = vmul.f32 %v11920_v29, %v8315_v32  ;;  %v8316_v35 = vmul.f32 %v16759_v1, %v8300_v12  ;;  %v8255_v40 = vmul.f32 %v16789_v24, %v8239_v46  ;;  %v8253_v47 = vmul.f32 %v16792_v11, %v8237_v7  ;;  %v11926_v12 = vpop.eup %11925 }
0x1771   :  { %v8224_v32 = vmul.f32 %v16802_v43, %v8208_v28  ;;  %v8313_v29 = vmul.f32 %v16752_v30, %v8297_v6  ;;  %v8222_v1 = vmul.f32 %v16808_v16, %v8206_v57  ;;  %11933 = vpow2.f32 %v8373_v61 }
0x1772   :  { %v8411_v38 = vsub.f32 1.0, %v8395_v2  ;;  %v8396_v39 = vmul.f32 %v11924_v62, %v8316_v35  ;;  %v8271_v56 = vadd.f32 -0.28449672, %v8255_v40  ;;  %v8269_v59 = vadd.f32 -0.28449672, %v8253_v47 }
0x1773   :  { %v8240_v8 = vadd.f32 1.4214138, %v8224_v32  ;;  %v8298_v2 = vadd.f32 0.2548296, %v8282_v52  ;;  %11935 = vpow2.f32 %v8375_v41  ;;  %v16829_v6 = vadd.f32 %v16685_v36, %v16731_v49 }
0x1774   :  { %v8443_v60 = vsub.f32 0.0, %v8411_v38  ;;  %v8412_v44 = vsub.f32 1.0, %v8396_v39  ;;  %v8287_v0 = vmul.f32 %v16789_v24, %v8271_v56  ;;  %v8285_v62 = vmul.f32 %v16792_v11, %v8269_v59 }
0x1775   :  { %v8256_v40 = vmul.f32 %v16802_v43, %v8240_v8  ;;  %v16831_v48 = vpop.eup %11927  ;;  %v8238_v28 = vadd.f32 1.4214138, %v8222_v1  ;;  %11937 = vpow2.f32 %v8371_v3  ;;  %v8393_v5 = vmul.f32 %v11926_v12, %v8313_v29 }
0x1776   :  { %v8459_v15 = vsel %vm8427_vm12, %v8443_v60, %v8411_v38  ;;  %v8444_v30 = vsub.f32 0.0, %v8412_v44  ;;  %v8301_v46 = vadd.f32 0.2548296, %v8285_v62  ;;  %v8314_v61 = vmul.f32 %v16767_v10, %v8298_v2 }
0x1777   :  { %v8475_v51 = vadd.f32 1.0, %v8459_v15  ;;  %v8272_v7 = vadd.f32 -0.28449672, %v8256_v40  ;;  %v8303_v38 = vadd.f32 0.2548296, %v8287_v0  ;;  %v11930_v35 = vpop.eup %11929  ;;  %v8254_v49 = vmul.f32 %v16808_v16, %v8238_v28 }
0x1778   :  { %v8460_v27 = vsel %vm8428_vm13, %v8444_v30, %v8412_v44  ;;  %v8317_v47 = vmul.f32 %v16792_v11, %v8301_v46  ;;  %v8195_v32 = vmul.f32 1.0614054, %v16831_v48  ;;  %v16839_v57 = vmul.f32 0.70710677, %v16829_v6 }
0x1779   :  { %v8476_v52 = vadd.f32 1.0, %v8460_v27  ;;  %v8288_v41 = vmul.f32 %v16802_v43, %v8272_v7  ;;  %v11932_v60 = vpop.eup %11931  ;;  %v16842_v39 = vmul.f32 %v8475_v51, %v16745_v34  ;;  %v8409_v3 = vsub.f32 1.0, %v8393_v5 }
0x177a   :  { %v8270_v29 = vadd.f32 -0.28449672, %v8254_v49  ;;  %v8211_v11 = vadd.f32 -1.4531521, %v8195_v32  ;;  %v8394_v8 = vmul.f32 %v11930_v35, %v8314_v61  ;;  %v8319_v1 = vmul.f32 %v16789_v24, %v8303_v38 }
0x177b   :  { %v16845_v10 = vmul.f32 %v8476_v52, %v16755_v19  ;;  %v8304_v56 = vadd.f32 0.2548296, %v8288_v41  ;;  %v8397_v15 = vmul.f32 %v11932_v60, %v8317_v47  ;;  %v8113_v19 = vand.u32 2147483647, %v16839_v57  ;;  %v11934_v0 = vpop.eup %11933 }
0x177c   :  { %v8286_v2 = vmul.f32 %v16808_v16, %v8270_v29  ;;  %v8227_v34 = vmul.f32 %v16831_v48, %v8211_v11  ;;  %v8073_v12 = vmul.f32 0.5, %v16689_v42  ;;  %v16857_v62 = vmul.f32 0.5, %v16698_v14 }
0x177d   :  { %v8506_v59 = vpack.c.bf16 %v16845_v10, %v16842_v39  ;;  %v8320_v44 = vmul.f32 %v16802_v43, %v8304_v56  ;;  %v16861_v24 = vadd.f32 %v16737_v21, %v16685_v36  ;;  %v11936_v40 = vpop.eup %11935  ;;  %v8339_v51 = vsub.f32 0.0, %v16787_v9 }
0x177e   :  { %v8302_v43 = vadd.f32 0.2548296, %v8286_v2  ;;  %v8129_v30 = vmul.f32 0.3275911, %v8113_v19  ;;  %v8441_v7 = vsub.f32 0.0, %v8409_v3  ;;  %v8410_v28 = vsub.f32 1.0, %v8394_v8 }
0x177f   :  { %v11938_v46 = vpop.eup %11937  ;;  %v8399_v42 = vmul.f32 %v11934_v0, %v8319_v1  ;;  %v8243_v5 = vadd.f32 1.4214138, %v8227_v34  ;;  %v8413_v27 = vsub.f32 1.0, %v8397_v15  ;;  %v8400_v61 = vmul.f32 %v11936_v40, %v8320_v44 }
0x1780   :  { %v8318_v14 = vmul.f32 %v16808_v16, %v8302_v43  ;;  %v8145_v38 = vadd.f32 1.0, %v8129_v30  ;;  %v16867_v21 = vmul.f32 0.5, %v16710_v20  ;;  %v16870_v35 = vmul.f32 0.5, %v16713_v37 }
0x1781   :  { %v16873_v52 = vmul.f32 0.5, %v16716_v23  ;;  %v16876_v47 = vmul.f32 0.70710677, %v16861_v24  ;;  %v16879_v41 = vmul.f32 0.5, %v16722_v4  ;;  %v8355_v32 = vmul.f32 %v8339_v51, %v16787_v9 }
0x1782   :  { %v8398_v49 = vmul.f32 %v11938_v46, %v8318_v14  ;;  %11939 = vrcp.f32 %v8145_v38  ;;  %v8457_v20 = vsel %vm8425_vm14, %v8441_v7, %v8409_v3  ;;  %v8442_v16 = vsub.f32 0.0, %v8410_v28 }
0x1783   :  { %v8259_v37 = vmul.f32 %v16831_v48, %v8243_v5  ;;  %v8116_v23 = vand.u32 2147483647, %v16876_v47  ;;  %v8415_v60 = vsub.f32 1.0, %v8399_v42  ;;  %v8445_v56 = vsub.f32 0.0, %v8413_v27 }
0x1784   :  { %v8416_v29 = vsub.f32 1.0, %v8400_v61  ;;  %v16889_v4 = vadd.f32 %v16685_v36, %v16750_v50  ;;  %v8414_v9 = vsub.f32 1.0, %v8398_v49  ;;  %v8473_v3 = vadd.f32 1.0, %v8457_v20 }
0x1785   :  { %v8132_v11 = vmul.f32 0.3275911, %v8116_v23  ;;  %v8381_v8 = vmul.f32 1.442695, %v8355_v32  ;;  %v8337_v1 = vsub.f32 0.0, %v8113_v19  ;;  %v8458_v15 = vsel %vm8426_vm15, %v8442_v16, %v8410_v28 }
0x1786   :  { %v8275_v44 = vadd.f32 -0.28449672, %v8259_v37  ;;  %v16900_v50 = vmul.f32 0.70710677, %v16889_v4  ;;  %v8447_v53 = vsub.f32 0.0, %v8415_v60  ;;  %v8461_v34 = vsel %vm8429_vm2, %v8445_v56, %v8413_v27 }
0x1787   :  { %v8148_v2 = vadd.f32 1.0, %v8132_v11  ;;  %v8448_v0 = vsub.f32 0.0, %v8416_v29  ;;  %v16903_v40 = vmul.f32 0.70710677, %v16894_v13  ;;  %v8446_v63 = vsub.f32 0.0, %v8414_v9 }
0x1788   :  { %v8114_v43 = vand.u32 2147483647, %v16900_v50  ;;  %v16908_v51 = vadd.f32 %v16685_v36, %v16765_v54  ;;  %v8489_v25 = vmul.f32 %v8473_v3, %v8073_v12  ;;  %v8353_v30 = vmul.f32 %v8337_v1, %v8113_v19 }
0x1789   :  { %11941 = vrcp.f32 %v8148_v2  ;;  %v16912_v46 = vand.u32 2147483647, %v16903_v40  ;;  %v8474_v7 = vadd.f32 1.0, %v8458_v15  ;;  %v8291_v28 = vmul.f32 %v16831_v48, %v8275_v44 }
0x178a   :  { %11943 = vpow2.f32 %v8381_v8  ;;  %v8130_v42 = vmul.f32 0.3275911, %v8114_v43  ;;  %v8463_v27 = vsel %vm8431_vm1, %v8447_v53, %v8415_v60  ;;  %v8477_v61 = vadd.f32 1.0, %v8461_v34 }
0x178b   :  { %v8464_v54 = vsel %vm8432_vm3, %v8448_v0, %v8416_v29  ;;  %v8135_v33 = vmul.f32 0.3275911, %v16912_v46  ;;  %v8462_v19 = vsel %vm8430_vm4, %v8446_v63, %v8414_v9  ;;  %v16924_v38 = vmul.f32 0.70710677, %v16908_v51 }
0x178c   :  { %v16915_v5 = vpop.eup %11939  ;;  %v8146_v14 = vadd.f32 1.0, %v8130_v42  ;;  %v8377_v49 = vmul.f32 1.442695, %v8353_v30  ;;  %v8340_v32 = vsub.f32 0.0, %v8116_v23  ;;  %v8307_v16 = vadd.f32 0.2548296, %v8291_v28 }
0x178d   :  { %v8193_v12 = vmul.f32 1.0614054, %v16915_v5  ;;  %v8151_v20 = vadd.f32 1.0, %v8135_v33  ;;  %v16931_v45 = vand.u32 2147483647, %v16924_v38  ;;  %v8490_v60 = vmul.f32 %v8474_v7, %v16857_v62 }
0x178e   :  { %11945 = vrcp.f32 %v8146_v14  ;;  %v8479_v56 = vadd.f32 1.0, %v8463_v27  ;;  %v8478_v29 = vadd.f32 1.0, %v8462_v19  ;;  %v8493_v9 = vmul.f32 %v8477_v61, %v16870_v35 }
0x178f   :  { %v8209_v37 = vadd.f32 -1.4531521, %v8193_v12  ;;  %11947 = vrcp.f32 %v8151_v20  ;;  %v8338_v3 = vsub.f32 0.0, %v8114_v43  ;;  %v8133_v8 = vmul.f32 0.3275911, %v16931_v45 }
0x1790   :  { %v8480_v22 = vadd.f32 1.0, %v8464_v54  ;;  %11949 = vpow2.f32 %v8377_v49  ;;  %v8356_v1 = vmul.f32 %v8340_v32, %v8116_v23  ;;  %v16938_v15 = vmul.f32 0.70710677, %v16928_v31 }
0x1791   :  { %v8225_v11 = vmul.f32 %v16915_v5, %v8209_v37  ;;  %v8323_v62 = vmul.f32 %v16831_v48, %v8307_v16  ;;  %v8149_v53 = vadd.f32 1.0, %v8133_v8  ;;  %v16945_v35 = vadd.f32 %v16685_v36, %v16777_v18 }
0x1792   :  { %v8494_v34 = vmul.f32 %v8478_v29, %v16879_v41  ;;  %v8343_v63 = vsub.f32 0.0, %v16912_v46  ;;  %v16951_v23 = vand.u32 2147483647, %v16938_v15  ;;  %v8354_v28 = vmul.f32 %v8338_v3, %v8114_v43 }
0x1793   :  { %v16940_v44 = vpop.eup %11941  ;;  %v8241_v2 = vadd.f32 1.4214138, %v8225_v11  ;;  %11951 = vrcp.f32 %v8149_v53  ;;  %v16955_v48 = vmul.f32 0.70710677, %v16945_v35  ;;  %v8496_v18 = vmul.f32 %v8480_v22, %v16873_v52 }
0x1794   :  { %v8196_v0 = vmul.f32 1.0614054, %v16940_v44  ;;  %v11944_v30 = vpop.eup %11943  ;;  %v8136_v41 = vmul.f32 0.3275911, %v16951_v23  ;;  %v8505_v42 = vpack.c.bf16 %v8490_v60, %v8489_v25  ;;  %v8495_v27 = vmul.f32 %v8479_v56, %v16867_v21 }
0x1795   :  { %v8257_v7 = vmul.f32 %v16915_v5, %v8241_v2  ;;  %v8383_v54 = vmul.f32 1.442695, %v8356_v1  ;;  %v16961_v33 = vand.u32 2147483647, %v16955_v48  ;;  %v16963_v19 = vmul.f32 %v11944_v30, %v8323_v62 }
0x1796   :  { %v8212_v36 = vadd.f32 -1.4531521, %v8196_v0  ;;  %v8152_v12 = vadd.f32 1.0, %v8136_v41  ;;  %10710 = vmatprep.mubr.bf16.mxu1 %v8505_v42  ;;  %v8507_v14 = vpack.c.bf16 %v8494_v34, %v8493_v9  ;;  %v8379_v32 = vmul.f32 1.442695, %v8354_v28 }
0x1797   :  { %v8273_v61 = vadd.f32 -0.28449672, %v8257_v7  ;;  %v8359_v25 = vmul.f32 %v8343_v63, %v16912_v46  ;;  %v8134_v21 = vmul.f32 0.3275911, %v16961_v33  ;;  %10711 = vmatmul.mubr.bf16.vlgmr.msra.gmra.mrb[208].mxu1 %v8506_v59  ;;  %v8508_v60 = vpack.c.bf16 %v8496_v18, %v8495_v27 }
0x1798   :  { %v8228_v43 = vmul.f32 %v16940_v44, %v8212_v36  ;;  %v16966_v49 = vpop.eup %11945  ;;  %11953 = vrcp.f32 %v8152_v12  ;;  %10714 = vmatprep.mubr.bf16.mxu1 %v8507_v14  ;;  %v8341_v46 = vsub.f32 0.0, %v16931_v45  ;;  %v8419_v10 = vsub.f32 1.0, %v16963_v19 }
0x1799   :  { %v8289_v52 = vmul.f32 %v16915_v5, %v8273_v61  ;;  %v16974_v20 = vpop.eup %11947  ;;  %v8194_v37 = vmul.f32 1.0614054, %v16966_v49  ;;  %11955 = vpow2.f32 %v8383_v54  ;;  %v8150_v39 = vadd.f32 1.0, %v8134_v21 }
0x179a   :  { %v8244_v16 = vadd.f32 1.4214138, %v8228_v43  ;;  %v8199_v29 = vmul.f32 1.0614054, %v16974_v20  ;;  %v11950_v9 = vpop.eup %11949  ;;  %v8389_v22 = vmul.f32 1.442695, %v8359_v25  ;;  %v8357_v63 = vmul.f32 %v8341_v46, %v16931_v45 }
0x179b   :  { %v8305_v56 = vadd.f32 0.2548296, %v8289_v52  ;;  %v8210_v3 = vadd.f32 -1.4531521, %v8194_v37  ;;  %v8344_v2 = vsub.f32 0.0, %v16951_v23  ;;  %11957 = vrcp.f32 %v8150_v39 }
0x179c   :  { %v8260_v11 = vmul.f32 %v16940_v44, %v8244_v16  ;;  %v8215_v8 = vadd.f32 -1.4531521, %v8199_v29  ;;  %v16987_v34 = vmul.f32 0.5, %v16772_v55  ;;  %11959 = vpow2.f32 %v8379_v32 }
0x179d   :  { %v8321_v59 = vmul.f32 %v16915_v5, %v8305_v56  ;;  %v8226_v62 = vmul.f32 %v16966_v49, %v8210_v3  ;;  %v16984_v53 = vpop.eup %11951  ;;  %v8451_v18 = vsub.f32 0.0, %v8419_v10  ;;  %11961 = vpow2.f32 %v8389_v22 }
0x179e   :  { %v8276_v1 = vadd.f32 -0.28449672, %v8260_v11  ;;  %v8231_v0 = vmul.f32 %v16974_v20, %v8215_v8  ;;  %v8197_v28 = vmul.f32 1.0614054, %v16984_v53  ;;  %v8360_v27 = vmul.f32 %v8344_v2, %v16951_v23 }
0x179f   :  { %v8401_v30 = vmul.f32 %v11950_v9, %v8321_v59  ;;  %v8242_v7 = vadd.f32 1.4214138, %v8226_v62  ;;  %10715 = vmatmul.mubr.bf16.gmra.mrb[212].mxu1 %v8508_v60  ;;  %vm8433_vm6 = vcmp.lt.f32.partialorder %v16839_v57, 0.0  ;;  %v8084_v45 = vmul.f32 0.5, %v16861_v24 }
0x17a0   :  { %v8292_v5 = vmul.f32 %v16940_v44, %v8276_v1  ;;  %v8247_v36 = vadd.f32 1.4214138, %v8231_v0  ;;  %v8213_v42 = vadd.f32 -1.4531521, %v8197_v28  ;;  %v8385_v54 = vmul.f32 1.442695, %v8357_v63 }
0x17a1   :  { %v8258_v55 = vmul.f32 %v16966_v49, %v8242_v7  ;;  %v8342_v19 = vsub.f32 0.0, %v16961_v33  ;;  %v8417_v12 = vsub.f32 1.0, %v8401_v30  ;;  %v8467_v23 = vsel %vm8435_vm5, %v8451_v18, %v8419_v10 }
0x17a2   :  { %v8308_v41 = vadd.f32 0.2548296, %v8292_v5  ;;  %v8263_v61 = vmul.f32 %v16974_v20, %v8247_v36  ;;  %v17000_v43 = vpop.eup %11953  ;;  %v8229_v32 = vmul.f32 %v16984_v53, %v8213_v42  ;;  %vm8436_vm7 = vcmp.lt.f32.partialorder %v16876_v47, 0.0 }
0x17a3   :  { %v8274_v52 = vadd.f32 -0.28449672, %v8258_v55  ;;  %v11956_v25 = vpop.eup %11955  ;;  %v8200_v21 = vmul.f32 1.0614054, %v17000_v43  ;;  %v8391_v56 = vmul.f32 1.442695, %v8360_v27  ;;  %11963 = vpow2.f32 %v8385_v54 }
0x17a4   :  { %v8324_v14 = vmul.f32 %v16940_v44, %v8308_v41  ;;  %v8279_v24 = vadd.f32 -0.28449672, %v8263_v61  ;;  %v8245_v60 = vadd.f32 1.4214138, %v8229_v32  ;;  %v8358_v46 = vmul.f32 %v8342_v19, %v16961_v33 }
0x17a5   :  { %v8290_v37 = vmul.f32 %v16966_v49, %v8274_v52  ;;  %v8216_v44 = vadd.f32 -1.4531521, %v8200_v21  ;;  %v17011_v9 = vpop.eup %11957  ;;  %v8449_v58 = vsub.f32 0.0, %v8417_v12  ;;  %v8483_v59 = vadd.f32 1.0, %v8467_v23 }
0x17a6   :  { %v8404_v16 = vmul.f32 %v11956_v25, %v8324_v14  ;;  %v8295_v29 = vmul.f32 %v16974_v20, %v8279_v24  ;;  %v8261_v39 = vmul.f32 %v16984_v53, %v8245_v60  ;;  %v11960_v10 = vpop.eup %11959  ;;  %v8198_v1 = vmul.f32 1.0614054, %v17011_v9 }
0x17a7   :  { %v8306_v3 = vadd.f32 0.2548296, %v8290_v37  ;;  %v8232_v22 = vmul.f32 %v17000_v43, %v8216_v44  ;;  %11965 = vpow2.f32 %v8391_v56  ;;  %v11962_v33 = vpop.eup %11961  ;;  %v8387_v7 = vmul.f32 1.442695, %v8358_v46 }
0x17a8   :  { %v8420_v11 = vsub.f32 1.0, %v8404_v16  ;;  %v8311_v8 = vadd.f32 0.2548296, %v8295_v29  ;;  %v8277_v0 = vadd.f32 -0.28449672, %v8261_v39  ;;  %v8465_v28 = vsel %vm8433_vm6, %v8449_v58, %v8417_v12 }
0x17a9   :  { %v8322_v2 = vmul.f32 %v16966_v49, %v8306_v3  ;;  %v8248_v30 = vadd.f32 1.4214138, %v8232_v22  ;;  %v8214_v5 = vadd.f32 -1.4531521, %v8198_v1  ;;  %11967 = vpow2.f32 %v8387_v7 }
0x17aa   :  { %v8452_v62 = vsub.f32 0.0, %v8420_v11  ;;  %v8327_v63 = vmul.f32 %v16974_v20, %v8311_v8  ;;  %v8293_v41 = vmul.f32 %v16984_v53, %v8277_v0  ;;  %v8499_v20 = vmul.f32 %v8483_v59, %v16987_v34 }
0x17ab   :  { %v8402_v36 = vmul.f32 %v11960_v10, %v8322_v2  ;;  %v8264_v49 = vmul.f32 %v17000_v43, %v8248_v30  ;;  %v8230_v27 = vmul.f32 %v17011_v9, %v8214_v5  ;;  %v8481_v12 = vadd.f32 1.0, %v8465_v28 }
0x17ac   :  { %v8468_v18 = vsel %vm8436_vm7, %v8452_v62, %v8420_v11  ;;  %v8407_v42 = vmul.f32 %v11962_v33, %v8327_v63  ;;  %v8309_v54 = vadd.f32 0.2548296, %v8293_v41  ;;  %vm8434_vm8 = vcmp.lt.f32.partialorder %v16900_v50, 0.0 }
0x17ad   :  { %v8484_v55 = vadd.f32 1.0, %v8468_v18  ;;  %v8418_v61 = vsub.f32 1.0, %v8402_v36  ;;  %v8280_v14 = vadd.f32 -0.28449672, %v8264_v49  ;;  %v8246_v57 = vadd.f32 1.4214138, %v8230_v27  ;;  %v11964_v25 = vpop.eup %11963 }
0x17ae   :  { %v8423_v52 = vsub.f32 1.0, %v8407_v42  ;;  %v8325_v32 = vmul.f32 %v16984_v53, %v8309_v54  ;;  %v8081_v34 = vmul.f32 0.5, %v16829_v6  ;;  %v8082_v37 = vmul.f32 0.5, %v16889_v4 }
0x17af   :  { %v8500_v19 = vmul.f32 %v8484_v55, %v8084_v45  ;;  %v8450_v47 = vsub.f32 0.0, %v8418_v61  ;;  %v8296_v23 = vmul.f32 %v17000_v43, %v8280_v14  ;;  %v8262_v24 = vmul.f32 %v17011_v9, %v8246_v57 }
0x17b0   :  { %v8405_v45 = vmul.f32 %v11964_v25, %v8325_v32  ;;  %v8497_v46 = vmul.f32 %v8481_v12, %v8081_v34  ;;  %v8455_v53 = vsub.f32 0.0, %v8423_v52  ;;  %vm8439_vm9 = vcmp.lt.f32.partialorder %v16903_v40, 0.0  ;;  %v17610_v12 = vld [vmem:[#allocation43_spill] sm:$0xff] }
0x17b1   :  { %v8510_v21 = vpack.c.bf16 %v8500_v19, %v8499_v20  ;;  %v8466_v16 = vsel %vm8434_vm8, %v8450_v47, %v8418_v61  ;;  %v8312_v56 = vadd.f32 0.2548296, %v8296_v23  ;;  %v8278_v29 = vadd.f32 -0.28449672, %v8262_v24  ;;  %v11966_v44 = vpop.eup %11965  ;;  %v17611_v23 = vld [vmem:[#allocation18_spill] sm:$0xff] }
0x17b2   :  { %v8482_v60 = vadd.f32 1.0, %v8466_v16  ;;  %v8421_v11 = vsub.f32 1.0, %v8405_v45  ;;  %v8471_v8 = vsel %vm8439_vm9, %v8455_v53, %v8423_v52  ;;  %vm8437_vm10 = vcmp.lt.f32.partialorder %v16924_v38, 0.0  ;;  %v17613_v45 = vld [vmem:[#allocation44_spill] sm:$0xff] }
0x17b3   :  { %v8328_v50 = vmul.f32 %v17000_v43, %v8312_v56  ;;  %v8294_v3 = vmul.f32 %v17011_v9, %v8278_v29  ;;  %v11968_v6 = vpop.eup %11967  ;;  %v8487_v0 = vadd.f32 1.0, %v8471_v8  ;;  %vm8440_vm11 = vcmp.lt.f32.partialorder %v16938_v15, 0.0  ;;  %v17617_v8 = vld [vmem:[#allocation7_spill] sm:$0xff] }
0x17b4   :  { %v8498_v58 = vmul.f32 %v8482_v60, %v8082_v37  ;;  %v8453_v4 = vsub.f32 0.0, %v8421_v11  ;;  %v8087_v40 = vmul.f32 0.5, %v16894_v13  ;;  %v8088_v30 = vmul.f32 0.5, %v16928_v31  ;;  %v9033_v13 = vld [vmem:[%s17095_s1 + $0x13] ss:$0 sm:$0xff]  ;;  %s12013_s1 = smov 32  }
0x17b5   :  { %v8408_v39 = vmul.f32 %v11966_v44, %v8328_v50  ;;  %v8310_v10 = vadd.f32 0.2548296, %v8294_v3  ;;  %vm8438_vm12 = vcmp.lt.f32.partialorder %v16955_v48, 0.0  ;;  %v8085_v41 = vmul.f32 0.5, %v16908_v51  ;;  %v17614_v44 = vld [vmem:[#allocation21_spill] sm:$0xff] }
0x17b6   :  { %v8509_v59 = vpack.c.bf16 %v8498_v58, %v8497_v46  ;;  %v8469_v43 = vsel %vm8437_vm10, %v8453_v4, %v8421_v11  ;;  %v8503_v28 = vmul.f32 %v8487_v0, %v8087_v40  ;;  %v8086_v38 = vmul.f32 0.5, %v16945_v35  ;;  %v17609_v35 = vld [vmem:[#allocation19_spill] sm:$0xff]  ;;  %v17619_v40 = vld [vmem:[#allocation60_spill] sm:$0xff] }
0x17b7   :  { %v8424_v22 = vsub.f32 1.0, %v8408_v39  ;;  %v8326_v1 = vmul.f32 %v17011_v9, %v8310_v10  ;;  %v8485_v9 = vadd.f32 1.0, %v8469_v43  ;;  %v17615_v11 = vld [vmem:[#allocation47_spill] sm:$0xff]  ;;  %vm8768_vm13 = vcmask 785408  }
0x17b8   :  { %10718 = vmatprep.mubr.bf16.mxu1 %v8509_v59  ;;  %v17616_v59 = vld [vmem:[#allocation20_spill] sm:$0xff]  ;;  %vm8763_vm14 = vcmask 523264  }
0x17b9   :  { %10719 = vmatmul.mubr.bf16.gmra.mrb[216].mxu1 %v8510_v21  ;;  %v8456_v62 = vsub.f32 0.0, %v8424_v22  ;;  %v8406_v2 = vmul.f32 %v11968_v6, %v8326_v1  ;;  %v8501_v42 = vmul.f32 %v8485_v9, %v8085_v41  ;;  %v17612_v21 = vld [vmem:[#allocation13_spill] sm:$0xff] }
0x17bb   :  { %v8472_v33 = vsel %vm8440_vm11, %v8456_v62, %v8424_v22  ;;  %v8422_v63 = vsub.f32 1.0, %v8406_v2  ;;  %v17618_v62 = vld [vmem:[#allocation5_spill] sm:$0xff] }
0x17bc   :  { %v8488_v5 = vadd.f32 1.0, %v8472_v33 }
0x17bd   :  { %v8454_v7 = vsub.f32 0.0, %v8422_v63 }
0x17be   :  { %v8504_v18 = vmul.f32 %v8488_v5, %v8088_v30 }
0x17bf   :  { %v8470_v36 = vsel %vm8438_vm12, %v8454_v7, %v8422_v63 }
0x17c0   :  { %v8486_v15 = vadd.f32 1.0, %v8470_v36  ;;  %v8512_v55 = vpack.c.bf16 %v8504_v18, %v8503_v28  ;;  %v17620_v28 = vld [vmem:[#allocation58_spill] sm:$0xff]  ;;  %v17621_v36 = vld [vmem:[#allocation48_spill] sm:$0xff] }
0x17c2   :  { %v8502_v49 = vmul.f32 %v8486_v15, %v8086_v38  ;;  %v17622_v38 = vld [vmem:[#allocation27_spill] sm:$0xff] }
0x17c4   :  { %v8511_v27 = vpack.c.bf16 %v8502_v49, %v8501_v42 }
0x17c6   :  { %10722 = vmatprep.mubr.bf16.mxu1 %v8511_v27 }
0x17c7   :  { %10723 = vmatmul.mubr.bf16.gmra.mrb[220].mxu1 %v8512_v55 }
0x186a   :  { %v10712_v31 = vpop.f32.mrb[208].mxu1 }
0x186b   :  { %v8677_v20 = vadd.f32 %v10712_v31, %v16402_v17  ;;  %v8612_v48 = vpop.f32.mrb[209].mxu1 }
0x186c   :  { %v8675_v61 = vadd.f32 %v8612_v48, %v16398_v26  ;;  %v10713_v51 = vpop.f32.mrb[210].mxu1 }
0x186d   :  { %v17048_v54 = vadd.f32 %v9033_v13, %v8677_v20  ;;  %v8678_v19 = vadd.f32 %v10713_v51, %v17609_v35  ;;  %v8615_v14 = vpop.f32.mrb[211].mxu1 }
0x186e   :  { %v17051_v57 = vadd.f32 %v9033_v13, %v8675_v61  ;;  %v8676_v47 = vadd.f32 %v8615_v14, %v17610_v12 }
0x186f   :  { %v17054_v52 = vadd.f32 %v9033_v13, %v8678_v19 }
0x1870   :  { %v17056_v32 = vadd.f32 %v9033_v13, %v8676_v47 }
0x1872   :  { %v10716_v25 = vpop.f32.mrb[212].mxu1 }
0x1873   :  { %v8681_v17 = vadd.f32 %v10716_v25, %v17611_v23  ;;  %v8628_v24 = vpop.f32.mrb[213].mxu1 }
0x1874   :  { %v8679_v26 = vadd.f32 %v8628_v24, %v17612_v21  ;;  %v10717_v34 = vpop.f32.mrb[214].mxu1 }
0x1875   :  { %v8701_v16 = vadd.f32 %v9033_v13, %v8681_v17  ;;  %v8682_v37 = vadd.f32 %v10717_v34, %v17613_v45  ;;  %v8631_v60 = vpop.f32.mrb[215].mxu1 }
0x1876   :  { %v8699_v56 = vadd.f32 %v9033_v13, %v8679_v26  ;;  %v8680_v46 = vadd.f32 %v8631_v60, %v17614_v44 }
0x1877   :  { %8719 = vrot.lane.b32.xlu1 %v8701_v16, %s12013_s1  ;;  %v8702_v29 = vadd.f32 %v9033_v13, %v8682_v37 }
0x1878   :  { %8715 = vrot.lane.b32.xlu0 %v8699_v56, %s12013_s1  ;;  %v8700_v53 = vadd.f32 %v9033_v13, %v8680_v46 }
0x187b   :  { %8721 = vrot.lane.b32.xlu1 %v8702_v29, %s12013_s1 }
0x187f   :  { %8717 = vrot.lane.b32.xlu1 %v8700_v53, %s12013_s1 }
0x188c   :  { %v10720_v58 = vpop.f32.mrb[216].mxu1 }
0x188d   :  { %v8685_v50 = vadd.f32 %v10720_v58, %v17615_v11  ;;  %v8644_v3 = vpop.f32.mrb[217].mxu1 }
0x188e   :  { %v10721_v39 = vpop.f32.mrb[218].mxu1  ;;  %v8683_v6 = vadd.f32 %v8644_v3, %v17616_v59 }
0x188f   :  { %v8705_v10 = vadd.f32 %v9033_v13, %v8685_v50  ;;  %v8686_v4 = vadd.f32 %v10721_v39, %v17617_v8  ;;  %v8647_v22 = vpop.f32.mrb[219].mxu1 }
0x1890   :  { %v8684_v2 = vadd.f32 %v8647_v22, %v17618_v62  ;;  %v8703_v0 = vadd.f32 %v9033_v13, %v8683_v6 }
0x1891   :  { %v8706_v1 = vadd.f32 %v9033_v13, %v8686_v4  ;;  %8735 = vrot.lane.b32.xlu0 %v8705_v10, %s12014_s6 }
0x1892   :  { %v8704_v43 = vadd.f32 %v9033_v13, %v8684_v2 }
0x1893   :  { %8737 = vrot.lane.b32.xlu1 %v8706_v1, %s12014_s6 }
0x1895   :  { %8731 = vrot.lane.b32.xlu0 %v8703_v0, %s12014_s6 }
0x1897   :  { %8733 = vrot.lane.b32.xlu1 %v8704_v43, %s12014_s6 }
0x189a   :  { %v10724_v33 = vpop.f32.mrb[220].mxu1 }
0x189b   :  { %v8660_v63 = vpop.f32.mrb[221].mxu1  ;;  %v8689_v9 = vadd.f32 %v10724_v33, %v17620_v28 }
0x189c   :  { %v8687_v30 = vadd.f32 %v8660_v63, %v17619_v40  ;;  %v10725_v5 = vpop.f32.mrb[222].mxu1 }
0x189d   :  { %v8663_v7 = vpop.f32.mrb[223].mxu1  ;;  %v8690_v15 = vadd.f32 %v10725_v5, %v17622_v38  ;;  %v8709_v42 = vadd.f32 %v9033_v13, %v8689_v9 }
0x189e   :  { %v8707_v18 = vadd.f32 %v9033_v13, %v8687_v30  ;;  %v8688_v41 = vadd.f32 %v8663_v7, %v17621_v36 }
0x189f   :  { %v8710_v49 = vadd.f32 %v9033_v13, %v8690_v15 }
0x18a0   :  { %v8708_v55 = vadd.f32 %v9033_v13, %v8688_v41  ;;  %8747 = vrot.lane.b32.xlu0 %v8707_v18, %s12015_s20 }
0x18a2   :  { %8749 = vrot.lane.b32.xlu1 %v8708_v55, %s12015_s20 }
0x18a4   :  { %8751 = vrot.lane.b32.xlu0 %v8709_v42, %s12015_s20 }
0x18a6   :  { %8753 = vrot.lane.b32.xlu1 %v8710_v49, %s12015_s20 }
0x18e9   :  { %v8720_v27 = vpop.permute.xlu1 %8719 }
0x18ea   :  { %v8716_v20 = vpop.permute.xlu0 %8715  ;;  %v8761_v24 = vsel %vm89_vm0, %v17048_v54, %v8720_v27 }
0x18eb   :  { %v8759_v14 = vsel %vm89_vm0, %v17051_v57, %v8716_v20 }
0x18ed   :  { %v8722_v31 = vpop.permute.xlu1 %8721 }
0x18f1   :  { %v8718_v48 = vpop.permute.xlu1 %8717 }
0x18f2   :  { %v8760_v13 = vsel %vm89_vm0, %v17056_v32, %v8718_v48  ;;  %v8762_v32 = vsel %vm89_vm0, %v17054_v52, %v8722_v31 }
0x1903   :  { %v8736_v61 = vpop.permute.xlu0 %8735 }
0x1904   :  { %v8766_v57 = vsel %vm8763_vm14, %v8761_v24, %v8736_v61 }
0x1905   :  { %v8738_v51 = vpop.permute.xlu1 %8737 }
0x1906   :  { %v8767_v16 = vsel %vm8763_vm14, %v8762_v32, %v8738_v51 }
0x1907   :  { %v8732_v35 = vpop.permute.xlu0 %8731 }
0x1908   :  { %v8764_v12 = vsel %vm8763_vm14, %v8759_v14, %v8732_v35 }
0x1909   :  { %v8734_v19 = vpop.permute.xlu1 %8733 }
0x190a   :  { %v8765_v23 = vsel %vm8763_vm14, %v8760_v13, %v8734_v19 }
0x1912   :  { %v8748_v47 = vpop.permute.xlu0 %8747 }
0x1913   :  { %v8769_v25 = vsel %vm8768_vm13, %v8764_v12, %v8748_v47 }
0x1914   :  { %8773 = vst [vmem:[%s17101_s7] sm:$0xff] %v8769_v25  ;;  %v8750_v17 = vpop.permute.xlu1 %8749 }
0x1915   :  { %v8770_v21 = vsel %vm8768_vm13, %v8765_v23, %v8750_v17 }
0x1916   :  { %8774 = vst [vmem:[%s17101_s7 + $0x8] sm:$0xff] %v8770_v21  ;;  %v8752_v26 = vpop.permute.xlu0 %8751 }
0x1917   :  { %v8771_v34 = vsel %vm8768_vm13, %v8766_v57, %v8752_v26 }
0x1918   :  { %8775 = vst [vmem:[%s17101_s7 + $0x10] sm:$0xff] %v8771_v34  ;;  %v8754_v45 = vpop.permute.xlu1 %8753 }
0x1919   :  { %v8772_v54 = vsel %vm8768_vm13, %v8767_v16, %v8754_v45 }
0x191a   :  { %8776 = vst [vmem:[%s17101_s7 + $0x18] sm:$0xff] %v8772_v54 }
0x191b   :  { %8781 = vsyncpa [#allocation3], 1 }

</bundles_post_ra>
